<compile_context>
chip_gen: v6e
topology: v6e:2x2x1
jax: 0.10.0
libtpu: 0.0.40
codegen_flags: <defaults>
</compile_context>

<pallas_src>
import functools

import jax
import jax.numpy as jnp
from jax.experimental import pallas as pl
from jax.experimental.pallas import tpu as pltpu

LANE = 128
SUB = 8


def _round_up(x, m):
    return (x + m - 1) // m * m


# ---------------------------- Pallas kernels ----------------------------

def _conv_gn_relu_kernel(p_ref, w_ref, g_ref, b_ref, o_ref, *, m_real):
    """Fused conv-as-matmul + GroupNorm(C, C) + ReLU for one sample.

    p_ref: (Mp, K) bf16 im2col patches (Mp = pad8(Ho*Wo), K = 9*Cin);
           rows >= m_real are zero padding.
    w_ref: (K, C)  bf16 flattened conv weight ((kh, kw, cin) ordering)
    g_ref, b_ref: (1, C) f32 GroupNorm affine
    o_ref: (Mp, C) bf16

    Conv bias is intentionally omitted: GroupNorm subtracts the per-channel
    spatial mean, so a per-channel bias cancels exactly.  Zero-padded patch
    rows give exactly-zero conv rows, so sums over Mp equal sums over m_real.
    """
    y = jnp.dot(p_ref[...], w_ref[...], preferred_element_type=jnp.float32)
    inv_m = jnp.float32(1.0 / m_real)
    s1 = jnp.sum(y, axis=0, keepdims=True)            # (1, C)
    s2 = jnp.sum(y * y, axis=0, keepdims=True)        # (1, C)
    mean = s1 * inv_m
    var = jnp.maximum(s2 * inv_m - mean * mean, 0.0)   # one-pass, clamped
    yn = (y - mean) * jax.lax.rsqrt(var + 1e-5)
    yn = yn * g_ref[...] + b_ref[...]
    o_ref[...] = jnp.maximum(yn, 0.0).astype(o_ref.dtype)


def _conv_bias_sigmoid_kernel(p_ref, w_ref, b_ref, o_ref):
    """Final conv (bias kept, Cout zero-padded to 128) + fused sigmoid.

    p_ref: (Mp, K) bf16, w_ref: (K, 128) bf16, b_ref: (1, 128) f32,
    o_ref: (Mp, 128) f32 (lane-dense store; real channels sliced in wrapper).
    """
    y = jnp.dot(p_ref[...], w_ref[...], preferred_element_type=jnp.float32)
    o_ref[...] = jax.nn.sigmoid(y + b_ref[...])


# ---------------------------- Pallas wrappers ----------------------------

def _fused_conv_gn_relu(patches, m_real, w, gamma, beta):
    """patches: (N, Mp, K) bf16, w: (K, C) bf16, gamma/beta: (C,) f32."""
    N, Mp, K = patches.shape
    C = w.shape[1]
    kernel = functools.partial(_conv_gn_relu_kernel, m_real=int(m_real))
    return pl.pallas_call(
        kernel,
        out_shape=jax.ShapeDtypeStruct((N, Mp, C), jnp.bfloat16),
        grid=(N,),
        in_specs=[
            pl.BlockSpec((None, Mp, K), lambda n: (n, 0, 0)),
            pl.BlockSpec((K, C), lambda n: (0, 0)),
            pl.BlockSpec((1, C), lambda n: (0, 0)),
            pl.BlockSpec((1, C), lambda n: (0, 0)),
        ],
        out_specs=pl.BlockSpec((None, Mp, C), lambda n: (n, 0, 0)),
        compiler_params=pltpu.CompilerParams(dimension_semantics=("parallel",)),
    )(patches, w, gamma.reshape(1, C), beta.reshape(1, C))


def _final_conv_sigmoid(patches, w_pad, b_pad):
    """patches: (N, Mp, K) bf16, w_pad: (K, 128) bf16, b_pad: (128,) f32."""
    N, Mp, K = patches.shape
    C = w_pad.shape[1]
    return pl.pallas_call(
        _conv_bias_sigmoid_kernel,
        out_shape=jax.ShapeDtypeStruct((N, Mp, C), jnp.float32),
        grid=(N,),
        in_specs=[
            pl.BlockSpec((None, Mp, K), lambda n: (n, 0, 0)),
            pl.BlockSpec((K, C), lambda n: (0, 0)),
            pl.BlockSpec((1, C), lambda n: (0, 0)),
        ],
        out_specs=pl.BlockSpec((None, Mp, C), lambda n: (n, 0, 0)),
        compiler_params=pltpu.CompilerParams(dimension_semantics=("parallel",)),
    )(patches, w_pad, b_pad.reshape(1, C))


# ---------------------------- JAX glue ----------------------------

def _im2col(x, k, dilation, padding):
    """x: (N,H,W,Cin) -> patches (N, Ho*Wo, k*k*Cin), ordering (kh, kw, cin)."""
    N, H, W, Cin = x.shape
    Ho = H + 2 * padding - dilation * (k - 1)
    Wo = W + 2 * padding - dilation * (k - 1)
    xp = jnp.pad(x, ((0, 0), (padding, padding), (padding, padding), (0, 0)))
    cols = [xp[:, kh * dilation:kh * dilation + Ho,
                  kw * dilation:kw * dilation + Wo, :]
            for kh in range(k) for kw in range(k)]
    patches = jnp.concatenate(cols, axis=-1).reshape(N, Ho * Wo, k * k * Cin)
    return patches, Ho, Wo


def _pad_rows(patches, multiple=SUB):
    """Zero-pad the M (row) dim up to a multiple of `multiple`."""
    N, M, K = patches.shape
    Mp = _round_up(M, multiple)
    if Mp != M:
        patches = jnp.pad(patches, ((0, 0), (0, Mp - M), (0, 0)))
    return patches, M


def interpolate_nearest(x, out_h, out_w):
    """F.interpolate(mode='nearest') equivalent; x: (N,H,W,C)."""
    N, H, W, C = x.shape
    ih = (jnp.arange(out_h) * H) // out_h
    iw = (jnp.arange(out_w) * W) // out_w
    return x[:, ih][:, :, iw]


# ---------------------------- Parameters ----------------------------

def init_params(key, output):
    """Torch-like f32 parameters (full-shape conv weights, biases, GN affine)."""
    def conv_init(k_, ksz, cin, cout):
        kw_, kb_ = jax.random.split(k_)
        fan_in = ksz * ksz * cin
        w = jax.random.normal(kw_, (ksz, ksz, cin, cout), jnp.float32) / jnp.sqrt(
            jnp.float32(fan_in))
        b = jax.random.normal(kb_, (cout,), jnp.float32) * 0.01
        return w, b

    keys = jax.random.split(key, 7)
    params = {}
    specs = [("l1a", 256, 128), ("l1b", 128, 128),
             ("l2a", 192, 128), ("l2b", 128, 128),
             ("l3a", 160, 128), ("l3b", 128, 128)]
    for (name, cin, cout), k_ in zip(specs, keys[:6]):
        w, b = conv_init(k_, 3, cin, cout)
        params[name + "_w"] = w
        params[name + "_b"] = b            # unused by kernels (GN cancels it)
        params[name + "_g"] = jnp.ones((cout,), jnp.float32)
        params[name + "_bt"] = jnp.zeros((cout,), jnp.float32)
    params["fin_w"], params["fin_b"] = conv_init(keys[6], 3, 128, output)
    return params


def prepare_kernel_params(p, output):
    """Flatten/cast for the Pallas path: bf16 weights, lane-padded final conv."""
    kp = {}
    for name in ("l1a", "l1b", "l2a", "l2b", "l3a", "l3b"):
        w = p[name + "_w"]
        k, _, cin, cout = w.shape
        kp[name + "_w"] = w.reshape(k * k * cin, cout).astype(jnp.bfloat16)
        kp[name + "_g"] = p[name + "_g"]
        kp[name + "_bt"] = p[name + "_bt"]
    wf, bf = p["fin_w"], p["fin_b"]
    k, _, cin, cout = wf.shape
    wflat = wf.reshape(k * k * cin, cout)
    kp["fin_w"] = jnp.pad(wflat, ((0, 0), (0, LANE - cout))).astype(jnp.bfloat16)
    kp["fin_b"] = jnp.pad(bf, (0, LANE - cout)).astype(jnp.float32)
    return kp


# ---------------------------- Forward (Pallas path) ----------------------------

def mapping_network_forward(params, C, C1, C2, *, output_ch, output_hw):
    """C/C1/C2 are NCHW (PyTorch convention); returns NCHW, matching the module."""
    C_ = jnp.transpose(C, (0, 2, 3, 1)).astype(jnp.bfloat16)
    C1_ = jnp.transpose(C1, (0, 2, 3, 1)).astype(jnp.bfloat16)
    C2_ = jnp.transpose(C2, (0, 2, 3, 1)).astype(jnp.bfloat16)
    N = C_.shape[0]

    def block(x, name, dilation):
        patches, Ho, Wo = _im2col(x, 3, dilation, 1)
        patches, M = _pad_rows(patches)
        y = _fused_conv_gn_relu(patches, M, params[name + "_w"],
                                params[name + "_g"], params[name + "_bt"])
        return y[:, :M, :].reshape(N, Ho, Wo, -1)

    # layer1 (dilation=2 blocks)
    x1 = block(C_, "l1a", 2)
    x1 = block(x1, "l1b", 2)
    # upsample to C2 spatial, concat on channels (128 + 64 = 192)
    x2 = interpolate_nearest(x1, C2_.shape[1], C2_.shape[2])
    x3 = jnp.concatenate([x2, C2_], axis=-1)
    # layer2
    x4 = block(x3, "l2a", 1)
    x4 = block(x4, "l2b", 1)
    # upsample to C1 spatial, concat (128 + 32 = 160)
    x5 = interpolate_nearest(x4, C1_.shape[1], C1_.shape[2])
    x6 = jnp.concatenate([x5, C1_], axis=-1)
    # layer3
    x7 = block(x6, "l3a", 1)
    x7 = block(x7, "l3b", 1)
    # final conv (kernel 3, padding 0) + sigmoid fused (sigmoid commutes with
    # nearest interpolation, so applying it before the resize is exact).
    patches, Ho, Wo = _im2col(x7, 3, 1, 0)
    patches, M = _pad_rows(patches)
    y = _final_conv_sigmoid(patches, params["fin_w"], params["fin_b"])
    x8 = y[:, :M, :].reshape(N, Ho, Wo, LANE)[..., :output_ch]
    W_out, H_out = output_hw                       # torch: size=(self.W, self.H)
    x9 = interpolate_nearest(x8, W_out, H_out)
    return jnp.transpose(x9, (0, 3, 1, 2))         # NCHW: (N, out, W, H)


# ---------------------------- Pure-JAX f32 reference ----------------------------

def ref_forward(p, C, C1, C2, *, output_ch, output_hw):
    x = jnp.transpose(C, (0, 2, 3, 1))
    c1 = jnp.transpose(C1, (0, 2, 3, 1))
    c2 = jnp.transpose(C2, (0, 2, 3, 1))

    def conv(x, w, b, dilation, padding):
        patches, Ho, Wo = _im2col(x, 3, dilation, padding)
        kk = w.shape[0] * w.shape[1] * w.shape[2]
        y = patches @ w.reshape(kk, -1) + b
        return y.reshape(x.shape[0], Ho, Wo, -1)

    def gn_relu(x, g, b):
        mean = jnp.mean(x, axis=(1, 2), keepdims=True)
        var = jnp.mean((x - mean) ** 2, axis=(1, 2), keepdims=True)
        return jnp.maximum((x - mean) * jax.lax.rsqrt(var + 1e-5) * g + b, 0.0)

    def block(x, name, dilation):
        y = conv(x, p[name + "_w"], p[name + "_b"], dilation, 1)
        return gn_relu(y, p[name + "_g"], p[name + "_bt"])

    x1 = block(x, "l1a", 2)
    x1 = block(x1, "l1b", 2)
    x2 = interpolate_nearest(x1, c2.shape[1], c2.shape[2])
    x3 = jnp.concatenate([x2, c2], axis=-1)
    x4 = block(x3, "l2a", 1)
    x4 = block(x4, "l2b", 1)
    x5 = interpolate_nearest(x4, c1.shape[1], c1.shape[2])
    x6 = jnp.concatenate([x5, c1], axis=-1)
    x7 = block(x6, "l3a", 1)
    x7 = block(x7, "l3b", 1)
    x8 = conv(x7, p["fin_w"], p["fin_b"], 1, 0)
    W_out, H_out = output_hw
    x9 = interpolate_nearest(x8, W_out, H_out)
    return jnp.transpose(jax.nn.sigmoid(x9), (0, 3, 1, 2))


# ---------------------------- main ----------------------------

if __name__ == "__main__":
    key = jax.random.PRNGKey(0)
    k_params, k_c, k_c1, k_c2 = jax.random.split(key, 4)

    output_ch = 3
    H = W = 16                     # MappingNetwork(output, H=16, W=16)
    N = 2

    torch_like = init_params(k_params, output_ch)
    kparams = prepare_kernel_params(torch_like, output_ch)

    # Channel counts fixed by the architecture: C=256, C2=64, C1=32.
    C = jax.random.normal(k_c, (N, 256, 12, 12), jnp.float32)
    C1 = jax.random.normal(k_c1, (N, 32, 16, 16), jnp.float32)
    C2 = jax.random.normal(k_c2, (N, 64, 8, 8), jnp.float32)

    fwd = jax.jit(functools.partial(mapping_network_forward,
                                    output_ch=output_ch, output_hw=(W, H)))
    out = fwd(kparams, C, C1, C2)
    jax.block_until_ready(out)

    assert out.shape == (N, output_ch, W, H), out.shape
    assert bool(jnp.all(jnp.isfinite(out)))

    ref = jax.jit(functools.partial(ref_forward,
                                    output_ch=output_ch, output_hw=(W, H)))(
        torch_like, C, C1, C2)
    max_err = float(jnp.max(jnp.abs(out - ref)))
    assert max_err < 0.1, f"max abs err vs f32 reference: {max_err}"

    # TODO(synk): nearest-resize / concat / im2col window extraction stay as XLA
    # data movement; a whole-network VMEM megakernel is left as future work.
    print("KERNEL_OK")
</pallas_src>

<mosaic_0001>
module attributes {stable_mosaic.version = 11 : i64} {
  func.func @_conv_gn_relu_kernel(%arg0: i32, %arg1: memref<1x104x2304xbf16, #tpu.memory_space<vmem>>, %arg2: memref<2304x128xbf16, #tpu.memory_space<vmem>>, %arg3: memref<1x128xf32, #tpu.memory_space<vmem>>, %arg4: memref<1x128xf32, #tpu.memory_space<vmem>>, %arg5: memref<1x104x128xbf16, #tpu.memory_space<vmem>>) attributes {dimension_semantics = [#tpu.dimension_semantics<parallel>], iteration_bounds = array<i64: 2>, scalar_prefetch = 0 : i64, scratch_operands = 0 : i64, tpu.core_type = #tpu.core_type<tc>, window_params = [{transform_indices = @transform_0, window_bounds = array<i64: 1, 104, 2304>}, {pipeline_mode = #tpu.pipeline_mode<synchronous>, transform_indices = @transform_1, window_bounds = array<i64: 2304, 128>}, {pipeline_mode = #tpu.pipeline_mode<synchronous>, transform_indices = @transform_2, window_bounds = array<i64: 1, 128>}, {pipeline_mode = #tpu.pipeline_mode<synchronous>, transform_indices = @transform_3, window_bounds = array<i64: 1, 128>}, {transform_indices = @transform_4, window_bounds = array<i64: 1, 104, 128>}]} {
    %c0 = arith.constant 0 : index
    %c0_0 = arith.constant 0 : index
    %c0_1 = arith.constant 0 : index
    %0 = vector.load %arg1[%c0, %c0_0, %c0_1] : memref<1x104x2304xbf16, #tpu.memory_space<vmem>>, vector<1x104x2304xbf16>
    %1 = vector.shape_cast %0 : vector<1x104x2304xbf16> to vector<104x2304xbf16>
    %c0_2 = arith.constant 0 : index
    %c0_3 = arith.constant 0 : index
    %2 = vector.load %arg2[%c0_2, %c0_3] : memref<2304x128xbf16, #tpu.memory_space<vmem>>, vector<2304x128xbf16>
    %cst = arith.constant dense<0.000000e+00> : vector<104x128xf32>
    %3 = tpu.matmul %1, %2, %cst {dimension_numbers = #tpu.dot_dimension_numbers<[1], [0], [0], [1], [0, 0, 1, 1], [], []>} : vector<104x2304xbf16>, vector<2304x128xbf16>, vector<104x128xf32> -> vector<104x128xf32>
    %cst_4 = arith.constant dense<0.000000e+00> : vector<128xf32>
    %4 = vector.multi_reduction <add>, %3, %cst_4 [0] : vector<104x128xf32> to vector<128xf32>
    %5 = vector.shape_cast %4 : vector<128xf32> to vector<1x128xf32>
    %6 = arith.mulf %3, %3 : vector<104x128xf32>
    %cst_5 = arith.constant dense<0.000000e+00> : vector<128xf32>
    %7 = vector.multi_reduction <add>, %6, %cst_5 [0] : vector<104x128xf32> to vector<128xf32>
    %8 = vector.shape_cast %7 : vector<128xf32> to vector<1x128xf32>
    %cst_6 = arith.constant 0.00999999977 : f32
    %9 = vector.broadcast %cst_6 : f32 to vector<1x128xf32>
    %10 = arith.mulf %5, %9 : vector<1x128xf32>
    %cst_7 = arith.constant 0.00999999977 : f32
    %11 = vector.broadcast %cst_7 : f32 to vector<1x128xf32>
    %12 = arith.mulf %8, %11 : vector<1x128xf32>
    %13 = arith.mulf %10, %10 : vector<1x128xf32>
    %14 = arith.subf %12, %13 : vector<1x128xf32>
    %cst_8 = arith.constant 0.000000e+00 : f32
    %15 = vector.broadcast %cst_8 : f32 to vector<1x128xf32>
    %16 = arith.maximumf %14, %15 : vector<1x128xf32>
    %17 = vector.broadcast %10 : vector<1x128xf32> to vector<104x128xf32>
    %18 = arith.subf %3, %17 : vector<104x128xf32>
    %cst_9 = arith.constant 9.99999974E-6 : f32
    %19 = vector.broadcast %cst_9 : f32 to vector<1x128xf32>
    %20 = arith.addf %16, %19 : vector<1x128xf32>
    %21 = math.rsqrt %20 : vector<1x128xf32>
    %22 = vector.broadcast %21 : vector<1x128xf32> to vector<104x128xf32>
    %23 = arith.mulf %18, %22 : vector<104x128xf32>
    %c0_10 = arith.constant 0 : index
    %c0_11 = arith.constant 0 : index
    %24 = vector.load %arg3[%c0_10, %c0_11] : memref<1x128xf32, #tpu.memory_space<vmem>>, vector<1x128xf32>
    %25 = vector.broadcast %24 : vector<1x128xf32> to vector<104x128xf32>
    %26 = arith.mulf %23, %25 : vector<104x128xf32>
    %c0_12 = arith.constant 0 : index
    %c0_13 = arith.constant 0 : index
    %27 = vector.load %arg4[%c0_12, %c0_13] : memref<1x128xf32, #tpu.memory_space<vmem>>, vector<1x128xf32>
    %28 = vector.broadcast %27 : vector<1x128xf32> to vector<104x128xf32>
    %29 = arith.addf %26, %28 : vector<104x128xf32>
    %cst_14 = arith.constant 0.000000e+00 : f32
    %30 = vector.broadcast %cst_14 : f32 to vector<104x128xf32>
    %31 = arith.maximumf %29, %30 : vector<104x128xf32>
    %32 = arith.truncf %31 : vector<104x128xf32> to vector<104x128xbf16>
    %c0_15 = arith.constant 0 : index
    %c0_16 = arith.constant 0 : index
    %c0_17 = arith.constant 0 : index
    %33 = vector.load %arg5[%c0_15, %c0_16, %c0_17] : memref<1x104x128xbf16, #tpu.memory_space<vmem>>, vector<1x104x128xbf16>
    %34 = vector.shape_cast %33 : vector<1x104x128xbf16> to vector<104x128xbf16>
    %35 = vector.shape_cast %32 : vector<104x128xbf16> to vector<1x104x128xbf16>
    tpu.vector_store %arg5[%c0_15, %c0_16, %c0_17], %35 {strides = array<i32>} : memref<1x104x128xbf16, #tpu.memory_space<vmem>>, vector<1x104x128xbf16>,
    return
  }
  func.func @transform_0(%arg0: i32) -> (i32, i32, i32) {
    %c0_i32 = arith.constant 0 : i32
    %c0_i32_0 = arith.constant 0 : i32
    %c0_i32_1 = arith.constant 0 : i32
    return %arg0, %c0_i32, %c0_i32_0 : i32, i32, i32
  }
  func.func @transform_1(%arg0: i32) -> (i32, i32) {
    %c0_i32 = arith.constant 0 : i32
    %c0_i32_0 = arith.constant 0 : i32
    %c0_i32_1 = arith.constant 0 : i32
    return %c0_i32, %c0_i32_0 : i32, i32
  }
  func.func @transform_2(%arg0: i32) -> (i32, i32) {
    %c0_i32 = arith.constant 0 : i32
    %c0_i32_0 = arith.constant 0 : i32
    %c0_i32_1 = arith.constant 0 : i32
    return %c0_i32, %c0_i32_0 : i32, i32
  }
  func.func @transform_3(%arg0: i32) -> (i32, i32) {
    %c0_i32 = arith.constant 0 : i32
    %c0_i32_0 = arith.constant 0 : i32
    %c0_i32_1 = arith.constant 0 : i32
    return %c0_i32, %c0_i32_0 : i32, i32
  }
  func.func @transform_4(%arg0: i32) -> (i32, i32, i32) {
    %c0_i32 = arith.constant 0 : i32
    %c0_i32_0 = arith.constant 0 : i32
    %c0_i32_1 = arith.constant 0 : i32
    return %arg0, %c0_i32, %c0_i32_0 : i32, i32, i32
  }
}

module attributes {stable_mosaic.version = 11 : i64} {
  func.func @_conv_gn_relu_kernel(%arg0: i32, %arg1: memref<1x64x1152xbf16, #tpu.memory_space<vmem>>, %arg2: memref<1152x128xbf16, #tpu.memory_space<vmem>>, %arg3: memref<1x128xf32, #tpu.memory_space<vmem>>, %arg4: memref<1x128xf32, #tpu.memory_space<vmem>>, %arg5: memref<1x64x128xbf16, #tpu.memory_space<vmem>>) attributes {dimension_semantics = [#tpu.dimension_semantics<parallel>], iteration_bounds = array<i64: 2>, scalar_prefetch = 0 : i64, scratch_operands = 0 : i64, tpu.core_type = #tpu.core_type<tc>, window_params = [{transform_indices = @transform_0, window_bounds = array<i64: 1, 64, 1152>}, {pipeline_mode = #tpu.pipeline_mode<synchronous>, transform_indices = @transform_1, window_bounds = array<i64: 1152, 128>}, {pipeline_mode = #tpu.pipeline_mode<synchronous>, transform_indices = @transform_2, window_bounds = array<i64: 1, 128>}, {pipeline_mode = #tpu.pipeline_mode<synchronous>, transform_indices = @transform_3, window_bounds = array<i64: 1, 128>}, {transform_indices = @transform_4, window_bounds = array<i64: 1, 64, 128>}]} {
    %c0 = arith.constant 0 : index
    %c0_0 = arith.constant 0 : index
    %c0_1 = arith.constant 0 : index
    %0 = vector.load %arg1[%c0, %c0_0, %c0_1] : memref<1x64x1152xbf16, #tpu.memory_space<vmem>>, vector<1x64x1152xbf16>
    %1 = vector.shape_cast %0 : vector<1x64x1152xbf16> to vector<64x1152xbf16>
    %c0_2 = arith.constant 0 : index
    %c0_3 = arith.constant 0 : index
    %2 = vector.load %arg2[%c0_2, %c0_3] : memref<1152x128xbf16, #tpu.memory_space<vmem>>, vector<1152x128xbf16>
    %cst = arith.constant dense<0.000000e+00> : vector<64x128xf32>
    %3 = tpu.matmul %1, %2, %cst {dimension_numbers = #tpu.dot_dimension_numbers<[1], [0], [0], [1], [0, 0, 1, 1], [], []>} : vector<64x1152xbf16>, vector<1152x128xbf16>, vector<64x128xf32> -> vector<64x128xf32>
    %cst_4 = arith.constant dense<0.000000e+00> : vector<128xf32>
    %4 = vector.multi_reduction <add>, %3, %cst_4 [0] : vector<64x128xf32> to vector<128xf32>
    %5 = vector.shape_cast %4 : vector<128xf32> to vector<1x128xf32>
    %6 = arith.mulf %3, %3 : vector<64x128xf32>
    %cst_5 = arith.constant dense<0.000000e+00> : vector<128xf32>
    %7 = vector.multi_reduction <add>, %6, %cst_5 [0] : vector<64x128xf32> to vector<128xf32>
    %8 = vector.shape_cast %7 : vector<128xf32> to vector<1x128xf32>
    %cst_6 = arith.constant 1.562500e-02 : f32
    %9 = vector.broadcast %cst_6 : f32 to vector<1x128xf32>
    %10 = arith.mulf %5, %9 : vector<1x128xf32>
    %cst_7 = arith.constant 1.562500e-02 : f32
    %11 = vector.broadcast %cst_7 : f32 to vector<1x128xf32>
    %12 = arith.mulf %8, %11 : vector<1x128xf32>
    %13 = arith.mulf %10, %10 : vector<1x128xf32>
    %14 = arith.subf %12, %13 : vector<1x128xf32>
    %cst_8 = arith.constant 0.000000e+00 : f32
    %15 = vector.broadcast %cst_8 : f32 to vector<1x128xf32>
    %16 = arith.maximumf %14, %15 : vector<1x128xf32>
    %17 = vector.broadcast %10 : vector<1x128xf32> to vector<64x128xf32>
    %18 = arith.subf %3, %17 : vector<64x128xf32>
    %cst_9 = arith.constant 9.99999974E-6 : f32
    %19 = vector.broadcast %cst_9 : f32 to vector<1x128xf32>
    %20 = arith.addf %16, %19 : vector<1x128xf32>
    %21 = math.rsqrt %20 : vector<1x128xf32>
    %22 = vector.broadcast %21 : vector<1x128xf32> to vector<64x128xf32>
    %23 = arith.mulf %18, %22 : vector<64x128xf32>
    %c0_10 = arith.constant 0 : index
    %c0_11 = arith.constant 0 : index
    %24 = vector.load %arg3[%c0_10, %c0_11] : memref<1x128xf32, #tpu.memory_space<vmem>>, vector<1x128xf32>
    %25 = vector.broadcast %24 : vector<1x128xf32> to vector<64x128xf32>
    %26 = arith.mulf %23, %25 : vector<64x128xf32>
    %c0_12 = arith.constant 0 : index
    %c0_13 = arith.constant 0 : index
    %27 = vector.load %arg4[%c0_12, %c0_13] : memref<1x128xf32, #tpu.memory_space<vmem>>, vector<1x128xf32>
    %28 = vector.broadcast %27 : vector<1x128xf32> to vector<64x128xf32>
    %29 = arith.addf %26, %28 : vector<64x128xf32>
    %cst_14 = arith.constant 0.000000e+00 : f32
    %30 = vector.broadcast %cst_14 : f32 to vector<64x128xf32>
    %31 = arith.maximumf %29, %30 : vector<64x128xf32>
    %32 = arith.truncf %31 : vector<64x128xf32> to vector<64x128xbf16>
    %c0_15 = arith.constant 0 : index
    %c0_16 = arith.constant 0 : index
    %c0_17 = arith.constant 0 : index
    %33 = vector.load %arg5[%c0_15, %c0_16, %c0_17] : memref<1x64x128xbf16, #tpu.memory_space<vmem>>, vector<1x64x128xbf16>
    %34 = vector.shape_cast %33 : vector<1x64x128xbf16> to vector<64x128xbf16>
    %35 = vector.shape_cast %32 : vector<64x128xbf16> to vector<1x64x128xbf16>
    tpu.vector_store %arg5[%c0_15, %c0_16, %c0_17], %35 {strides = array<i32>} : memref<1x64x128xbf16, #tpu.memory_space<vmem>>, vector<1x64x128xbf16>,
    return
  }
  func.func @transform_0(%arg0: i32) -> (i32, i32, i32) {
    %c0_i32 = arith.constant 0 : i32
    %c0_i32_0 = arith.constant 0 : i32
    %c0_i32_1 = arith.constant 0 : i32
    return %arg0, %c0_i32, %c0_i32_0 : i32, i32, i32
  }
  func.func @transform_1(%arg0: i32) -> (i32, i32) {
    %c0_i32 = arith.constant 0 : i32
    %c0_i32_0 = arith.constant 0 : i32
    %c0_i32_1 = arith.constant 0 : i32
    return %c0_i32, %c0_i32_0 : i32, i32
  }
  func.func @transform_2(%arg0: i32) -> (i32, i32) {
    %c0_i32 = arith.constant 0 : i32
    %c0_i32_0 = arith.constant 0 : i32
    %c0_i32_1 = arith.constant 0 : i32
    return %c0_i32, %c0_i32_0 : i32, i32
  }
  func.func @transform_3(%arg0: i32) -> (i32, i32) {
    %c0_i32 = arith.constant 0 : i32
    %c0_i32_0 = arith.constant 0 : i32
    %c0_i32_1 = arith.constant 0 : i32
    return %c0_i32, %c0_i32_0 : i32, i32
  }
  func.func @transform_4(%arg0: i32) -> (i32, i32, i32) {
    %c0_i32 = arith.constant 0 : i32
    %c0_i32_0 = arith.constant 0 : i32
    %c0_i32_1 = arith.constant 0 : i32
    return %arg0, %c0_i32, %c0_i32_0 : i32, i32, i32
  }
}

module attributes {stable_mosaic.version = 11 : i64} {
  func.func @_conv_gn_relu_kernel(%arg0: i32, %arg1: memref<1x64x1728xbf16, #tpu.memory_space<vmem>>, %arg2: memref<1728x128xbf16, #tpu.memory_space<vmem>>, %arg3: memref<1x128xf32, #tpu.memory_space<vmem>>, %arg4: memref<1x128xf32, #tpu.memory_space<vmem>>, %arg5: memref<1x64x128xbf16, #tpu.memory_space<vmem>>) attributes {dimension_semantics = [#tpu.dimension_semantics<parallel>], iteration_bounds = array<i64: 2>, scalar_prefetch = 0 : i64, scratch_operands = 0 : i64, tpu.core_type = #tpu.core_type<tc>, window_params = [{transform_indices = @transform_0, window_bounds = array<i64: 1, 64, 1728>}, {pipeline_mode = #tpu.pipeline_mode<synchronous>, transform_indices = @transform_1, window_bounds = array<i64: 1728, 128>}, {pipeline_mode = #tpu.pipeline_mode<synchronous>, transform_indices = @transform_2, window_bounds = array<i64: 1, 128>}, {pipeline_mode = #tpu.pipeline_mode<synchronous>, transform_indices = @transform_3, window_bounds = array<i64: 1, 128>}, {transform_indices = @transform_4, window_bounds = array<i64: 1, 64, 128>}]} {
    %c0 = arith.constant 0 : index
    %c0_0 = arith.constant 0 : index
    %c0_1 = arith.constant 0 : index
    %0 = vector.load %arg1[%c0, %c0_0, %c0_1] : memref<1x64x1728xbf16, #tpu.memory_space<vmem>>, vector<1x64x1728xbf16>
    %1 = vector.shape_cast %0 : vector<1x64x1728xbf16> to vector<64x1728xbf16>
    %c0_2 = arith.constant 0 : index
    %c0_3 = arith.constant 0 : index
    %2 = vector.load %arg2[%c0_2, %c0_3] : memref<1728x128xbf16, #tpu.memory_space<vmem>>, vector<1728x128xbf16>
    %cst = arith.constant dense<0.000000e+00> : vector<64x128xf32>
    %3 = tpu.matmul %1, %2, %cst {dimension_numbers = #tpu.dot_dimension_numbers<[1], [0], [0], [1], [0, 0, 1, 1], [], []>} : vector<64x1728xbf16>, vector<1728x128xbf16>, vector<64x128xf32> -> vector<64x128xf32>
    %cst_4 = arith.constant dense<0.000000e+00> : vector<128xf32>
    %4 = vector.multi_reduction <add>, %3, %cst_4 [0] : vector<64x128xf32> to vector<128xf32>
    %5 = vector.shape_cast %4 : vector<128xf32> to vector<1x128xf32>
    %6 = arith.mulf %3, %3 : vector<64x128xf32>
    %cst_5 = arith.constant dense<0.000000e+00> : vector<128xf32>
    %7 = vector.multi_reduction <add>, %6, %cst_5 [0] : vector<64x128xf32> to vector<128xf32>
    %8 = vector.shape_cast %7 : vector<128xf32> to vector<1x128xf32>
    %cst_6 = arith.constant 1.562500e-02 : f32
    %9 = vector.broadcast %cst_6 : f32 to vector<1x128xf32>
    %10 = arith.mulf %5, %9 : vector<1x128xf32>
    %cst_7 = arith.constant 1.562500e-02 : f32
    %11 = vector.broadcast %cst_7 : f32 to vector<1x128xf32>
    %12 = arith.mulf %8, %11 : vector<1x128xf32>
    %13 = arith.mulf %10, %10 : vector<1x128xf32>
    %14 = arith.subf %12, %13 : vector<1x128xf32>
    %cst_8 = arith.constant 0.000000e+00 : f32
    %15 = vector.broadcast %cst_8 : f32 to vector<1x128xf32>
    %16 = arith.maximumf %14, %15 : vector<1x128xf32>
    %17 = vector.broadcast %10 : vector<1x128xf32> to vector<64x128xf32>
    %18 = arith.subf %3, %17 : vector<64x128xf32>
    %cst_9 = arith.constant 9.99999974E-6 : f32
    %19 = vector.broadcast %cst_9 : f32 to vector<1x128xf32>
    %20 = arith.addf %16, %19 : vector<1x128xf32>
    %21 = math.rsqrt %20 : vector<1x128xf32>
    %22 = vector.broadcast %21 : vector<1x128xf32> to vector<64x128xf32>
    %23 = arith.mulf %18, %22 : vector<64x128xf32>
    %c0_10 = arith.constant 0 : index
    %c0_11 = arith.constant 0 : index
    %24 = vector.load %arg3[%c0_10, %c0_11] : memref<1x128xf32, #tpu.memory_space<vmem>>, vector<1x128xf32>
    %25 = vector.broadcast %24 : vector<1x128xf32> to vector<64x128xf32>
    %26 = arith.mulf %23, %25 : vector<64x128xf32>
    %c0_12 = arith.constant 0 : index
    %c0_13 = arith.constant 0 : index
    %27 = vector.load %arg4[%c0_12, %c0_13] : memref<1x128xf32, #tpu.memory_space<vmem>>, vector<1x128xf32>
    %28 = vector.broadcast %27 : vector<1x128xf32> to vector<64x128xf32>
    %29 = arith.addf %26, %28 : vector<64x128xf32>
    %cst_14 = arith.constant 0.000000e+00 : f32
    %30 = vector.broadcast %cst_14 : f32 to vector<64x128xf32>
    %31 = arith.maximumf %29, %30 : vector<64x128xf32>
    %32 = arith.truncf %31 : vector<64x128xf32> to vector<64x128xbf16>
    %c0_15 = arith.constant 0 : index
    %c0_16 = arith.constant 0 : index
    %c0_17 = arith.constant 0 : index
    %33 = vector.load %arg5[%c0_15, %c0_16, %c0_17] : memref<1x64x128xbf16, #tpu.memory_space<vmem>>, vector<1x64x128xbf16>
    %34 = vector.shape_cast %33 : vector<1x64x128xbf16> to vector<64x128xbf16>
    %35 = vector.shape_cast %32 : vector<64x128xbf16> to vector<1x64x128xbf16>
    tpu.vector_store %arg5[%c0_15, %c0_16, %c0_17], %35 {strides = array<i32>} : memref<1x64x128xbf16, #tpu.memory_space<vmem>>, vector<1x64x128xbf16>,
    return
  }
  func.func @transform_0(%arg0: i32) -> (i32, i32, i32) {
    %c0_i32 = arith.constant 0 : i32
    %c0_i32_0 = arith.constant 0 : i32
    %c0_i32_1 = arith.constant 0 : i32
    return %arg0, %c0_i32, %c0_i32_0 : i32, i32, i32
  }
  func.func @transform_1(%arg0: i32) -> (i32, i32) {
    %c0_i32 = arith.constant 0 : i32
    %c0_i32_0 = arith.constant 0 : i32
    %c0_i32_1 = arith.constant 0 : i32
    return %c0_i32, %c0_i32_0 : i32, i32
  }
  func.func @transform_2(%arg0: i32) -> (i32, i32) {
    %c0_i32 = arith.constant 0 : i32
    %c0_i32_0 = arith.constant 0 : i32
    %c0_i32_1 = arith.constant 0 : i32
    return %c0_i32, %c0_i32_0 : i32, i32
  }
  func.func @transform_3(%arg0: i32) -> (i32, i32) {
    %c0_i32 = arith.constant 0 : i32
    %c0_i32_0 = arith.constant 0 : i32
    %c0_i32_1 = arith.constant 0 : i32
    return %c0_i32, %c0_i32_0 : i32, i32
  }
  func.func @transform_4(%arg0: i32) -> (i32, i32, i32) {
    %c0_i32 = arith.constant 0 : i32
    %c0_i32_0 = arith.constant 0 : i32
    %c0_i32_1 = arith.constant 0 : i32
    return %arg0, %c0_i32, %c0_i32_0 : i32, i32, i32
  }
}

module attributes {stable_mosaic.version = 11 : i64} {
  func.func @_conv_gn_relu_kernel(%arg0: i32, %arg1: memref<1x256x1440xbf16, #tpu.memory_space<vmem>>, %arg2: memref<1440x128xbf16, #tpu.memory_space<vmem>>, %arg3: memref<1x128xf32, #tpu.memory_space<vmem>>, %arg4: memref<1x128xf32, #tpu.memory_space<vmem>>, %arg5: memref<1x256x128xbf16, #tpu.memory_space<vmem>>) attributes {dimension_semantics = [#tpu.dimension_semantics<parallel>], iteration_bounds = array<i64: 2>, scalar_prefetch = 0 : i64, scratch_operands = 0 : i64, tpu.core_type = #tpu.core_type<tc>, window_params = [{transform_indices = @transform_0, window_bounds = array<i64: 1, 256, 1440>}, {pipeline_mode = #tpu.pipeline_mode<synchronous>, transform_indices = @transform_1, window_bounds = array<i64: 1440, 128>}, {pipeline_mode = #tpu.pipeline_mode<synchronous>, transform_indices = @transform_2, window_bounds = array<i64: 1, 128>}, {pipeline_mode = #tpu.pipeline_mode<synchronous>, transform_indices = @transform_3, window_bounds = array<i64: 1, 128>}, {transform_indices = @transform_4, window_bounds = array<i64: 1, 256, 128>}]} {
    %c0 = arith.constant 0 : index
    %c0_0 = arith.constant 0 : index
    %c0_1 = arith.constant 0 : index
    %0 = vector.load %arg1[%c0, %c0_0, %c0_1] : memref<1x256x1440xbf16, #tpu.memory_space<vmem>>, vector<1x256x1440xbf16>
    %1 = vector.shape_cast %0 : vector<1x256x1440xbf16> to vector<256x1440xbf16>
    %c0_2 = arith.constant 0 : index
    %c0_3 = arith.constant 0 : index
    %2 = vector.load %arg2[%c0_2, %c0_3] : memref<1440x128xbf16, #tpu.memory_space<vmem>>, vector<1440x128xbf16>
    %cst = arith.constant dense<0.000000e+00> : vector<256x128xf32>
    %3 = tpu.matmul %1, %2, %cst {dimension_numbers = #tpu.dot_dimension_numbers<[1], [0], [0], [1], [0, 0, 1, 1], [], []>} : vector<256x1440xbf16>, vector<1440x128xbf16>, vector<256x128xf32> -> vector<256x128xf32>
    %cst_4 = arith.constant dense<0.000000e+00> : vector<128xf32>
    %4 = vector.multi_reduction <add>, %3, %cst_4 [0] : vector<256x128xf32> to vector<128xf32>
    %5 = vector.shape_cast %4 : vector<128xf32> to vector<1x128xf32>
    %6 = arith.mulf %3, %3 : vector<256x128xf32>
    %cst_5 = arith.constant dense<0.000000e+00> : vector<128xf32>
    %7 = vector.multi_reduction <add>, %6, %cst_5 [0] : vector<256x128xf32> to vector<128xf32>
    %8 = vector.shape_cast %7 : vector<128xf32> to vector<1x128xf32>
    %cst_6 = arith.constant 3.906250e-03 : f32
    %9 = vector.broadcast %cst_6 : f32 to vector<1x128xf32>
    %10 = arith.mulf %5, %9 : vector<1x128xf32>
    %cst_7 = arith.constant 3.906250e-03 : f32
    %11 = vector.broadcast %cst_7 : f32 to vector<1x128xf32>
    %12 = arith.mulf %8, %11 : vector<1x128xf32>
    %13 = arith.mulf %10, %10 : vector<1x128xf32>
    %14 = arith.subf %12, %13 : vector<1x128xf32>
    %cst_8 = arith.constant 0.000000e+00 : f32
    %15 = vector.broadcast %cst_8 : f32 to vector<1x128xf32>
    %16 = arith.maximumf %14, %15 : vector<1x128xf32>
    %17 = vector.broadcast %10 : vector<1x128xf32> to vector<256x128xf32>
    %18 = arith.subf %3, %17 : vector<256x128xf32>
    %cst_9 = arith.constant 9.99999974E-6 : f32
    %19 = vector.broadcast %cst_9 : f32 to vector<1x128xf32>
    %20 = arith.addf %16, %19 : vector<1x128xf32>
    %21 = math.rsqrt %20 : vector<1x128xf32>
    %22 = vector.broadcast %21 : vector<1x128xf32> to vector<256x128xf32>
    %23 = arith.mulf %18, %22 : vector<256x128xf32>
    %c0_10 = arith.constant 0 : index
    %c0_11 = arith.constant 0 : index
    %24 = vector.load %arg3[%c0_10, %c0_11] : memref<1x128xf32, #tpu.memory_space<vmem>>, vector<1x128xf32>
    %25 = vector.broadcast %24 : vector<1x128xf32> to vector<256x128xf32>
    %26 = arith.mulf %23, %25 : vector<256x128xf32>
    %c0_12 = arith.constant 0 : index
    %c0_13 = arith.constant 0 : index
    %27 = vector.load %arg4[%c0_12, %c0_13] : memref<1x128xf32, #tpu.memory_space<vmem>>, vector<1x128xf32>
    %28 = vector.broadcast %27 : vector<1x128xf32> to vector<256x128xf32>
    %29 = arith.addf %26, %28 : vector<256x128xf32>
    %cst_14 = arith.constant 0.000000e+00 : f32
    %30 = vector.broadcast %cst_14 : f32 to vector<256x128xf32>
    %31 = arith.maximumf %29, %30 : vector<256x128xf32>
    %32 = arith.truncf %31 : vector<256x128xf32> to vector<256x128xbf16>
    %c0_15 = arith.constant 0 : index
    %c0_16 = arith.constant 0 : index
    %c0_17 = arith.constant 0 : index
    %33 = vector.load %arg5[%c0_15, %c0_16, %c0_17] : memref<1x256x128xbf16, #tpu.memory_space<vmem>>, vector<1x256x128xbf16>
    %34 = vector.shape_cast %33 : vector<1x256x128xbf16> to vector<256x128xbf16>
    %35 = vector.shape_cast %32 : vector<256x128xbf16> to vector<1x256x128xbf16>
    tpu.vector_store %arg5[%c0_15, %c0_16, %c0_17], %35 {strides = array<i32>} : memref<1x256x128xbf16, #tpu.memory_space<vmem>>, vector<1x256x128xbf16>,
    return
  }
  func.func @transform_0(%arg0: i32) -> (i32, i32, i32) {
    %c0_i32 = arith.constant 0 : i32
    %c0_i32_0 = arith.constant 0 : i32
    %c0_i32_1 = arith.constant 0 : i32
    return %arg0, %c0_i32, %c0_i32_0 : i32, i32, i32
  }
  func.func @transform_1(%arg0: i32) -> (i32, i32) {
    %c0_i32 = arith.constant 0 : i32
    %c0_i32_0 = arith.constant 0 : i32
    %c0_i32_1 = arith.constant 0 : i32
    return %c0_i32, %c0_i32_0 : i32, i32
  }
  func.func @transform_2(%arg0: i32) -> (i32, i32) {
    %c0_i32 = arith.constant 0 : i32
    %c0_i32_0 = arith.constant 0 : i32
    %c0_i32_1 = arith.constant 0 : i32
    return %c0_i32, %c0_i32_0 : i32, i32
  }
  func.func @transform_3(%arg0: i32) -> (i32, i32) {
    %c0_i32 = arith.constant 0 : i32
    %c0_i32_0 = arith.constant 0 : i32
    %c0_i32_1 = arith.constant 0 : i32
    return %c0_i32, %c0_i32_0 : i32, i32
  }
  func.func @transform_4(%arg0: i32) -> (i32, i32, i32) {
    %c0_i32 = arith.constant 0 : i32
    %c0_i32_0 = arith.constant 0 : i32
    %c0_i32_1 = arith.constant 0 : i32
    return %arg0, %c0_i32, %c0_i32_0 : i32, i32, i32
  }
}

module attributes {stable_mosaic.version = 11 : i64} {
  func.func @_conv_gn_relu_kernel(%arg0: i32, %arg1: memref<1x256x1152xbf16, #tpu.memory_space<vmem>>, %arg2: memref<1152x128xbf16, #tpu.memory_space<vmem>>, %arg3: memref<1x128xf32, #tpu.memory_space<vmem>>, %arg4: memref<1x128xf32, #tpu.memory_space<vmem>>, %arg5: memref<1x256x128xbf16, #tpu.memory_space<vmem>>) attributes {dimension_semantics = [#tpu.dimension_semantics<parallel>], iteration_bounds = array<i64: 2>, scalar_prefetch = 0 : i64, scratch_operands = 0 : i64, tpu.core_type = #tpu.core_type<tc>, window_params = [{transform_indices = @transform_0, window_bounds = array<i64: 1, 256, 1152>}, {pipeline_mode = #tpu.pipeline_mode<synchronous>, transform_indices = @transform_1, window_bounds = array<i64: 1152, 128>}, {pipeline_mode = #tpu.pipeline_mode<synchronous>, transform_indices = @transform_2, window_bounds = array<i64: 1, 128>}, {pipeline_mode = #tpu.pipeline_mode<synchronous>, transform_indices = @transform_3, window_bounds = array<i64: 1, 128>}, {transform_indices = @transform_4, window_bounds = array<i64: 1, 256, 128>}]} {
    %c0 = arith.constant 0 : index
    %c0_0 = arith.constant 0 : index
    %c0_1 = arith.constant 0 : index
    %0 = vector.load %arg1[%c0, %c0_0, %c0_1] : memref<1x256x1152xbf16, #tpu.memory_space<vmem>>, vector<1x256x1152xbf16>
    %1 = vector.shape_cast %0 : vector<1x256x1152xbf16> to vector<256x1152xbf16>
    %c0_2 = arith.constant 0 : index
    %c0_3 = arith.constant 0 : index
    %2 = vector.load %arg2[%c0_2, %c0_3] : memref<1152x128xbf16, #tpu.memory_space<vmem>>, vector<1152x128xbf16>
    %cst = arith.constant dense<0.000000e+00> : vector<256x128xf32>
    %3 = tpu.matmul %1, %2, %cst {dimension_numbers = #tpu.dot_dimension_numbers<[1], [0], [0], [1], [0, 0, 1, 1], [], []>} : vector<256x1152xbf16>, vector<1152x128xbf16>, vector<256x128xf32> -> vector<256x128xf32>
    %cst_4 = arith.constant dense<0.000000e+00> : vector<128xf32>
    %4 = vector.multi_reduction <add>, %3, %cst_4 [0] : vector<256x128xf32> to vector<128xf32>
    %5 = vector.shape_cast %4 : vector<128xf32> to vector<1x128xf32>
    %6 = arith.mulf %3, %3 : vector<256x128xf32>
    %cst_5 = arith.constant dense<0.000000e+00> : vector<128xf32>
    %7 = vector.multi_reduction <add>, %6, %cst_5 [0] : vector<256x128xf32> to vector<128xf32>
    %8 = vector.shape_cast %7 : vector<128xf32> to vector<1x128xf32>
    %cst_6 = arith.constant 3.906250e-03 : f32
    %9 = vector.broadcast %cst_6 : f32 to vector<1x128xf32>
    %10 = arith.mulf %5, %9 : vector<1x128xf32>
    %cst_7 = arith.constant 3.906250e-03 : f32
    %11 = vector.broadcast %cst_7 : f32 to vector<1x128xf32>
    %12 = arith.mulf %8, %11 : vector<1x128xf32>
    %13 = arith.mulf %10, %10 : vector<1x128xf32>
    %14 = arith.subf %12, %13 : vector<1x128xf32>
    %cst_8 = arith.constant 0.000000e+00 : f32
    %15 = vector.broadcast %cst_8 : f32 to vector<1x128xf32>
    %16 = arith.maximumf %14, %15 : vector<1x128xf32>
    %17 = vector.broadcast %10 : vector<1x128xf32> to vector<256x128xf32>
    %18 = arith.subf %3, %17 : vector<256x128xf32>
    %cst_9 = arith.constant 9.99999974E-6 : f32
    %19 = vector.broadcast %cst_9 : f32 to vector<1x128xf32>
    %20 = arith.addf %16, %19 : vector<1x128xf32>
    %21 = math.rsqrt %20 : vector<1x128xf32>
    %22 = vector.broadcast %21 : vector<1x128xf32> to vector<256x128xf32>
    %23 = arith.mulf %18, %22 : vector<256x128xf32>
    %c0_10 = arith.constant 0 : index
    %c0_11 = arith.constant 0 : index
    %24 = vector.load %arg3[%c0_10, %c0_11] : memref<1x128xf32, #tpu.memory_space<vmem>>, vector<1x128xf32>
    %25 = vector.broadcast %24 : vector<1x128xf32> to vector<256x128xf32>
    %26 = arith.mulf %23, %25 : vector<256x128xf32>
    %c0_12 = arith.constant 0 : index
    %c0_13 = arith.constant 0 : index
    %27 = vector.load %arg4[%c0_12, %c0_13] : memref<1x128xf32, #tpu.memory_space<vmem>>, vector<1x128xf32>
    %28 = vector.broadcast %27 : vector<1x128xf32> to vector<256x128xf32>
    %29 = arith.addf %26, %28 : vector<256x128xf32>
    %cst_14 = arith.constant 0.000000e+00 : f32
    %30 = vector.broadcast %cst_14 : f32 to vector<256x128xf32>
    %31 = arith.maximumf %29, %30 : vector<256x128xf32>
    %32 = arith.truncf %31 : vector<256x128xf32> to vector<256x128xbf16>
    %c0_15 = arith.constant 0 : index
    %c0_16 = arith.constant 0 : index
    %c0_17 = arith.constant 0 : index
    %33 = vector.load %arg5[%c0_15, %c0_16, %c0_17] : memref<1x256x128xbf16, #tpu.memory_space<vmem>>, vector<1x256x128xbf16>
    %34 = vector.shape_cast %33 : vector<1x256x128xbf16> to vector<256x128xbf16>
    %35 = vector.shape_cast %32 : vector<256x128xbf16> to vector<1x256x128xbf16>
    tpu.vector_store %arg5[%c0_15, %c0_16, %c0_17], %35 {strides = array<i32>} : memref<1x256x128xbf16, #tpu.memory_space<vmem>>, vector<1x256x128xbf16>,
    return
  }
  func.func @transform_0(%arg0: i32) -> (i32, i32, i32) {
    %c0_i32 = arith.constant 0 : i32
    %c0_i32_0 = arith.constant 0 : i32
    %c0_i32_1 = arith.constant 0 : i32
    return %arg0, %c0_i32, %c0_i32_0 : i32, i32, i32
  }
  func.func @transform_1(%arg0: i32) -> (i32, i32) {
    %c0_i32 = arith.constant 0 : i32
    %c0_i32_0 = arith.constant 0 : i32
    %c0_i32_1 = arith.constant 0 : i32
    return %c0_i32, %c0_i32_0 : i32, i32
  }
  func.func @transform_2(%arg0: i32) -> (i32, i32) {
    %c0_i32 = arith.constant 0 : i32
    %c0_i32_0 = arith.constant 0 : i32
    %c0_i32_1 = arith.constant 0 : i32
    return %c0_i32, %c0_i32_0 : i32, i32
  }
  func.func @transform_3(%arg0: i32) -> (i32, i32) {
    %c0_i32 = arith.constant 0 : i32
    %c0_i32_0 = arith.constant 0 : i32
    %c0_i32_1 = arith.constant 0 : i32
    return %c0_i32, %c0_i32_0 : i32, i32
  }
  func.func @transform_4(%arg0: i32) -> (i32, i32, i32) {
    %c0_i32 = arith.constant 0 : i32
    %c0_i32_0 = arith.constant 0 : i32
    %c0_i32_1 = arith.constant 0 : i32
    return %arg0, %c0_i32, %c0_i32_0 : i32, i32, i32
  }
}

module attributes {stable_mosaic.version = 11 : i64} {
  func.func @_conv_bias_sigmoid_kernel(%arg0: i32, %arg1: memref<1x200x1152xbf16, #tpu.memory_space<vmem>>, %arg2: memref<1152x128xbf16, #tpu.memory_space<vmem>>, %arg3: memref<1x128xf32, #tpu.memory_space<vmem>>, %arg4: memref<1x200x128xf32, #tpu.memory_space<vmem>>) attributes {dimension_semantics = [#tpu.dimension_semantics<parallel>], iteration_bounds = array<i64: 2>, scalar_prefetch = 0 : i64, scratch_operands = 0 : i64, tpu.core_type = #tpu.core_type<tc>, window_params = [{transform_indices = @transform_0, window_bounds = array<i64: 1, 200, 1152>}, {pipeline_mode = #tpu.pipeline_mode<synchronous>, transform_indices = @transform_1, window_bounds = array<i64: 1152, 128>}, {pipeline_mode = #tpu.pipeline_mode<synchronous>, transform_indices = @transform_2, window_bounds = array<i64: 1, 128>}, {transform_indices = @transform_3, window_bounds = array<i64: 1, 200, 128>}]} {
    %c0 = arith.constant 0 : index
    %c0_0 = arith.constant 0 : index
    %c0_1 = arith.constant 0 : index
    %0 = vector.load %arg1[%c0, %c0_0, %c0_1] : memref<1x200x1152xbf16, #tpu.memory_space<vmem>>, vector<1x200x1152xbf16>
    %1 = vector.shape_cast %0 : vector<1x200x1152xbf16> to vector<200x1152xbf16>
    %c0_2 = arith.constant 0 : index
    %c0_3 = arith.constant 0 : index
    %2 = vector.load %arg2[%c0_2, %c0_3] : memref<1152x128xbf16, #tpu.memory_space<vmem>>, vector<1152x128xbf16>
    %cst = arith.constant dense<0.000000e+00> : vector<200x128xf32>
    %3 = tpu.matmul %1, %2, %cst {dimension_numbers = #tpu.dot_dimension_numbers<[1], [0], [0], [1], [0, 0, 1, 1], [], []>} : vector<200x1152xbf16>, vector<1152x128xbf16>, vector<200x128xf32> -> vector<200x128xf32>
    %c0_4 = arith.constant 0 : index
    %c0_5 = arith.constant 0 : index
    %4 = vector.load %arg3[%c0_4, %c0_5] : memref<1x128xf32, #tpu.memory_space<vmem>>, vector<1x128xf32>
    %5 = vector.broadcast %4 : vector<1x128xf32> to vector<200x128xf32>
    %6 = arith.addf %3, %5 : vector<200x128xf32>
    %7 = arith.negf %6 : vector<200x128xf32>
    %8 = math.exp %7 : vector<200x128xf32>
    %cst_6 = arith.constant 1.000000e+00 : f32
    %9 = vector.broadcast %cst_6 : f32 to vector<200x128xf32>
    %10 = arith.addf %9, %8 : vector<200x128xf32>
    %11 = arith.divf %9, %10 : vector<200x128xf32>
    %c0_7 = arith.constant 0 : index
    %c0_8 = arith.constant 0 : index
    %c0_9 = arith.constant 0 : index
    %12 = vector.load %arg4[%c0_7, %c0_8, %c0_9] : memref<1x200x128xf32, #tpu.memory_space<vmem>>, vector<1x200x128xf32>
    %13 = vector.shape_cast %12 : vector<1x200x128xf32> to vector<200x128xf32>
    %14 = vector.shape_cast %11 : vector<200x128xf32> to vector<1x200x128xf32>
    tpu.vector_store %arg4[%c0_7, %c0_8, %c0_9], %14 {strides = array<i32>} : memref<1x200x128xf32, #tpu.memory_space<vmem>>, vector<1x200x128xf32>,
    return
  }
  func.func @transform_0(%arg0: i32) -> (i32, i32, i32) {
    %c0_i32 = arith.constant 0 : i32
    %c0_i32_0 = arith.constant 0 : i32
    %c0_i32_1 = arith.constant 0 : i32
    return %arg0, %c0_i32, %c0_i32_0 : i32, i32, i32
  }
  func.func @transform_1(%arg0: i32) -> (i32, i32) {
    %c0_i32 = arith.constant 0 : i32
    %c0_i32_0 = arith.constant 0 : i32
    %c0_i32_1 = arith.constant 0 : i32
    return %c0_i32, %c0_i32_0 : i32, i32
  }
  func.func @transform_2(%arg0: i32) -> (i32, i32) {
    %c0_i32 = arith.constant 0 : i32
    %c0_i32_0 = arith.constant 0 : i32
    %c0_i32_1 = arith.constant 0 : i32
    return %c0_i32, %c0_i32_0 : i32, i32
  }
  func.func @transform_3(%arg0: i32) -> (i32, i32, i32) {
    %c0_i32 = arith.constant 0 : i32
    %c0_i32_0 = arith.constant 0 : i32
    %c0_i32_1 = arith.constant 0 : i32
    return %arg0, %c0_i32, %c0_i32_0 : i32, i32, i32
  }
}

</mosaic_0001>

<bundles_post_ra>
// kernel: mapping_network_forward.7
= control target key start
LH: loop header
LB: loop body
LE: loop exit
PB: predicated region body
PF: predicated region fallthrough
CT: control target
= control target key end

     0   :  { %s4368_s15 = smov 0   ;;  %s5186_s0 = inlined_call_operand.vmem [shape: bf16[2,104,2304], index: 0, kind: input, shape index: {}]   ;;  %s5187_s1 = inlined_call_operand.vmem [shape: bf16[2304,128], index: 1, kind: input, shape index: {}]   ;;  %s5188_s2 = inlined_call_operand.vmem [shape: f32[1,128], index: 2, kind: input, shape index: {}]   ;;  %s5189_s3 = inlined_call_operand.vmem [shape: f32[1,128], index: 3, kind: input, shape index: {}]   ;;  %s5190_s4 = inlined_call_operand.vmem [shape: bf16[2,104,128], index: 4, kind: output, shape index: {}]  }
   0x1 LB: > { %s3119_s16 = sadd.s32 4294967295, %s4341_s15   ;;  %p3123_p0 = scmp.ge.s32.totalorder %s4341_s15, 1  ;;  %s4341_s15 = sphi %s4368_s15, %s14_s15  }
   0x2   : > { %p162_p1 = scmp.lt.s32.totalorder %s4341_s15, 3 }
   0x4   : > { %p163_p2 = pnand %p3123_p0, %p162_p1 }
   0x5   : > { %p188_p3 = scmp.lt.s32.totalorder (!%p163_p2), %s3119_s16, 1 }
   0x6   : > { %166 = sbr.rel (%p163_p2) target bundleno = 550 (0x226), region = 36 }
   0xb   : > { %v4009_v0 = vld [vmem:[%s5187_s1 + $0x78] sm:$0xff]   ;;  %v4011_v2 = vld [vmem:[%s5187_s1 + $0x70] sm:$0xff]   ;;  %v4013_v4 = vld [vmem:[%s5187_s1 + $0x68] sm:$0xff]   ;;  %s5192_s16 = smov (!%p188_p3, %s3119_s16), 1 }
   0xc   : > { %v4010_v1 = vld [vmem:[%s5187_s1 + $0x38] sm:$0xff]   ;;  %3461 = vmatprep.subr.bf16.mxu0 %v4009_v0  ;;  %3983 = vmatprep.subr.bf16.mxu1 %v4009_v0  ;;  %v4012_v3 = vld [vmem:[%s5187_s1 + $0x30] sm:$0xff]   ;;  %v4014_v5 = vld [vmem:[%s5187_s1 + $0x28] sm:$0xff]   ;;  %s3999_s5 = smul.u32 936, %s5192_s16 }
   0xd   : > { %3462 = vmatpush3.bf16.msra.mxu0 %v4010_v1  ;;  %3991 = vmatpush3.bf16.msra.mxu1 %v4010_v1  ;;  %v4015_v6 = vld [vmem:[%s5187_s1 + $0x60] sm:$0xff]   ;;  %v4017_v8 = vld [vmem:[%s5187_s1 + $0x58] sm:$0xff]   ;;  %v4019_v10 = vld [vmem:[%s5187_s1 + $0x50] sm:$0xff]   ;;  %s4000_s9 = smul.u32 52, %s5192_s16 }
   0xe   : > { %3463 = vmatprep.subr.bf16.mxu0 %v4011_v2  ;;  %3984 = vmatprep.subr.bf16.mxu1 %v4011_v2  ;;  %v4016_v7 = vld [vmem:[%s5187_s1 + $0x20] sm:$0xff]   ;;  %s4409_s12 = scalar_lea.vmem %s5186_s0, %s3999_s5  ;;  %v4018_v9 = vld [vmem:[%s5187_s1 + $0x18] sm:$0xff]   ;;  %v4020_v13 = vld [vmem:[%s5187_s1 + $0x10] sm:$0xff]  }
   0xf   : > { %v4027_v11 = vld [vmem:[%s4409_s12 + $0x4] ss:$72 sps:$4 sm:$0xff]   ;;  %v4031_v18 = vld [vmem:[%s5187_s1 + $0xf8] sm:$0xff]   ;;  %v4025_v19 = vld [vmem:[%s4409_s12] ss:$72 sps:$4 sm:$0xff]   ;;  %s197_s16 = scalar_lea.vmem %s5190_s4, %s4000_s9 }
  0x10   : > { %v4030_v12 = vld [vmem:[%s4409_s12 + $0x244] ss:$72 sps:$4 sm:$0xff]   ;;  %2103 = vmatprep.mubr.bf16.mxu0 %v4027_v11  ;;  %v4028_v20 = vld [vmem:[%s4409_s12 + $0x240] ss:$72 sps:$4 sm:$0xff]   ;;  %v4032_v21 = vld [vmem:[%s5187_s1 + $0x178] sm:$0xff]  }
  0x11   : > { %3464 = vmatpush3.bf16.msra.mxu0 %v4012_v3  ;;  %3992 = vmatpush3.bf16.msra.mxu1 %v4012_v3  ;;  %v4021_v14 = vld [vmem:[%s5187_s1 + $0x48] sm:$0xff]   ;;  %v4023_v16 = vld [vmem:[%s5187_s1 + $0x40] sm:$0xff]   ;;  %v4033_v22 = vld [vmem:[%s5187_s1 + $0xb8] sm:$0xff]  }
  0x12   : > { %3465 = vmatprep.subr.bf16.mxu0 %v4013_v4  ;;  %3985 = vmatprep.subr.bf16.mxu1 %v4013_v4  ;;  %v4022_v15 = vld [vmem:[%s5187_s1 + $0x8] sm:$0xff]   ;;  %v4024_v17 = vld [vmem:[%s5187_s1] sm:$0xff]   ;;  %v4034_v23 = vld [vmem:[%s5187_s1 + $0x138] sm:$0xff]  }
  0x13   : > { %2135 = vmatprep.mubr.bf16.mxu1 %v4030_v12  ;;  %v4035_v24 = vld [vmem:[%s5187_s1 + $0xf0] sm:$0xff]   ;;  %v4042_v30 = vld [vmem:[%s5187_s1 + $0xe8] sm:$0xff]   ;;  %v4049_v36 = vld [vmem:[%s5187_s1 + $0xe0] sm:$0xff]  }
  0x14   : > { %v4036_v25 = vld [vmem:[%s5187_s1 + $0x170] sm:$0xff]   ;;  %v4043_v32 = vld [vmem:[%s5187_s1 + $0x168] sm:$0xff]   ;;  %v4050_v37 = vld [vmem:[%s5187_s1 + $0x160] sm:$0xff]  }
  0x15   : > { %3466 = vmatpush3.bf16.msra.mxu0 %v4014_v5  ;;  %3993 = vmatpush3.bf16.msra.mxu1 %v4014_v5  ;;  %v4039_v26 = vld [vmem:[%s4409_s12 + $0x94] ss:$72 sps:$4 sm:$0xff]   ;;  %v4041_v31 = vld [vmem:[%s4409_s12 + $0x90] ss:$72 sps:$4 sm:$0xff]   ;;  %v4044_v33 = vld [vmem:[%s5187_s1 + $0xa8] sm:$0xff]  }
  0x16   : > { %3467 = vmatprep.subr.bf16.mxu0 %v4015_v6  ;;  %3986 = vmatprep.subr.bf16.mxu1 %v4015_v6  ;;  %v4037_v27 = vld [vmem:[%s5187_s1 + $0xb0] sm:$0xff]   ;;  %v4045_v34 = vld [vmem:[%s5187_s1 + $0x128] sm:$0xff]   ;;  %v4051_v38 = vld [vmem:[%s5187_s1 + $0xa0] sm:$0xff]  }
  0x17   : > { %v4046_v28 = vld [vmem:[%s4409_s12 + $0x2d4] ss:$72 sps:$4 sm:$0xff]   ;;  %v4048_v35 = vld [vmem:[%s4409_s12 + $0x2d0] ss:$72 sps:$4 sm:$0xff]   ;;  %v4053_v39 = vld [vmem:[%s4409_s12 + $0x124] ss:$72 sps:$4 sm:$0xff]  }
  0x18   : > { %v4038_v29 = vld [vmem:[%s5187_s1 + $0x130] sm:$0xff]   ;;  %v4052_v40 = vld [vmem:[%s5187_s1 + $0x120] sm:$0xff]   ;;  %v4056_v42 = vld [vmem:[%s5187_s1 + $0xd8] sm:$0xff]  }
  0x19   : > { %3468 = vmatpush3.bf16.msra.mxu0 %v4016_v7  ;;  %3994 = vmatpush3.bf16.msra.mxu1 %v4016_v7  ;;  %v307_v41 = vld [vmem:[%s4409_s12 + $0x360] sm:$0xff]  ;;  %v4057_v45 = vld [vmem:[%s5187_s1 + $0x158] sm:$0xff]   ;;  %v4062_v49 = vld [vmem:[%s5187_s1 + $0xd0] sm:$0xff]  }
  0x1a   : > { %3469 = vmatprep.subr.bf16.mxu0 %v4017_v8  ;;  %3987 = vmatprep.subr.bf16.mxu1 %v4017_v8  ;;  %v3235_v43 = vcombine.high %v307_v41, %v307_v41  ;;  %v4055_v44 = vld [vmem:[%s4409_s12 + $0x120] ss:$72 sps:$4 sm:$0xff]   ;;  %v4058_v46 = vld [vmem:[%s5187_s1 + $0x98] sm:$0xff]   ;;  %v3234_v48 = vcombine.low %v307_v41, %v307_v41  ;;  %v4063_v50 = vld [vmem:[%s5187_s1 + $0x150] sm:$0xff]  }
  0x1b   : > { %v4059_v47 = vld [vmem:[%s5187_s1 + $0x118] sm:$0xff]   ;;  %v4064_v51 = vld [vmem:[%s5187_s1 + $0x90] sm:$0xff]   ;;  %v4069_v54 = vld [vmem:[%s5187_s1 + $0xc8] sm:$0xff]  }
  0x1c   : > { %v4066_v52 = vld [vmem:[%s4409_s12 + $0x1b4] ss:$72 sps:$4 sm:$0xff]   ;;  %v4068_v55 = vld [vmem:[%s4409_s12 + $0x1b0] ss:$72 sps:$4 sm:$0xff]   ;;  %v4070_v56 = vld [vmem:[%s5187_s1 + $0x148] sm:$0xff]  }
  0x1d   : > { %3470 = vmatpush3.bf16.msra.mxu0 %v4018_v9  ;;  %3995 = vmatpush3.bf16.msra.mxu1 %v4018_v9  ;;  %v4065_v53 = vld [vmem:[%s5187_s1 + $0x110] sm:$0xff]   ;;  %v4071_v57 = vld [vmem:[%s5187_s1 + $0x88] sm:$0xff]   ;;  %v4073_v59 = vld [vmem:[%s5187_s1 + $0xc0] sm:$0xff]  }
  0x1e   : > { %3471 = vmatprep.subr.bf16.mxu0 %v4019_v10  ;;  %3988 = vmatprep.subr.bf16.mxu1 %v4019_v10  ;;  %v4072_v58 = vld [vmem:[%s5187_s1 + $0x108] sm:$0xff]   ;;  %v4074_v60 = vld [vmem:[%s5187_s1 + $0x140] sm:$0xff]   ;;  %v4082_v63 = vld [vmem:[%s4409_s12 + $0x14] ss:$72 sps:$4 sm:$0xff]  }
  0x1f   : > { %v4079_v61 = vld [vmem:[%s4409_s12 + $0xc] ss:$72 sps:$4 sm:$0xff]   ;;  %v4075_v62 = vld [vmem:[%s5187_s1 + $0x80] sm:$0xff]   ;;  %v4077_v1 = vld [vmem:[%s4409_s12 + $0x8] ss:$72 sps:$4 sm:$0xff]  }
  0x20   : > { %v4076_v0 = vld [vmem:[%s5187_s1 + $0x100] sm:$0xff]   ;;  %v4080_v2 = vld [vmem:[%s4409_s12 + $0x10] ss:$72 sps:$4 sm:$0xff]  }
  0x21   : > { %3472 = vmatpush3.bf16.msra.mxu0 %v4020_v13  ;;  %3996 = vmatpush3.bf16.msra.mxu1 %v4020_v13  ;;  %v4083_v3 = vld [vmem:[%s5187_s1 + $0x1f8] sm:$0xff]   ;;  %v4089_v8 = vld [vmem:[%s4409_s12 + $0xa4] ss:$72 sps:$4 sm:$0xff]   ;;  %v4091_v9 = vld [vmem:[%s5187_s1 + $0x1f0] sm:$0xff]  }
  0x22   : > { %3473 = vmatprep.subr.bf16.mxu0 %v4021_v14  ;;  %3989 = vmatprep.subr.bf16.mxu1 %v4021_v14  ;;  %v4084_v4 = vld [vmem:[%s5187_s1 + $0x1b8] sm:$0xff]   ;;  %v4094_v10 = vld [vmem:[%s5187_s1 + $0x1b0] sm:$0xff]   ;;  %v4093_v12 = vld [vmem:[%s4409_s12 + $0xa0] ss:$72 sps:$4 sm:$0xff]  }
  0x23   : > { %v4085_v5 = vld [vmem:[%s5187_s1 + $0x278] sm:$0xff]   ;;  %v4095_v13 = vld [vmem:[%s5187_s1 + $0x270] sm:$0xff]  }
  0x24   : > { %v4086_v6 = vld [vmem:[%s5187_s1 + $0x238] sm:$0xff]   ;;  %v4096_v14 = vld [vmem:[%s5187_s1 + $0x230] sm:$0xff]  }
  0x25   : > { %3474 = vmatpush3.bf16.msra.mxu0 %v4022_v15  ;;  %3997 = vmatpush3.bf16.msra.mxu1 %v4022_v15  ;;  %v4087_v7 = vld [vmem:[%s4409_s12 + $0x9c] ss:$72 sps:$4 sm:$0xff]   ;;  %v4092_v11 = vld [vmem:[%s4409_s12 + $0x98] ss:$72 sps:$4 sm:$0xff]   ;;  %v4097_v15 = vld [vmem:[%s5187_s1 + $0x1e8] sm:$0xff]  }
  0x26   : > { %3475 = vmatprep.subr.bf16.mxu0 %v4023_v16  ;;  %3990 = vmatprep.subr.bf16.mxu1 %v4023_v16  ;;  %v4098_v16 = vld [vmem:[%s4409_s12 + $0x12c] ss:$72 sps:$4 sm:$0xff]  }
  0x27   : > { %v4130_v41 = vld [vmem:[%s5187_s1 + $0x210] sm:$0xff]  }
  0x29   : > { %3476 = vmatpush3.bf16.msra.mxu0 %v4024_v17  ;;  %3998 = vmatpush3.bf16.msra.mxu1 %v4024_v17  ;;  %v4100_v17 = vld [vmem:[%s4409_s12 + $0x134] ss:$72 sps:$4 sm:$0xff]  }
  0x2a   : > { %3519 = vmatprep.subr.bf16.mxu1 %v4031_v18  ;;  %3577 = vmatprep.subr.bf16.mxu0 %v4032_v21  ;;  %v4102_v18 = vld [vmem:[%s5187_s1 + $0x1a8] sm:$0xff]   ;;  %v4104_v21 = vld [vmem:[%s4409_s12 + $0x130] ss:$72 sps:$4 sm:$0xff]  }
  0x2c   : > { %2104 = vmatmul.mubr.bf16.vlgmr.msra.gmra.mxu0 %v4025_v19  ;;  %2136 = vmatmul.mubr.bf16.vlgmr.msra.gmra.mxu1 %v4028_v20  ;;  %v4105_v19 = vld [vmem:[%s5187_s1 + $0x268] sm:$0xff]  }
  0x2d   : > { %3520 = vmatpush3.bf16.msra.mxu1 %v4033_v22  ;;  %3578 = vmatpush3.bf16.msra.mxu0 %v4034_v23  ;;  %v4103_v20 = vld [vmem:[%s4409_s12 + $0x128] ss:$72 sps:$4 sm:$0xff]   ;;  %v4107_v23 = vld [vmem:[%s5187_s1 + $0x1e0] sm:$0xff]  }
  0x2e   : > { %3521 = vmatprep.subr.bf16.mxu1 %v4035_v24  ;;  %3579 = vmatprep.subr.bf16.mxu0 %v4036_v25  ;;  %v4106_v22 = vld [vmem:[%s5187_s1 + $0x228] sm:$0xff]   ;;  %v4108_v24 = vld [vmem:[%s5187_s1 + $0x1a0] sm:$0xff]  }
  0x2f   : > { %2111 = vmatprep.mubr.bf16.mxu0 %v4039_v26  ;;  %2143 = vmatprep.mubr.bf16.mxu1 %v4046_v28  ;;  %v4109_v25 = vld [vmem:[%s4409_s12 + $0x1bc] ss:$72 sps:$4 sm:$0xff]  }
  0x30   : > { %v4111_v26 = vld [vmem:[%s4409_s12 + $0x1c4] ss:$72 sps:$4 sm:$0xff]  }
  0x31   : > { %3522 = vmatpush3.bf16.msra.mxu1 %v4037_v27  ;;  %3580 = vmatpush3.bf16.msra.mxu0 %v4038_v29  ;;  %v4113_v27 = vld [vmem:[%s5187_s1 + $0x260] sm:$0xff]   ;;  %v4117_v29 = vld [vmem:[%s5187_s1 + $0x1d8] sm:$0xff]  }
  0x32   : > { %3523 = vmatprep.subr.bf16.mxu1 %v4042_v30  ;;  %3581 = vmatprep.subr.bf16.mxu0 %v4043_v32  ;;  %v4116_v28 = vld [vmem:[%s5187_s1 + $0x220] sm:$0xff]   ;;  %v4118_v32 = vld [vmem:[%s5187_s1 + $0x198] sm:$0xff]  }
  0x33   : > { %v4114_v30 = vld [vmem:[%s4409_s12 + $0x1b8] ss:$72 sps:$4 sm:$0xff]  }
  0x34   : > { %2112 = vmatmul.mubr.bf16.gmra.mxu0 %v4041_v31  ;;  %2144 = vmatmul.mubr.bf16.gmra.mxu1 %v4048_v35  ;;  %v4115_v31 = vld [vmem:[%s4409_s12 + $0x1c0] ss:$72 sps:$4 sm:$0xff]   ;;  %v4122_v35 = vld [vmem:[%s4409_s12 + $0x254] ss:$72 sps:$4 sm:$0xff]  }
  0x35   : > { %3524 = vmatpush3.bf16.msra.mxu1 %v4044_v33  ;;  %3582 = vmatpush3.bf16.msra.mxu0 %v4045_v34  ;;  %v4119_v33 = vld [vmem:[%s5187_s1 + $0x258] sm:$0xff]   ;;  %v4120_v34 = vld [vmem:[%s4409_s12 + $0x24c] ss:$72 sps:$4 sm:$0xff]  }
  0x36   : > { %3525 = vmatprep.subr.bf16.mxu1 %v4049_v36  ;;  %3583 = vmatprep.subr.bf16.mxu0 %v4050_v37  ;;  %v4124_v36 = vld [vmem:[%s5187_s1 + $0x218] sm:$0xff]   ;;  %v4127_v37 = vld [vmem:[%s5187_s1 + $0x1d0] sm:$0xff]  }
  0x37   : > { %2119 = vmatprep.mubr.bf16.mxu0 %v4053_v39  ;;  %2151 = vmatprep.mubr.bf16.mxu1 %v3235_v43  ;;  %v4125_v39 = vld [vmem:[%s4409_s12 + $0x248] ss:$72 sps:$4 sm:$0xff]   ;;  %v4131_v43 = vld [vmem:[%s4409_s12 + $0x2dc] ss:$72 sps:$4 sm:$0xff]  }
  0x39   : > { %3526 = vmatpush3.bf16.msra.mxu1 %v4051_v38  ;;  %3584 = vmatpush3.bf16.msra.mxu0 %v4052_v40  ;;  %v4128_v38 = vld [vmem:[%s5187_s1 + $0x190] sm:$0xff]  }
  0x3a   : > { %3527 = vmatprep.subr.bf16.mxu1 %v4056_v42  ;;  %3585 = vmatprep.subr.bf16.mxu0 %v4057_v45  ;;  %v4129_v40 = vld [vmem:[%s5187_s1 + $0x250] sm:$0xff]   ;;  %v4137_v45 = vld [vmem:[%s5187_s1 + $0x1c8] sm:$0xff]  }
  0x3b   : > { %v4126_v42 = vld [vmem:[%s4409_s12 + $0x250] ss:$72 sps:$4 sm:$0xff]  }
  0x3c   : > { %2120 = vmatmul.mubr.bf16.gmra.mxu0 %v4055_v44  ;;  %2152 = vmatmul.mubr.bf16.gmra.mxu1 %v3234_v48  ;;  %v4133_v44 = vld [vmem:[%s4409_s12 + $0x2e4] ss:$72 sps:$4 sm:$0xff]   ;;  %v4135_v48 = vld [vmem:[%s4409_s12 + $0x2d8] ss:$72 sps:$4 sm:$0xff]  }
  0x3d   : > { %3528 = vmatpush3.bf16.msra.mxu1 %v4058_v46  ;;  %3586 = vmatpush3.bf16.msra.mxu0 %v4059_v47  ;;  %v4138_v46 = vld [vmem:[%s5187_s1 + $0x188] sm:$0xff]  }
  0x3e   : > { %3529 = vmatprep.subr.bf16.mxu1 %v4062_v49  ;;  %3587 = vmatprep.subr.bf16.mxu0 %v4063_v50  ;;  %v4139_v47 = vld [vmem:[%s5187_s1 + $0x248] sm:$0xff]  }
  0x3f   : > { %2127 = vmatprep.mubr.bf16.mxu0 %v4066_v52  ;;  %2191 = vmatprep.mubr.bf16.mxu1 %v4079_v61  ;;  %v4136_v49 = vld [vmem:[%s4409_s12 + $0x2e0] ss:$72 sps:$4 sm:$0xff]   ;;  %v309_v52 = vld [vmem:[%s4409_s12 + $0x370] sm:$0xff] }
  0x40   : > { %v4140_v50 = vld [vmem:[%s5187_s1 + $0x208] sm:$0xff]  }
  0x41   : > { %3530 = vmatpush3.bf16.msra.mxu1 %v4064_v51  ;;  %3588 = vmatpush3.bf16.msra.mxu0 %v4065_v53  ;;  %v308_v51 = vld [vmem:[%s4409_s12 + $0x368] sm:$0xff]  ;;  %v4145_v53 = vld [vmem:[%s5187_s1 + $0x1c0] sm:$0xff]  }
  0x42   : > { %3531 = vmatprep.subr.bf16.mxu1 %v4069_v54  ;;  %3589 = vmatprep.subr.bf16.mxu0 %v4070_v56  ;;  %v4146_v54 = vld [vmem:[%s5187_s1 + $0x180] sm:$0xff]   ;;  %v3239_v56 = vcombine.high %v309_v52, %v309_v52  ;;  %v3236_v61 = vcombine.low %v308_v51, %v308_v51 }
  0x44   : > { %2128 = vmatmul.mubr.bf16.gmra.mxu0 %v4068_v55  ;;  %v3237_v55 = vcombine.high %v308_v51, %v308_v51  ;;  %v310_v51 = vld [vmem:[%s4409_s12 + $0x378] sm:$0xff] }
  0x45   : > { %3532 = vmatpush3.bf16.msra.mxu1 %v4071_v57  ;;  %3590 = vmatpush3.bf16.msra.mxu0 %v4072_v58  ;;  %v4147_v57 = vld [vmem:[%s5187_s1 + $0x240] sm:$0xff]  }
  0x46   : > { %3533 = vmatprep.subr.bf16.mxu1 %v4073_v59  ;;  %3591 = vmatprep.subr.bf16.mxu0 %v4074_v60  ;;  %v4148_v58 = vld [vmem:[%s5187_s1 + $0x200] sm:$0xff]   ;;  %v4155_v59 = vld [vmem:[%s5187_s1 + $0x2f8] sm:$0xff]  }
  0x47   : > { %2279 = vmatprep.mubr.bf16.mxu0 %v4082_v63  ;;  %v4151_v60 = vld [vmem:[%s4409_s12 + $0x1c] ss:$72 sps:$4 sm:$0xff]  }
  0x48   : > { %v4157_v63 = vld [vmem:[%s5187_s1 + $0x378] sm:$0xff]  }
  0x49   : > { %3534 = vmatpush3.bf16.msra.mxu1 %v4075_v62  ;;  %3592 = vmatpush3.bf16.msra.mxu0 %v4076_v0  ;;  %v3238_v62 = vcombine.low %v309_v52, %v309_v52  ;;  %v4154_v0 = vld [vmem:[%s4409_s12 + $0x24] ss:$72 sps:$4 sm:$0xff]   ;;  %v4207_v52 = vld [vmem:[%s4409_s12 + $0x2e8] ss:$72 sps:$4 sm:$0xff]  }
  0x4a   : > { %3635 = vmatprep.subr.bf16.mxu1 %v4083_v3  ;;  %3693 = vmatprep.subr.bf16.mxu0 %v4085_v5  ;;  %v4156_v3 = vld [vmem:[%s5187_s1 + $0x2b8] sm:$0xff]   ;;  %v4159_v5 = vld [vmem:[%s4409_s12 + $0xac] ss:$72 sps:$4 sm:$0xff]  }
  0x4c   : > { %2192 = vmatmul.mubr.bf16.vlgmr.msra.gmra.mxu1 %v4077_v1  ;;  %2280 = vmatmul.mubr.bf16.vlgmr.msra.gmra.mxu0 %v4080_v2  ;;  %v4149_v1 = vld [vmem:[%s4409_s12 + $0x18] ss:$72 sps:$4 sm:$0xff]  }
  0x4d   : > { %3636 = vmatpush3.bf16.msra.mxu1 %v4084_v4  ;;  %3694 = vmatpush3.bf16.msra.mxu0 %v4086_v6  ;;  %v4152_v2 = vld [vmem:[%s4409_s12 + $0x20] ss:$72 sps:$4 sm:$0xff]   ;;  %v4158_v4 = vld [vmem:[%s5187_s1 + $0x338] sm:$0xff]  }
  0x4e   : > { %2199 = vmatprep.mubr.bf16.mxu1 %v4087_v7  ;;  %2287 = vmatprep.mubr.bf16.mxu0 %v4089_v8  ;;  %v4161_v6 = vld [vmem:[%s4409_s12 + $0xb4] ss:$72 sps:$4 sm:$0xff]  }
  0x4f   : > { %3637 = vmatprep.subr.bf16.mxu1 %v4091_v9  ;;  %3695 = vmatprep.subr.bf16.mxu0 %v4095_v13  ;;  %v4163_v7 = vld [vmem:[%s5187_s1 + $0x2f0] sm:$0xff]  }
  0x50   : > { %v4167_v8 = vld [vmem:[%s5187_s1 + $0x370] sm:$0xff]  }
  0x51   : > { %3638 = vmatpush3.bf16.msra.mxu1 %v4094_v10  ;;  %3696 = vmatpush3.bf16.msra.mxu0 %v4096_v14  ;;  %v4166_v9 = vld [vmem:[%s5187_s1 + $0x2b0] sm:$0xff]   ;;  %v4177_v14 = vld [vmem:[%s5187_s1 + $0x368] sm:$0xff]  }
  0x52   : > { %3639 = vmatprep.subr.bf16.mxu1 %v4097_v15  ;;  %3697 = vmatprep.subr.bf16.mxu0 %v4105_v19  ;;  %v4168_v10 = vld [vmem:[%s5187_s1 + $0x330] sm:$0xff]   ;;  %v4170_v15 = vld [vmem:[%s4409_s12 + $0x13c] ss:$72 sps:$4 sm:$0xff]  }
  0x53   : > { %v4165_v13 = vld [vmem:[%s4409_s12 + $0xb0] ss:$72 sps:$4 sm:$0xff]   ;;  %v4179_v19 = vld [vmem:[%s5187_s1 + $0x2e0] sm:$0xff]  }
  0x54   : > { %2200 = vmatmul.mubr.bf16.gmra.mxu1 %v4092_v11  ;;  %2288 = vmatmul.mubr.bf16.gmra.mxu0 %v4093_v12  ;;  %v4169_v11 = vld [vmem:[%s5187_s1 + $0x2e8] sm:$0xff]  }
  0x55   : > { %2207 = vmatprep.mubr.bf16.mxu1 %v4098_v16  ;;  %2295 = vmatprep.mubr.bf16.mxu0 %v4100_v17  ;;  %v4164_v12 = vld [vmem:[%s4409_s12 + $0xa8] ss:$72 sps:$4 sm:$0xff]   ;;  %v4172_v16 = vld [vmem:[%s4409_s12 + $0x144] ss:$72 sps:$4 sm:$0xff]  }
  0x56   : > { %3640 = vmatpush3.bf16.msra.mxu1 %v4102_v18  ;;  %3698 = vmatpush3.bf16.msra.mxu0 %v4106_v22  ;;  %v4174_v17 = vld [vmem:[%s5187_s1 + $0x2a8] sm:$0xff]   ;;  %v4175_v22 = vld [vmem:[%s4409_s12 + $0x138] ss:$72 sps:$4 sm:$0xff]  }
  0x57   : > { %3641 = vmatprep.subr.bf16.mxu1 %v4107_v23  ;;  %3699 = vmatprep.subr.bf16.mxu0 %v4113_v27  ;;  %v4178_v18 = vld [vmem:[%s5187_s1 + $0x328] sm:$0xff]   ;;  %v4191_v27 = vld [vmem:[%s5187_s1 + $0x358] sm:$0xff]  }
  0x58   : > { %v4176_v23 = vld [vmem:[%s4409_s12 + $0x140] ss:$72 sps:$4 sm:$0xff]  }
  0x5a   : > { %3642 = vmatpush3.bf16.msra.mxu1 %v4108_v24  ;;  %3700 = vmatpush3.bf16.msra.mxu0 %v4116_v28  ;;  %v4188_v24 = vld [vmem:[%s5187_s1 + $0x320] sm:$0xff]   ;;  %v4183_v28 = vld [vmem:[%s4409_s12 + $0x1d4] ss:$72 sps:$4 sm:$0xff]  }
  0x5b   : > { %3643 = vmatprep.subr.bf16.mxu1 %v4117_v29  ;;  %3701 = vmatprep.subr.bf16.mxu0 %v4119_v33  ;;  %v4190_v29 = vld [vmem:[%s5187_s1 + $0x298] sm:$0xff]  }
  0x5c   : > { %2208 = vmatmul.mubr.bf16.gmra.mxu1 %v4103_v20  ;;  %2296 = vmatmul.mubr.bf16.gmra.mxu0 %v4104_v21  ;;  %v4185_v20 = vld [vmem:[%s5187_s1 + $0x360] sm:$0xff]   ;;  %v4187_v33 = vld [vmem:[%s4409_s12 + $0x1d0] ss:$72 sps:$4 sm:$0xff]  }
  0x5d   : > { %2215 = vmatprep.mubr.bf16.mxu1 %v4109_v25  ;;  %2303 = vmatprep.mubr.bf16.mxu0 %v4111_v26  ;;  %v4180_v21 = vld [vmem:[%s5187_s1 + $0x2a0] sm:$0xff]   ;;  %v4181_v25 = vld [vmem:[%s4409_s12 + $0x1cc] ss:$72 sps:$4 sm:$0xff]   ;;  %v4189_v26 = vld [vmem:[%s5187_s1 + $0x2d8] sm:$0xff]  }
  0x5e   : > { %3644 = vmatpush3.bf16.msra.mxu1 %v4118_v32  ;;  %3702 = vmatpush3.bf16.msra.mxu0 %v4124_v36  ;;  %v4186_v32 = vld [vmem:[%s4409_s12 + $0x1c8] ss:$72 sps:$4 sm:$0xff]  }
  0x5f   : > { %3645 = vmatprep.subr.bf16.mxu1 %v4127_v37  ;;  %3703 = vmatprep.subr.bf16.mxu0 %v4129_v40  ;;  %v4201_v36 = vld [vmem:[%s5187_s1 + $0x350] sm:$0xff]   ;;  %v4210_v40 = vld [vmem:[%s5187_s1 + $0x288] sm:$0xff]  }
  0x60   : > { %v4202_v37 = vld [vmem:[%s5187_s1 + $0x310] sm:$0xff]  }
  0x62   : > { %3646 = vmatpush3.bf16.msra.mxu1 %v4128_v38  ;;  %3704 = vmatpush3.bf16.msra.mxu0 %v4130_v41  ;;  %v4194_v38 = vld [vmem:[%s4409_s12 + $0x264] ss:$72 sps:$4 sm:$0xff]  }
  0x63   : > { %3647 = vmatprep.subr.bf16.mxu1 %v4137_v45  ;;  %3705 = vmatprep.subr.bf16.mxu0 %v4139_v47  ;;  %v4211_v41 = vld [vmem:[%s5187_s1 + $0x348] sm:$0xff]   ;;  %v4217_v47 = vld [vmem:[%s5187_s1 + $0x2c0] sm:$0xff]  }
  0x64   : > { %2216 = vmatmul.mubr.bf16.gmra.mxu1 %v4114_v30  ;;  %2304 = vmatmul.mubr.bf16.gmra.mxu0 %v4115_v31  ;;  %v4196_v30 = vld [vmem:[%s5187_s1 + $0x318] sm:$0xff]   ;;  %v4199_v31 = vld [vmem:[%s5187_s1 + $0x2d0] sm:$0xff]  }
  0x65   : > { %2223 = vmatprep.mubr.bf16.mxu1 %v4120_v34  ;;  %2311 = vmatprep.mubr.bf16.mxu0 %v4122_v35  ;;  %v4200_v34 = vld [vmem:[%s5187_s1 + $0x290] sm:$0xff]   ;;  %v4192_v35 = vld [vmem:[%s4409_s12 + $0x25c] ss:$72 sps:$4 sm:$0xff]  }
  0x66   : > { %3648 = vmatpush3.bf16.msra.mxu1 %v4138_v46  ;;  %3706 = vmatpush3.bf16.msra.mxu0 %v4140_v50  ;;  %v4203_v45 = vld [vmem:[%s4409_s12 + $0x2ec] ss:$72 sps:$4 sm:$0xff]   ;;  %v4220_v50 = vld [vmem:[%s5187_s1 + $0x300] sm:$0xff]  }
  0x67   : > { %3649 = vmatprep.subr.bf16.mxu1 %v4145_v53  ;;  %3707 = vmatprep.subr.bf16.mxu0 %v4147_v57  ;;  %v4205_v46 = vld [vmem:[%s4409_s12 + $0x2f4] ss:$72 sps:$4 sm:$0xff]   ;;  %v311_v53 = vld [vmem:[%s4409_s12 + $0x380] sm:$0xff] }
  0x68   : > { %v3243_v57 = vcombine.high %v311_v53, %v311_v53 }
  0x6a   : > { %3650 = vmatpush3.bf16.msra.mxu1 %v4146_v54  ;;  %3708 = vmatpush3.bf16.msra.mxu0 %v4148_v58  ;;  %v4227_v54 = vld [vmem:[%s5187_s1 + $0x3f8] sm:$0xff]  }
  0x6b   : > { %3751 = vmatprep.subr.bf16.mxu1 %v4155_v59  ;;  %3809 = vmatprep.subr.bf16.mxu0 %v4157_v63  ;;  %v4229_v58 = vld [vmem:[%s5187_s1 + $0x478] sm:$0xff]   ;;  %v3240_v59 = vcombine.low %v310_v51, %v310_v51  ;;  %v4221_v63 = vld [vmem:[%s4409_s12 + $0x28] ss:$72 sps:$4 sm:$0xff]  }
  0x6c   : > { %2224 = vmatmul.mubr.bf16.gmra.mxu1 %v4125_v39  ;;  %2312 = vmatmul.mubr.bf16.gmra.mxu0 %v4126_v42  ;;  %v4209_v39 = vld [vmem:[%s5187_s1 + $0x2c8] sm:$0xff]   ;;  %v4197_v42 = vld [vmem:[%s4409_s12 + $0x258] ss:$72 sps:$4 sm:$0xff]  }
  0x6d   : > { %2231 = vmatprep.mubr.bf16.mxu1 %v4131_v43  ;;  %2319 = vmatprep.mubr.bf16.mxu0 %v4133_v44  ;;  %v4198_v43 = vld [vmem:[%s4409_s12 + $0x260] ss:$72 sps:$4 sm:$0xff]  }
  0x6e   : > { %v4212_v44 = vld [vmem:[%s5187_s1 + $0x308] sm:$0xff]  }
  0x74   : > { %2232 = vmatmul.mubr.bf16.gmra.mxu1 %v4135_v48  ;;  %2320 = vmatmul.mubr.bf16.gmra.mxu0 %v4136_v49  ;;  %v4218_v48 = vld [vmem:[%s5187_s1 + $0x280] sm:$0xff]  }
  0x75   : > { %2239 = vmatprep.mubr.bf16.mxu1 %v3237_v55  ;;  %2327 = vmatprep.mubr.bf16.mxu0 %v3239_v56  ;;  %v4219_v49 = vld [vmem:[%s5187_s1 + $0x340] sm:$0xff]   ;;  %v4208_v55 = vld [vmem:[%s4409_s12 + $0x2f0] ss:$72 sps:$4 sm:$0xff]   ;;  %v3241_v56 = vcombine.high %v310_v51, %v310_v51 }
  0x76   : > { %v4279_v51 = vld [vmem:[%s4409_s12 + $0x2f8] ss:$72 sps:$4 sm:$0xff]  }
  0x7c   : > { %2240 = vmatmul.mubr.bf16.gmra.mxu1 %v3236_v61  ;;  %2328 = vmatmul.mubr.bf16.gmra.mxu0 %v3238_v62  ;;  %v4223_v61 = vld [vmem:[%s4409_s12 + $0x2c] ss:$72 sps:$4 sm:$0xff]  }
  0x7d   : > { %2367 = vmatprep.mubr.bf16.mxu1 %v4151_v60  ;;  %2455 = vmatprep.mubr.bf16.mxu0 %v4154_v0  ;;  %v3242_v60 = vcombine.low %v311_v53, %v311_v53  ;;  %v4226_v62 = vld [vmem:[%s4409_s12 + $0x34] ss:$72 sps:$4 sm:$0xff]   ;;  %v4224_v0 = vld [vmem:[%s4409_s12 + $0x30] ss:$72 sps:$4 sm:$0xff]  }
  0x84   : > { %2368 = vmatmul.mubr.bf16.vlgmr.msra.gmra.mxu1 %v4149_v1  ;;  %2456 = vmatmul.mubr.bf16.vlgmr.msra.gmra.mxu0 %v4152_v2  ;;  %v4228_v1 = vld [vmem:[%s5187_s1 + $0x3b8] sm:$0xff]  }
  0x85   : > { %3752 = vmatpush3.bf16.msra.mxu1 %v4156_v3  ;;  %3810 = vmatpush3.bf16.msra.mxu0 %v4158_v4  ;;  %v4230_v2 = vld [vmem:[%s5187_s1 + $0x438] sm:$0xff]   ;;  %v4233_v4 = vld [vmem:[%s4409_s12 + $0xc4] ss:$72 sps:$4 sm:$0xff]  }
  0x86   : > { %2375 = vmatprep.mubr.bf16.mxu1 %v4159_v5  ;;  %2463 = vmatprep.mubr.bf16.mxu0 %v4161_v6  ;;  %v4231_v3 = vld [vmem:[%s4409_s12 + $0xbc] ss:$72 sps:$4 sm:$0xff]   ;;  %v4235_v5 = vld [vmem:[%s5187_s1 + $0x3f0] sm:$0xff]  }
  0x87   : > { %3753 = vmatprep.subr.bf16.mxu1 %v4163_v7  ;;  %3811 = vmatprep.subr.bf16.mxu0 %v4167_v8  ;;  %v4239_v6 = vld [vmem:[%s5187_s1 + $0x470] sm:$0xff]  }
  0x88   : > { %v4238_v7 = vld [vmem:[%s5187_s1 + $0x3b0] sm:$0xff]  }
  0x89   : > { %3754 = vmatpush3.bf16.msra.mxu1 %v4166_v9  ;;  %3812 = vmatpush3.bf16.msra.mxu0 %v4168_v10  ;;  %v4240_v8 = vld [vmem:[%s5187_s1 + $0x430] sm:$0xff]   ;;  %v4241_v9 = vld [vmem:[%s5187_s1 + $0x3e8] sm:$0xff]   ;;  %v4236_v10 = vld [vmem:[%s4409_s12 + $0xb8] ss:$72 sps:$4 sm:$0xff]  }
  0x8a   : > { %3755 = vmatprep.subr.bf16.mxu1 %v4169_v11  ;;  %3813 = vmatprep.subr.bf16.mxu0 %v4177_v14  ;;  %v4237_v11 = vld [vmem:[%s4409_s12 + $0xc0] ss:$72 sps:$4 sm:$0xff]   ;;  %v4244_v14 = vld [vmem:[%s4409_s12 + $0x154] ss:$72 sps:$4 sm:$0xff]  }
  0x8c   : > { %2376 = vmatmul.mubr.bf16.gmra.mxu1 %v4164_v12  ;;  %2464 = vmatmul.mubr.bf16.gmra.mxu0 %v4165_v13  ;;  %v4249_v12 = vld [vmem:[%s5187_s1 + $0x468] sm:$0xff]  }
  0x8d   : > { %2383 = vmatprep.mubr.bf16.mxu1 %v4170_v15  ;;  %2471 = vmatprep.mubr.bf16.mxu0 %v4172_v16  ;;  %v4242_v13 = vld [vmem:[%s4409_s12 + $0x14c] ss:$72 sps:$4 sm:$0xff]  }
  0x8e   : > { %3756 = vmatpush3.bf16.msra.mxu1 %v4174_v17  ;;  %3814 = vmatpush3.bf16.msra.mxu0 %v4178_v18  ;;  %v4246_v15 = vld [vmem:[%s5187_s1 + $0x3a8] sm:$0xff]   ;;  %v4251_v17 = vld [vmem:[%s5187_s1 + $0x3e0] sm:$0xff]  }
  0x8f   : > { %3757 = vmatprep.subr.bf16.mxu1 %v4179_v19  ;;  %3815 = vmatprep.subr.bf16.mxu0 %v4185_v20  ;;  %v4250_v16 = vld [vmem:[%s5187_s1 + $0x428] sm:$0xff]   ;;  %v4257_v18 = vld [vmem:[%s5187_s1 + $0x460] sm:$0xff]  }
  0x90   : > { %v4252_v19 = vld [vmem:[%s5187_s1 + $0x3a0] sm:$0xff]  }
  0x91   : > { %v4260_v20 = vld [vmem:[%s5187_s1 + $0x420] sm:$0xff]  }
  0x92   : > { %3758 = vmatpush3.bf16.msra.mxu1 %v4180_v21  ;;  %3816 = vmatpush3.bf16.msra.mxu0 %v4188_v24  ;;  %v4247_v21 = vld [vmem:[%s4409_s12 + $0x148] ss:$72 sps:$4 sm:$0xff]   ;;  %v4253_v24 = vld [vmem:[%s4409_s12 + $0x1dc] ss:$72 sps:$4 sm:$0xff]  }
  0x93   : > { %3759 = vmatprep.subr.bf16.mxu1 %v4189_v26  ;;  %3817 = vmatprep.subr.bf16.mxu0 %v4191_v27  ;;  %v4255_v26 = vld [vmem:[%s4409_s12 + $0x1e4] ss:$72 sps:$4 sm:$0xff]   ;;  %v4262_v27 = vld [vmem:[%s5187_s1 + $0x398] sm:$0xff]  }
  0x94   : > { %2384 = vmatmul.mubr.bf16.gmra.mxu1 %v4175_v22  ;;  %2472 = vmatmul.mubr.bf16.gmra.mxu0 %v4176_v23  ;;  %v4248_v22 = vld [vmem:[%s4409_s12 + $0x150] ss:$72 sps:$4 sm:$0xff]  }
  0x95   : > { %2391 = vmatprep.mubr.bf16.mxu1 %v4181_v25  ;;  %2479 = vmatprep.mubr.bf16.mxu0 %v4183_v28  ;;  %v4261_v23 = vld [vmem:[%s5187_s1 + $0x3d8] sm:$0xff]  }
  0x96   : > { %3760 = vmatpush3.bf16.msra.mxu1 %v4190_v29  ;;  %3818 = vmatpush3.bf16.msra.mxu0 %v4196_v30  ;;  %v4263_v25 = vld [vmem:[%s5187_s1 + $0x458] sm:$0xff]   ;;  %v4271_v29 = vld [vmem:[%s5187_s1 + $0x3d0] sm:$0xff]  }
  0x97   : > { %3761 = vmatprep.subr.bf16.mxu1 %v4199_v31  ;;  %3819 = vmatprep.subr.bf16.mxu0 %v4201_v36  ;;  %v4268_v28 = vld [vmem:[%s5187_s1 + $0x418] sm:$0xff]   ;;  %v4273_v30 = vld [vmem:[%s5187_s1 + $0x450] sm:$0xff]  }
  0x98   : > { %v4272_v31 = vld [vmem:[%s5187_s1 + $0x390] sm:$0xff]  }
  0x99   : > { %v4266_v36 = vld [vmem:[%s4409_s12 + $0x274] ss:$72 sps:$4 sm:$0xff]  }
  0x9a   : > { %3762 = vmatpush3.bf16.msra.mxu1 %v4200_v34  ;;  %3820 = vmatpush3.bf16.msra.mxu0 %v4202_v37  ;;  %v4274_v34 = vld [vmem:[%s5187_s1 + $0x410] sm:$0xff]   ;;  %v4281_v37 = vld [vmem:[%s5187_s1 + $0x3c8] sm:$0xff]  }
  0x9b   : > { %3763 = vmatprep.subr.bf16.mxu1 %v4209_v39  ;;  %3821 = vmatprep.subr.bf16.mxu0 %v4211_v41  ;;  %v4282_v39 = vld [vmem:[%s5187_s1 + $0x388] sm:$0xff]   ;;  %v4289_v41 = vld [vmem:[%s5187_s1 + $0x3c0] sm:$0xff]  }
  0x9c   : > { %2392 = vmatmul.mubr.bf16.gmra.mxu1 %v4186_v32  ;;  %2480 = vmatmul.mubr.bf16.gmra.mxu0 %v4187_v33  ;;  %v4258_v32 = vld [vmem:[%s4409_s12 + $0x1d8] ss:$72 sps:$4 sm:$0xff]  }
  0x9d   : > { %2399 = vmatprep.mubr.bf16.mxu1 %v4192_v35  ;;  %2487 = vmatprep.mubr.bf16.mxu0 %v4194_v38  ;;  %v4259_v33 = vld [vmem:[%s4409_s12 + $0x1e0] ss:$72 sps:$4 sm:$0xff]   ;;  %v4264_v35 = vld [vmem:[%s4409_s12 + $0x26c] ss:$72 sps:$4 sm:$0xff]  }
  0x9e   : > { %3764 = vmatpush3.bf16.msra.mxu1 %v4210_v40  ;;  %3822 = vmatpush3.bf16.msra.mxu0 %v4212_v44  ;;  %v4283_v38 = vld [vmem:[%s5187_s1 + $0x448] sm:$0xff]   ;;  %v4292_v44 = vld [vmem:[%s5187_s1 + $0x400] sm:$0xff]  }
  0x9f   : > { %3765 = vmatprep.subr.bf16.mxu1 %v4217_v47  ;;  %3823 = vmatprep.subr.bf16.mxu0 %v4219_v49  ;;  %v4284_v40 = vld [vmem:[%s5187_s1 + $0x408] sm:$0xff]   ;;  %v4275_v47 = vld [vmem:[%s4409_s12 + $0x2fc] ss:$72 sps:$4 sm:$0xff]  }
  0xa0   : > { %v312_v49 = vld [vmem:[%s4409_s12 + $0x388] sm:$0xff] }
  0xa1   : > { %v3245_v53 = vcombine.high %v312_v49, %v312_v49 }
  0xa2   : > { %3766 = vmatpush3.bf16.msra.mxu1 %v4218_v48  ;;  %3824 = vmatpush3.bf16.msra.mxu0 %v4220_v50  ;;  %v4277_v48 = vld [vmem:[%s4409_s12 + $0x304] ss:$72 sps:$4 sm:$0xff]   ;;  %v313_v50 = vld [vmem:[%s4409_s12 + $0x390] sm:$0xff] }
  0xa3   : > { %3867 = vmatprep.subr.bf16.mxu1 %v4227_v54  ;;  %3925 = vmatprep.subr.bf16.mxu0 %v4229_v58  ;;  %v3247_v54 = vcombine.high %v313_v50, %v313_v50  ;;  %v4298_v58 = vld [vmem:[%s4409_s12 + $0x44] ss:$72 sps:$4 sm:$0xff]  }
  0xa4   : > { %2400 = vmatmul.mubr.bf16.gmra.mxu1 %v4197_v42  ;;  %2488 = vmatmul.mubr.bf16.gmra.mxu0 %v4198_v43  ;;  %v4291_v42 = vld [vmem:[%s5187_s1 + $0x440] sm:$0xff]  }
  0xa5   : > { %2407 = vmatprep.mubr.bf16.mxu1 %v4203_v45  ;;  %2495 = vmatprep.mubr.bf16.mxu0 %v4205_v46  ;;  %v4290_v43 = vld [vmem:[%s5187_s1 + $0x380] sm:$0xff]   ;;  %v4269_v45 = vld [vmem:[%s4409_s12 + $0x268] ss:$72 sps:$4 sm:$0xff]  }
  0xa6   : > { %v4270_v46 = vld [vmem:[%s4409_s12 + $0x270] ss:$72 sps:$4 sm:$0xff]  }
  0xac   : > { %2408 = vmatmul.mubr.bf16.gmra.mxu1 %v4207_v52  ;;  %2496 = vmatmul.mubr.bf16.gmra.mxu0 %v4208_v55  ;;  %v4280_v52 = vld [vmem:[%s4409_s12 + $0x300] ss:$72 sps:$4 sm:$0xff]   ;;  %v3244_v55 = vcombine.low %v312_v49, %v312_v49  ;;  %v4322_v49 = vld [vmem:[%s4409_s12 + $0x284] ss:$72 sps:$4 sm:$0xff]  }
  0xad   : > { %2415 = vmatprep.mubr.bf16.mxu1 %v3241_v56  ;;  %2503 = vmatprep.mubr.bf16.mxu0 %v3243_v57  ;;  %v3246_v56 = vcombine.low %v313_v50, %v313_v50  ;;  %v4295_v57 = vld [vmem:[%s4409_s12 + $0x3c] ss:$72 sps:$4 sm:$0xff]  }
  0xb4   : > { %2416 = vmatmul.mubr.bf16.gmra.mxu1 %v3240_v59  ;;  %2504 = vmatmul.mubr.bf16.gmra.mxu0 %v3242_v60 }
  0xb5   : > { %2543 = vmatprep.mubr.bf16.mxu1 %v4223_v61  ;;  %2631 = vmatprep.mubr.bf16.mxu0 %v4226_v62 }
  0xbc   : > { %2544 = vmatmul.mubr.bf16.vlgmr.msra.gmra.mxu1 %v4221_v63  ;;  %2632 = vmatmul.mubr.bf16.vlgmr.msra.gmra.mxu0 %v4224_v0 }
  0xbd   : > { %3868 = vmatpush3.bf16.msra.mxu1 %v4228_v1  ;;  %3926 = vmatpush3.bf16.msra.mxu0 %v4230_v2 }
  0xbe   : > { %2551 = vmatprep.mubr.bf16.mxu1 %v4231_v3  ;;  %2639 = vmatprep.mubr.bf16.mxu0 %v4233_v4  ;;  %v4293_v3 = vld [vmem:[%s4409_s12 + $0x38] ss:$72 sps:$4 sm:$0xff]  }
  0xbf   : > { %3869 = vmatprep.subr.bf16.mxu1 %v4235_v5  ;;  %3927 = vmatprep.subr.bf16.mxu0 %v4239_v6  ;;  %v4296_v4 = vld [vmem:[%s4409_s12 + $0x40] ss:$72 sps:$4 sm:$0xff]   ;;  %v4299_v5 = vld [vmem:[%s4409_s12 + $0xcc] ss:$72 sps:$4 sm:$0xff]  }
  0xc0   : > { %v4301_v6 = vld [vmem:[%s4409_s12 + $0xd4] ss:$72 sps:$4 sm:$0xff]  }
  0xc1   : > { %3870 = vmatpush3.bf16.msra.mxu1 %v4238_v7  ;;  %3928 = vmatpush3.bf16.msra.mxu0 %v4240_v8 }
  0xc2   : > { %3871 = vmatprep.subr.bf16.mxu1 %v4241_v9  ;;  %3929 = vmatprep.subr.bf16.mxu0 %v4249_v12 }
  0xc4   : > { %2552 = vmatmul.mubr.bf16.gmra.mxu1 %v4236_v10  ;;  %2640 = vmatmul.mubr.bf16.gmra.mxu0 %v4237_v11 }
  0xc5   : > { %2559 = vmatprep.mubr.bf16.mxu1 %v4242_v13  ;;  %2647 = vmatprep.mubr.bf16.mxu0 %v4244_v14 }
  0xc6   : > { %3872 = vmatpush3.bf16.msra.mxu1 %v4246_v15  ;;  %3930 = vmatpush3.bf16.msra.mxu0 %v4250_v16 }
  0xc7   : > { %3873 = vmatprep.subr.bf16.mxu1 %v4251_v17  ;;  %3931 = vmatprep.subr.bf16.mxu0 %v4257_v18 }
  0xca   : > { %3874 = vmatpush3.bf16.msra.mxu1 %v4252_v19  ;;  %3932 = vmatpush3.bf16.msra.mxu0 %v4260_v20  ;;  %v4303_v19 = vld [vmem:[%s4409_s12 + $0xc8] ss:$72 sps:$4 sm:$0xff]  }
  0xcb   : > { %3875 = vmatprep.subr.bf16.mxu1 %v4261_v23  ;;  %3933 = vmatprep.subr.bf16.mxu0 %v4263_v25  ;;  %v4304_v20 = vld [vmem:[%s4409_s12 + $0xd0] ss:$72 sps:$4 sm:$0xff]  }
  0xcc   : > { %2560 = vmatmul.mubr.bf16.gmra.mxu1 %v4247_v21  ;;  %2648 = vmatmul.mubr.bf16.gmra.mxu0 %v4248_v22  ;;  %v4305_v21 = vld [vmem:[%s4409_s12 + $0x15c] ss:$72 sps:$4 sm:$0xff]  }
  0xcd   : > { %2567 = vmatprep.mubr.bf16.mxu1 %v4253_v24  ;;  %2655 = vmatprep.mubr.bf16.mxu0 %v4255_v26  ;;  %v4307_v22 = vld [vmem:[%s4409_s12 + $0x164] ss:$72 sps:$4 sm:$0xff]  }
  0xce   : > { %3876 = vmatpush3.bf16.msra.mxu1 %v4262_v27  ;;  %3934 = vmatpush3.bf16.msra.mxu0 %v4268_v28 }
  0xcf   : > { %3877 = vmatprep.subr.bf16.mxu1 %v4271_v29  ;;  %3935 = vmatprep.subr.bf16.mxu0 %v4273_v30 }
  0xd2   : > { %3878 = vmatpush3.bf16.msra.mxu1 %v4272_v31  ;;  %3936 = vmatpush3.bf16.msra.mxu0 %v4274_v34 }
  0xd3   : > { %3879 = vmatprep.subr.bf16.mxu1 %v4281_v37  ;;  %3937 = vmatprep.subr.bf16.mxu0 %v4283_v38  ;;  %v4311_v37 = vld [vmem:[%s4409_s12 + $0x1ec] ss:$72 sps:$4 sm:$0xff]  }
  0xd4   : > { %2568 = vmatmul.mubr.bf16.gmra.mxu1 %v4258_v32  ;;  %2656 = vmatmul.mubr.bf16.gmra.mxu0 %v4259_v33  ;;  %v4315_v38 = vld [vmem:[%s4409_s12 + $0x1f4] ss:$72 sps:$4 sm:$0xff]  }
  0xd5   : > { %2575 = vmatprep.mubr.bf16.mxu1 %v4264_v35  ;;  %2663 = vmatprep.mubr.bf16.mxu0 %v4266_v36  ;;  %v4309_v35 = vld [vmem:[%s4409_s12 + $0x158] ss:$72 sps:$4 sm:$0xff]  }
  0xd6   : > { %3880 = vmatpush3.bf16.msra.mxu1 %v4282_v39  ;;  %3938 = vmatpush3.bf16.msra.mxu0 %v4284_v40  ;;  %v4310_v36 = vld [vmem:[%s4409_s12 + $0x160] ss:$72 sps:$4 sm:$0xff]  }
  0xd7   : > { %3881 = vmatprep.subr.bf16.mxu1 %v4289_v41  ;;  %3939 = vmatprep.subr.bf16.mxu0 %v4291_v42 }
  0xda   : > { %3882 = vmatpush3.bf16.msra.mxu1 %v4290_v43  ;;  %3940 = vmatpush3.bf16.msra.mxu0 %v4292_v44 }
  0xdc   : > { %2576 = vmatmul.mubr.bf16.gmra.mxu1 %v4269_v45  ;;  %2664 = vmatmul.mubr.bf16.gmra.mxu0 %v4270_v46  ;;  %v4313_v46 = vld [vmem:[%s4409_s12 + $0x1f0] ss:$72 sps:$4 sm:$0xff]  }
  0xdd   : > { %2583 = vmatprep.mubr.bf16.mxu1 %v4275_v47  ;;  %2671 = vmatprep.mubr.bf16.mxu0 %v4277_v48  ;;  %v4316_v47 = vld [vmem:[%s4409_s12 + $0x1e8] ss:$72 sps:$4 sm:$0xff]   ;;  %v4319_v48 = vld [vmem:[%s4409_s12 + $0x27c] ss:$72 sps:$4 sm:$0xff]  }
  0xe4   : > { %2584 = vmatmul.mubr.bf16.gmra.mxu1 %v4279_v51  ;;  %2672 = vmatmul.mubr.bf16.gmra.mxu0 %v4280_v52 }
  0xe5   : > { %2591 = vmatprep.mubr.bf16.mxu1 %v3245_v53  ;;  %2679 = vmatprep.mubr.bf16.mxu0 %v3247_v54 }
  0xec   : > { %v3477_v59 = vpop.f32.mrf.mxu0  ;;  %v3501_v60 = vpop.f32.mrf.mxu1  ;;  %2592 = vmatmul.mubr.bf16.gmra.mxu1 %v3244_v55  ;;  %2680 = vmatmul.mubr.bf16.gmra.mxu0 %v3246_v56 }
  0xed   : > { %2719 = vmatprep.mubr.bf16.mxu1 %v4295_v57  ;;  %2807 = vmatprep.mubr.bf16.mxu0 %v4298_v58 }
  0xee   : > { %v3478_v61 = vpop.f32.mrf.mxu0  ;;  %v3502_v62 = vpop.f32.mrf.mxu1 }
  0xef   : > { %v4909_v63 = vadd.f32 %v3478_v61, %v3477_v59  ;;  %v4911_v0 = vadd.f32 %v3502_v62, %v3501_v60  ;;  %v4317_v60 = vld [vmem:[%s4409_s12 + $0x278] ss:$72 sps:$4 sm:$0xff]  }
  0xf0   : > { %v3480_v1 = vpop.f32.mrf.mxu0  ;;  %v3504_v2 = vpop.f32.mrf.mxu1  ;;  %v4320_v61 = vld [vmem:[%s4409_s12 + $0x280] ss:$72 sps:$4 sm:$0xff]  }
  0xf2   : > { %v3481_v7 = vpop.f32.mrf.mxu0  ;;  %v3505_v8 = vpop.f32.mrf.mxu1 }
  0xf3   : > { %v4917_v9 = vadd.f32 %v3481_v7, %v3480_v1  ;;  %v4919_v10 = vadd.f32 %v3505_v8, %v3504_v2  ;;  %v4325_v1 = vld [vmem:[%s4409_s12 + $0x30c] ss:$72 sps:$4 sm:$0xff]  }
  0xf4   : > { %v3483_v11 = vpop.f32.mrf.mxu0  ;;  %2720 = vmatmul.mubr.bf16.vlgmr.msra.gmra.mxu1 %v4293_v3  ;;  %2808 = vmatmul.mubr.bf16.vlgmr.msra.gmra.mxu0 %v4296_v4  ;;  %v3507_v12 = vpop.f32.mrf.mxu1  ;;  %v4328_v2 = vld [vmem:[%s4409_s12 + $0x314] ss:$72 sps:$4 sm:$0xff]  }
  0xf5   : > { %2727 = vmatprep.mubr.bf16.mxu1 %v4299_v5  ;;  %2815 = vmatprep.mubr.bf16.mxu0 %v4301_v6 }
  0xf6   : > { %v3484_v13 = vpop.f32.mrf.mxu0  ;;  %v3508_v14 = vpop.f32.mrf.mxu1 }
  0xf7   : > { %v4921_v15 = vadd.f32 %v3484_v13, %v3483_v11  ;;  %v4923_v16 = vadd.f32 %v3508_v14, %v3507_v12  ;;  %v314_v14 = vld [vmem:[%s4409_s12 + $0x398] sm:$0xff] }
  0xf8   : > { %v3486_v17 = vpop.f32.mrf.mxu0  ;;  %v3510_v18 = vpop.f32.mrf.mxu1 }
  0xfa   : > { %v3487_v23 = vpop.f32.mrf.mxu0  ;;  %v3511_v24 = vpop.f32.mrf.mxu1 }
  0xfb   : > { %v4929_v25 = vadd.f32 %v3487_v23, %v3486_v17  ;;  %v4931_v26 = vadd.f32 %v3511_v24, %v3510_v18  ;;  %v315_v17 = vld [vmem:[%s4409_s12 + $0x3a0] sm:$0xff]  ;;  %v4323_v23 = vld [vmem:[%s4409_s12 + $0x308] ss:$72 sps:$4 sm:$0xff]  }
  0xfc   : > { %v3489_v27 = vpop.f32.mrf.mxu0  ;;  %2728 = vmatmul.mubr.bf16.gmra.mxu1 %v4303_v19  ;;  %2816 = vmatmul.mubr.bf16.gmra.mxu0 %v4304_v20  ;;  %v3513_v28 = vpop.f32.mrf.mxu1  ;;  %v4326_v24 = vld [vmem:[%s4409_s12 + $0x310] ss:$72 sps:$4 sm:$0xff]  }
  0xfd   : > { %2735 = vmatprep.mubr.bf16.mxu1 %v4305_v21  ;;  %2823 = vmatprep.mubr.bf16.mxu0 %v4307_v22 }
  0xfe   : > { %v3490_v29 = vpop.f32.mrf.mxu0  ;;  %v3514_v30 = vpop.f32.mrf.mxu1 }
  0xff   : > { %v4933_v31 = vadd.f32 %v3490_v29, %v3489_v27  ;;  %v4935_v32 = vadd.f32 %v3514_v30, %v3513_v28  ;;  %v3249_v28 = vcombine.high %v314_v14, %v314_v14  ;;  %v3251_v29 = vcombine.high %v315_v17, %v315_v17 }
 0x100   : > { %v3492_v33 = vpop.f32.mrf.mxu0  ;;  %v3516_v34 = vpop.f32.mrf.mxu1 }
 0x102   : > { %v3493_v39 = vpop.f32.mrf.mxu0  ;;  %v3517_v40 = vpop.f32.mrf.mxu1 }
 0x103   : > { %v4941_v41 = vadd.f32 %v3493_v39, %v3492_v33 }
 0x104   : > { %v3495_v42 = vpop.f32.mrf.mxu0  ;;  %2736 = vmatmul.mubr.bf16.gmra.mxu1 %v4309_v35  ;;  %2824 = vmatmul.mubr.bf16.gmra.mxu0 %v4310_v36 }
 0x105   : > { %2743 = vmatprep.mubr.bf16.mxu1 %v4311_v37  ;;  %2831 = vmatprep.mubr.bf16.mxu0 %v4315_v38 }
 0x106   : > { %v3496_v43 = vpop.f32.mrf.mxu0 }
 0x107   : > { %v4943_v44 = vadd.f32 %v3496_v43, %v3495_v42 }
 0x108   : > { %v3498_v45 = vpop.f32.mrf.mxu0 }
 0x10a   : > { %v3499_v50 = vpop.f32.mrf.mxu0 }
 0x10b   : > { %v4949_v51 = vadd.f32 %v3499_v50, %v3498_v45 }
 0x10c   : > { %v3535_v52 = vpop.f32.mrf.mxu1  ;;  %v3593_v53 = vpop.f32.mrf.mxu0  ;;  %2744 = vmatmul.mubr.bf16.gmra.mxu1 %v4316_v47  ;;  %2832 = vmatmul.mubr.bf16.gmra.mxu0 %v4313_v46  ;;  %v3248_v47 = vcombine.low %v314_v14, %v314_v14 }
 0x10d   : > { %2751 = vmatprep.mubr.bf16.mxu1 %v4319_v48  ;;  %2839 = vmatprep.mubr.bf16.mxu0 %v4322_v49  ;;  %v3250_v48 = vcombine.low %v315_v17, %v315_v17 }
 0x10e   : > { %v3536_v54 = vpop.f32.mrf.mxu1  ;;  %v3594_v55 = vpop.f32.mrf.mxu0 }
 0x10f   : > { %v3537_v56 = vadd.f32 %v3536_v54, %v3535_v52  ;;  %v3595_v57 = vadd.f32 %v3594_v55, %v3593_v53 }
 0x110   : > { %v3538_v58 = vpop.f32.mrf.mxu1  ;;  %v3596_v59 = vpop.f32.mrf.mxu0 }
 0x111   : > { %v2194_v62 = vadd.f32 %v3537_v56, %v4909_v63 }
 0x112   : > { %v3539_v3 = vpop.f32.mrf.mxu1  ;;  %v3597_v4 = vpop.f32.mrf.mxu0 }
 0x113   : > { %v4956_v5 = vadd.f32 %v3595_v57, %v2194_v62  ;;  %v3540_v6 = vadd.f32 %v3539_v3, %v3538_v58  ;;  %v3598_v7 = vadd.f32 %v3597_v4, %v3596_v59 }
 0x114   : > { %v3541_v8 = vpop.f32.mrf.mxu1  ;;  %v3599_v11 = vpop.f32.mrf.mxu0  ;;  %2752 = vmatmul.mubr.bf16.gmra.mxu1 %v4317_v60  ;;  %2840 = vmatmul.mubr.bf16.gmra.mxu0 %v4320_v61 }
 0x115   : > { %v2197_v12 = vadd.f32 %v3540_v6, %v4917_v9  ;;  %2759 = vmatprep.mubr.bf16.mxu1 %v4325_v1  ;;  %2847 = vmatprep.mubr.bf16.mxu0 %v4328_v2 }
 0x116   : > { %v3542_v63 = vpop.f32.mrf.mxu1  ;;  %v3600_v13 = vpop.f32.mrf.mxu0 }
 0x117   : > { %v4961_v18 = vadd.f32 %v3598_v7, %v2197_v12  ;;  %v3543_v19 = vadd.f32 %v3542_v63, %v3541_v8  ;;  %v3601_v20 = vadd.f32 %v3600_v13, %v3599_v11 }
 0x118   : > { %v3544_v21 = vpop.f32.mrf.mxu1  ;;  %v3602_v22 = vpop.f32.mrf.mxu0 }
 0x119   : > { %v2202_v27 = vadd.f32 %v3543_v19, %v4921_v15 }
 0x11a   : > { %v3545_v30 = vpop.f32.mrf.mxu1  ;;  %v3603_v9 = vpop.f32.mrf.mxu0 }
 0x11b   : > { %v4966_v33 = vadd.f32 %v3601_v20, %v2202_v27  ;;  %v3546_v34 = vadd.f32 %v3545_v30, %v3544_v21  ;;  %v3604_v35 = vadd.f32 %v3603_v9, %v3602_v22 }
 0x11c   : > { %v3547_v36 = vpop.f32.mrf.mxu1  ;;  %v3605_v37 = vpop.f32.mrf.mxu0  ;;  %2760 = vmatmul.mubr.bf16.gmra.mxu1 %v4323_v23  ;;  %2848 = vmatmul.mubr.bf16.gmra.mxu0 %v4326_v24 }
 0x11d   : > { %v2205_v38 = vadd.f32 %v3546_v34, %v4929_v25  ;;  %2767 = vmatprep.mubr.bf16.mxu1 %v3249_v28  ;;  %2855 = vmatprep.mubr.bf16.mxu0 %v3251_v29 }
 0x11e   : > { %v3548_v39 = vpop.f32.mrf.mxu1  ;;  %v3606_v40 = vpop.f32.mrf.mxu0 }
 0x11f   : > { %v4969_v42 = vadd.f32 %v3604_v35, %v2205_v38  ;;  %v3549_v15 = vadd.f32 %v3548_v39, %v3547_v36  ;;  %v3607_v43 = vadd.f32 %v3606_v40, %v3605_v37 }
 0x120   : > { %v3550_v45 = vpop.f32.mrf.mxu1  ;;  %v3608_v46 = vpop.f32.mrf.mxu0 }
 0x121   : > { %v2210_v49 = vadd.f32 %v3549_v15, %v4933_v31 }
 0x122   : > { %v3551_v50 = vpop.f32.mrf.mxu1  ;;  %v3609_v52 = vpop.f32.mrf.mxu0 }
 0x123   : > { %v4972_v53 = vadd.f32 %v3607_v43, %v2210_v49  ;;  %v3552_v54 = vadd.f32 %v3551_v50, %v3550_v45  ;;  %v3610_v25 = vadd.f32 %v3609_v52, %v3608_v46 }
 0x124   : > { %v3553_v55 = vpop.f32.mrf.mxu1  ;;  %v3611_v56 = vpop.f32.mrf.mxu0  ;;  %2768 = vmatmul.mubr.bf16.gmra.mxu1 %v3248_v47  ;;  %2856 = vmatmul.mubr.bf16.gmra.mxu0 %v3250_v48 }
 0x125   : > { %v2213_v57 = vadd.f32 %v3552_v54, %v4941_v41 }
 0x126   : > { %v3554_v58 = vpop.f32.mrf.mxu1  ;;  %v3612_v59 = vpop.f32.mrf.mxu0 }
 0x127   : > { %v4975_v60 = vadd.f32 %v3610_v25, %v2213_v57  ;;  %v3555_v61 = vadd.f32 %v3554_v58, %v3553_v55  ;;  %v3613_v62 = vadd.f32 %v3612_v59, %v3611_v56 }
 0x128   : > { %v3556_v1 = vpop.f32.mrf.mxu1  ;;  %v3614_v31 = vpop.f32.mrf.mxu0 }
 0x129   : > { %v2218_v2 = vadd.f32 %v3555_v61, %v4943_v44 }
 0x12a   : > { %v3557_v3 = vpop.f32.mrf.mxu1  ;;  %v3615_v4 = vpop.f32.mrf.mxu0 }
 0x12b   : > { %v4978_v6 = vadd.f32 %v3613_v62, %v2218_v2  ;;  %v3558_v7 = vadd.f32 %v3557_v3, %v3556_v1  ;;  %v3616_v8 = vadd.f32 %v3615_v4, %v3614_v31 }
 0x12c   : > { %v3559_v11 = vpop.f32.mrf.mxu1  ;;  %v3617_v12 = vpop.f32.mrf.mxu0 }
 0x12d   : > { %v2221_v41 = vadd.f32 %v3558_v7, %v4949_v51 }
 0x12e   : > { %v3560_v63 = vpop.f32.mrf.mxu1  ;;  %v3618_v13 = vpop.f32.mrf.mxu0 }
 0x12f   : > { %v4981_v14 = vadd.f32 %v3616_v8, %v2221_v41  ;;  %v3561_v17 = vadd.f32 %v3560_v63, %v3559_v11  ;;  %v3619_v19 = vadd.f32 %v3618_v13, %v3617_v12 }
 0x130   : > { %v3562_v20 = vpop.f32.mrf.mxu1  ;;  %v3620_v21 = vpop.f32.mrf.mxu0 }
 0x131   : > { %v2226_v44 = vadd.f32 %v3561_v17, %v4911_v0 }
 0x132   : > { %v3563_v22 = vpop.f32.mrf.mxu1  ;;  %v3621_v23 = vpop.f32.mrf.mxu0 }
 0x133   : > { %v4984_v24 = vadd.f32 %v3619_v19, %v2226_v44  ;;  %v3564_v27 = vadd.f32 %v3563_v22, %v3562_v20  ;;  %v3622_v28 = vadd.f32 %v3621_v23, %v3620_v21 }
 0x134   : > { %v3565_v29 = vpop.f32.mrf.mxu1  ;;  %v3623_v30 = vpop.f32.mrf.mxu0 }
 0x135   : > { %v2229_v51 = vadd.f32 %v3564_v27, %v4919_v10 }
 0x136   : > { %v3566_v9 = vpop.f32.mrf.mxu1  ;;  %v3624_v34 = vpop.f32.mrf.mxu0 }
 0x137   : > { %v4987_v35 = vadd.f32 %v3622_v28, %v2229_v51  ;;  %v3567_v36 = vadd.f32 %v3566_v9, %v3565_v29  ;;  %v3625_v37 = vadd.f32 %v3624_v34, %v3623_v30 }
 0x138   : > { %v3568_v38 = vpop.f32.mrf.mxu1  ;;  %v3626_v39 = vpop.f32.mrf.mxu0 }
 0x139   : > { %v2234_v0 = vadd.f32 %v3567_v36, %v4923_v16 }
 0x13a   : > { %v3569_v40 = vpop.f32.mrf.mxu1  ;;  %v3627_v15 = vpop.f32.mrf.mxu0 }
 0x13b   : > { %v4990_v43 = vadd.f32 %v3625_v37, %v2234_v0  ;;  %v3570_v45 = vadd.f32 %v3569_v40, %v3568_v38  ;;  %v3628_v46 = vadd.f32 %v3627_v15, %v3626_v39 }
 0x13c   : > { %v3571_v47 = vpop.f32.mrf.mxu1  ;;  %v3629_v48 = vpop.f32.mrf.mxu0 }
 0x13d   : > { %v2237_v10 = vadd.f32 %v3570_v45, %v4931_v26 }
 0x13e   : > { %v3572_v49 = vpop.f32.mrf.mxu1  ;;  %v3630_v50 = vpop.f32.mrf.mxu0 }
 0x13f   : > { %v4993_v52 = vadd.f32 %v3628_v46, %v2237_v10  ;;  %v3573_v54 = vadd.f32 %v3572_v49, %v3571_v47  ;;  %v3631_v25 = vadd.f32 %v3630_v50, %v3629_v48 }
 0x140   : > { %v3574_v55 = vpop.f32.mrf.mxu1  ;;  %v3632_v56 = vpop.f32.mrf.mxu0 }
 0x141   : > { %v2242_v16 = vadd.f32 %v3573_v54, %v4935_v32 }
 0x142   : > { %v3575_v57 = vpop.f32.mrf.mxu1  ;;  %v3633_v58 = vpop.f32.mrf.mxu0 }
 0x143   : > { %v4996_v59 = vadd.f32 %v3631_v25, %v2242_v16 }
 0x144   : > { %v3651_v61 = vpop.f32.mrf.mxu1  ;;  %v3709_v62 = vpop.f32.mrf.mxu0 }
 0x146   : > { %v3652_v1 = vpop.f32.mrf.mxu1  ;;  %v3710_v31 = vpop.f32.mrf.mxu0 }
 0x147   : > { %v3653_v2 = vadd.f32 %v3652_v1, %v3651_v61  ;;  %v3711_v26 = vadd.f32 %v3710_v31, %v3709_v62 }
 0x148   : > { %v3654_v3 = vpop.f32.mrf.mxu1  ;;  %v3712_v4 = vpop.f32.mrf.mxu0 }
 0x149   : > { %v2370_v7 = vadd.f32 %v3653_v2, %v4956_v5 }
 0x14a   : > { %v3655_v8 = vpop.f32.mrf.mxu1  ;;  %v3713_v11 = vpop.f32.mrf.mxu0 }
 0x14b   : > { %v4999_v12 = vadd.f32 %v3711_v26, %v2370_v7  ;;  %v3656_v41 = vadd.f32 %v3655_v8, %v3654_v3  ;;  %v3714_v32 = vadd.f32 %v3713_v11, %v3712_v4 }
 0x14c   : > { %v3657_v63 = vpop.f32.mrf.mxu1  ;;  %v3715_v13 = vpop.f32.mrf.mxu0 }
 0x14d   : > { %v2373_v17 = vadd.f32 %v3656_v41, %v4961_v18 }
 0x14e   : > { %v3658_v19 = vpop.f32.mrf.mxu1  ;;  %v3716_v20 = vpop.f32.mrf.mxu0 }
 0x14f   : > { %v5002_v21 = vadd.f32 %v3714_v32, %v2373_v17  ;;  %v3659_v44 = vadd.f32 %v3658_v19, %v3657_v63  ;;  %v3717_v22 = vadd.f32 %v3716_v20, %v3715_v13 }
 0x150   : > { %v3660_v23 = vpop.f32.mrf.mxu1  ;;  %v3718_v27 = vpop.f32.mrf.mxu0 }
 0x151   : > { %v2378_v5 = vadd.f32 %v3659_v44, %v4966_v33 }
 0x152   : > { %v3661_v28 = vpop.f32.mrf.mxu1  ;;  %v3719_v29 = vpop.f32.mrf.mxu0 }
 0x153   : > { %v5005_v30 = vadd.f32 %v3717_v22, %v2378_v5  ;;  %v3662_v51 = vadd.f32 %v3661_v28, %v3660_v23  ;;  %v3720_v9 = vadd.f32 %v3719_v29, %v3718_v27 }
 0x154   : > { %v3663_v34 = vpop.f32.mrf.mxu1  ;;  %v3721_v36 = vpop.f32.mrf.mxu0 }
 0x155   : > { %v2381_v18 = vadd.f32 %v3662_v51, %v4969_v42 }
 0x156   : > { %v3664_v37 = vpop.f32.mrf.mxu1  ;;  %v3722_v38 = vpop.f32.mrf.mxu0 }
 0x157   : > { %v5008_v39 = vadd.f32 %v3720_v9, %v2381_v18  ;;  %v3665_v0 = vadd.f32 %v3664_v37, %v3663_v34  ;;  %v3723_v40 = vadd.f32 %v3722_v38, %v3721_v36 }
 0x158   : > { %v3666_v15 = vpop.f32.mrf.mxu1  ;;  %v3724_v45 = vpop.f32.mrf.mxu0 }
 0x159   : > { %v2386_v33 = vadd.f32 %v3665_v0, %v4972_v53 }
 0x15a   : > { %v3667_v46 = vpop.f32.mrf.mxu1  ;;  %v3725_v47 = vpop.f32.mrf.mxu0 }
 0x15b   : > { %v5011_v48 = vadd.f32 %v3723_v40, %v2386_v33  ;;  %v3668_v10 = vadd.f32 %v3667_v46, %v3666_v15  ;;  %v3726_v49 = vadd.f32 %v3725_v47, %v3724_v45 }
 0x15c   : > { %v3669_v50 = vpop.f32.mrf.mxu1  ;;  %v3727_v54 = vpop.f32.mrf.mxu0 }
 0x15d   : > { %v2389_v42 = vadd.f32 %v3668_v10, %v4975_v60 }
 0x15e   : > { %v3670_v25 = vpop.f32.mrf.mxu1  ;;  %v3728_v55 = vpop.f32.mrf.mxu0 }
 0x15f   : > { %v5014_v56 = vadd.f32 %v3726_v49, %v2389_v42  ;;  %v3671_v16 = vadd.f32 %v3670_v25, %v3669_v50  ;;  %v3729_v57 = vadd.f32 %v3728_v55, %v3727_v54 }
 0x160   : > { %v3672_v58 = vpop.f32.mrf.mxu1  ;;  %v3730_v61 = vpop.f32.mrf.mxu0 }
 0x161   : > { %v2394_v53 = vadd.f32 %v3671_v16, %v4978_v6 }
 0x162   : > { %v3673_v62 = vpop.f32.mrf.mxu1  ;;  %v3731_v1 = vpop.f32.mrf.mxu0 }
 0x163   : > { %v5017_v31 = vadd.f32 %v3729_v57, %v2394_v53  ;;  %v3674_v2 = vadd.f32 %v3673_v62, %v3672_v58  ;;  %v3732_v26 = vadd.f32 %v3731_v1, %v3730_v61 }
 0x164   : > { %v3675_v3 = vpop.f32.mrf.mxu1  ;;  %v3733_v4 = vpop.f32.mrf.mxu0 }
 0x165   : > { %v2397_v60 = vadd.f32 %v3674_v2, %v4981_v14 }
 0x166   : > { %v3676_v7 = vpop.f32.mrf.mxu1  ;;  %v3734_v8 = vpop.f32.mrf.mxu0 }
 0x167   : > { %v5020_v11 = vadd.f32 %v3732_v26, %v2397_v60  ;;  %v3677_v41 = vadd.f32 %v3676_v7, %v3675_v3  ;;  %v3735_v32 = vadd.f32 %v3734_v8, %v3733_v4 }
 0x168   : > { %v3678_v63 = vpop.f32.mrf.mxu1  ;;  %v3736_v13 = vpop.f32.mrf.mxu0 }
 0x169   : > { %v2402_v6 = vadd.f32 %v3677_v41, %v4984_v24 }
 0x16a   : > { %v3679_v17 = vpop.f32.mrf.mxu1  ;;  %v3737_v19 = vpop.f32.mrf.mxu0 }
 0x16b   : > { %v5023_v20 = vadd.f32 %v3735_v32, %v2402_v6  ;;  %v3680_v44 = vadd.f32 %v3679_v17, %v3678_v63  ;;  %v3738_v22 = vadd.f32 %v3737_v19, %v3736_v13 }
 0x16c   : > { %v3681_v23 = vpop.f32.mrf.mxu1  ;;  %v3739_v27 = vpop.f32.mrf.mxu0 }
 0x16d   : > { %v2405_v14 = vadd.f32 %v3680_v44, %v4987_v35 }
 0x16e   : > { %v3682_v5 = vpop.f32.mrf.mxu1  ;;  %v3740_v28 = vpop.f32.mrf.mxu0 }
 0x16f   : > { %v5026_v29 = vadd.f32 %v3738_v22, %v2405_v14  ;;  %v3683_v51 = vadd.f32 %v3682_v5, %v3681_v23  ;;  %v3741_v9 = vadd.f32 %v3740_v28, %v3739_v27 }
 0x170   : > { %v3684_v34 = vpop.f32.mrf.mxu1  ;;  %v3742_v36 = vpop.f32.mrf.mxu0 }
 0x171   : > { %v2410_v24 = vadd.f32 %v3683_v51, %v4990_v43 }
 0x172   : > { %v3685_v18 = vpop.f32.mrf.mxu1  ;;  %v3743_v37 = vpop.f32.mrf.mxu0 }
 0x173   : > { %v5029_v38 = vadd.f32 %v3741_v9, %v2410_v24  ;;  %v3686_v0 = vadd.f32 %v3685_v18, %v3684_v34  ;;  %v3744_v40 = vadd.f32 %v3743_v37, %v3742_v36 }
 0x174   : > { %v3687_v15 = vpop.f32.mrf.mxu1  ;;  %v3745_v45 = vpop.f32.mrf.mxu0 }
 0x175   : > { %v2413_v35 = vadd.f32 %v3686_v0, %v4993_v52 }
 0x176   : > { %v3688_v33 = vpop.f32.mrf.mxu1  ;;  %v3746_v46 = vpop.f32.mrf.mxu0 }
 0x177   : > { %v5032_v47 = vadd.f32 %v3744_v40, %v2413_v35  ;;  %v3689_v10 = vadd.f32 %v3688_v33, %v3687_v15  ;;  %v3747_v49 = vadd.f32 %v3746_v46, %v3745_v45 }
 0x178   : > { %v3690_v50 = vpop.f32.mrf.mxu1  ;;  %v3748_v54 = vpop.f32.mrf.mxu0 }
 0x179   : > { %v2418_v43 = vadd.f32 %v3689_v10, %v4996_v59 }
 0x17a   : > { %v3691_v42 = vpop.f32.mrf.mxu1  ;;  %v3749_v25 = vpop.f32.mrf.mxu0 }
 0x17b   : > { %v5035_v55 = vadd.f32 %v3747_v49, %v2418_v43 }
 0x17c   : > { %v3767_v16 = vpop.f32.mrf.mxu1  ;;  %v3825_v57 = vpop.f32.mrf.mxu0 }
 0x17e   : > { %v3768_v58 = vpop.f32.mrf.mxu1  ;;  %v3826_v61 = vpop.f32.mrf.mxu0 }
 0x17f   : > { %v3769_v53 = vadd.f32 %v3768_v58, %v3767_v16  ;;  %v3827_v52 = vadd.f32 %v3826_v61, %v3825_v57 }
 0x180   : > { %v3770_v62 = vpop.f32.mrf.mxu1  ;;  %v3828_v1 = vpop.f32.mrf.mxu0 }
 0x181   : > { %v2546_v2 = vadd.f32 %v3769_v53, %v4999_v12 }
 0x182   : > { %v3771_v26 = vpop.f32.mrf.mxu1  ;;  %v3829_v3 = vpop.f32.mrf.mxu0 }
 0x183   : > { %v5038_v4 = vadd.f32 %v3827_v52, %v2546_v2  ;;  %v3772_v60 = vadd.f32 %v3771_v26, %v3770_v62  ;;  %v3830_v59 = vadd.f32 %v3829_v3, %v3828_v1 }
 0x184   : > { %v3773_v7 = vpop.f32.mrf.mxu1  ;;  %v3831_v8 = vpop.f32.mrf.mxu0 }
 0x185   : > { %v2549_v41 = vadd.f32 %v3772_v60, %v5002_v21 }
 0x186   : > { %v3774_v32 = vpop.f32.mrf.mxu1  ;;  %v3832_v63 = vpop.f32.mrf.mxu0 }
 0x187   : > { %v5041_v13 = vadd.f32 %v3830_v59, %v2549_v41  ;;  %v3775_v6 = vadd.f32 %v3774_v32, %v3773_v7  ;;  %v3833_v17 = vadd.f32 %v3832_v63, %v3831_v8 }
 0x188   : > { %v3776_v19 = vpop.f32.mrf.mxu1  ;;  %v3834_v44 = vpop.f32.mrf.mxu0 }
 0x189   : > { %v2554_v12 = vadd.f32 %v3775_v6, %v5005_v30 }
 0x18a   : > { %v3777_v22 = vpop.f32.mrf.mxu1  ;;  %v3835_v23 = vpop.f32.mrf.mxu0 }
 0x18b   : > { %v5044_v27 = vadd.f32 %v3833_v17, %v2554_v12  ;;  %v3778_v14 = vadd.f32 %v3777_v22, %v3776_v19  ;;  %v3836_v5 = vadd.f32 %v3835_v23, %v3834_v44 }
 0x18c   : > { %v3779_v28 = vpop.f32.mrf.mxu1  ;;  %v3837_v51 = vpop.f32.mrf.mxu0 }
 0x18d   : > { %v2557_v21 = vadd.f32 %v3778_v14, %v5008_v39 }
 0x18e   : > { %v3780_v9 = vpop.f32.mrf.mxu1  ;;  %v3838_v34 = vpop.f32.mrf.mxu0 }
 0x18f   : > { %v5047_v36 = vadd.f32 %v3836_v5, %v2557_v21  ;;  %v3781_v24 = vadd.f32 %v3780_v9, %v3779_v28  ;;  %v3839_v18 = vadd.f32 %v3838_v34, %v3837_v51 }
 0x190   : > { %v3782_v37 = vpop.f32.mrf.mxu1  ;;  %v3840_v0 = vpop.f32.mrf.mxu0 }
 0x191   : > { %v2562_v30 = vadd.f32 %v3781_v24, %v5011_v48 }
 0x192   : > { %v3783_v40 = vpop.f32.mrf.mxu1  ;;  %v3841_v15 = vpop.f32.mrf.mxu0 }
 0x193   : > { %v5050_v45 = vadd.f32 %v3839_v18, %v2562_v30  ;;  %v3784_v35 = vadd.f32 %v3783_v40, %v3782_v37  ;;  %v3842_v33 = vadd.f32 %v3841_v15, %v3840_v0 }
 0x194   : > { %v3785_v46 = vpop.f32.mrf.mxu1  ;;  %v3843_v10 = vpop.f32.mrf.mxu0 }
 0x195   : > { %v2565_v39 = vadd.f32 %v3784_v35, %v5014_v56 }
 0x196   : > { %v3786_v49 = vpop.f32.mrf.mxu1  ;;  %v3844_v50 = vpop.f32.mrf.mxu0 }
 0x197   : > { %v5053_v54 = vadd.f32 %v3842_v33, %v2565_v39  ;;  %v3787_v43 = vadd.f32 %v3786_v49, %v3785_v46  ;;  %v3845_v42 = vadd.f32 %v3844_v50, %v3843_v10 }
 0x198   : > { %v3788_v25 = vpop.f32.mrf.mxu1  ;;  %v3846_v16 = vpop.f32.mrf.mxu0 }
 0x199   : > { %v2570_v48 = vadd.f32 %v3787_v43, %v5017_v31 }
 0x19a   : > { %v3789_v57 = vpop.f32.mrf.mxu1  ;;  %v3847_v58 = vpop.f32.mrf.mxu0 }
 0x19b   : > { %v5056_v61 = vadd.f32 %v3845_v42, %v2570_v48  ;;  %v3790_v53 = vadd.f32 %v3789_v57, %v3788_v25  ;;  %v3848_v52 = vadd.f32 %v3847_v58, %v3846_v16 }
 0x19c   : > { %v3791_v62 = vpop.f32.mrf.mxu1  ;;  %v3849_v1 = vpop.f32.mrf.mxu0 }
 0x19d   : > { %v2573_v56 = vadd.f32 %v3790_v53, %v5020_v11 }
 0x19e   : > { %v3792_v2 = vpop.f32.mrf.mxu1  ;;  %v3850_v26 = vpop.f32.mrf.mxu0 }
 0x19f   : > { %v5059_v3 = vadd.f32 %v3848_v52, %v2573_v56  ;;  %v3793_v60 = vadd.f32 %v3792_v2, %v3791_v62  ;;  %v3851_v59 = vadd.f32 %v3850_v26, %v3849_v1 }
 0x1a0   : > { %v3794_v7 = vpop.f32.mrf.mxu1  ;;  %v3852_v8 = vpop.f32.mrf.mxu0 }
 0x1a1   : > { %v2578_v31 = vadd.f32 %v3793_v60, %v5023_v20 }
 0x1a2   : > { %v3795_v41 = vpop.f32.mrf.mxu1  ;;  %v3853_v32 = vpop.f32.mrf.mxu0 }
 0x1a3   : > { %v5062_v63 = vadd.f32 %v3851_v59, %v2578_v31  ;;  %v3796_v6 = vadd.f32 %v3795_v41, %v3794_v7  ;;  %v3854_v17 = vadd.f32 %v3853_v32, %v3852_v8 }
 0x1a4   : > { %v3797_v19 = vpop.f32.mrf.mxu1  ;;  %v3855_v44 = vpop.f32.mrf.mxu0 }
 0x1a5   : > { %v2581_v11 = vadd.f32 %v3796_v6, %v5026_v29 }
 0x1a6   : > { %v3798_v12 = vpop.f32.mrf.mxu1  ;;  %v3856_v22 = vpop.f32.mrf.mxu0 }
 0x1a7   : > { %v5065_v23 = vadd.f32 %v3854_v17, %v2581_v11  ;;  %v3799_v14 = vadd.f32 %v3798_v12, %v3797_v19  ;;  %v3857_v51 = vadd.f32 %v3856_v22, %v3855_v44 }
 0x1a8   : > { %v5067_v5 = vpop.f32.mrf.mxu1  ;;  %v5069_v28 = vpop.f32.mrf.mxu0 }
 0x1a9   : > { %v2586_v20 = vadd.f32 %v3799_v14, %v5029_v38 }
 0x1aa   : > { %v5072_v21 = vpop.f32.mrf.mxu1  ;;  %v5074_v9 = vpop.f32.mrf.mxu0 }
 0x1ab   : > { %v5076_v34 = vadd.f32 %v3857_v51, %v2586_v20 }
 0x1ac   : > { %v5078_v24 = vpop.f32.mrf.mxu1  ;;  %v5080_v29 = vpop.f32.mrf.mxu0 }
 0x1ae   : > { %v5082_v18 = vpop.f32.mrf.mxu1  ;;  %v5084_v37 = vpop.f32.mrf.mxu0 }
 0x1b0   : > { %v3806_v0 = vpop.f32.mrf.mxu1  ;;  %v3864_v30 = vpop.f32.mrf.mxu0 }
 0x1b2   : > { %v3807_v40 = vpop.f32.mrf.mxu1  ;;  %v3865_v15 = vpop.f32.mrf.mxu0 }
 0x1b4   : > { %v3883_v38 = vpop.f32.mrf.mxu1  ;;  %v3941_v35 = vpop.f32.mrf.mxu0 }
 0x1b6   : > { %v3884_v33 = vpop.f32.mrf.mxu1  ;;  %v3942_v46 = vpop.f32.mrf.mxu0 }
 0x1b7   : > { %v3885_v10 = vadd.f32 %v3884_v33, %v3883_v38  ;;  %v3943_v43 = vadd.f32 %v3942_v46, %v3941_v35 }
 0x1b8   : > { %v3886_v39 = vpop.f32.mrf.mxu1  ;;  %v3944_v49 = vpop.f32.mrf.mxu0 }
 0x1b9   : > { %v2722_v50 = vadd.f32 %v3885_v10, %v5038_v4 }
 0x1ba   : > { %v3887_v42 = vpop.f32.mrf.mxu1  ;;  %v3945_v25 = vpop.f32.mrf.mxu0 }
 0x1bb   : > { %v3888_v16 = vadd.f32 %v3887_v42, %v3886_v39  ;;  %v5087_v48 = vadd.f32 %v3943_v43, %v2722_v50  ;;  %v3946_v52 = vadd.f32 %v3945_v25, %v3944_v49 }
 0x1bc   : > { %v3889_v57 = vpop.f32.mrf.mxu1  ;;  %v3947_v58 = vpop.f32.mrf.mxu0 }
 0x1bd   : > { %v2725_v53 = vadd.f32 %v3888_v16, %v5041_v13  ;;  %v2881_v26 = vmul.f32 %v5087_v48, %v5087_v48 }
 0x1be   : > { %v3890_v62 = vpop.f32.mrf.mxu1  ;;  %v3948_v1 = vpop.f32.mrf.mxu0 }
 0x1bf   : > { %v5090_v56 = vadd.f32 %v3946_v52, %v2725_v53  ;;  %v3891_v2 = vadd.f32 %v3890_v62, %v3889_v57  ;;  %v3949_v13 = vadd.f32 %v3948_v1, %v3947_v58 }
 0x1c0   : > { %v3892_v4 = vpop.f32.mrf.mxu1  ;;  %v3950_v60 = vpop.f32.mrf.mxu0 }
 0x1c1   : > { %v2863_v59 = vadd.f32 %v5090_v56, %v5087_v48  ;;  %v2882_v7 = vmul.f32 %v5090_v56, %v5090_v56  ;;  %v2730_v8 = vadd.f32 %v3891_v2, %v5044_v27 }
 0x1c2   : > { %v3893_v31 = vpop.f32.mrf.mxu1  ;;  %v3951_v41 = vpop.f32.mrf.mxu0 }
 0x1c3   : > { %v2894_v32 = vadd.f32 %v2882_v7, %v2881_v26  ;;  %v5099_v6 = vadd.f32 %v3949_v13, %v2730_v8  ;;  %v3894_v17 = vadd.f32 %v3893_v31, %v3892_v4  ;;  %v3952_v14 = vadd.f32 %v3951_v41, %v3950_v60 }
 0x1c4   : > { %v3895_v19 = vpop.f32.mrf.mxu1  ;;  %v3953_v44 = vpop.f32.mrf.mxu0 }
 0x1c5   : > { %v2864_v11 = vadd.f32 %v2863_v59, %v5099_v6  ;;  %v2883_v12 = vmul.f32 %v5099_v6, %v5099_v6  ;;  %v2733_v22 = vadd.f32 %v3894_v17, %v5047_v36 }
 0x1c6   : > { %v3896_v20 = vpop.f32.mrf.mxu1  ;;  %v3954_v51 = vpop.f32.mrf.mxu0 }
 0x1c7   : > { %v2895_v27 = vadd.f32 %v2894_v32, %v2883_v12  ;;  %v5105_v0 = vadd.f32 %v3952_v14, %v2733_v22  ;;  %v3897_v30 = vadd.f32 %v3896_v20, %v3895_v19  ;;  %v3955_v46 = vadd.f32 %v3954_v51, %v3953_v44 }
 0x1c8   : > { %v3898_v40 = vpop.f32.mrf.mxu1  ;;  %v3956_v15 = vpop.f32.mrf.mxu0 }
 0x1c9   : > { %v2865_v38 = vadd.f32 %v2864_v11, %v5105_v0  ;;  %v2884_v35 = vmul.f32 %v5105_v0, %v5105_v0  ;;  %v2738_v33 = vadd.f32 %v3897_v30, %v5050_v45 }
 0x1ca   : > { %v3899_v10 = vpop.f32.mrf.mxu1  ;;  %v3957_v39 = vpop.f32.mrf.mxu0 }
 0x1cb   : > { %v2896_v36 = vadd.f32 %v2895_v27, %v2884_v35  ;;  %v5111_v49 = vadd.f32 %v3955_v46, %v2738_v33  ;;  %v3900_v50 = vadd.f32 %v3899_v10, %v3898_v40  ;;  %v3958_v58 = vadd.f32 %v3957_v39, %v3956_v15 }
 0x1cc   : > { %v3901_v43 = vpop.f32.mrf.mxu1  ;;  %v3959_v42 = vpop.f32.mrf.mxu0 }
 0x1cd   : > { %v2866_v25 = vadd.f32 %v2865_v38, %v5111_v49  ;;  %v2885_v16 = vmul.f32 %v5111_v49, %v5111_v49  ;;  %v2741_v57 = vadd.f32 %v3900_v50, %v5053_v54 }
 0x1ce   : > { %v3902_v53 = vpop.f32.mrf.mxu1  ;;  %v3960_v52 = vpop.f32.mrf.mxu0 }
 0x1cf   : > { %v2897_v45 = vadd.f32 %v2896_v36, %v2885_v16  ;;  %v5117_v62 = vadd.f32 %v3958_v58, %v2741_v57  ;;  %v3903_v1 = vadd.f32 %v3902_v53, %v3901_v43  ;;  %v3961_v7 = vadd.f32 %v3960_v52, %v3959_v42 }
 0x1d0   : > { %v3904_v2 = vpop.f32.mrf.mxu1  ;;  %v3962_v26 = vpop.f32.mrf.mxu0 }
 0x1d1   : > { %v2867_v4 = vadd.f32 %v2866_v25, %v5117_v62  ;;  %v2886_v60 = vmul.f32 %v5117_v62, %v5117_v62  ;;  %v2746_v59 = vadd.f32 %v3903_v1, %v5056_v61  ;;  %v3860_v1 = vadd.f32 %v5074_v9, %v5069_v28 }
 0x1d2   : > { %v3905_v8 = vpop.f32.mrf.mxu1  ;;  %v3963_v13 = vpop.f32.mrf.mxu0  ;;  %v3863_v28 = vadd.f32 %v5084_v37, %v5080_v29 }
 0x1d3   : > { %v2898_v54 = vadd.f32 %v2897_v45, %v2886_v60  ;;  %v5123_v31 = vadd.f32 %v3961_v7, %v2746_v59  ;;  %v3906_v41 = vadd.f32 %v3905_v8, %v3904_v2  ;;  %v3964_v12 = vadd.f32 %v3963_v13, %v3962_v26 }
 0x1d4   : > { %v3907_v32 = vpop.f32.mrf.mxu1  ;;  %v3965_v17 = vpop.f32.mrf.mxu0 }
 0x1d5   : > { %v2868_v19 = vadd.f32 %v2867_v4, %v5123_v31  ;;  %v2887_v44 = vmul.f32 %v5123_v31, %v5123_v31  ;;  %v2749_v11 = vadd.f32 %v3906_v41, %v5059_v3  ;;  %v3802_v3 = vadd.f32 %v5072_v21, %v5067_v5 }
 0x1d6   : > { %v3908_v22 = vpop.f32.mrf.mxu1  ;;  %v3966_v14 = vpop.f32.mrf.mxu0  ;;  %v3805_v21 = vadd.f32 %v5082_v18, %v5078_v24 }
 0x1d7   : > { %v2899_v61 = vadd.f32 %v2898_v54, %v2887_v44  ;;  %v5129_v20 = vadd.f32 %v3964_v12, %v2749_v11  ;;  %v3909_v51 = vadd.f32 %v3908_v22, %v3907_v32  ;;  %v3967_v35 = vadd.f32 %v3966_v14, %v3965_v17 }
 0x1d8   : > { %v3910_v27 = vpop.f32.mrf.mxu1  ;;  %v3968_v30 = vpop.f32.mrf.mxu0  ;;  %v2589_v57 = vadd.f32 %v3802_v3, %v5032_v47  ;;  %v2594_v18 = vadd.f32 %v3805_v21, %v5035_v55 }
 0x1d9   : > { %v2869_v40 = vadd.f32 %v2868_v19, %v5129_v20  ;;  %v2888_v15 = vmul.f32 %v5129_v20, %v5129_v20  ;;  %v2754_v38 = vadd.f32 %v3909_v51, %v5062_v63 }
 0x1da   : > { %v3911_v33 = vpop.f32.mrf.mxu1  ;;  %v3969_v46 = vpop.f32.mrf.mxu0  ;;  %v2677_v59 = vadd.f32 %v3860_v1, %v2589_v57  ;;  %v2682_v12 = vadd.f32 %v3863_v28, %v2594_v18 }
 0x1db   : > { %v2900_v10 = vadd.f32 %v2899_v61, %v2888_v15  ;;  %v5137_v39 = vadd.f32 %v3967_v35, %v2754_v38  ;;  %v3912_v36 = vadd.f32 %v3911_v33, %v3910_v27  ;;  %v3970_v63 = vadd.f32 %v3969_v46, %v3968_v30 }
 0x1dc   : > { %v3913_v50 = vpop.f32.mrf.mxu1  ;;  %v3971_v43 = vpop.f32.mrf.mxu0 }
 0x1dd   : > { %v2870_v42 = vadd.f32 %v2869_v40, %v5137_v39  ;;  %v2889_v25 = vmul.f32 %v5137_v39, %v5137_v39  ;;  %v2757_v16 = vadd.f32 %v3912_v36, %v5065_v23 }
 0x1de   : > { %v3914_v58 = vpop.f32.mrf.mxu1  ;;  %v3972_v5 = vpop.f32.mrf.mxu0 }
 0x1df   : > { %v2901_v53 = vadd.f32 %v2900_v10, %v2889_v25  ;;  %v5146_v52 = vadd.f32 %v3970_v63, %v2757_v16  ;;  %v3915_v45 = vadd.f32 %v3914_v58, %v3913_v50  ;;  %v3973_v60 = vadd.f32 %v3972_v5, %v3971_v43 }
 0x1e0   : > { %v3916_v2 = vpop.f32.mrf.mxu1  ;;  %v3974_v26 = vpop.f32.mrf.mxu0 }
 0x1e1   : > { %v2871_v4 = vadd.f32 %v2870_v42, %v5146_v52  ;;  %v2890_v23 = vmul.f32 %v5146_v52, %v5146_v52  ;;  %v2762_v47 = vadd.f32 %v3915_v45, %v5076_v34 }
 0x1e2   : > { %v3917_v7 = vpop.f32.mrf.mxu1  ;;  %v3975_v24 = vpop.f32.mrf.mxu0 }
 0x1e3   : > { %v2902_v8 = vadd.f32 %v2901_v53, %v2890_v23  ;;  %v5155_v13 = vadd.f32 %v3973_v60, %v2762_v47  ;;  %v3918_v54 = vadd.f32 %v3917_v7, %v3916_v2  ;;  %v3976_v19 = vadd.f32 %v3975_v24, %v3974_v26 }
 0x1e4   : > { %v3919_v9 = vpop.f32.mrf.mxu1  ;;  %v3977_v41 = vpop.f32.mrf.mxu0 }
 0x1e5   : > { %v2872_v32 = vadd.f32 %v2871_v4, %v5155_v13  ;;  %v2891_v34 = vmul.f32 %v5155_v13, %v5155_v13  ;;  %v2765_v17 = vadd.f32 %v3918_v54, %v2677_v59 }
 0x1e6   : > { %v3920_v44 = vpop.f32.mrf.mxu1  ;;  %v3978_v11 = vpop.f32.mrf.mxu0 }
 0x1e7   : > { %v2903_v55 = vadd.f32 %v2902_v8, %v2891_v34  ;;  %v2853_v22 = vadd.f32 %v3976_v19, %v2765_v17  ;;  %v3921_v14 = vadd.f32 %v3920_v44, %v3919_v9  ;;  %v3979_v37 = vadd.f32 %v3978_v11, %v3977_v41 }
 0x1e8   : > { %v3922_v61 = vpop.f32.mrf.mxu1  ;;  %v3980_v51 = vpop.f32.mrf.mxu0 }
 0x1e9   : > { %v2873_v27 = vadd.f32 %v2872_v32, %v2853_v22  ;;  %v2892_v30 = vmul.f32 %v2853_v22, %v2853_v22  ;;  %v2770_v29 = vadd.f32 %v3921_v14, %v2682_v12 }
 0x1ea   : > { %v3923_v40 = vpop.f32.mrf.mxu1  ;;  %v3981_v15 = vpop.f32.mrf.mxu0 }
 0x1eb   : > { %v2904_v38 = vadd.f32 %v2903_v55, %v2892_v30  ;;  %v2858_v35 = vadd.f32 %v3979_v37, %v2770_v29 }
 0x1ed   : > { %v2874_v3 = vadd.f32 %v2873_v27, %v2858_v35  ;;  %v2893_v33 = vmul.f32 %v2858_v35, %v2858_v35 }
 0x1ef   : > { %v2875_v46 = vrot.slane %v2874_v3, 4  ;;  %v2905_v10 = vadd.f32 %v2904_v38, %v2893_v33 }
 0x1f1   : > { %v2876_v36 = vadd.f32 %v2875_v46, %v2874_v3  ;;  %v2906_v50 = vrot.slane %v2905_v10, 4 }
 0x1f3   : > { %v2877_v43 = vrot.slane %v2876_v36, 2  ;;  %v2907_v42 = vadd.f32 %v2906_v50, %v2905_v10 }
 0x1f5   : > { %v2878_v25 = vadd.f32 %v2877_v43, %v2876_v36  ;;  %v2908_v16 = vrot.slane %v2907_v42, 2 }
 0x1f7   : > { %v2879_v63 = vrot.slane %v2878_v25, 1  ;;  %v2909_v57 = vadd.f32 %v2908_v16, %v2907_v42 }
 0x1f9   : > { %v2880_v58 = vadd.f32 %v2879_v63, %v2878_v25  ;;  %v2910_v5 = vrot.slane %v2909_v57, 1 }
 0x1fb   : > { %v2911_v21 = vadd.f32 %v2910_v5, %v2909_v57  ;;  %v2912_v53 = vmul.f32 0.01, %v2880_v58 }
 0x1fd   : > { %v2913_v45 = vmul.f32 0.01, %v2911_v21  ;;  %v2914_v1 = vmul.f32 %v2912_v53, %v2912_v53  ;;  %v2917_v2 = vsub.f32 %v5087_v48, %v2912_v53  ;;  %v2918_v26 = vsub.f32 %v5090_v56, %v2912_v53 }
 0x1fe   : > { %v2919_v4 = vsub.f32 %v5099_v6, %v2912_v53  ;;  %v2920_v23 = vsub.f32 %v5105_v0, %v2912_v53  ;;  %v2921_v47 = vsub.f32 %v5111_v49, %v2912_v53  ;;  %v2922_v60 = vsub.f32 %v5117_v62, %v2912_v53 }
 0x1ff   : > { %v2915_v59 = vsub.f32 %v2913_v45, %v2914_v1  ;;  %v2923_v7 = vsub.f32 %v5123_v31, %v2912_v53  ;;  %v2924_v24 = vsub.f32 %v5129_v20, %v2912_v53  ;;  %v2925_v18 = vsub.f32 %v5137_v39, %v2912_v53  ;;  %v3396_v31 = vld [vmem:[%s5188_s2] ss:$0 sm:$0xff] }
 0x200   : > { %v2926_v8 = vsub.f32 %v5146_v52, %v2912_v53  ;;  %v2927_v48 = vsub.f32 %v5155_v13, %v2912_v53  ;;  %v2928_v56 = vsub.f32 %v2853_v22, %v2912_v53  ;;  %v2929_v54 = vsub.f32 %v2858_v35, %v2912_v53  ;;  %v3397_v22 = vld [vmem:[%s5189_s3] ss:$0 sm:$0xff] }
 0x201   : > { %v2916_v6 = vmax.f32 %v2915_v59, 0.0 }
 0x203   : > { %v2930_v28 = vadd.f32 1e-05, %v2916_v6 }
 0x205   : > { %4333 = vrsqrt.f32 %v2930_v28 }
 0x212   : > { %v4334_v0 = vpop.eup %4333 }
 0x213   : > { %v2932_v49 = vmul.f32 %v4334_v0, %v2917_v2  ;;  %v2933_v9 = vmul.f32 %v4334_v0, %v2918_v26  ;;  %v2934_v62 = vmul.f32 %v4334_v0, %v2919_v4  ;;  %v2935_v41 = vmul.f32 %v4334_v0, %v2920_v23 }
 0x214   : > { %v2936_v20 = vmul.f32 %v4334_v0, %v2921_v47  ;;  %v2937_v39 = vmul.f32 %v4334_v0, %v2922_v60  ;;  %v2938_v32 = vmul.f32 %v4334_v0, %v2923_v7  ;;  %v2939_v52 = vmul.f32 %v4334_v0, %v2924_v24 }
 0x215   : > { %v2940_v34 = vmul.f32 %v4334_v0, %v2925_v18  ;;  %v2941_v13 = vmul.f32 %v4334_v0, %v2926_v8  ;;  %v2942_v17 = vmul.f32 %v4334_v0, %v2927_v48  ;;  %v2943_v19 = vmul.f32 %v4334_v0, %v2928_v56 }
 0x216   : > { %v2944_v44 = vmul.f32 %v4334_v0, %v2929_v54  ;;  %v2952_v11 = vmul.f32 %v3396_v31, %v2932_v49  ;;  %v2953_v12 = vmul.f32 %v3396_v31, %v2933_v9  ;;  %v2954_v55 = vmul.f32 %v3396_v31, %v2934_v62 }
 0x217   : > { %v2955_v14 = vmul.f32 %v3396_v31, %v2935_v41  ;;  %v2956_v61 = vmul.f32 %v3396_v31, %v2936_v20  ;;  %v2957_v51 = vmul.f32 %v3396_v31, %v2937_v39  ;;  %v2958_v27 = vmul.f32 %v3396_v31, %v2938_v32 }
 0x218   : > { %v2959_v30 = vmul.f32 %v3396_v31, %v2939_v52  ;;  %v2960_v29 = vmul.f32 %v3396_v31, %v2940_v34  ;;  %v2961_v37 = vmul.f32 %v3396_v31, %v2941_v13  ;;  %v2962_v40 = vmul.f32 %v3396_v31, %v2942_v17 }
 0x219   : > { %v2963_v15 = vmul.f32 %v3396_v31, %v2943_v19  ;;  %v2964_v38 = vmul.f32 %v3396_v31, %v2944_v44  ;;  %v2972_v35 = vadd.f32 %v3397_v22, %v2952_v11  ;;  %v2973_v3 = vadd.f32 %v3397_v22, %v2953_v12 }
 0x21a   : > { %v2974_v33 = vadd.f32 %v3397_v22, %v2954_v55  ;;  %v2975_v46 = vadd.f32 %v3397_v22, %v2955_v14  ;;  %v2976_v10 = vadd.f32 %v3397_v22, %v2956_v61  ;;  %v2977_v36 = vadd.f32 %v3397_v22, %v2957_v51 }
 0x21b   : > { %v2978_v50 = vadd.f32 %v3397_v22, %v2958_v27  ;;  %v2979_v43 = vadd.f32 %v3397_v22, %v2959_v30  ;;  %v2980_v42 = vadd.f32 %v3397_v22, %v2960_v29  ;;  %v2981_v25 = vadd.f32 %v3397_v22, %v2961_v37 }
 0x21c   : > { %v2982_v16 = vadd.f32 %v3397_v22, %v2962_v40  ;;  %v2983_v63 = vadd.f32 %v3397_v22, %v2963_v15  ;;  %v2984_v57 = vadd.f32 %v3397_v22, %v2964_v38  ;;  %v2985_v58 = vmax.f32 %v2972_v35, 0.0 }
 0x21d   : > { %v2986_v5 = vmax.f32 %v2973_v3, 0.0  ;;  %v2987_v21 = vmax.f32 %v2974_v33, 0.0  ;;  %v2988_v53 = vmax.f32 %v2975_v46, 0.0  ;;  %v2989_v45 = vmax.f32 %v2976_v10, 0.0 }
 0x21e   : > { %v2990_v1 = vmax.f32 %v2977_v36, 0.0  ;;  %v2991_v2 = vmax.f32 %v2978_v50, 0.0  ;;  %v2992_v26 = vmax.f32 %v2979_v43, 0.0  ;;  %v2993_v4 = vmax.f32 %v2980_v42, 0.0 }
 0x21f   : > { %v2994_v23 = vmax.f32 %v2981_v25, 0.0  ;;  %v2995_v47 = vmax.f32 %v2982_v16, 0.0  ;;  %v2996_v60 = vmax.f32 %v2983_v63, 0.0  ;;  %v2997_v59 = vmax.f32 %v2984_v57, 0.0 }
 0x220   : > { %v3429_v7 = vpack.c.bf16 %v2986_v5, %v2985_v58  ;;  %v3434_v24 = vpack.c.bf16 %v2988_v53, %v2987_v21  ;;  %v3439_v18 = vpack.c.bf16 %v2990_v1, %v2989_v45  ;;  %v3444_v8 = vpack.c.bf16 %v2992_v26, %v2991_v2 }
 0x221   : > { %v3425_v48 = vpack.c.bf16 %v2997_v59, %v2997_v59  ;;  %v3449_v56 = vpack.c.bf16 %v2994_v23, %v2993_v4  ;;  %v3454_v54 = vpack.c.bf16 %v2996_v60, %v2995_v47 }
 0x222   : > { %3430 = vst [vmem:[%s197_s16] sm:$0xff] %v3429_v7   ;;  %3456 = vst [vmem:[%s197_s16 + $0x8] sm:$0xff] %v3434_v24  }
 0x223   : > { %3457 = vst [vmem:[%s197_s16 + $0x10] sm:$0xff] %v3439_v18   ;;  %3458 = vst [vmem:[%s197_s16 + $0x18] sm:$0xff] %v3444_v8  }
 0x224   : > { %3459 = vst [vmem:[%s197_s16 + $0x20] sm:$0xff] %v3449_v56   ;;  %3460 = vst [vmem:[%s197_s16 + $0x28] sm:$0xff] %v3454_v54  }
 0x225   : > { %3063 = vst [vmem:[%s197_s16 + $0x30] sm:$0xf] %v3425_v48 }
 0x226 PF: > { %s14_s15 = sadd.s32 1, %s4341_s15  }
 0x227   : > { %p11_p4 = scmp.ge.s32.totalorder %s14_s15, 4  }
 0x229   :  { %13 = sbr.rel (!%p11_p4) target bundleno = 1 (0x1), region = 66 }

// kernel: mapping_network_forward.8
= control target key start
LH: loop header
LB: loop body
LE: loop exit
PB: predicated region body
PF: predicated region fallthrough
CT: control target
= control target key end

     0   :  { %s2054_s15 = smov 0   ;;  %s2366_s0 = inlined_call_operand.vmem [shape: bf16[2,64,1152], index: 0, kind: input, shape index: {}]   ;;  %s2367_s1 = inlined_call_operand.vmem [shape: bf16[1152,128], index: 1, kind: input, shape index: {}]   ;;  %s2368_s2 = inlined_call_operand.vmem [shape: f32[1,128], index: 2, kind: input, shape index: {}]   ;;  %s2369_s3 = inlined_call_operand.vmem [shape: f32[1,128], index: 3, kind: input, shape index: {}]   ;;  %s2370_s4 = inlined_call_operand.vmem [shape: bf16[2,64,128], index: 4, kind: output, shape index: {}]  }
   0x1 LB: > { %s1514_s16 = sadd.s32 4294967295, %s2027_s15   ;;  %p1518_p0 = scmp.ge.s32.totalorder %s2027_s15, 1  ;;  %s2027_s15 = sphi %s2054_s15, %s14_s15  }
   0x2   : > { %p162_p1 = scmp.lt.s32.totalorder %s2027_s15, 3 }
   0x4   : > { %p163_p2 = pnand %p1518_p0, %p162_p1 }
   0x6   : > { %166 = sbr.rel (%p163_p2) target bundleno = 373 (0x175), region = 36 }
   0xb   : > { %v1895_v0 = vld [vmem:[%s2367_s1 + $0x78] sm:$0xff]   ;;  %v1899_v4 = vld [vmem:[%s2367_s1 + $0x70] sm:$0xff]   ;;  %v1903_v8 = vld [vmem:[%s2367_s1 + $0x68] sm:$0xff]   ;;  %p188_p3 = scmp.lt.s32.totalorder %s1514_s16, 1 }
   0xc   : > { %v1896_v1 = vld [vmem:[%s2367_s1 + $0xf8] sm:$0xff]   ;;  %1674 = vmatprep.subr.bf16.mxu0 %v1895_v0  ;;  %v1900_v5 = vld [vmem:[%s2367_s1 + $0xf0] sm:$0xff]   ;;  %v1904_v9 = vld [vmem:[%s2367_s1 + $0xe8] sm:$0xff]  }
   0xd   : > { %v1897_v2 = vld [vmem:[%s2367_s1 + $0x38] sm:$0xff]   ;;  %1714 = vmatprep.subr.bf16.mxu1 %v1896_v1  ;;  %v1901_v6 = vld [vmem:[%s2367_s1 + $0x30] sm:$0xff]   ;;  %v1905_v10 = vld [vmem:[%s2367_s1 + $0x28] sm:$0xff]   ;;  %s2374_s16 = smov (!%p188_p3, %s1514_s16), 1 }
   0xe   : > { %v1898_v3 = vld [vmem:[%s2367_s1 + $0xb8] sm:$0xff]   ;;  %1675 = vmatpush3.bf16.msra.mxu0 %v1897_v2  ;;  %v1902_v7 = vld [vmem:[%s2367_s1 + $0xb0] sm:$0xff]   ;;  %v1906_v11 = vld [vmem:[%s2367_s1 + $0xa8] sm:$0xff]   ;;  %s1886_s21 = smul.u32 288, %s2374_s16  ;;  %s1642_s27 = sshll.u32 %s2374_s16, 5 }
   0xf   : > { %1715 = vmatpush3.bf16.msra.mxu1 %v1898_v3  ;;  %1676 = vmatprep.subr.bf16.mxu0 %v1899_v4  ;;  %v1907_v12 = vld [vmem:[%s2367_s1 + $0x60] sm:$0xff]   ;;  %v1911_v16 = vld [vmem:[%s2367_s1 + $0x58] sm:$0xff]   ;;  %v1915_v20 = vld [vmem:[%s2367_s1 + $0x50] sm:$0xff]   ;;  %s197_s30 = scalar_lea.vmem %s2370_s4, %s1642_s27 }
  0x10   : > { %1716 = vmatprep.subr.bf16.mxu1 %v1900_v5  ;;  %v1908_v13 = vld [vmem:[%s2367_s1 + $0xe0] sm:$0xff]   ;;  %v1912_v17 = vld [vmem:[%s2367_s1 + $0xd8] sm:$0xff]   ;;  %v1916_v21 = vld [vmem:[%s2367_s1 + $0xd0] sm:$0xff]   ;;  %s2162_s6 = scalar_lea.vmem %s2366_s0, %s1886_s21 }
  0x11   : > { %v1909_v14 = vld [vmem:[%s2367_s1 + $0x20] sm:$0xff]   ;;  %v1913_v18 = vld [vmem:[%s2367_s1 + $0x18] sm:$0xff]   ;;  %v1917_v22 = vld [vmem:[%s2367_s1 + $0x10] sm:$0xff]  }
  0x12   : > { %1677 = vmatpush3.bf16.msra.mxu0 %v1901_v6  ;;  %v1910_v15 = vld [vmem:[%s2367_s1 + $0xa0] sm:$0xff]   ;;  %v1914_v19 = vld [vmem:[%s2367_s1 + $0x98] sm:$0xff]   ;;  %v1918_v23 = vld [vmem:[%s2367_s1 + $0x90] sm:$0xff]  }
  0x13   : > { %1717 = vmatpush3.bf16.msra.mxu1 %v1902_v7  ;;  %1678 = vmatprep.subr.bf16.mxu0 %v1903_v8  ;;  %v1919_v24 = vld [vmem:[%s2367_s1 + $0x48] sm:$0xff]   ;;  %v1923_v28 = vld [vmem:[%s2367_s1 + $0x40] sm:$0xff]   ;;  %v1933_v36 = vld [vmem:[%s2367_s1 + $0x178] sm:$0xff]  }
  0x14   : > { %1718 = vmatprep.subr.bf16.mxu1 %v1904_v9  ;;  %v1920_v25 = vld [vmem:[%s2367_s1 + $0xc8] sm:$0xff]   ;;  %v1924_v29 = vld [vmem:[%s2367_s1 + $0xc0] sm:$0xff]   ;;  %v1934_v37 = vld [vmem:[%s2367_s1 + $0x1f8] sm:$0xff]  }
  0x15   : > { %v1921_v26 = vld [vmem:[%s2367_s1 + $0x8] sm:$0xff]   ;;  %v1925_v30 = vld [vmem:[%s2367_s1] sm:$0xff]   ;;  %v1935_v38 = vld [vmem:[%s2367_s1 + $0x138] sm:$0xff]  }
  0x16   : > { %1679 = vmatpush3.bf16.msra.mxu0 %v1905_v10  ;;  %v1922_v27 = vld [vmem:[%s2367_s1 + $0x88] sm:$0xff]   ;;  %v1926_v31 = vld [vmem:[%s2367_s1 + $0x80] sm:$0xff]   ;;  %v1936_v39 = vld [vmem:[%s2367_s1 + $0x1b8] sm:$0xff]  }
  0x17   : > { %1719 = vmatpush3.bf16.msra.mxu1 %v1906_v11  ;;  %1680 = vmatprep.subr.bf16.mxu0 %v1907_v12  ;;  %v1927_v32 = vld [vmem:[%s2162_s6] ss:$36 sps:$4 sm:$0xff]   ;;  %v1930_v34 = vld [vmem:[%s2162_s6 + $0x8] ss:$36 sps:$4 sm:$0xff]   ;;  %v1937_v40 = vld [vmem:[%s2367_s1 + $0x170] sm:$0xff]  }
  0x18   : > { %1720 = vmatprep.subr.bf16.mxu1 %v1908_v13  ;;  %v1929_v33 = vld [vmem:[%s2162_s6 + $0x4] ss:$36 sps:$4 sm:$0xff]   ;;  %v1932_v35 = vld [vmem:[%s2162_s6 + $0xc] ss:$36 sps:$4 sm:$0xff]   ;;  %v1943_v45 = vld [vmem:[%s2162_s6 + $0x54] ss:$36 sps:$4 sm:$0xff]  }
  0x19   : > { %1031 = vmatprep.mubr.bf16.mxu0 %v1929_v33  ;;  %1096 = vmatprep.mubr.bf16.mxu1 %v1932_v35  ;;  %v1938_v41 = vld [vmem:[%s2367_s1 + $0x1f0] sm:$0xff]   ;;  %v1945_v46 = vld [vmem:[%s2162_s6 + $0x48] ss:$36 sps:$4 sm:$0xff]   ;;  %v1951_v52 = vld [vmem:[%s2367_s1 + $0x160] sm:$0xff]  }
  0x1a   : > { %1681 = vmatpush3.bf16.msra.mxu0 %v1909_v14  ;;  %v1939_v42 = vld [vmem:[%s2367_s1 + $0x130] sm:$0xff]   ;;  %v1947_v48 = vld [vmem:[%s2367_s1 + $0x168] sm:$0xff]   ;;  %v1952_v53 = vld [vmem:[%s2367_s1 + $0x1e0] sm:$0xff]  }
  0x1b   : > { %1721 = vmatpush3.bf16.msra.mxu1 %v1910_v15  ;;  %1682 = vmatprep.subr.bf16.mxu0 %v1911_v16  ;;  %v1940_v43 = vld [vmem:[%s2367_s1 + $0x1b0] sm:$0xff]   ;;  %v1948_v49 = vld [vmem:[%s2367_s1 + $0x1e8] sm:$0xff]   ;;  %v1953_v54 = vld [vmem:[%s2367_s1 + $0x120] sm:$0xff]  }
  0x1c   : > { %1722 = vmatprep.subr.bf16.mxu1 %v1912_v17  ;;  %v1941_v44 = vld [vmem:[%s2162_s6 + $0x4c] ss:$36 sps:$4 sm:$0xff]   ;;  %v1954_v55 = vld [vmem:[%s2367_s1 + $0x1a0] sm:$0xff]   ;;  %v1955_v56 = vld [vmem:[%s2162_s6 + $0x94] ss:$36 sps:$4 sm:$0xff]  }
  0x1d   : > { %v1946_v47 = vld [vmem:[%s2162_s6 + $0x50] ss:$36 sps:$4 sm:$0xff]   ;;  %v1949_v50 = vld [vmem:[%s2367_s1 + $0x128] sm:$0xff]   ;;  %v1957_v57 = vld [vmem:[%s2162_s6 + $0x9c] ss:$36 sps:$4 sm:$0xff]  }
  0x1e   : > { %1683 = vmatpush3.bf16.msra.mxu0 %v1913_v18  ;;  %v1950_v51 = vld [vmem:[%s2367_s1 + $0x1a8] sm:$0xff]   ;;  %v1959_v58 = vld [vmem:[%s2162_s6 + $0x90] ss:$36 sps:$4 sm:$0xff]   ;;  %v1960_v59 = vld [vmem:[%s2162_s6 + $0x98] ss:$36 sps:$4 sm:$0xff]  }
  0x1f   : > { %1723 = vmatpush3.bf16.msra.mxu1 %v1914_v19  ;;  %1684 = vmatprep.subr.bf16.mxu0 %v1915_v20  ;;  %v1961_v60 = vld [vmem:[%s2367_s1 + $0x158] sm:$0xff]   ;;  %v1965_v0 = vld [vmem:[%s2367_s1 + $0x150] sm:$0xff]   ;;  %v1971_v5 = vld [vmem:[%s2162_s6 + $0xe4] ss:$36 sps:$4 sm:$0xff]  }
  0x20   : > { %1724 = vmatprep.subr.bf16.mxu1 %v1916_v21  ;;  %v1962_v61 = vld [vmem:[%s2367_s1 + $0x1d8] sm:$0xff]   ;;  %v1966_v1 = vld [vmem:[%s2367_s1 + $0x1d0] sm:$0xff]   ;;  %v1974_v7 = vld [vmem:[%s2162_s6 + $0xe0] ss:$36 sps:$4 sm:$0xff]  }
  0x21   : > { %v1963_v62 = vld [vmem:[%s2367_s1 + $0x118] sm:$0xff]   ;;  %v1967_v2 = vld [vmem:[%s2367_s1 + $0x110] sm:$0xff]   ;;  %v1975_v8 = vld [vmem:[%s2367_s1 + $0x148] sm:$0xff]  }
  0x22   : > { %1685 = vmatpush3.bf16.msra.mxu0 %v1917_v22  ;;  %v1964_v63 = vld [vmem:[%s2367_s1 + $0x198] sm:$0xff]   ;;  %v1968_v3 = vld [vmem:[%s2367_s1 + $0x190] sm:$0xff]   ;;  %v1976_v9 = vld [vmem:[%s2367_s1 + $0x1c8] sm:$0xff]  }
  0x23   : > { %1725 = vmatpush3.bf16.msra.mxu1 %v1918_v23  ;;  %1686 = vmatprep.subr.bf16.mxu0 %v1919_v24  ;;  %v1969_v4 = vld [vmem:[%s2162_s6 + $0xdc] ss:$36 sps:$4 sm:$0xff]   ;;  %v1977_v10 = vld [vmem:[%s2367_s1 + $0x108] sm:$0xff]   ;;  %v1983_v16 = vld [vmem:[%s2162_s6 + $0x10] ss:$36 sps:$4 sm:$0xff]  }
  0x24   : > { %1726 = vmatprep.subr.bf16.mxu1 %v1920_v25  ;;  %v1973_v6 = vld [vmem:[%s2162_s6 + $0xd8] ss:$36 sps:$4 sm:$0xff]   ;;  %v1978_v11 = vld [vmem:[%s2367_s1 + $0x188] sm:$0xff]   ;;  %v1979_v12 = vld [vmem:[%s2367_s1 + $0x140] sm:$0xff]  }
  0x25   : > { %v1980_v13 = vld [vmem:[%s2367_s1 + $0x1c0] sm:$0xff]   ;;  %v1985_v17 = vld [vmem:[%s2162_s6 + $0x14] ss:$36 sps:$4 sm:$0xff]   ;;  %v2007_v33 = vld [vmem:[%s2162_s6 + $0xec] ss:$36 sps:$4 sm:$0xff]  }
  0x26   : > { %1687 = vmatpush3.bf16.msra.mxu0 %v1921_v26  ;;  %v1981_v14 = vld [vmem:[%s2367_s1 + $0x100] sm:$0xff]   ;;  %v1986_v18 = vld [vmem:[%s2162_s6 + $0x18] ss:$36 sps:$4 sm:$0xff]   ;;  %v1990_v21 = vld [vmem:[%s2367_s1 + $0x230] sm:$0xff]  }
  0x27   : > { %1727 = vmatpush3.bf16.msra.mxu1 %v1922_v27  ;;  %1688 = vmatprep.subr.bf16.mxu0 %v1923_v28  ;;  %v1982_v15 = vld [vmem:[%s2367_s1 + $0x180] sm:$0xff]   ;;  %v1989_v20 = vld [vmem:[%s2367_s1 + $0x238] sm:$0xff]   ;;  %v1997_v26 = vld [vmem:[%s2367_s1 + $0x228] sm:$0xff]  }
  0x28   : > { %1728 = vmatprep.subr.bf16.mxu1 %v1924_v29  ;;  %v1988_v19 = vld [vmem:[%s2162_s6 + $0x1c] ss:$36 sps:$4 sm:$0xff]   ;;  %v1993_v23 = vld [vmem:[%s2162_s6 + $0x64] ss:$36 sps:$4 sm:$0xff]   ;;  %v2001_v28 = vld [vmem:[%s2162_s6 + $0xac] ss:$36 sps:$4 sm:$0xff]  }
  0x29   : > { %v1991_v22 = vld [vmem:[%s2162_s6 + $0x5c] ss:$36 sps:$4 sm:$0xff]   ;;  %v1999_v27 = vld [vmem:[%s2162_s6 + $0xa4] ss:$36 sps:$4 sm:$0xff]   ;;  %v2006_v35 = vld [vmem:[%s2367_s1 + $0x210] sm:$0xff]  }
  0x2a   : > { %1689 = vmatpush3.bf16.msra.mxu0 %v1925_v30  ;;  %v1995_v24 = vld [vmem:[%s2162_s6 + $0x58] ss:$36 sps:$4 sm:$0xff]   ;;  %v1996_v25 = vld [vmem:[%s2162_s6 + $0x60] ss:$36 sps:$4 sm:$0xff]  }
  0x2b   : > { %1729 = vmatpush3.bf16.msra.mxu1 %v1926_v31  ;;  %1754 = vmatprep.subr.bf16.mxu0 %v1933_v36  ;;  %v1998_v29 = vld [vmem:[%s2367_s1 + $0x220] sm:$0xff]   ;;  %v2004_v31 = vld [vmem:[%s2162_s6 + $0xa8] ss:$36 sps:$4 sm:$0xff]  }
  0x2c   : > { %1794 = vmatprep.subr.bf16.mxu1 %v1934_v37  ;;  %v2003_v30 = vld [vmem:[%s2162_s6 + $0xa0] ss:$36 sps:$4 sm:$0xff]   ;;  %v2011_v36 = vld [vmem:[%s2162_s6 + $0xe8] ss:$36 sps:$4 sm:$0xff]  }
  0x2d   : > { %1032 = vmatmul.mubr.bf16.vlgmr.msra.gmra.mxu0 %v1927_v32  ;;  %v2005_v32 = vld [vmem:[%s2367_s1 + $0x218] sm:$0xff]   ;;  %v2013_v37 = vld [vmem:[%s2367_s1 + $0x208] sm:$0xff]  }
  0x2e   : > { %1097 = vmatmul.mubr.bf16.vlgmr.msra.gmra.mxu1 %v1930_v34  ;;  %1755 = vmatpush3.bf16.msra.mxu0 %v1935_v38  ;;  %v2009_v34 = vld [vmem:[%s2162_s6 + $0xf4] ss:$36 sps:$4 sm:$0xff]  }
  0x2f   : > { %1795 = vmatpush3.bf16.msra.mxu1 %v1936_v39  ;;  %1756 = vmatprep.subr.bf16.mxu0 %v1937_v40  ;;  %v2012_v38 = vld [vmem:[%s2162_s6 + $0xf0] ss:$36 sps:$4 sm:$0xff]   ;;  %v2015_v39 = vld [vmem:[%s2162_s6 + $0x20] ss:$36 sps:$4 sm:$0xff]  }
  0x30   : > { %1796 = vmatprep.subr.bf16.mxu1 %v1938_v41  ;;  %1039 = vmatprep.mubr.bf16.mxu0 %v1941_v44  ;;  %v2016_v40 = vld [vmem:[%s2162_s6 + $0xb0] ss:$36 sps:$4 sm:$0xff]   ;;  %v2014_v41 = vld [vmem:[%s2367_s1 + $0x200] sm:$0xff]  }
  0x31   : > { %1104 = vmatprep.mubr.bf16.mxu1 %v1943_v45 }
  0x32   : > { %1757 = vmatpush3.bf16.msra.mxu0 %v1939_v42  ;;  %v2017_v42 = vld [vmem:[%s2162_s6 + $0x68] ss:$36 sps:$4 sm:$0xff]  }
  0x33   : > { %1797 = vmatpush3.bf16.msra.mxu1 %v1940_v43  ;;  %1758 = vmatprep.subr.bf16.mxu0 %v1947_v48  ;;  %v2018_v43 = vld [vmem:[%s2162_s6 + $0xf8] ss:$36 sps:$4 sm:$0xff]  }
  0x34   : > { %1798 = vmatprep.subr.bf16.mxu1 %v1948_v49 }
  0x35   : > { %1040 = vmatmul.mubr.bf16.gmra.mxu0 %v1945_v46 }
  0x36   : > { %1105 = vmatmul.mubr.bf16.gmra.mxu1 %v1946_v47  ;;  %1759 = vmatpush3.bf16.msra.mxu0 %v1949_v50 }
  0x37   : > { %1799 = vmatpush3.bf16.msra.mxu1 %v1950_v51  ;;  %1760 = vmatprep.subr.bf16.mxu0 %v1951_v52 }
  0x38   : > { %1800 = vmatprep.subr.bf16.mxu1 %v1952_v53  ;;  %1047 = vmatprep.mubr.bf16.mxu0 %v1955_v56 }
  0x39   : > { %1112 = vmatprep.mubr.bf16.mxu1 %v1957_v57 }
  0x3a   : > { %1761 = vmatpush3.bf16.msra.mxu0 %v1953_v54 }
  0x3b   : > { %1801 = vmatpush3.bf16.msra.mxu1 %v1954_v55  ;;  %1762 = vmatprep.subr.bf16.mxu0 %v1961_v60 }
  0x3c   : > { %1802 = vmatprep.subr.bf16.mxu1 %v1962_v61 }
  0x3d   : > { %1048 = vmatmul.mubr.bf16.gmra.mxu0 %v1959_v58 }
  0x3e   : > { %1113 = vmatmul.mubr.bf16.gmra.mxu1 %v1960_v59  ;;  %1763 = vmatpush3.bf16.msra.mxu0 %v1963_v62 }
  0x3f   : > { %1803 = vmatpush3.bf16.msra.mxu1 %v1964_v63  ;;  %1764 = vmatprep.subr.bf16.mxu0 %v1965_v0 }
  0x40   : > { %1804 = vmatprep.subr.bf16.mxu1 %v1966_v1  ;;  %1055 = vmatprep.mubr.bf16.mxu0 %v1969_v4 }
  0x41   : > { %1120 = vmatprep.mubr.bf16.mxu1 %v1971_v5 }
  0x42   : > { %1765 = vmatpush3.bf16.msra.mxu0 %v1967_v2 }
  0x43   : > { %1805 = vmatpush3.bf16.msra.mxu1 %v1968_v3  ;;  %1766 = vmatprep.subr.bf16.mxu0 %v1975_v8 }
  0x44   : > { %1806 = vmatprep.subr.bf16.mxu1 %v1976_v9 }
  0x45   : > { %1056 = vmatmul.mubr.bf16.gmra.mxu0 %v1973_v6 }
  0x46   : > { %1121 = vmatmul.mubr.bf16.gmra.mxu1 %v1974_v7  ;;  %1767 = vmatpush3.bf16.msra.mxu0 %v1977_v10 }
  0x47   : > { %1807 = vmatpush3.bf16.msra.mxu1 %v1978_v11  ;;  %1768 = vmatprep.subr.bf16.mxu0 %v1979_v12 }
  0x48   : > { %1808 = vmatprep.subr.bf16.mxu1 %v1980_v13  ;;  %1161 = vmatprep.mubr.bf16.mxu0 %v1985_v17 }
  0x49   : > { %1226 = vmatprep.mubr.bf16.mxu1 %v1988_v19 }
  0x4a   : > { %1769 = vmatpush3.bf16.msra.mxu0 %v1981_v14 }
  0x4b   : > { %1809 = vmatpush3.bf16.msra.mxu1 %v1982_v15  ;;  %1846 = vmatprep.subr.bf16.mxu0 %v1989_v20 }
  0x4c   : > { %1870 = vmatprep.subr.bf16.mxu1 %v1989_v20 }
  0x4d   : > { %1162 = vmatmul.mubr.bf16.vlgmr.msra.gmra.mxu0 %v1983_v16 }
  0x4e   : > { %1227 = vmatmul.mubr.bf16.vlgmr.msra.gmra.mxu1 %v1986_v18  ;;  %1847 = vmatpush3.bf16.msra.mxu0 %v1989_v20 }
  0x4f   : > { %1878 = vmatpush3.bf16.msra.mxu1 %v1989_v20  ;;  %1848 = vmatprep.subr.bf16.mxu0 %v1990_v21 }
  0x50   : > { %1871 = vmatprep.subr.bf16.mxu1 %v1990_v21  ;;  %1169 = vmatprep.mubr.bf16.mxu0 %v1991_v22 }
  0x51   : > { %1234 = vmatprep.mubr.bf16.mxu1 %v1993_v23 }
  0x52   : > { %1849 = vmatpush3.bf16.msra.mxu0 %v1990_v21 }
  0x53   : > { %1879 = vmatpush3.bf16.msra.mxu1 %v1990_v21  ;;  %1850 = vmatprep.subr.bf16.mxu0 %v1997_v26 }
  0x54   : > { %1872 = vmatprep.subr.bf16.mxu1 %v1997_v26 }
  0x55   : > { %1170 = vmatmul.mubr.bf16.gmra.mxu0 %v1995_v24 }
  0x56   : > { %1235 = vmatmul.mubr.bf16.gmra.mxu1 %v1996_v25  ;;  %1177 = vmatprep.mubr.bf16.mxu0 %v1999_v27 }
  0x57   : > { %1851 = vmatpush3.bf16.msra.mxu0 %v1997_v26  ;;  %1242 = vmatprep.mubr.bf16.mxu1 %v2001_v28 }
  0x58   : > { %1880 = vmatpush3.bf16.msra.mxu1 %v1997_v26  ;;  %1852 = vmatprep.subr.bf16.mxu0 %v1998_v29 }
  0x59   : > { %1873 = vmatprep.subr.bf16.mxu1 %v1998_v29 }
  0x5b   : > { %1853 = vmatpush3.bf16.msra.mxu0 %v1998_v29 }
  0x5c   : > { %1881 = vmatpush3.bf16.msra.mxu1 %v1998_v29  ;;  %1854 = vmatprep.subr.bf16.mxu0 %v2005_v32 }
  0x5d   : > { %1178 = vmatmul.mubr.bf16.gmra.mxu0 %v2003_v30  ;;  %1874 = vmatprep.subr.bf16.mxu1 %v2005_v32 }
  0x5e   : > { %1243 = vmatmul.mubr.bf16.gmra.mxu1 %v2004_v31  ;;  %1185 = vmatprep.mubr.bf16.mxu0 %v2007_v33 }
  0x5f   : > { %1855 = vmatpush3.bf16.msra.mxu0 %v2005_v32  ;;  %1250 = vmatprep.mubr.bf16.mxu1 %v2009_v34 }
  0x60   : > { %1882 = vmatpush3.bf16.msra.mxu1 %v2005_v32  ;;  %1856 = vmatprep.subr.bf16.mxu0 %v2006_v35 }
  0x61   : > { %1875 = vmatprep.subr.bf16.mxu1 %v2006_v35 }
  0x63   : > { %1857 = vmatpush3.bf16.msra.mxu0 %v2006_v35 }
  0x64   : > { %1883 = vmatpush3.bf16.msra.mxu1 %v2006_v35  ;;  %1858 = vmatprep.subr.bf16.mxu0 %v2013_v37 }
  0x65   : > { %1186 = vmatmul.mubr.bf16.gmra.mxu0 %v2011_v36  ;;  %1876 = vmatprep.subr.bf16.mxu1 %v2013_v37 }
  0x66   : > { %1251 = vmatmul.mubr.bf16.gmra.mxu1 %v2012_v38  ;;  %1862 = vmatprep.mubr.bf16.mxu0 %v2015_v39 }
  0x67   : > { %1859 = vmatpush3.bf16.msra.mxu0 %v2013_v37  ;;  %1866 = vmatprep.mubr.bf16.mxu1 %v2016_v40 }
  0x68   : > { %1884 = vmatpush3.bf16.msra.mxu1 %v2013_v37  ;;  %1860 = vmatprep.subr.bf16.mxu0 %v2014_v41 }
  0x69   : > { %1877 = vmatprep.subr.bf16.mxu1 %v2014_v41 }
  0x6b   : > { %1861 = vmatpush3.bf16.msra.mxu0 %v2014_v41 }
  0x6c   : > { %1885 = vmatpush3.bf16.msra.mxu1 %v2014_v41 }
  0x6e   : > { %1863 = vmatmul.mubr.bf16.vlgmr.msra.gmra.mxu0 %v2017_v42 }
  0x6f   : > { %1867 = vmatmul.mubr.bf16.vlgmr.msra.gmra.mxu1 %v2018_v43 }
  0xed   : > { %v1690_v44 = vpop.f32.mrf.mxu0 }
  0xee   : > { %v1730_v45 = vpop.f32.mrf.mxu1 }
  0xef   : > { %v1691_v46 = vpop.f32.mrf.mxu0 }
  0xf0   : > { %v1731_v47 = vpop.f32.mrf.mxu1  ;;  %v1692_v37 = vadd.f32 %v1691_v46, %v1690_v44 }
  0xf1   : > { %v1693_v48 = vpop.f32.mrf.mxu0  ;;  %v1732_v38 = vadd.f32 %v1731_v47, %v1730_v45 }
  0xf2   : > { %v1733_v49 = vpop.f32.mrf.mxu1 }
  0xf3   : > { %v1694_v50 = vpop.f32.mrf.mxu0 }
  0xf4   : > { %v1734_v51 = vpop.f32.mrf.mxu1  ;;  %v1695_v39 = vadd.f32 %v1694_v50, %v1693_v48  ;;  %v1099_v50 = vadd.f32 %v1732_v38, %v1692_v37 }
  0xf5   : > { %v1696_v52 = vpop.f32.mrf.mxu0  ;;  %v1735_v40 = vadd.f32 %v1734_v51, %v1733_v49 }
  0xf6   : > { %v1736_v53 = vpop.f32.mrf.mxu1 }
  0xf7   : > { %v1697_v54 = vpop.f32.mrf.mxu0  ;;  %v1102_v49 = vadd.f32 %v1735_v40, %v1695_v39 }
  0xf8   : > { %v1737_v55 = vpop.f32.mrf.mxu1  ;;  %v1698_v43 = vadd.f32 %v1697_v54, %v1696_v52 }
  0xf9   : > { %v1699_v56 = vpop.f32.mrf.mxu0 }
  0xfa   : > { %v1739_v57 = vpop.f32.mrf.mxu1 }
  0xfb   : > { %v1700_v58 = vpop.f32.mrf.mxu0 }
  0xfc   : > { %v1740_v59 = vpop.f32.mrf.mxu1  ;;  %v1701_v44 = vadd.f32 %v1700_v58, %v1699_v56 }
  0xfd   : > { %v1702_v60 = vpop.f32.mrf.mxu0  ;;  %v1741_v46 = vadd.f32 %v1740_v59, %v1739_v57 }
  0xfe   : > { %v1742_v61 = vpop.f32.mrf.mxu1 }
  0xff   : > { %v1703_v62 = vpop.f32.mrf.mxu0 }
 0x100   : > { %v1743_v63 = vpop.f32.mrf.mxu1  ;;  %v1704_v58 = vadd.f32 %v1703_v62, %v1702_v60 }
 0x101   : > { %v1705_v0 = vpop.f32.mrf.mxu0  ;;  %v1744_v57 = vadd.f32 %v1743_v63, %v1742_v61 }
 0x102   : > { %v1745_v1 = vpop.f32.mrf.mxu1 }
 0x103   : > { %v1706_v2 = vpop.f32.mrf.mxu0  ;;  %v1115_v61 = vadd.f32 %v1744_v57, %v1704_v58 }
 0x104   : > { %v1746_v3 = vpop.f32.mrf.mxu1  ;;  %v1707_v59 = vadd.f32 %v1706_v2, %v1705_v0 }
 0x105   : > { %v1708_v4 = vpop.f32.mrf.mxu0 }
 0x106   : > { %v1748_v5 = vpop.f32.mrf.mxu1 }
 0x107   : > { %v1709_v6 = vpop.f32.mrf.mxu0 }
 0x108   : > { %v1749_v7 = vpop.f32.mrf.mxu1  ;;  %v1710_v37 = vadd.f32 %v1709_v6, %v1708_v4 }
 0x109   : > { %v1711_v8 = vpop.f32.mrf.mxu0 }
 0x10a   : > { %v1751_v9 = vpop.f32.mrf.mxu1 }
 0x10b   : > { %v1712_v10 = vpop.f32.mrf.mxu0 }
 0x10c   : > { %v1752_v11 = vpop.f32.mrf.mxu1 }
 0x10d   : > { %v1770_v12 = vpop.f32.mrf.mxu0 }
 0x10e   : > { %v1810_v13 = vpop.f32.mrf.mxu1 }
 0x10f   : > { %v1771_v14 = vpop.f32.mrf.mxu0 }
 0x110   : > { %v1811_v15 = vpop.f32.mrf.mxu1  ;;  %v1772_v48 = vadd.f32 %v1771_v14, %v1770_v12  ;;  %v1747_v12 = vadd.f32 %v1746_v3, %v1745_v1 }
 0x111   : > { %v1773_v16 = vpop.f32.mrf.mxu0  ;;  %v1812_v39 = vadd.f32 %v1811_v15, %v1810_v13 }
 0x112   : > { %v1813_v17 = vpop.f32.mrf.mxu1  ;;  %v1164_v38 = vadd.f32 %v1772_v48, %v1099_v50  ;;  %v1118_v1 = vadd.f32 %v1747_v12, %v1707_v59 }
 0x113   : > { %v1774_v18 = vpop.f32.mrf.mxu0 }
 0x114   : > { %v1814_v19 = vpop.f32.mrf.mxu1  ;;  %v1229_v6 = vadd.f32 %v1812_v39, %v1164_v38 }
 0x115   : > { %v1776_v20 = vpop.f32.mrf.mxu0 }
 0x116   : > { %v1816_v21 = vpop.f32.mrf.mxu1 }
 0x117   : > { %v1777_v22 = vpop.f32.mrf.mxu0 }
 0x118   : > { %v1817_v23 = vpop.f32.mrf.mxu1  ;;  %v1778_v56 = vadd.f32 %v1777_v22, %v1776_v20  ;;  %v1815_v20 = vadd.f32 %v1814_v19, %v1813_v17 }
 0x119   : > { %v1779_v24 = vpop.f32.mrf.mxu0  ;;  %v1818_v60 = vadd.f32 %v1817_v23, %v1816_v21 }
 0x11a   : > { %v1819_v25 = vpop.f32.mrf.mxu1 }
 0x11b   : > { %v1780_v26 = vpop.f32.mrf.mxu0 }
 0x11c   : > { %v1820_v27 = vpop.f32.mrf.mxu1  ;;  %v1781_v40 = vadd.f32 %v1780_v26, %v1779_v24 }
 0x11d   : > { %v1782_v28 = vpop.f32.mrf.mxu0  ;;  %v1821_v4 = vadd.f32 %v1820_v27, %v1819_v25 }
 0x11e   : > { %v1822_v29 = vpop.f32.mrf.mxu1 }
 0x11f   : > { %v1783_v30 = vpop.f32.mrf.mxu0 }
 0x120   : > { %v1823_v31 = vpop.f32.mrf.mxu1 }
 0x121   : > { %v1785_v32 = vpop.f32.mrf.mxu0 }
 0x122   : > { %v2326_v33 = vpop.f32.mrf.mxu1 }
 0x123   : > { %2371 = vst [vmem:[#allocation2_spill] sm:$0xff] %v2326_v33  ;;  %v1786_v34 = vpop.f32.mrf.mxu0  ;;  %v1738_v33 = vadd.f32 %v1737_v55, %v1736_v53  ;;  %v1110_v53 = vadd.f32 %v1741_v46, %v1701_v44  ;;  %v1775_v55 = vadd.f32 %v1774_v18, %v1773_v16  ;;  %v1753_v44 = vadd.f32 %v1752_v11, %v1751_v9 }
 0x124   : > { %v1826_v35 = vpop.f32.mrf.mxu1  ;;  %v1784_v46 = vadd.f32 %v1783_v30, %v1782_v28  ;;  %v1787_v63 = vadd.f32 %v1786_v34, %v1785_v32 }
 0x125   : > { %v1788_v36 = vpop.f32.mrf.mxu0  ;;  %v1107_v54 = vadd.f32 %v1738_v33, %v1698_v43  ;;  %v1750_v33 = vadd.f32 %v1749_v7, %v1748_v5  ;;  %v1713_v43 = vadd.f32 %v1712_v10, %v1711_v8  ;;  %v1167_v18 = vadd.f32 %v1775_v55, %v1102_v49 }
 0x126   : > { %v1828_v41 = vpop.f32.mrf.mxu1  ;;  %v1175_v3 = vadd.f32 %v1781_v40, %v1110_v53  ;;  %v1180_v5 = vadd.f32 %v1784_v46, %v1115_v61  ;;  %v1824_v7 = vadd.f32 %v1823_v31, %v1822_v29  ;;  %v1183_v21 = vadd.f32 %v1787_v63, %v1118_v1 }
 0x127   : > { %v1789_v42 = vpop.f32.mrf.mxu0  ;;  %v1172_v22 = vadd.f32 %v1778_v56, %v1107_v54  ;;  %v1123_v15 = vadd.f32 %v1750_v33, %v1710_v37  ;;  %v1126_v10 = vadd.f32 %v1753_v44, %v1713_v43  ;;  %v1232_v19 = vadd.f32 %v1815_v20, %v1167_v18 }
 0x128   : > { %v1829_v45 = vpop.f32.mrf.mxu1  ;;  %v1790_v0 = vadd.f32 %v1789_v42, %v1788_v36  ;;  %v1240_v27 = vadd.f32 %v1821_v4, %v1175_v3  ;;  %v1245_v36 = vadd.f32 %v1824_v7, %v1180_v5 }
 0x129   : > { %v1791_v47 = vpop.f32.mrf.mxu0  ;;  %v1237_v11 = vadd.f32 %v1818_v60, %v1172_v22  ;;  %v1830_v28 = vadd.f32 %v1829_v45, %v1828_v41 }
 0x12a   : > { %v1831_v51 = vpop.f32.mrf.mxu1  ;;  %v2372_v23 = vld [vmem:[#allocation2_spill] sm:$0xff]  ;;  %v1188_v26 = vadd.f32 %v1790_v0, %v1123_v15 }
 0x12b   : > { %v1792_v52 = vpop.f32.mrf.mxu0  ;;  %v1827_v24 = vadd.f32 %v1826_v35, %v2372_v23 }
 0x12c   : > { %v1832_v14 = vpop.f32.mrf.mxu1  ;;  %v1793_v8 = vadd.f32 %v1792_v52, %v1791_v47  ;;  %v1253_v45 = vadd.f32 %v1830_v28, %v1188_v26 }
 0x12d   : > { %v1833_v31 = vadd.f32 %v1832_v14, %v1831_v51  ;;  %v1248_v48 = vadd.f32 %v1827_v24, %v1183_v21 }
 0x12e   : > { %v1864_v16 = vpop.f32.mrf.mxu0  ;;  %v1191_v29 = vadd.f32 %v1793_v8, %v1126_v10 }
 0x12f   : > { %v1868_v62 = vpop.f32.mrf.mxu1  ;;  %v2331_v25 = vadd.f32 %v1864_v16, %v1237_v11 }
 0x130   : > { %v1293_v2 = vpop.f32.mrf.mxu0  ;;  %v1256_v53 = vadd.f32 %v1833_v31, %v1191_v29  ;;  %v1318_v59 = vadd.f32 %v1868_v62, %v1253_v45  ;;  %v1630_v29 = vld [vmem:[%s2368_s2] ss:$0 sm:$0xff] }
 0x131   : > { %v1309_v13 = vpop.f32.mrf.mxu1  ;;  %v2328_v17 = vadd.f32 %v1293_v2, %v1229_v6  ;;  %v1339_v49 = vmul.f32 %v2331_v25, %v2331_v25 }
 0x132   : > { %v1865_v9 = vpop.f32.mrf.mxu0  ;;  %v1310_v52 = vadd.f32 %v1309_v13, %v1245_v36  ;;  %v1343_v43 = vmul.f32 %v1318_v59, %v1318_v59 }
 0x133   : > { %v1869_v30 = vpop.f32.mrf.mxu1  ;;  %v1337_v42 = vmul.f32 %v2328_v17, %v2328_v17  ;;  %v2337_v47 = vadd.f32 %v1865_v9, %v1240_v27 }
 0x134   : > { %v1296_v32 = vpop.f32.mrf.mxu0  ;;  %v1341_v12 = vmul.f32 %v1310_v52, %v1310_v52  ;;  %v1321_v38 = vadd.f32 %v1869_v30, %v1256_v53 }
 0x135   : > { %v2333_v34 = vadd.f32 %v1296_v32, %v1232_v19  ;;  %v1312_v50 = vpop.f32.mrf.mxu1  ;;  %v1340_v55 = vmul.f32 %v2337_v47, %v2337_v47 }
 0x136   : > { %v1313_v58 = vadd.f32 %v1312_v50, %v1248_v48  ;;  %v1344_v16 = vmul.f32 %v1321_v38, %v1321_v38 }
 0x137   : > { %v1324_v35 = vadd.f32 %v2333_v34, %v2328_v17  ;;  %v1338_v41 = vmul.f32 %v2333_v34, %v2333_v34 }
 0x138   : > { %v1342_v40 = vmul.f32 %v1313_v58, %v1313_v58 }
 0x139   : > { %v1325_v51 = vadd.f32 %v1324_v35, %v2331_v25  ;;  %v1345_v54 = vadd.f32 %v1338_v41, %v1337_v42 }
 0x13b   : > { %v1346_v56 = vadd.f32 %v1345_v54, %v1339_v49  ;;  %v1326_v57 = vadd.f32 %v1325_v51, %v2337_v47 }
 0x13d   : > { %v1327_v14 = vadd.f32 %v1326_v57, %v1310_v52  ;;  %v1347_v37 = vadd.f32 %v1346_v56, %v1340_v55 }
 0x13f   : > { %v1328_v39 = vadd.f32 %v1327_v14, %v1313_v58  ;;  %v1348_v33 = vadd.f32 %v1347_v37, %v1341_v12 }
 0x141   : > { %v1329_v44 = vadd.f32 %v1328_v39, %v1318_v59  ;;  %v1349_v46 = vadd.f32 %v1348_v33, %v1342_v40 }
 0x143   : > { %v1330_v18 = vadd.f32 %v1329_v44, %v1321_v38  ;;  %v1350_v20 = vadd.f32 %v1349_v46, %v1343_v43 }
 0x145   : > { %v1331_v22 = vrot.slane %v1330_v18, 4  ;;  %v1351_v60 = vadd.f32 %v1350_v20, %v1344_v16 }
 0x147   : > { %v1332_v61 = vadd.f32 %v1331_v22, %v1330_v18  ;;  %v1352_v63 = vrot.slane %v1351_v60, 4 }
 0x149   : > { %v1333_v0 = vrot.slane %v1332_v61, 2  ;;  %v1353_v2 = vadd.f32 %v1352_v63, %v1351_v60 }
 0x14b   : > { %v1334_v62 = vadd.f32 %v1333_v0, %v1332_v61  ;;  %v1354_v1 = vrot.slane %v1353_v2, 2 }
 0x14d   : > { %v1335_v3 = vrot.slane %v1334_v62, 1  ;;  %v1355_v4 = vadd.f32 %v1354_v1, %v1353_v2 }
 0x14f   : > { %v1336_v6 = vadd.f32 %v1335_v3, %v1334_v62  ;;  %v1356_v13 = vrot.slane %v1355_v4, 1 }
 0x151   : > { %v1357_v15 = vadd.f32 %v1356_v13, %v1355_v4  ;;  %v1358_v5 = vmul.f32 0.015625, %v1336_v6 }
 0x153   : > { %v1359_v7 = vmul.f32 0.015625, %v1357_v15  ;;  %v1360_v8 = vmul.f32 %v1358_v5, %v1358_v5  ;;  %v1363_v19 = vsub.f32 %v2328_v17, %v1358_v5  ;;  %v1364_v21 = vsub.f32 %v2333_v34, %v1358_v5 }
 0x154   : > { %v1365_v23 = vsub.f32 %v2331_v25, %v1358_v5  ;;  %v1366_v24 = vsub.f32 %v2337_v47, %v1358_v5  ;;  %v1367_v28 = vsub.f32 %v1310_v52, %v1358_v5  ;;  %v1368_v30 = vsub.f32 %v1313_v58, %v1358_v5  ;;  %v1631_v47 = vld [vmem:[%s2369_s3] ss:$0 sm:$0xff] }
 0x155   : > { %v1361_v9 = vsub.f32 %v1359_v7, %v1360_v8  ;;  %v1369_v32 = vsub.f32 %v1318_v59, %v1358_v5  ;;  %v1370_v27 = vsub.f32 %v1321_v38, %v1358_v5 }
 0x157   : > { %v1362_v10 = vmax.f32 %v1361_v9, 0.0 }
 0x159   : > { %v1371_v11 = vadd.f32 1e-05, %v1362_v10 }
 0x15b   : > { %2019 = vrsqrt.f32 %v1371_v11 }
 0x168   : > { %v2020_v26 = vpop.eup %2019 }
 0x169   : > { %v1373_v31 = vmul.f32 %v2020_v26, %v1363_v19  ;;  %v1374_v36 = vmul.f32 %v2020_v26, %v1364_v21  ;;  %v1375_v42 = vmul.f32 %v2020_v26, %v1365_v23  ;;  %v1376_v17 = vmul.f32 %v2020_v26, %v1366_v24 }
 0x16a   : > { %v1377_v35 = vmul.f32 %v2020_v26, %v1367_v28  ;;  %v1378_v34 = vmul.f32 %v2020_v26, %v1368_v30  ;;  %v1379_v41 = vmul.f32 %v2020_v26, %v1369_v32  ;;  %v1380_v25 = vmul.f32 %v2020_v26, %v1370_v27 }
 0x16b   : > { %v1388_v45 = vmul.f32 %v1630_v29, %v1373_v31  ;;  %v1389_v48 = vmul.f32 %v1630_v29, %v1374_v36  ;;  %v1390_v50 = vmul.f32 %v1630_v29, %v1375_v42  ;;  %v1391_v49 = vmul.f32 %v1630_v29, %v1376_v17 }
 0x16c   : > { %v1392_v52 = vmul.f32 %v1630_v29, %v1377_v35  ;;  %v1393_v51 = vmul.f32 %v1630_v29, %v1378_v34  ;;  %v1394_v54 = vmul.f32 %v1630_v29, %v1379_v41  ;;  %v1395_v53 = vmul.f32 %v1630_v29, %v1380_v25 }
 0x16d   : > { %v1403_v55 = vadd.f32 %v1631_v47, %v1388_v45  ;;  %v1404_v56 = vadd.f32 %v1631_v47, %v1389_v48  ;;  %v1405_v58 = vadd.f32 %v1631_v47, %v1390_v50  ;;  %v1406_v57 = vadd.f32 %v1631_v47, %v1391_v49 }
 0x16e   : > { %v1407_v59 = vadd.f32 %v1631_v47, %v1392_v52  ;;  %v1408_v12 = vadd.f32 %v1631_v47, %v1393_v51  ;;  %v1409_v14 = vadd.f32 %v1631_v47, %v1394_v54  ;;  %v1410_v37 = vadd.f32 %v1631_v47, %v1395_v53 }
 0x16f   : > { %v1411_v38 = vmax.f32 %v1403_v55, 0.0  ;;  %v1412_v39 = vmax.f32 %v1404_v56, 0.0  ;;  %v1413_v40 = vmax.f32 %v1405_v58, 0.0  ;;  %v1414_v33 = vmax.f32 %v1406_v57, 0.0 }
 0x170   : > { %v1415_v43 = vmax.f32 %v1407_v59, 0.0  ;;  %v1416_v44 = vmax.f32 %v1408_v12, 0.0  ;;  %v1417_v46 = vmax.f32 %v1409_v14, 0.0  ;;  %v1418_v16 = vmax.f32 %v1410_v37, 0.0 }
 0x171   : > { %v1654_v18 = vpack.c.bf16 %v1412_v39, %v1411_v38  ;;  %v1659_v20 = vpack.c.bf16 %v1414_v33, %v1413_v40 }
 0x172   : > { %v1664_v22 = vpack.c.bf16 %v1416_v44, %v1415_v43  ;;  %v1669_v60 = vpack.c.bf16 %v1418_v16, %v1417_v46 }
 0x173   : > { %1655 = vst [vmem:[%s197_s30] sm:$0xff] %v1654_v18   ;;  %1671 = vst [vmem:[%s197_s30 + $0x8] sm:$0xff] %v1659_v20  }
 0x174   : > { %1672 = vst [vmem:[%s197_s30 + $0x10] sm:$0xff] %v1664_v22   ;;  %1673 = vst [vmem:[%s197_s30 + $0x18] sm:$0xff] %v1669_v60  }
 0x175 PF: > { %s14_s15 = sadd.s32 1, %s2027_s15  }
 0x176   : > { %p11_p4 = scmp.ge.s32.totalorder %s14_s15, 4  }
 0x178   :  { %13 = sbr.rel (!%p11_p4) target bundleno = 1 (0x1), region = 66 }

// kernel: mapping_network_forward.9
= control target key start
LH: loop header
LB: loop body
LE: loop exit
PB: predicated region body
PF: predicated region fallthrough
CT: control target
= control target key end

     0   :  { %s2751_s15 = smov 0   ;;  %s3293_s0 = inlined_call_operand.vmem [shape: bf16[2,64,1728], index: 0, kind: input, shape index: {}]   ;;  %s3294_s1 = inlined_call_operand.vmem [shape: bf16[1728,128], index: 1, kind: input, shape index: {}]   ;;  %s3295_s2 = inlined_call_operand.vmem [shape: f32[1,128], index: 2, kind: input, shape index: {}]   ;;  %s3296_s3 = inlined_call_operand.vmem [shape: f32[1,128], index: 3, kind: input, shape index: {}]   ;;  %s3297_s4 = inlined_call_operand.vmem [shape: bf16[2,64,128], index: 4, kind: output, shape index: {}]  }
   0x1 LB: > { %s2053_s16 = sadd.s32 4294967295, %s2723_s15   ;;  %p2057_p0 = scmp.ge.s32.totalorder %s2723_s15, 1  ;;  %s2723_s15 = sphi %s2751_s15, %s14_s15  }
   0x2   : > { %p162_p1 = scmp.lt.s32.totalorder %s2723_s15, 3 }
   0x4   : > { %p163_p2 = pnand %p2057_p0, %p162_p1 }
   0x6   : > { %166 = sbr.rel (%p163_p2) target bundleno = 419 (0x1a3), region = 36 }
   0xb   : > { %v2523_v0 = vld [vmem:[%s3294_s1 + $0x78] sm:$0xff]   ;;  %v2525_v2 = vld [vmem:[%s3294_s1 + $0x70] sm:$0xff]   ;;  %v2527_v4 = vld [vmem:[%s3294_s1 + $0x68] sm:$0xff]   ;;  %p188_p3 = scmp.lt.s32.totalorder %s2053_s16, 1  ;;  %vm1395_vm0 = vcmask 523264  }
   0xc   : > { %v2524_v1 = vld [vmem:[%s3294_s1 + $0x38] sm:$0xff]   ;;  %2273 = vmatprep.subr.bf16.mxu1 %v2523_v0  ;;  %v2526_v3 = vld [vmem:[%s3294_s1 + $0x30] sm:$0xff]   ;;  %v2528_v5 = vld [vmem:[%s3294_s1 + $0x28] sm:$0xff]  }
   0xd   : > { %2274 = vmatpush3.bf16.msra.mxu1 %v2524_v1  ;;  %v2529_v6 = vld [vmem:[%s3294_s1 + $0x60] sm:$0xff]   ;;  %v2533_v8 = vld [vmem:[%s3294_s1 + $0x178] sm:$0xff]   ;;  %v2537_v12 = vld [vmem:[%s3294_s1 + $0x170] sm:$0xff]   ;;  %s3309_s16 = smov (!%p188_p3, %s2053_s16), 1 }
   0xe   : > { %2275 = vmatprep.subr.bf16.mxu1 %v2525_v2  ;;  %v2530_v7 = vld [vmem:[%s3294_s1 + $0x20] sm:$0xff]   ;;  %v2534_v9 = vld [vmem:[%s3294_s1 + $0x138] sm:$0xff]   ;;  %2353 = vmatprep.subr.bf16.mxu0 %v2533_v8  ;;  %v2538_v13 = vld [vmem:[%s3294_s1 + $0x130] sm:$0xff]   ;;  %s2513_s27 = smul.u32 448, %s3309_s16  ;;  %s2241_s5 = sshll.u32 %s3309_s16, 5 }
   0xf   : > { %v2531_v10 = vld [vmem:[%s3294_s1 + $0x58] sm:$0xff]   ;;  %2354 = vmatpush3.bf16.msra.mxu0 %v2534_v9  ;;  %v2535_v14 = vld [vmem:[%s3294_s1 + $0x50] sm:$0xff]   ;;  %v2541_v16 = vld [vmem:[%s3294_s1 + $0x168] sm:$0xff]   ;;  %s197_s8 = scalar_lea.vmem %s3297_s4, %s2241_s5 }
  0x10   : > { %v2532_v11 = vld [vmem:[%s3294_s1 + $0x18] sm:$0xff]   ;;  %2355 = vmatprep.subr.bf16.mxu0 %v2537_v12  ;;  %v2536_v15 = vld [vmem:[%s3294_s1 + $0x10] sm:$0xff]   ;;  %v2542_v17 = vld [vmem:[%s3294_s1 + $0x128] sm:$0xff]   ;;  %s2828_s12 = scalar_lea.vmem %s3293_s0, %s2513_s27 }
  0x11   : > { %2276 = vmatpush3.bf16.msra.mxu1 %v2526_v3  ;;  %v2539_v18 = vld [vmem:[%s3294_s1 + $0x48] sm:$0xff]   ;;  %v2545_v20 = vld [vmem:[%s3294_s1 + $0x160] sm:$0xff]   ;;  %v2550_v25 = vld [vmem:[%s3294_s1 + $0xf8] sm:$0xff]  }
  0x12   : > { %2277 = vmatprep.subr.bf16.mxu1 %v2527_v4  ;;  %v2540_v19 = vld [vmem:[%s3294_s1 + $0x8] sm:$0xff]   ;;  %v2546_v21 = vld [vmem:[%s3294_s1 + $0x120] sm:$0xff]   ;;  %v2552_v27 = vld [vmem:[%s3294_s1 + $0x158] sm:$0xff]  }
  0x13   : > { %2356 = vmatpush3.bf16.msra.mxu0 %v2538_v13  ;;  %v2543_v22 = vld [vmem:[%s3294_s1 + $0x40] sm:$0xff]   ;;  %v2553_v28 = vld [vmem:[%s3294_s1 + $0x118] sm:$0xff]   ;;  %v2554_v30 = vld [vmem:[%s3294_s1 + $0xf0] sm:$0xff]  }
  0x14   : > { %2357 = vmatprep.subr.bf16.mxu0 %v2541_v16  ;;  %v2549_v23 = vld [vmem:[%s2828_s12 + $0x4] ss:$56 sps:$4 sm:$0xff]   ;;  %v2547_v26 = vld [vmem:[%s2828_s12] ss:$56 sps:$4 sm:$0xff]   ;;  %v2556_v31 = vld [vmem:[%s3294_s1 + $0x150] sm:$0xff]  }
  0x15   : > { %2278 = vmatpush3.bf16.msra.mxu1 %v2528_v5  ;;  %v2544_v24 = vld [vmem:[%s3294_s1] sm:$0xff]   ;;  %1440 = vmatprep.mubr.bf16.mxu1 %v2549_v23  ;;  %v2551_v29 = vld [vmem:[%s3294_s1 + $0xb8] sm:$0xff]   ;;  %v2557_v32 = vld [vmem:[%s3294_s1 + $0x110] sm:$0xff]  }
  0x16   : > { %2279 = vmatprep.subr.bf16.mxu1 %v2529_v6  ;;  %v2558_v33 = vld [vmem:[%s2828_s12 + $0x74] ss:$56 sps:$4 sm:$0xff]   ;;  %v2560_v35 = vld [vmem:[%s2828_s12 + $0x70] ss:$56 sps:$4 sm:$0xff]   ;;  %v2565_v40 = vld [vmem:[%s3294_s1 + $0xe0] sm:$0xff]  }
  0x17   : > { %2358 = vmatpush3.bf16.msra.mxu0 %v2542_v17  ;;  %v2555_v34 = vld [vmem:[%s3294_s1 + $0xb0] sm:$0xff]   ;;  %v2561_v36 = vld [vmem:[%s3294_s1 + $0xe8] sm:$0xff]   ;;  %v2567_v41 = vld [vmem:[%s3294_s1 + $0x140] sm:$0xff]  }
  0x18   : > { %2359 = vmatprep.subr.bf16.mxu0 %v2545_v20  ;;  %v2563_v37 = vld [vmem:[%s3294_s1 + $0x148] sm:$0xff]   ;;  %v2568_v42 = vld [vmem:[%s3294_s1 + $0x100] sm:$0xff]   ;;  %v2572_v46 = vld [vmem:[%s3294_s1 + $0xd8] sm:$0xff]  }
  0x19   : > { %2280 = vmatpush3.bf16.msra.mxu1 %v2530_v7  ;;  %v2564_v38 = vld [vmem:[%s3294_s1 + $0x108] sm:$0xff]   ;;  %v2566_v43 = vld [vmem:[%s3294_s1 + $0xa0] sm:$0xff]   ;;  %v2573_v47 = vld [vmem:[%s3294_s1 + $0x98] sm:$0xff]  }
  0x1a   : > { %2281 = vmatprep.subr.bf16.mxu1 %v2531_v10  ;;  %v2562_v39 = vld [vmem:[%s3294_s1 + $0xa8] sm:$0xff]   ;;  %v2569_v44 = vld [vmem:[%s2828_s12 + $0xe4] ss:$56 sps:$4 sm:$0xff]   ;;  %v2571_v45 = vld [vmem:[%s2828_s12 + $0xe0] ss:$56 sps:$4 sm:$0xff]  }
  0x1b   : > { %2360 = vmatpush3.bf16.msra.mxu0 %v2546_v21  ;;  %v2574_v48 = vld [vmem:[%s2828_s12 + $0x10] ss:$56 sps:$4 sm:$0xff]   ;;  %v2576_v49 = vld [vmem:[%s2828_s12 + $0x14] ss:$56 sps:$4 sm:$0xff]   ;;  %v2577_v50 = vld [vmem:[%s3294_s1 + $0x278] sm:$0xff]  }
  0x1c   : > { %2361 = vmatprep.subr.bf16.mxu0 %v2552_v27  ;;  %1570 = vmatprep.mubr.bf16.mxu0 %v2576_v49  ;;  %v2578_v51 = vld [vmem:[%s3294_s1 + $0x238] sm:$0xff]   ;;  %v2579_v52 = vld [vmem:[%s3294_s1 + $0xd0] sm:$0xff]   ;;  %v2586_v58 = vld [vmem:[%s3294_s1 + $0xc8] sm:$0xff]  }
  0x1d   : > { %2282 = vmatpush3.bf16.msra.mxu1 %v2532_v11  ;;  %v2580_v53 = vld [vmem:[%s3294_s1 + $0x90] sm:$0xff]   ;;  %v2587_v59 = vld [vmem:[%s3294_s1 + $0x88] sm:$0xff]   ;;  %v2588_v60 = vld [vmem:[%s2828_s12 + $0x84] ss:$56 sps:$4 sm:$0xff]  }
  0x1e   : > { %2283 = vmatprep.subr.bf16.mxu1 %v2535_v14  ;;  %v2581_v54 = vld [vmem:[%s3294_s1 + $0x270] sm:$0xff]   ;;  %v2590_v61 = vld [vmem:[%s3294_s1 + $0x268] sm:$0xff]   ;;  %v2591_v62 = vld [vmem:[%s2828_s12 + $0x80] ss:$56 sps:$4 sm:$0xff]  }
  0x1f   : > { %2362 = vmatpush3.bf16.msra.mxu0 %v2553_v28  ;;  %v2582_v55 = vld [vmem:[%s3294_s1 + $0x230] sm:$0xff]   ;;  %v2592_v63 = vld [vmem:[%s3294_s1 + $0x228] sm:$0xff]   ;;  %v2593_v0 = vld [vmem:[%s3294_s1 + $0xc0] sm:$0xff]  }
  0x20   : > { %2363 = vmatprep.subr.bf16.mxu0 %v2556_v31  ;;  %v2583_v56 = vld [vmem:[%s2828_s12 + $0x154] ss:$56 sps:$4 sm:$0xff]   ;;  %v2585_v57 = vld [vmem:[%s2828_s12 + $0x150] ss:$56 sps:$4 sm:$0xff]   ;;  %v2594_v1 = vld [vmem:[%s3294_s1 + $0x80] sm:$0xff]  }
  0x21   : > { %2284 = vmatpush3.bf16.msra.mxu1 %v2536_v15  ;;  %v2595_v2 = vld [vmem:[%s3294_s1 + $0x260] sm:$0xff]   ;;  %v2600_v6 = vld [vmem:[%s3294_s1 + $0x1f8] sm:$0xff]   ;;  %v2601_v7 = vld [vmem:[%s2828_s12 + $0xf4] ss:$56 sps:$4 sm:$0xff]  }
  0x22   : > { %2285 = vmatprep.subr.bf16.mxu1 %v2539_v18  ;;  %v2596_v3 = vld [vmem:[%s3294_s1 + $0x220] sm:$0xff]   ;;  %v2603_v8 = vld [vmem:[%s3294_s1 + $0x1b8] sm:$0xff]   ;;  %v2605_v10 = vld [vmem:[%s2828_s12 + $0xf0] ss:$56 sps:$4 sm:$0xff]  }
  0x23   : > { %2364 = vmatpush3.bf16.msra.mxu0 %v2557_v32  ;;  %v2597_v4 = vld [vmem:[%s2828_s12 + $0x8] ss:$56 sps:$4 sm:$0xff]   ;;  %v2599_v5 = vld [vmem:[%s2828_s12 + $0xc] ss:$56 sps:$4 sm:$0xff]   ;;  %v2604_v9 = vld [vmem:[%s3294_s1 + $0x258] sm:$0xff]   ;;  %v2725_v32 = vmov 0  }
  0x24   : > { %2365 = vmatprep.subr.bf16.mxu0 %v2563_v37  ;;  %v2606_v11 = vld [vmem:[%s3294_s1 + $0x218] sm:$0xff]   ;;  %v2607_v12 = vld [vmem:[%s3294_s1 + $0x1f0] sm:$0xff]   ;;  %v2614_v18 = vld [vmem:[%s3294_s1 + $0x1e8] sm:$0xff]  }
  0x25   : > { %2286 = vmatpush3.bf16.msra.mxu1 %v2540_v19  ;;  %v2608_v13 = vld [vmem:[%s3294_s1 + $0x1b0] sm:$0xff]   ;;  %v2615_v19 = vld [vmem:[%s2828_s12 + $0x164] ss:$56 sps:$4 sm:$0xff]   ;;  %v2617_v20 = vld [vmem:[%s3294_s1 + $0x1a8] sm:$0xff]  }
  0x26   : > { %2287 = vmatprep.subr.bf16.mxu1 %v2543_v22  ;;  %v2609_v14 = vld [vmem:[%s3294_s1 + $0x250] sm:$0xff]   ;;  %v2618_v21 = vld [vmem:[%s3294_s1 + $0x248] sm:$0xff]   ;;  %v2619_v22 = vld [vmem:[%s2828_s12 + $0x160] ss:$56 sps:$4 sm:$0xff]  }
  0x27   : > { %2366 = vmatpush3.bf16.msra.mxu0 %v2564_v38  ;;  %v2610_v15 = vld [vmem:[%s3294_s1 + $0x210] sm:$0xff]   ;;  %v2620_v23 = vld [vmem:[%s3294_s1 + $0x208] sm:$0xff]   ;;  %v2624_v27 = vld [vmem:[%s3294_s1 + $0x200] sm:$0xff]  }
  0x28   : > { %2367 = vmatprep.subr.bf16.mxu0 %v2567_v41  ;;  %v2611_v16 = vld [vmem:[%s2828_s12 + $0x7c] ss:$56 sps:$4 sm:$0xff]   ;;  %v2613_v17 = vld [vmem:[%s2828_s12 + $0x78] ss:$56 sps:$4 sm:$0xff]   ;;  %v2625_v28 = vld [vmem:[%s2828_s12 + $0xec] ss:$56 sps:$4 sm:$0xff]  }
  0x29   : > { %2288 = vmatpush3.bf16.msra.mxu1 %v2544_v24  ;;  %v2621_v24 = vld [vmem:[%s3294_s1 + $0x1e0] sm:$0xff]   ;;  %v2629_v31 = vld [vmem:[%s3294_s1 + $0x198] sm:$0xff]   ;;  %v2635_v37 = vld [vmem:[%s3294_s1 + $0x190] sm:$0xff]  }
  0x2a   : > { %2313 = vmatprep.subr.bf16.mxu1 %v2550_v25  ;;  %v2622_v25 = vld [vmem:[%s3294_s1 + $0x1a0] sm:$0xff]   ;;  %v2636_v38 = vld [vmem:[%s3294_s1 + $0x330] sm:$0xff]   ;;  %v2640_v41 = vld [vmem:[%s3294_s1 + $0x1c8] sm:$0xff]  }
  0x2b   : > { %2368 = vmatpush3.bf16.msra.mxu0 %v2568_v42  ;;  %v2641_v42 = vld [vmem:[%s3294_s1 + $0x188] sm:$0xff]   ;;  %v2649_v49 = vld [vmem:[%s3294_s1 + $0x2f8] sm:$0xff]  }
  0x2c   : > { %1441 = vmatmul.mubr.bf16.vlgmr.msra.gmra.mxu1 %v2547_v26  ;;  %2433 = vmatprep.subr.bf16.mxu0 %v2577_v50  ;;  %v2623_v26 = vld [vmem:[%s3294_s1 + $0x240] sm:$0xff]   ;;  %v2650_v50 = vld [vmem:[%s3294_s1 + $0x2b8] sm:$0xff]  }
  0x2d   : > { %2314 = vmatpush3.bf16.msra.mxu1 %v2551_v29  ;;  %1448 = vmatprep.mubr.bf16.mxu1 %v2558_v33  ;;  %v2627_v29 = vld [vmem:[%s2828_s12 + $0xe8] ss:$56 sps:$4 sm:$0xff]  }
  0x2e   : > { %2315 = vmatprep.subr.bf16.mxu1 %v2554_v30  ;;  %1571 = vmatmul.mubr.bf16.vlgmr.msra.gmra.mxu0 %v2574_v48  ;;  %v2628_v30 = vld [vmem:[%s3294_s1 + $0x1d8] sm:$0xff]  }
  0x2f   : > { %2434 = vmatpush3.bf16.msra.mxu0 %v2578_v51  ;;  %1578 = vmatprep.mubr.bf16.mxu0 %v2588_v60  ;;  %v2630_v33 = vld [vmem:[%s2828_s12 + $0x20] ss:$56 sps:$4 sm:$0xff]   ;;  %v2648_v48 = vld [vmem:[%s2828_s12 + $0x1c] ss:$56 sps:$4 sm:$0xff]   ;;  %v2662_v60 = vld [vmem:[%s3294_s1 + $0x2a8] sm:$0xff]  }
  0x30   : > { %2435 = vmatprep.subr.bf16.mxu0 %v2581_v54  ;;  %v2651_v51 = vld [vmem:[%s3294_s1 + $0x318] sm:$0xff]   ;;  %v2654_v54 = vld [vmem:[%s3294_s1 + $0x310] sm:$0xff]  }
  0x31   : > { %2316 = vmatpush3.bf16.msra.mxu1 %v2555_v34  ;;  %v2632_v34 = vld [vmem:[%s2828_s12 + $0x24] ss:$56 sps:$4 sm:$0xff]  }
  0x32   : > { %2317 = vmatprep.subr.bf16.mxu1 %v2561_v36  ;;  %v2634_v36 = vld [vmem:[%s3294_s1 + $0x1d0] sm:$0xff]  }
  0x33   : > { %2436 = vmatpush3.bf16.msra.mxu0 %v2582_v55  ;;  %v2655_v55 = vld [vmem:[%s2828_s12 + $0x8c] ss:$56 sps:$4 sm:$0xff]  }
  0x34   : > { %1449 = vmatmul.mubr.bf16.gmra.mxu1 %v2560_v35  ;;  %2437 = vmatprep.subr.bf16.mxu0 %v2590_v61  ;;  %v2633_v35 = vld [vmem:[%s3294_s1 + $0x338] sm:$0xff]   ;;  %v2663_v61 = vld [vmem:[%s3294_s1 + $0x308] sm:$0xff]  }
  0x35   : > { %2318 = vmatpush3.bf16.msra.mxu1 %v2562_v39  ;;  %1456 = vmatprep.mubr.bf16.mxu1 %v2569_v44  ;;  %v2637_v39 = vld [vmem:[%s2828_s12 + $0x15c] ss:$56 sps:$4 sm:$0xff]   ;;  %v2643_v44 = vld [vmem:[%s3294_s1 + $0x1c0] sm:$0xff]  }
  0x36   : > { %2319 = vmatprep.subr.bf16.mxu1 %v2565_v40  ;;  %1579 = vmatmul.mubr.bf16.gmra.mxu0 %v2591_v62  ;;  %v2639_v40 = vld [vmem:[%s2828_s12 + $0x158] ss:$56 sps:$4 sm:$0xff]   ;;  %v2664_v62 = vld [vmem:[%s3294_s1 + $0x2e0] sm:$0xff]  }
  0x37   : > { %2438 = vmatpush3.bf16.msra.mxu0 %v2592_v63  ;;  %1586 = vmatprep.mubr.bf16.mxu0 %v2601_v7  ;;  %v2665_v63 = vld [vmem:[%s3294_s1 + $0x2a0] sm:$0xff]   ;;  %v2675_v7 = vld [vmem:[%s3294_s1 + $0x358] sm:$0xff]  }
  0x38   : > { %2439 = vmatprep.subr.bf16.mxu0 %v2595_v2  ;;  %v2669_v2 = vld [vmem:[%s2828_s12 + $0xf8] ss:$56 sps:$4 sm:$0xff]  }
  0x39   : > { %2320 = vmatpush3.bf16.msra.mxu1 %v2566_v43  ;;  %v2642_v43 = vld [vmem:[%s3294_s1 + $0x328] sm:$0xff]  }
  0x3a   : > { %2321 = vmatprep.subr.bf16.mxu1 %v2572_v46  ;;  %v2645_v46 = vld [vmem:[%s3294_s1 + $0x320] sm:$0xff]  }
  0x3b   : > { %2440 = vmatpush3.bf16.msra.mxu0 %v2596_v3  ;;  %v2670_v3 = vld [vmem:[%s2828_s12 + $0x104] ss:$56 sps:$4 sm:$0xff]  }
  0x3c   : > { %1457 = vmatmul.mubr.bf16.gmra.mxu1 %v2571_v45  ;;  %2441 = vmatprep.subr.bf16.mxu0 %v2604_v9  ;;  %v2644_v45 = vld [vmem:[%s3294_s1 + $0x180] sm:$0xff]   ;;  %v2677_v9 = vld [vmem:[%s3294_s1 + $0x290] sm:$0xff]  }
  0x3d   : > { %2322 = vmatpush3.bf16.msra.mxu1 %v2573_v47  ;;  %1464 = vmatprep.mubr.bf16.mxu1 %v2583_v56  ;;  %v2646_v47 = vld [vmem:[%s2828_s12 + $0x18] ss:$56 sps:$4 sm:$0xff]   ;;  %v2657_v56 = vld [vmem:[%s2828_s12 + $0x88] ss:$56 sps:$4 sm:$0xff]  }
  0x3e   : > { %2323 = vmatprep.subr.bf16.mxu1 %v2579_v52  ;;  %1587 = vmatmul.mubr.bf16.gmra.mxu0 %v2605_v10  ;;  %v2652_v52 = vld [vmem:[%s3294_s1 + $0x2f0] sm:$0xff]  }
  0x3f   : > { %2442 = vmatpush3.bf16.msra.mxu0 %v2606_v11  ;;  %1594 = vmatprep.mubr.bf16.mxu0 %v2615_v19  ;;  %v2678_v10 = vld [vmem:[%s3294_s1 + $0x350] sm:$0xff]   ;;  %v2679_v11 = vld [vmem:[%s2828_s12 + $0x16c] ss:$56 sps:$4 sm:$0xff]  }
  0x40   : > { %2443 = vmatprep.subr.bf16.mxu0 %v2609_v14  ;;  %v2684_v14 = vld [vmem:[%s3294_s1 + $0x2c8] sm:$0xff]   ;;  %v2689_v19 = vld [vmem:[%s3294_s1 + $0x280] sm:$0xff]  }
  0x41   : > { %2324 = vmatpush3.bf16.msra.mxu1 %v2580_v53  ;;  %v2653_v53 = vld [vmem:[%s3294_s1 + $0x2b0] sm:$0xff]  }
  0x42   : > { %2325 = vmatprep.subr.bf16.mxu1 %v2586_v58  ;;  %v2660_v58 = vld [vmem:[%s3294_s1 + $0x2e8] sm:$0xff]  }
  0x43   : > { %2444 = vmatpush3.bf16.msra.mxu0 %v2610_v15  ;;  %v2685_v15 = vld [vmem:[%s2828_s12 + $0x170] ss:$56 sps:$4 sm:$0xff]  }
  0x44   : > { %1465 = vmatmul.mubr.bf16.gmra.mxu1 %v2585_v57  ;;  %2445 = vmatprep.subr.bf16.mxu0 %v2618_v21  ;;  %v2658_v57 = vld [vmem:[%s2828_s12 + $0x94] ss:$56 sps:$4 sm:$0xff]   ;;  %v2691_v21 = vld [vmem:[%s2828_s12 + $0x28] ss:$56 sps:$4 sm:$0xff]  }
  0x45   : > { %2326 = vmatpush3.bf16.msra.mxu1 %v2587_v59  ;;  %1505 = vmatprep.mubr.bf16.mxu1 %v2599_v5  ;;  %v2661_v59 = vld [vmem:[%s2828_s12 + $0x90] ss:$56 sps:$4 sm:$0xff]   ;;  %v2673_v5 = vld [vmem:[%s2828_s12 + $0x100] ss:$56 sps:$4 sm:$0xff]  }
  0x46   : > { %2327 = vmatprep.subr.bf16.mxu1 %v2593_v0  ;;  %1595 = vmatmul.mubr.bf16.gmra.mxu0 %v2619_v22  ;;  %v2666_v0 = vld [vmem:[%s3294_s1 + $0x300] sm:$0xff]  }
  0x47   : > { %2446 = vmatpush3.bf16.msra.mxu0 %v2620_v23  ;;  %1700 = vmatprep.mubr.bf16.mxu0 %v2632_v34  ;;  %v2693_v22 = vld [vmem:[%s2828_s12 + $0x2c] ss:$56 sps:$4 sm:$0xff]   ;;  %v2694_v23 = vld [vmem:[%s2828_s12 + $0x30] ss:$56 sps:$4 sm:$0xff]  }
  0x48   : > { %2447 = vmatprep.subr.bf16.mxu0 %v2623_v26  ;;  %v2700_v26 = vld [vmem:[%s2828_s12 + $0xa4] ss:$56 sps:$4 sm:$0xff]  }
  0x49   : > { %2328 = vmatpush3.bf16.msra.mxu1 %v2594_v1  ;;  %v2667_v1 = vld [vmem:[%s2828_s12 + $0xfc] ss:$56 sps:$4 sm:$0xff]  }
  0x4a   : > { %2393 = vmatprep.subr.bf16.mxu1 %v2600_v6  ;;  %v2674_v6 = vld [vmem:[%s3294_s1 + $0x298] sm:$0xff]  }
  0x4b   : > { %2448 = vmatpush3.bf16.msra.mxu0 %v2624_v27  ;;  %v2699_v27 = vld [vmem:[%s2828_s12 + $0x98] ss:$56 sps:$4 sm:$0xff]   ;;  %v2712_v34 = vld [vmem:[%s2828_s12 + $0x184] ss:$56 sps:$4 sm:$0xff]  }
  0x4c   : > { %1506 = vmatmul.mubr.bf16.vlgmr.msra.gmra.mxu1 %v2597_v4  ;;  %1798 = vmatprep.subr.bf16.mxu0 %v2725_v32  ;;  %v2672_v4 = vld [vmem:[%s3294_s1 + $0x2d8] sm:$0xff]  }
  0x4d   : > { %2394 = vmatpush3.bf16.msra.mxu1 %v2603_v8  ;;  %1513 = vmatprep.mubr.bf16.mxu1 %v2611_v16  ;;  %v2676_v8 = vld [vmem:[%s3294_s1 + $0x2d0] sm:$0xff]   ;;  %v2686_v16 = vld [vmem:[%s3294_s1 + $0x288] sm:$0xff]  }
  0x4e   : > { %2395 = vmatprep.subr.bf16.mxu1 %v2607_v12  ;;  %1701 = vmatmul.mubr.bf16.vlgmr.msra.gmra.mxu0 %v2630_v33  ;;  %v2681_v12 = vld [vmem:[%s2828_s12 + $0x168] ss:$56 sps:$4 sm:$0xff]   ;;  %v2709_v33 = vld [vmem:[%s2828_s12 + $0x17c] ss:$56 sps:$4 sm:$0xff]  }
  0x4f   : > { %1799 = vmatpush1.bf16.msra.mxu0 %v2633_v35  ;;  %1708 = vmatprep.mubr.bf16.mxu0 %v2658_v57  ;;  %v2711_v35 = vld [vmem:[%s2828_s12 + $0x178] ss:$56 sps:$4 sm:$0xff]  }
  0x50   : > { %1800 = vmatprep.subr.bf16.mxu0 %v2725_v32 }
  0x51   : > { %2396 = vmatpush3.bf16.msra.mxu1 %v2608_v13  ;;  %v2682_v13 = vld [vmem:[%s2828_s12 + $0x174] ss:$56 sps:$4 sm:$0xff]  }
  0x52   : > { %2397 = vmatprep.subr.bf16.mxu1 %v2614_v18  ;;  %v2688_v18 = vld [vmem:[%s3294_s1 + $0x2c0] sm:$0xff]  }
  0x53   : > { %1801 = vmatpush1.bf16.msra.mxu0 %v2636_v38 }
  0x54   : > { %1514 = vmatmul.mubr.bf16.gmra.mxu1 %v2613_v17  ;;  %1802 = vmatprep.subr.bf16.mxu0 %v2725_v32  ;;  %v2687_v17 = vld [vmem:[%s3294_s1 + $0x348] sm:$0xff]  }
  0x55   : > { %2398 = vmatpush3.bf16.msra.mxu1 %v2617_v20  ;;  %1521 = vmatprep.mubr.bf16.mxu1 %v2625_v28  ;;  %v2690_v20 = vld [vmem:[%s3294_s1 + $0x340] sm:$0xff]  }
  0x56   : > { %2399 = vmatprep.subr.bf16.mxu1 %v2621_v24  ;;  %1709 = vmatmul.mubr.bf16.gmra.mxu0 %v2661_v59  ;;  %v2696_v24 = vld [vmem:[%s2828_s12 + $0x34] ss:$56 sps:$4 sm:$0xff]   ;;  %v2702_v28 = vld [vmem:[%s2828_s12 + $0xa0] ss:$56 sps:$4 sm:$0xff]  }
  0x57   : > { %1803 = vmatpush1.bf16.msra.mxu0 %v2642_v43  ;;  %1716 = vmatprep.mubr.bf16.mxu0 %v2670_v3 }
  0x58   : > { %1804 = vmatprep.subr.bf16.mxu0 %v2725_v32 }
  0x59   : > { %2400 = vmatpush3.bf16.msra.mxu1 %v2622_v25  ;;  %v2697_v25 = vld [vmem:[%s2828_s12 + $0x9c] ss:$56 sps:$4 sm:$0xff]  }
  0x5a   : > { %2401 = vmatprep.subr.bf16.mxu1 %v2628_v30  ;;  %v2706_v30 = vld [vmem:[%s2828_s12 + $0x114] ss:$56 sps:$4 sm:$0xff]  }
  0x5b   : > { %1805 = vmatpush1.bf16.msra.mxu0 %v2645_v46 }
  0x5c   : > { %1522 = vmatmul.mubr.bf16.gmra.mxu1 %v2627_v29  ;;  %1806 = vmatprep.subr.bf16.mxu0 %v2725_v32  ;;  %v2703_v29 = vld [vmem:[%s2828_s12 + $0x10c] ss:$56 sps:$4 sm:$0xff]  }
  0x5d   : > { %2402 = vmatpush3.bf16.msra.mxu1 %v2629_v31  ;;  %1529 = vmatprep.mubr.bf16.mxu1 %v2637_v39  ;;  %v2705_v31 = vld [vmem:[%s2828_s12 + $0x108] ss:$56 sps:$4 sm:$0xff]  }
  0x5e   : > { %2403 = vmatprep.subr.bf16.mxu1 %v2634_v36  ;;  %1717 = vmatmul.mubr.bf16.gmra.mxu0 %v2673_v5  ;;  %v2714_v36 = vld [vmem:[%s2828_s12 + $0x180] ss:$56 sps:$4 sm:$0xff]  }
  0x5f   : > { %1807 = vmatpush1.bf16.msra.mxu0 %v2651_v51  ;;  %1724 = vmatprep.mubr.bf16.mxu0 %v2682_v13 }
  0x60   : > { %1808 = vmatprep.subr.bf16.mxu0 %v2725_v32 }
  0x61   : > { %2404 = vmatpush3.bf16.msra.mxu1 %v2635_v37 }
  0x62   : > { %2405 = vmatprep.subr.bf16.mxu1 %v2640_v41 }
  0x63   : > { %1809 = vmatpush1.bf16.msra.mxu0 %v2654_v54 }
  0x64   : > { %1530 = vmatmul.mubr.bf16.gmra.mxu1 %v2639_v40  ;;  %1810 = vmatprep.subr.bf16.mxu0 %v2725_v32 }
  0x65   : > { %2406 = vmatpush3.bf16.msra.mxu1 %v2641_v42  ;;  %1635 = vmatprep.mubr.bf16.mxu1 %v2648_v48 }
  0x66   : > { %2407 = vmatprep.subr.bf16.mxu1 %v2643_v44  ;;  %1725 = vmatmul.mubr.bf16.gmra.mxu0 %v2685_v15 }
  0x67   : > { %1811 = vmatpush1.bf16.msra.mxu0 %v2663_v61  ;;  %2225 = vmatprep.mubr.msk.bf16.mxu0 %vm1395_vm0, %v2696_v24 }
  0x68   : > { %1812 = vmatprep.subr.bf16.mxu0 %v2725_v32 }
  0x69   : > { %2408 = vmatpush3.bf16.msra.mxu1 %v2644_v45 }
  0x6a   : > { %2473 = vmatprep.subr.bf16.mxu1 %v2649_v49 }
  0x6b   : > { %1813 = vmatpush1.bf16.msra.mxu0 %v2666_v0 }
  0x6c   : > { %1636 = vmatmul.mubr.bf16.vlgmr.msra.gmra.mxu1 %v2646_v47  ;;  %1822 = vmatprep.subr.bf16.mxu0 %v2725_v32 }
  0x6d   : > { %2474 = vmatpush3.bf16.msra.mxu1 %v2650_v50  ;;  %1643 = vmatprep.mubr.bf16.mxu1 %v2655_v55 }
  0x6e   : > { %2475 = vmatprep.subr.bf16.mxu1 %v2652_v52 }
  0x6f   : > { %1823 = vmatpush2.bf16.msra.mxu0 %v2675_v7 }
  0x70   : > { %1824 = vmatprep.subr.bf16.mxu0 %v2725_v32 }
  0x71   : > { %2476 = vmatpush3.bf16.msra.mxu1 %v2653_v53 }
  0x72   : > { %2477 = vmatprep.subr.bf16.mxu1 %v2660_v58 }
  0x73   : > { %1825 = vmatpush2.bf16.msra.mxu0 %v2678_v10 }
  0x74   : > { %1644 = vmatmul.mubr.bf16.gmra.mxu1 %v2657_v56  ;;  %1826 = vmatprep.subr.bf16.mxu0 %v2725_v32 }
  0x75   : > { %2478 = vmatpush3.bf16.msra.mxu1 %v2662_v60  ;;  %1651 = vmatprep.mubr.bf16.mxu1 %v2667_v1 }
  0x76   : > { %2479 = vmatprep.subr.bf16.mxu1 %v2664_v62 }
  0x77   : > { %1827 = vmatpush2.bf16.msra.mxu0 %v2687_v17 }
  0x78   : > { %1828 = vmatprep.subr.bf16.mxu0 %v2725_v32  ;;  %v2708_v32 = vld [vmem:[%s2828_s12 + $0x110] ss:$56 sps:$4 sm:$0xff]  }
  0x79   : > { %2480 = vmatpush3.bf16.msra.mxu1 %v2665_v63 }
  0x7a   : > { %2481 = vmatprep.subr.bf16.mxu1 %v2672_v4 }
  0x7b   : > { %1829 = vmatpush2.bf16.msra.mxu0 %v2690_v20 }
  0x7c   : > { %1652 = vmatmul.mubr.bf16.gmra.mxu1 %v2669_v2 }
  0x7d   : > { %2482 = vmatpush3.bf16.msra.mxu1 %v2674_v6  ;;  %1659 = vmatprep.mubr.bf16.mxu1 %v2679_v11 }
  0x7e   : > { %2483 = vmatprep.subr.bf16.mxu1 %v2676_v8  ;;  %1831 = vmatmul.mubr.bf16.vlgmr.msra.gmra.mxu0 %v2694_v23 }
  0x7f   : > { %2226 = vmatprep.mubr.msk.bf16.mxu0 %vm1395_vm0, %v2700_v26 }
  0x81   : > { %2484 = vmatpush3.bf16.msra.mxu1 %v2677_v9 }
  0x82   : > { %2485 = vmatprep.subr.bf16.mxu1 %v2684_v14 }
  0x84   : > { %1660 = vmatmul.mubr.bf16.gmra.mxu1 %v2681_v12 }
  0x85   : > { %2486 = vmatpush3.bf16.msra.mxu1 %v2686_v16  ;;  %1765 = vmatprep.mubr.bf16.mxu1 %v2693_v22 }
  0x86   : > { %2487 = vmatprep.subr.bf16.mxu1 %v2688_v18  ;;  %1839 = vmatmul.mubr.bf16.gmra.mxu0 %v2702_v28 }
  0x87   : > { %2227 = vmatprep.mubr.msk.bf16.mxu0 %vm1395_vm0, %v2706_v30 }
  0x89   : > { %2488 = vmatpush3.bf16.msra.mxu1 %v2689_v19 }
  0x8c   : > { %1766 = vmatmul.mubr.bf16.vlgmr.msra.gmra.mxu1 %v2691_v21 }
  0x8d   : > { %1773 = vmatprep.mubr.bf16.mxu1 %v2697_v25 }
  0x8e   : > { %1847 = vmatmul.mubr.bf16.gmra.mxu0 %v2708_v32 }
  0x8f   : > { %2228 = vmatprep.mubr.msk.bf16.mxu0 %vm1395_vm0, %v2712_v34 }
  0x94   : > { %1774 = vmatmul.mubr.bf16.gmra.mxu1 %v2699_v27 }
  0x95   : > { %1781 = vmatprep.mubr.bf16.mxu1 %v2703_v29 }
  0x96   : > { %1855 = vmatmul.mubr.bf16.gmra.mxu0 %v2714_v36 }
  0x9c   : > { %1782 = vmatmul.mubr.bf16.gmra.mxu1 %v2705_v31 }
  0x9d   : > { %1789 = vmatprep.mubr.bf16.mxu1 %v2709_v33 }
  0xa4   : > { %1790 = vmatmul.mubr.bf16.gmra.mxu1 %v2711_v35 }
  0xec   : > { %v2289_v37 = vpop.f32.mrf.mxu1 }
  0xee   : > { %v2290_v38 = vpop.f32.mrf.mxu1  ;;  %v2369_v50 = vpop.f32.mrf.mxu0 }
  0xef   : > { %v2291_v39 = vadd.f32 %v2290_v38, %v2289_v37 }
  0xf0   : > { %v2292_v40 = vpop.f32.mrf.mxu1  ;;  %v2370_v53 = vpop.f32.mrf.mxu0 }
  0xf1   : > { %v2371_v55 = vadd.f32 %v2370_v53, %v2369_v50 }
  0xf2   : > { %v2293_v41 = vpop.f32.mrf.mxu1  ;;  %v2372_v56 = vpop.f32.mrf.mxu0 }
  0xf3   : > { %v2294_v42 = vadd.f32 %v2293_v41, %v2292_v40 }
  0xf4   : > { %v2295_v43 = vpop.f32.mrf.mxu1  ;;  %v2373_v59 = vpop.f32.mrf.mxu0 }
  0xf5   : > { %v2374_v61 = vadd.f32 %v2373_v59, %v2372_v56 }
  0xf6   : > { %v2296_v44 = vpop.f32.mrf.mxu1  ;;  %v2375_v63 = vpop.f32.mrf.mxu0 }
  0xf7   : > { %v2297_v45 = vadd.f32 %v2296_v44, %v2295_v43 }
  0xf8   : > { %v2298_v46 = vpop.f32.mrf.mxu1  ;;  %v2376_v2 = vpop.f32.mrf.mxu0 }
  0xf9   : > { %v2377_v3 = vadd.f32 %v2376_v2, %v2375_v63 }
  0xfa   : > { %v2299_v47 = vpop.f32.mrf.mxu1  ;;  %v2378_v5 = vpop.f32.mrf.mxu0 }
  0xfb   : > { %v2300_v48 = vadd.f32 %v2299_v47, %v2298_v46 }
  0xfc   : > { %v2301_v49 = vpop.f32.mrf.mxu1  ;;  %v2379_v7 = vpop.f32.mrf.mxu0 }
  0xfd   : > { %v2380_v8 = vadd.f32 %v2379_v7, %v2378_v5 }
  0xfe   : > { %v2302_v51 = vpop.f32.mrf.mxu1  ;;  %v2381_v12 = vpop.f32.mrf.mxu0 }
  0xff   : > { %v2303_v52 = vadd.f32 %v2302_v51, %v2301_v49 }
 0x100   : > { %v2304_v54 = vpop.f32.mrf.mxu1  ;;  %v2382_v15 = vpop.f32.mrf.mxu0 }
 0x101   : > { %v2383_v40 = vadd.f32 %v2382_v15, %v2381_v12 }
 0x102   : > { %v2305_v57 = vpop.f32.mrf.mxu1  ;;  %v3171_v19 = vpop.f32.mrf.mxu0 }
 0x103   : > { %v3163_v58 = vadd.f32 %v2305_v57, %v2304_v54 }
 0x104   : > { %v2307_v60 = vpop.f32.mrf.mxu1  ;;  %v3175_v23 = vpop.f32.mrf.mxu0 }
 0x106   : > { %v2308_v62 = vpop.f32.mrf.mxu1  ;;  %v3177_v28 = vpop.f32.mrf.mxu0 }
 0x107   : > { %v3165_v0 = vadd.f32 %v2308_v62, %v2307_v60 }
 0x108   : > { %v2310_v1 = vpop.f32.mrf.mxu1  ;;  %v3181_v33 = vpop.f32.mrf.mxu0 }
 0x10a   : > { %v2311_v4 = vpop.f32.mrf.mxu1  ;;  %v3185_v37 = vpop.f32.mrf.mxu0 }
 0x10b   : > { %v3167_v6 = vadd.f32 %v2311_v4, %v2310_v1 }
 0x10c   : > { %v2329_v9 = vpop.f32.mrf.mxu1  ;;  %v3189_v43 = vpop.f32.mrf.mxu0 }
 0x10e   : > { %v2330_v10 = vpop.f32.mrf.mxu1  ;;  %v2449_v47 = vpop.f32.mrf.mxu0 }
 0x10f   : > { %v2331_v11 = vadd.f32 %v2330_v10, %v2329_v9 }
 0x110   : > { %v2332_v13 = vpop.f32.mrf.mxu1  ;;  %v2450_v50 = vpop.f32.mrf.mxu0 }
 0x111   : > { %v1508_v14 = vadd.f32 %v2331_v11, %v2291_v39 }
 0x112   : > { %v2333_v16 = vpop.f32.mrf.mxu1  ;;  %v2452_v53 = vpop.f32.mrf.mxu0 }
 0x113   : > { %v2334_v17 = vadd.f32 %v2333_v16, %v2332_v13  ;;  %v3169_v18 = vadd.f32 %v2371_v55, %v1508_v14 }
 0x114   : > { %v2335_v21 = vpop.f32.mrf.mxu1 }
 0x115   : > { %v1511_v20 = vadd.f32 %v2334_v17, %v2294_v42 }
 0x116   : > { %v2336_v24 = vpop.f32.mrf.mxu1 }
 0x117   : > { %v3173_v22 = vadd.f32 %v2374_v61, %v1511_v20  ;;  %v2337_v25 = vadd.f32 %v2336_v24, %v2335_v21 }
 0x118   : > { %v2338_v26 = vpop.f32.mrf.mxu1 }
 0x119   : > { %v1516_v27 = vadd.f32 %v2337_v25, %v2297_v45 }
 0x11a   : > { %v2339_v29 = vpop.f32.mrf.mxu1 }
 0x11b   : > { %v2340_v30 = vadd.f32 %v2339_v29, %v2338_v26  ;;  %v3179_v31 = vadd.f32 %v2377_v3, %v1516_v27  ;;  %v2451_v29 = vadd.f32 %v2450_v50, %v2449_v47 }
 0x11c   : > { %v2341_v34 = vpop.f32.mrf.mxu1 }
 0x11d   : > { %v1519_v32 = vadd.f32 %v2340_v30, %v2300_v48 }
 0x11e   : > { %v2342_v36 = vpop.f32.mrf.mxu1 }
 0x11f   : > { %v3183_v35 = vadd.f32 %v2380_v8, %v1519_v32  ;;  %v2343_v38 = vadd.f32 %v2342_v36, %v2341_v34 }
 0x120   : > { %v3187_v39 = vpop.f32.mrf.mxu1 }
 0x121   : > { %v1524_v41 = vadd.f32 %v2343_v38, %v2303_v52  ;;  %v2453_v52 = vpop.f32.mrf.mxu0 }
 0x122   : > { %v2345_v42 = vpop.f32.mrf.mxu1 }
 0x123   : > { %v3191_v44 = vadd.f32 %v2383_v40, %v1524_v41  ;;  %v2455_v59 = vpop.f32.mrf.mxu0  ;;  %v2346_v50 = vadd.f32 %v2345_v42, %v3187_v39 }
 0x124   : > { %v3193_v45 = vpop.f32.mrf.mxu1 }
 0x125   : > { %v2456_v61 = vpop.f32.mrf.mxu0 }
 0x126   : > { %v3195_v46 = vpop.f32.mrf.mxu1 }
 0x127   : > { %v2458_v63 = vpop.f32.mrf.mxu0 }
 0x128   : > { %v3197_v48 = vpop.f32.mrf.mxu1 }
 0x129   : > { %v2459_v2 = vpop.f32.mrf.mxu0 }
 0x12a   : > { %v3199_v49 = vpop.f32.mrf.mxu1  ;;  %v2460_v39 = vadd.f32 %v2459_v2, %v2458_v63 }
 0x12b   : > { %v2461_v4 = vpop.f32.mrf.mxu0 }
 0x12c   : > { %v2409_v51 = vpop.f32.mrf.mxu1 }
 0x12d   : > { %v2462_v7 = vpop.f32.mrf.mxu0 }
 0x12e   : > { %v2410_v54 = vpop.f32.mrf.mxu1 }
 0x12f   : > { %v3201_v9 = vpop.f32.mrf.mxu0  ;;  %v2411_v16 = vadd.f32 %v2410_v54, %v2409_v51  ;;  %v2454_v54 = vadd.f32 %v2453_v52, %v2452_v53 }
 0x130   : > { %v2412_v55 = vpop.f32.mrf.mxu1 }
 0x131   : > { %v3203_v11 = vpop.f32.mrf.mxu0  ;;  %v1638_v25 = vadd.f32 %v2411_v16, %v3169_v18  ;;  %v2457_v18 = vadd.f32 %v2456_v61, %v2455_v59  ;;  %v1527_v59 = vadd.f32 %v2346_v50, %v3163_v58  ;;  %v2349_v61 = vadd.f32 %v3195_v46, %v3193_v45 }
 0x132   : > { %v2413_v56 = vpop.f32.mrf.mxu1 }
 0x133   : > { %v3207_v13 = vpop.f32.mrf.mxu0  ;;  %v2414_v26 = vadd.f32 %v2413_v56, %v2412_v55  ;;  %v1703_v38 = vadd.f32 %v2451_v29, %v1638_v25 }
 0x134   : > { %v2415_v57 = vpop.f32.mrf.mxu1 }
 0x135   : > { %v3211_v15 = vpop.f32.mrf.mxu0  ;;  %v1641_v34 = vadd.f32 %v2414_v26, %v3173_v22 }
 0x136   : > { %v2416_v60 = vpop.f32.mrf.mxu1  ;;  %3298 = vst [vmem:[#allocation2_spill] sm:$0xff] %v3211_v15 }
 0x137   : > { %v3215_v20 = vpop.f32.mrf.mxu0  ;;  %v2417_v36 = vadd.f32 %v2416_v60, %v2415_v57  ;;  %v1706_v55 = vadd.f32 %v2454_v54, %v1641_v34 }
 0x138   : > { %v2418_v62 = vpop.f32.mrf.mxu1  ;;  %3300 = vst [vmem:[#allocation4_spill] sm:$0xff] %v3215_v20 }
 0x139   : > { %v3219_v24 = vpop.f32.mrf.mxu0 }
 0x13a   : > { %v2419_v1 = vpop.f32.mrf.mxu1  ;;  %3302 = vst [vmem:[#allocation6_spill] sm:$0xff] %v3219_v24  ;;  %v1646_v24 = vadd.f32 %v2417_v36, %v3179_v31  ;;  %v2352_v36 = vadd.f32 %v3199_v49, %v3197_v48 }
 0x13c   : > { %v2421_v3 = vpop.f32.mrf.mxu1  ;;  %v1711_v52 = vadd.f32 %v2457_v18, %v1646_v24 }
 0x13e   : > { %v2422_v5 = vpop.f32.mrf.mxu1  ;;  %v1832_v30 = vpop.f32.mrf.mxu0 }
 0x13f   : > { %v2423_v26 = vadd.f32 %v2422_v5, %v2421_v3 }
 0x140   : > { %v2424_v8 = vpop.f32.mrf.mxu1  ;;  %v1834_v41 = vpop.f32.mrf.mxu0 }
 0x141   : > { %v1654_v46 = vadd.f32 %v2423_v26, %v3191_v44  ;;  %v2389_v44 = vadd.f32 %v3181_v33, %v3177_v28 }
 0x142   : > { %v2425_v10 = vpop.f32.mrf.mxu1 }
 0x143   : > { %v2426_v24 = vadd.f32 %v2425_v10, %v2424_v8 }
 0x144   : > { %v3205_v12 = vpop.f32.mrf.mxu1 }
 0x146   : > { %v3209_v14 = vpop.f32.mrf.mxu1 }
 0x147   : > { %v2429_v10 = vadd.f32 %v3209_v14, %v3205_v12 }
 0x148   : > { %v3213_v17 = vpop.f32.mrf.mxu1 }
 0x149   : > { %3299 = vst [vmem:[#allocation3_spill] sm:$0xff] %v3213_v17  ;;  %v1835_v17 = vpop.f32.mrf.mxu0 }
 0x14a   : > { %v3217_v21 = vpop.f32.mrf.mxu1 }
 0x14b   : > { %3301 = vst [vmem:[#allocation5_spill] sm:$0xff] %v3217_v21  ;;  %v2420_v21 = vadd.f32 %v2419_v1, %v2418_v62  ;;  %v1837_v47 = vpop.f32.mrf.mxu0 }
 0x14c   : > { %v2489_v27 = vpop.f32.mrf.mxu1 }
 0x14d   : > { %v1840_v60 = vpop.f32.mrf.mxu0  ;;  %v1649_v25 = vadd.f32 %v2420_v21, %v3183_v35  ;;  %v2463_v21 = vadd.f32 %v2462_v7, %v2461_v4 }
 0x14e   : > { %v2490_v32 = vpop.f32.mrf.mxu1 }
 0x14f   : > { %v2491_v40 = vadd.f32 %v2490_v32, %v2489_v27  ;;  %v1842_v31 = vpop.f32.mrf.mxu0  ;;  %v1714_v58 = vadd.f32 %v2460_v39, %v1649_v25 }
 0x150   : > { %v2492_v51 = vpop.f32.mrf.mxu1 }
 0x151   : > { %v1768_v20 = vadd.f32 %v2491_v40, %v1703_v38  ;;  %v1719_v38 = vadd.f32 %v2463_v21, %v1654_v46 }
 0x152   : > { %v2493_v15 = vpop.f32.mrf.mxu1 }
 0x153   : > { %v2494_v56 = vadd.f32 %v2493_v15, %v2492_v51  ;;  %v3225_v22 = vadd.f32 %v1832_v30, %v1768_v20  ;;  %v2386_v20 = vadd.f32 %v3175_v23, %v3171_v19  ;;  %v1532_v30 = vadd.f32 %v2349_v61, %v3165_v0 }
 0x154   : > { %v2495_v16 = vpop.f32.mrf.mxu1  ;;  %v2466_v51 = vadd.f32 %v3203_v11, %v3201_v9  ;;  %v3304_v11 = vld [vmem:[#allocation3_spill] sm:$0xff] }
 0x155   : > { %v1771_v57 = vadd.f32 %v2494_v56, %v1706_v55  ;;  %v1876_v15 = vmul.f32 %v3225_v22, %v3225_v22  ;;  %v1592_v32 = vadd.f32 %v2386_v20, %v1527_v59  ;;  %v1597_v54 = vadd.f32 %v2389_v44, %v1532_v30  ;;  %v3306_v20 = vld [vmem:[#allocation4_spill] sm:$0xff] }
 0x156   : > { %v2496_v53 = vpop.f32.mrf.mxu1  ;;  %v1535_v55 = vadd.f32 %v2352_v36, %v3167_v6  ;;  %v2392_v56 = vadd.f32 %v3189_v43, %v3185_v37 }
 0x157   : > { %v3228_v62 = vadd.f32 %v1835_v17, %v1771_v57  ;;  %v2497_v1 = vadd.f32 %v2496_v53, %v2495_v16  ;;  %v1843_v17 = vpop.f32.mrf.mxu0  ;;  %v1657_v8 = vadd.f32 %v2426_v24, %v1592_v32  ;;  %v1662_v50 = vadd.f32 %v2429_v10, %v1597_v54  ;;  %v3303_v16 = vld [vmem:[#allocation2_spill] sm:$0xff] }
 0x158   : > { %v2498_v42 = vpop.f32.mrf.mxu1  ;;  %v2469_v57 = vadd.f32 %v3303_v16, %v3207_v13  ;;  %v1600_v31 = vadd.f32 %v2392_v56, %v1535_v55 }
 0x159   : > { %v1863_v35 = vadd.f32 %v3228_v62, %v3225_v22  ;;  %v1877_v3 = vmul.f32 %v3228_v62, %v3228_v62  ;;  %v1776_v5 = vadd.f32 %v2497_v1, %v1711_v52  ;;  %v1845_v29 = vpop.f32.mrf.mxu0  ;;  %v1722_v47 = vadd.f32 %v2466_v51, %v1657_v8 }
 0x15a   : > { %v2499_v45 = vpop.f32.mrf.mxu1  ;;  %v1727_v39 = vadd.f32 %v2469_v57, %v1662_v50 }
 0x15b   : > { %v1884_v63 = vadd.f32 %v1877_v3, %v1876_v15  ;;  %v3242_v2 = vadd.f32 %v1840_v60, %v1776_v5  ;;  %v2500_v27 = vadd.f32 %v2499_v45, %v2498_v42  ;;  %v1848_v7 = vpop.f32.mrf.mxu0  ;;  %v3305_v60 = vld [vmem:[#allocation5_spill] sm:$0xff] }
 0x15c   : > { %v2501_v34 = vpop.f32.mrf.mxu1  ;;  %v2432_v25 = vadd.f32 %v3305_v60, %v3304_v11 }
 0x15d   : > { %v1864_v19 = vadd.f32 %v1863_v35, %v3242_v2  ;;  %v1878_v23 = vmul.f32 %v3242_v2, %v3242_v2  ;;  %v1779_v4 = vadd.f32 %v2500_v27, %v1714_v58  ;;  %v1850_v49 = vpop.f32.mrf.mxu0  ;;  %v3307_v58 = vld [vmem:[#allocation6_spill] sm:$0xff] }
 0x15e   : > { %v2502_v0 = vpop.f32.mrf.mxu1  ;;  %v1665_v42 = vadd.f32 %v2432_v25, %v1600_v31  ;;  %v2472_v21 = vadd.f32 %v3307_v58, %v3306_v20 }
 0x15f   : > { %v1885_v40 = vadd.f32 %v1884_v63, %v1878_v23  ;;  %v3254_v41 = vadd.f32 %v1843_v17, %v1779_v4  ;;  %v2503_v48 = vadd.f32 %v2502_v0, %v2501_v34  ;;  %v1851_v14 = vpop.f32.mrf.mxu0 }
 0x160   : > { %v2504_v18 = vpop.f32.mrf.mxu1  ;;  %v1730_v29 = vadd.f32 %v2472_v21, %v1665_v42 }
 0x161   : > { %v1865_v28 = vadd.f32 %v1864_v19, %v3254_v41  ;;  %v1879_v33 = vmul.f32 %v3254_v41, %v3254_v41  ;;  %v1784_v12 = vadd.f32 %v2503_v48, %v1719_v38  ;;  %v1853_v26 = vpop.f32.mrf.mxu0 }
 0x162   : > { %v2505_v9 = vpop.f32.mrf.mxu1 }
 0x163   : > { %v1886_v6 = vadd.f32 %v1885_v40, %v1879_v33  ;;  %v3268_v53 = vadd.f32 %v1848_v7, %v1784_v12  ;;  %v2506_v52 = vadd.f32 %v2505_v9, %v2504_v18  ;;  %v1856_v61 = vpop.f32.mrf.mxu0 }
 0x164   : > { %v2507_v1 = vpop.f32.mrf.mxu1 }
 0x165   : > { %v1866_v59 = vadd.f32 %v1865_v28, %v3268_v53  ;;  %v1880_v37 = vmul.f32 %v3268_v53, %v3268_v53  ;;  %v1787_v43 = vadd.f32 %v2506_v52, %v1722_v47  ;;  %v1858_v5 = vpop.f32.mrf.mxu0 }
 0x166   : > { %v2508_v13 = vpop.f32.mrf.mxu1 }
 0x167   : > { %v1887_v15 = vadd.f32 %v1886_v6, %v1880_v37  ;;  %v1852_v35 = vadd.f32 %v1851_v14, %v1787_v43  ;;  %v2509_v3 = vadd.f32 %v2508_v13, %v2507_v1  ;;  %v1859_v63 = vpop.f32.mrf.mxu0  ;;  %v2230_v13 = vld [vmem:[%s3296_s3] ss:$0 sm:$0xff] }
 0x168   : > { %v2510_v17 = vpop.f32.mrf.mxu1 }
 0x169   : > { %v1867_v24 = vadd.f32 %v1866_v59, %v1852_v35  ;;  %v1881_v45 = vmul.f32 %v1852_v35, %v1852_v35  ;;  %v1792_v46 = vadd.f32 %v2509_v3, %v1727_v39  ;;  %v1861_v36 = vpop.f32.mrf.mxu0 }
 0x16a   : > { %v2511_v27 = vpop.f32.mrf.mxu1 }
 0x16b   : > { %v1888_v30 = vadd.f32 %v1887_v15, %v1881_v45  ;;  %v1857_v32 = vadd.f32 %v1856_v61, %v1792_v46  ;;  %v2512_v34 = vadd.f32 %v2511_v27, %v2510_v17 }
 0x16d   : > { %v1868_v19 = vadd.f32 %v1867_v24, %v1857_v32  ;;  %v1882_v23 = vmul.f32 %v1857_v32, %v1857_v32  ;;  %v1795_v4 = vadd.f32 %v2512_v34, %v1730_v29 }
 0x16f   : > { %v1889_v7 = vadd.f32 %v1888_v30, %v1882_v23  ;;  %v1860_v44 = vadd.f32 %v1859_v63, %v1795_v4 }
 0x171   : > { %v1869_v8 = vadd.f32 %v1868_v19, %v1860_v44  ;;  %v1883_v10 = vmul.f32 %v1860_v44, %v1860_v44 }
 0x173   : > { %v1870_v0 = vrot.slane %v1869_v8, 4  ;;  %v1890_v38 = vadd.f32 %v1889_v7, %v1883_v10 }
 0x175   : > { %v1871_v40 = vadd.f32 %v1870_v0, %v1869_v8  ;;  %v1891_v48 = vrot.slane %v1890_v38, 4 }
 0x177   : > { %v1872_v49 = vrot.slane %v1871_v40, 2  ;;  %v1892_v51 = vadd.f32 %v1891_v48, %v1890_v38 }
 0x179   : > { %v1873_v54 = vadd.f32 %v1872_v49, %v1871_v40  ;;  %v1893_v18 = vrot.slane %v1892_v51, 2 }
 0x17b   : > { %v1874_v55 = vrot.slane %v1873_v54, 1  ;;  %v1894_v28 = vadd.f32 %v1893_v18, %v1892_v51 }
 0x17d   : > { %v1875_v33 = vadd.f32 %v1874_v55, %v1873_v54  ;;  %v1895_v12 = vrot.slane %v1894_v28, 1 }
 0x17f   : > { %v1896_v14 = vadd.f32 %v1895_v12, %v1894_v28  ;;  %v1897_v56 = vmul.f32 0.015625, %v1875_v33 }
 0x181   : > { %v1898_v47 = vmul.f32 0.015625, %v1896_v14  ;;  %v1899_v50 = vmul.f32 %v1897_v56, %v1897_v56  ;;  %v1902_v16 = vsub.f32 %v3225_v22, %v1897_v56  ;;  %v1903_v57 = vsub.f32 %v3228_v62, %v1897_v56  ;;  %v2229_v22 = vld [vmem:[%s3295_s2] ss:$0 sm:$0xff] }
 0x182   : > { %v1904_v9 = vsub.f32 %v3242_v2, %v1897_v56  ;;  %v1905_v11 = vsub.f32 %v3254_v41, %v1897_v56  ;;  %v1906_v60 = vsub.f32 %v3268_v53, %v1897_v56  ;;  %v1907_v25 = vsub.f32 %v1852_v35, %v1897_v56 }
 0x183   : > { %v1900_v6 = vsub.f32 %v1898_v47, %v1899_v50  ;;  %v1908_v52 = vsub.f32 %v1857_v32, %v1897_v56  ;;  %v1909_v26 = vsub.f32 %v1860_v44, %v1897_v56 }
 0x185   : > { %v1901_v1 = vmax.f32 %v1900_v6, 0.0 }
 0x187   : > { %v1910_v31 = vadd.f32 1e-05, %v1901_v1 }
 0x189   : > { %2715 = vrsqrt.f32 %v1910_v31 }
 0x196   : > { %v2716_v59 = vpop.eup %2715 }
 0x197   : > { %v1912_v37 = vmul.f32 %v2716_v59, %v1902_v16  ;;  %v1913_v62 = vmul.f32 %v2716_v59, %v1903_v57  ;;  %v1914_v2 = vmul.f32 %v2716_v59, %v1904_v9  ;;  %v1915_v43 = vmul.f32 %v2716_v59, %v1905_v11 }
 0x198   : > { %v1916_v41 = vmul.f32 %v2716_v59, %v1906_v60  ;;  %v1917_v61 = vmul.f32 %v2716_v59, %v1907_v25  ;;  %v1918_v53 = vmul.f32 %v2716_v59, %v1908_v52  ;;  %v1919_v39 = vmul.f32 %v2716_v59, %v1909_v26 }
 0x199   : > { %v1927_v42 = vmul.f32 %v2229_v22, %v1912_v37  ;;  %v1928_v15 = vmul.f32 %v2229_v22, %v1913_v62  ;;  %v1929_v35 = vmul.f32 %v2229_v22, %v1914_v2  ;;  %v1930_v3 = vmul.f32 %v2229_v22, %v1915_v43 }
 0x19a   : > { %v1931_v5 = vmul.f32 %v2229_v22, %v1916_v41  ;;  %v1932_v17 = vmul.f32 %v2229_v22, %v1917_v61  ;;  %v1933_v20 = vmul.f32 %v2229_v22, %v1918_v53  ;;  %v1934_v58 = vmul.f32 %v2229_v22, %v1919_v39 }
 0x19b   : > { %v1942_v21 = vadd.f32 %v2230_v13, %v1927_v42  ;;  %v1943_v24 = vadd.f32 %v2230_v13, %v1928_v15  ;;  %v1944_v45 = vadd.f32 %v2230_v13, %v1929_v35  ;;  %v1945_v46 = vadd.f32 %v2230_v13, %v1930_v3 }
 0x19c   : > { %v1946_v63 = vadd.f32 %v2230_v13, %v1931_v5  ;;  %v1947_v27 = vadd.f32 %v2230_v13, %v1932_v17  ;;  %v1948_v29 = vadd.f32 %v2230_v13, %v1933_v20  ;;  %v1949_v30 = vadd.f32 %v2230_v13, %v1934_v58 }
 0x19d   : > { %v1950_v32 = vmax.f32 %v1942_v21, 0.0  ;;  %v1951_v34 = vmax.f32 %v1943_v24, 0.0  ;;  %v1952_v36 = vmax.f32 %v1944_v45, 0.0  ;;  %v1953_v19 = vmax.f32 %v1945_v46, 0.0 }
 0x19e   : > { %v1954_v23 = vmax.f32 %v1946_v63, 0.0  ;;  %v1955_v4 = vmax.f32 %v1947_v27, 0.0  ;;  %v1956_v7 = vmax.f32 %v1948_v29, 0.0  ;;  %v1957_v44 = vmax.f32 %v1949_v30, 0.0 }
 0x19f   : > { %v2253_v8 = vpack.c.bf16 %v1951_v34, %v1950_v32  ;;  %v2258_v10 = vpack.c.bf16 %v1953_v19, %v1952_v36 }
 0x1a0   : > { %v2263_v0 = vpack.c.bf16 %v1955_v4, %v1954_v23  ;;  %v2268_v38 = vpack.c.bf16 %v1957_v44, %v1956_v7 }
 0x1a1   : > { %2254 = vst [vmem:[%s197_s8] sm:$0xff] %v2253_v8   ;;  %2270 = vst [vmem:[%s197_s8 + $0x8] sm:$0xff] %v2258_v10  }
 0x1a2   : > { %2271 = vst [vmem:[%s197_s8 + $0x10] sm:$0xff] %v2263_v0   ;;  %2272 = vst [vmem:[%s197_s8 + $0x18] sm:$0xff] %v2268_v38  }
 0x1a3 PF: > { %s14_s15 = sadd.s32 1, %s2723_s15  }
 0x1a4   : > { %p11_p4 = scmp.ge.s32.totalorder %s14_s15, 4  }
 0x1a6   :  { %13 = sbr.rel (!%p11_p4) target bundleno = 1 (0x1), region = 66 }

// kernel: mapping_network_forward.11
= control target key start
LH: loop header
LB: loop body
LE: loop exit
PB: predicated region body
PF: predicated region fallthrough
CT: control target
= control target key end

     0   :  { %s5026_s15 = smov 0   ;;  %s6018_s0 = inlined_call_operand.vmem [shape: bf16[2,256,1440], index: 0, kind: input, shape index: {}]   ;;  %s6019_s1 = inlined_call_operand.vmem [shape: bf16[1440,128], index: 1, kind: input, shape index: {}]   ;;  %s6020_s2 = inlined_call_operand.vmem [shape: f32[1,128], index: 2, kind: input, shape index: {}]   ;;  %s6021_s3 = inlined_call_operand.vmem [shape: f32[1,128], index: 3, kind: input, shape index: {}]   ;;  %s6022_s4 = inlined_call_operand.vmem [shape: bf16[2,256,128], index: 4, kind: output, shape index: {}]  }
   0x1 LB: > { %s3572_s16 = sadd.s32 4294967295, %s4998_s15   ;;  %p3576_p0 = scmp.ge.s32.totalorder %s4998_s15, 1  ;;  %s4998_s15 = sphi %s5026_s15, %s14_s15  }
   0x2   : > { %p162_p1 = scmp.lt.s32.totalorder %s4998_s15, 3 }
   0x4   : > { %p163_p2 = pnand %p3576_p0, %p162_p1 }
   0x5   : > { %p188_p3 = scmp.lt.s32.totalorder (!%p163_p2), %s3572_s16, 1 }
   0x6   : > { %166 = sbr.rel (%p163_p2) target bundleno = 706 (0x2c2), region = 36 }
   0xb   : > { %v4612_v0 = vld [vmem:[%s6019_s1 + $0x78] sm:$0xff]   ;;  %v4616_v4 = vld [vmem:[%s6019_s1 + $0x70] sm:$0xff]   ;;  %v4620_v8 = vld [vmem:[%s6019_s1 + $0x68] sm:$0xff]   ;;  %s6024_s16 = smov (!%p188_p3, %s3572_s16), 1  ;;  %vm2055_vm0 = vcmask 261120  }
   0xc   : > { %v4613_v1 = vld [vmem:[%s6019_s1 + $0xf8] sm:$0xff]   ;;  %4042 = vmatprep.subr.bf16.mxu0 %v4612_v0  ;;  %v4617_v5 = vld [vmem:[%s6019_s1 + $0xf0] sm:$0xff]   ;;  %v4621_v9 = vld [vmem:[%s6019_s1 + $0xe8] sm:$0xff]   ;;  %s4602_s21 = smul.u32 1536, %s6024_s16  ;;  %s3914_s17 = sshll.u32 %s6024_s16, 7 }
   0xd   : > { %v4614_v2 = vld [vmem:[%s6019_s1 + $0x38] sm:$0xff]   ;;  %4154 = vmatprep.subr.bf16.mxu1 %v4613_v1  ;;  %v4618_v6 = vld [vmem:[%s6019_s1 + $0x30] sm:$0xff]   ;;  %v4622_v10 = vld [vmem:[%s6019_s1 + $0x28] sm:$0xff]   ;;  %s5997_s20 = scalar_lea.vmem %s6022_s4, %s3914_s17 }
   0xe   : > { %v4615_v3 = vld [vmem:[%s6019_s1 + $0xb8] sm:$0xff]   ;;  %4043 = vmatpush3.bf16.msra.mxu0 %v4614_v2  ;;  %v4619_v7 = vld [vmem:[%s6019_s1 + $0xb0] sm:$0xff]   ;;  %v4623_v11 = vld [vmem:[%s6019_s1 + $0xa8] sm:$0xff]   ;;  %s5134_s6 = scalar_lea.vmem %s6018_s0, %s4602_s21 }
   0xf   : > { %4155 = vmatpush3.bf16.msra.mxu1 %v4615_v3  ;;  %4044 = vmatprep.subr.bf16.mxu0 %v4616_v4  ;;  %v4624_v12 = vld [vmem:[%s6019_s1 + $0x60] sm:$0xff]   ;;  %v4628_v16 = vld [vmem:[%s6019_s1 + $0x58] sm:$0xff]   ;;  %v4632_v20 = vld [vmem:[%s6019_s1 + $0x50] sm:$0xff]  }
  0x10   : > { %4156 = vmatprep.subr.bf16.mxu1 %v4617_v5  ;;  %v4625_v13 = vld [vmem:[%s6019_s1 + $0xe0] sm:$0xff]   ;;  %v4629_v17 = vld [vmem:[%s6019_s1 + $0xd8] sm:$0xff]   ;;  %v4633_v21 = vld [vmem:[%s6019_s1 + $0xd0] sm:$0xff]  }
  0x11   : > { %v4626_v14 = vld [vmem:[%s6019_s1 + $0x20] sm:$0xff]   ;;  %v4630_v18 = vld [vmem:[%s6019_s1 + $0x18] sm:$0xff]   ;;  %v4634_v22 = vld [vmem:[%s6019_s1 + $0x10] sm:$0xff]  }
  0x12   : > { %4045 = vmatpush3.bf16.msra.mxu0 %v4618_v6  ;;  %v4627_v15 = vld [vmem:[%s6019_s1 + $0xa0] sm:$0xff]   ;;  %v4631_v19 = vld [vmem:[%s6019_s1 + $0x98] sm:$0xff]   ;;  %v4635_v23 = vld [vmem:[%s6019_s1 + $0x90] sm:$0xff]  }
  0x13   : > { %4157 = vmatpush3.bf16.msra.mxu1 %v4619_v7  ;;  %4046 = vmatprep.subr.bf16.mxu0 %v4620_v8  ;;  %v4636_v24 = vld [vmem:[%s6019_s1 + $0x48] sm:$0xff]   ;;  %v4640_v28 = vld [vmem:[%s6019_s1 + $0x40] sm:$0xff]   ;;  %v4650_v36 = vld [vmem:[%s6019_s1 + $0x178] sm:$0xff]  }
  0x14   : > { %4158 = vmatprep.subr.bf16.mxu1 %v4621_v9  ;;  %v4637_v25 = vld [vmem:[%s6019_s1 + $0xc8] sm:$0xff]   ;;  %v4641_v29 = vld [vmem:[%s6019_s1 + $0xc0] sm:$0xff]   ;;  %v4651_v37 = vld [vmem:[%s6019_s1 + $0x138] sm:$0xff]  }
  0x15   : > { %v4638_v26 = vld [vmem:[%s6019_s1 + $0x8] sm:$0xff]   ;;  %v4642_v30 = vld [vmem:[%s6019_s1] sm:$0xff]   ;;  %v4652_v38 = vld [vmem:[%s6019_s1 + $0x1f8] sm:$0xff]  }
  0x16   : > { %4047 = vmatpush3.bf16.msra.mxu0 %v4622_v10  ;;  %v4639_v27 = vld [vmem:[%s6019_s1 + $0x88] sm:$0xff]   ;;  %v4643_v31 = vld [vmem:[%s6019_s1 + $0x80] sm:$0xff]   ;;  %v4657_v41 = vld [vmem:[%s6019_s1 + $0x1b8] sm:$0xff]  }
  0x17   : > { %4159 = vmatpush3.bf16.msra.mxu1 %v4623_v11  ;;  %4048 = vmatprep.subr.bf16.mxu0 %v4624_v12  ;;  %v4644_v32 = vld [vmem:[%s5134_s6] ss:$48 sps:$4 sm:$0xff]   ;;  %v4646_v33 = vld [vmem:[%s5134_s6 + $0x4] ss:$48 sps:$4 sm:$0xff]   ;;  %v4647_v34 = vld [vmem:[%s5134_s6 + $0x8] ss:$48 sps:$4 sm:$0xff]  }
  0x18   : > { %4160 = vmatprep.subr.bf16.mxu1 %v4625_v13  ;;  %v4649_v35 = vld [vmem:[%s5134_s6 + $0xc] ss:$48 sps:$4 sm:$0xff]   ;;  %2136 = vmatprep.mubr.bf16.mxu0 %v4646_v33  ;;  %v4653_v39 = vld [vmem:[%s5134_s6 + $0x64] ss:$48 sps:$4 sm:$0xff]   ;;  %v4658_v42 = vld [vmem:[%s5134_s6 + $0x60] ss:$48 sps:$4 sm:$0xff]  }
  0x19   : > { %2297 = vmatprep.mubr.bf16.mxu1 %v4649_v35  ;;  %v4655_v40 = vld [vmem:[%s5134_s6 + $0x6c] ss:$48 sps:$4 sm:$0xff]   ;;  %v4659_v43 = vld [vmem:[%s5134_s6 + $0x68] ss:$48 sps:$4 sm:$0xff]   ;;  %v4660_v44 = vld [vmem:[%s5134_s6 + $0xc4] ss:$48 sps:$4 sm:$0xff]  }
  0x1a   : > { %4049 = vmatpush3.bf16.msra.mxu0 %v4626_v14  ;;  %v4662_v45 = vld [vmem:[%s5134_s6 + $0xcc] ss:$48 sps:$4 sm:$0xff]   ;;  %v4666_v46 = vld [vmem:[%s6019_s1 + $0x170] sm:$0xff]   ;;  %v4665_v50 = vld [vmem:[%s5134_s6 + $0xc8] ss:$48 sps:$4 sm:$0xff]  }
  0x1b   : > { %4161 = vmatpush3.bf16.msra.mxu1 %v4627_v15  ;;  %4050 = vmatprep.subr.bf16.mxu0 %v4628_v16  ;;  %v4667_v47 = vld [vmem:[%s6019_s1 + $0x130] sm:$0xff]   ;;  %v4671_v53 = vld [vmem:[%s5134_s6 + $0x12c] ss:$48 sps:$4 sm:$0xff]   ;;  %v4675_v56 = vld [vmem:[%s5134_s6 + $0x128] ss:$48 sps:$4 sm:$0xff]  }
  0x1c   : > { %4162 = vmatprep.subr.bf16.mxu1 %v4629_v17  ;;  %v4664_v48 = vld [vmem:[%s5134_s6 + $0xc0] ss:$48 sps:$4 sm:$0xff]   ;;  %v4669_v51 = vld [vmem:[%s5134_s6 + $0x124] ss:$48 sps:$4 sm:$0xff]   ;;  %v4682_v55 = vld [vmem:[%s6019_s1 + $0x168] sm:$0xff]  }
  0x1d   : > { %v4668_v49 = vld [vmem:[%s6019_s1 + $0x1f0] sm:$0xff]   ;;  %v4683_v57 = vld [vmem:[%s6019_s1 + $0x128] sm:$0xff]   ;;  %v4698_v1 = vld [vmem:[%s6019_s1 + $0x160] sm:$0xff]  }
  0x1e   : > { %4051 = vmatpush3.bf16.msra.mxu0 %v4630_v18  ;;  %v4673_v52 = vld [vmem:[%s6019_s1 + $0x1b0] sm:$0xff]   ;;  %v4684_v58 = vld [vmem:[%s6019_s1 + $0x1e8] sm:$0xff]   ;;  %v4699_v2 = vld [vmem:[%s6019_s1 + $0x120] sm:$0xff]  }
  0x1f   : > { %4163 = vmatpush3.bf16.msra.mxu1 %v4631_v19  ;;  %4052 = vmatprep.subr.bf16.mxu0 %v4632_v20  ;;  %v4674_v54 = vld [vmem:[%s5134_s6 + $0x120] ss:$48 sps:$4 sm:$0xff]   ;;  %v4676_v59 = vld [vmem:[%s5134_s6 + $0x184] ss:$48 sps:$4 sm:$0xff]   ;;  %v4678_v60 = vld [vmem:[%s5134_s6 + $0x18c] ss:$48 sps:$4 sm:$0xff]  }
  0x20   : > { %4164 = vmatprep.subr.bf16.mxu1 %v4633_v21  ;;  %v4689_v61 = vld [vmem:[%s6019_s1 + $0x1a8] sm:$0xff]   ;;  %v4680_v62 = vld [vmem:[%s5134_s6 + $0x180] ss:$48 sps:$4 sm:$0xff]   ;;  %v4685_v0 = vld [vmem:[%s5134_s6 + $0x1e4] ss:$48 sps:$4 sm:$0xff]  }
  0x21   : > { %v4681_v63 = vld [vmem:[%s5134_s6 + $0x188] ss:$48 sps:$4 sm:$0xff]   ;;  %v4700_v3 = vld [vmem:[%s6019_s1 + $0x1e0] sm:$0xff]   ;;  %v4687_v4 = vld [vmem:[%s5134_s6 + $0x1ec] ss:$48 sps:$4 sm:$0xff]  }
  0x22   : > { %4053 = vmatpush3.bf16.msra.mxu0 %v4634_v22  ;;  %v4705_v5 = vld [vmem:[%s6019_s1 + $0x1a0] sm:$0xff]   ;;  %v4691_v7 = vld [vmem:[%s5134_s6 + $0x1e8] ss:$48 sps:$4 sm:$0xff]   ;;  %v4694_v9 = vld [vmem:[%s5134_s6 + $0x24c] ss:$48 sps:$4 sm:$0xff]  }
  0x23   : > { %4165 = vmatpush3.bf16.msra.mxu1 %v4635_v23  ;;  %4054 = vmatprep.subr.bf16.mxu0 %v4636_v24  ;;  %v4690_v6 = vld [vmem:[%s5134_s6 + $0x1e0] ss:$48 sps:$4 sm:$0xff]   ;;  %v4692_v8 = vld [vmem:[%s5134_s6 + $0x244] ss:$48 sps:$4 sm:$0xff]   ;;  %v4714_v10 = vld [vmem:[%s6019_s1 + $0x158] sm:$0xff]  }
  0x24   : > { %4166 = vmatprep.subr.bf16.mxu1 %v4637_v25  ;;  %v4715_v11 = vld [vmem:[%s6019_s1 + $0x118] sm:$0xff]   ;;  %v4696_v14 = vld [vmem:[%s5134_s6 + $0x240] ss:$48 sps:$4 sm:$0xff]   ;;  %v4701_v16 = vld [vmem:[%s5134_s6 + $0x2a4] ss:$48 sps:$4 sm:$0xff]  }
  0x25   : > { %v4716_v12 = vld [vmem:[%s6019_s1 + $0x1d8] sm:$0xff]   ;;  %v4730_v18 = vld [vmem:[%s6019_s1 + $0x150] sm:$0xff]   ;;  %v4763_v35 = vld [vmem:[%s6019_s1 + $0x100] sm:$0xff]  }
  0x26   : > { %4055 = vmatpush3.bf16.msra.mxu0 %v4638_v26  ;;  %v4721_v13 = vld [vmem:[%s6019_s1 + $0x198] sm:$0xff]   ;;  %v4731_v19 = vld [vmem:[%s6019_s1 + $0x110] sm:$0xff]   ;;  %v4746_v26 = vld [vmem:[%s6019_s1 + $0x148] sm:$0xff]  }
  0x27   : > { %4167 = vmatpush3.bf16.msra.mxu1 %v4639_v27  ;;  %4056 = vmatprep.subr.bf16.mxu0 %v4640_v28  ;;  %v4697_v15 = vld [vmem:[%s5134_s6 + $0x248] ss:$48 sps:$4 sm:$0xff]   ;;  %v4703_v17 = vld [vmem:[%s5134_s6 + $0x2ac] ss:$48 sps:$4 sm:$0xff]   ;;  %v4732_v20 = vld [vmem:[%s6019_s1 + $0x1d0] sm:$0xff]  }
  0x28   : > { %4168 = vmatprep.subr.bf16.mxu1 %v4641_v29  ;;  %v4706_v21 = vld [vmem:[%s5134_s6 + $0x2a0] ss:$48 sps:$4 sm:$0xff]   ;;  %v4707_v23 = vld [vmem:[%s5134_s6 + $0x2a8] ss:$48 sps:$4 sm:$0xff]   ;;  %v4708_v24 = vld [vmem:[%s5134_s6 + $0x304] ss:$48 sps:$4 sm:$0xff]  }
  0x29   : > { %v4737_v22 = vld [vmem:[%s6019_s1 + $0x190] sm:$0xff]   ;;  %v4710_v25 = vld [vmem:[%s5134_s6 + $0x30c] ss:$48 sps:$4 sm:$0xff]  }
  0x2a   : > { %4057 = vmatpush3.bf16.msra.mxu0 %v4642_v30  ;;  %v4747_v27 = vld [vmem:[%s6019_s1 + $0x108] sm:$0xff]   ;;  %v4712_v29 = vld [vmem:[%s5134_s6 + $0x300] ss:$48 sps:$4 sm:$0xff]  }
  0x2b   : > { %4169 = vmatpush3.bf16.msra.mxu1 %v4643_v31  ;;  %4266 = vmatprep.subr.bf16.mxu0 %v4650_v36  ;;  %v4748_v28 = vld [vmem:[%s6019_s1 + $0x1c8] sm:$0xff]   ;;  %v4722_v36 = vld [vmem:[%s5134_s6 + $0x360] ss:$48 sps:$4 sm:$0xff]  }
  0x2c   : > { %4378 = vmatprep.subr.bf16.mxu1 %v4652_v38  ;;  %v4713_v30 = vld [vmem:[%s5134_s6 + $0x308] ss:$48 sps:$4 sm:$0xff]   ;;  %v4719_v33 = vld [vmem:[%s5134_s6 + $0x36c] ss:$48 sps:$4 sm:$0xff]  }
  0x2d   : > { %2137 = vmatmul.mubr.bf16.vlgmr.msra.gmra.mxu0 %v4644_v32  ;;  %v4753_v31 = vld [vmem:[%s6019_s1 + $0x188] sm:$0xff]   ;;  %v4717_v32 = vld [vmem:[%s5134_s6 + $0x364] ss:$48 sps:$4 sm:$0xff]  }
  0x2e   : > { %2298 = vmatmul.mubr.bf16.vlgmr.msra.gmra.mxu1 %v4647_v34  ;;  %4267 = vmatpush3.bf16.msra.mxu0 %v4651_v37  ;;  %v4762_v34 = vld [vmem:[%s6019_s1 + $0x140] sm:$0xff]   ;;  %v4723_v38 = vld [vmem:[%s5134_s6 + $0x368] ss:$48 sps:$4 sm:$0xff]  }
  0x2f   : > { %2144 = vmatprep.mubr.bf16.mxu0 %v4653_v39  ;;  %2305 = vmatprep.mubr.bf16.mxu1 %v4655_v40  ;;  %v4764_v37 = vld [vmem:[%s6019_s1 + $0x1c0] sm:$0xff]  }
  0x30   : > { %4379 = vmatpush3.bf16.msra.mxu1 %v4657_v41  ;;  %4268 = vmatprep.subr.bf16.mxu0 %v4666_v46  ;;  %v4724_v39 = vld [vmem:[%s5134_s6 + $0x3c4] ss:$48 sps:$4 sm:$0xff]   ;;  %v4726_v41 = vld [vmem:[%s5134_s6 + $0x3cc] ss:$48 sps:$4 sm:$0xff]  }
  0x31   : > { %4380 = vmatprep.subr.bf16.mxu1 %v4668_v49  ;;  %v4769_v40 = vld [vmem:[%s6019_s1 + $0x180] sm:$0xff]   ;;  %v4739_v49 = vld [vmem:[%s5134_s6 + $0x428] ss:$48 sps:$4 sm:$0xff]  }
  0x32   : > { %4269 = vmatpush3.bf16.msra.mxu0 %v4667_v47  ;;  %v4733_v46 = vld [vmem:[%s5134_s6 + $0x424] ss:$48 sps:$4 sm:$0xff]   ;;  %v4735_v47 = vld [vmem:[%s5134_s6 + $0x42c] ss:$48 sps:$4 sm:$0xff]  }
  0x33   : > { %4270 = vmatprep.subr.bf16.mxu0 %v4682_v55  ;;  %v4751_v55 = vld [vmem:[%s5134_s6 + $0x4ec] ss:$48 sps:$4 sm:$0xff]  }
  0x34   : > { %4381 = vmatpush3.bf16.msra.mxu1 %v4673_v52  ;;  %v4744_v52 = vld [vmem:[%s5134_s6 + $0x480] ss:$48 sps:$4 sm:$0xff]  }
  0x35   : > { %2145 = vmatmul.mubr.bf16.gmra.mxu0 %v4658_v42  ;;  %4382 = vmatprep.subr.bf16.mxu1 %v4684_v58  ;;  %v5000_v42 = vmov 0   ;;  %v4756_v58 = vld [vmem:[%s5134_s6 + $0x544] ss:$48 sps:$4 sm:$0xff]  }
  0x36   : > { %2306 = vmatmul.mubr.bf16.gmra.mxu1 %v4659_v43  ;;  %2152 = vmatprep.mubr.bf16.mxu0 %v4660_v44  ;;  %v4778_v43 = vld [vmem:[%s6019_s1 + $0x278] sm:$0xff]   ;;  %v4728_v44 = vld [vmem:[%s5134_s6 + $0x3c0] ss:$48 sps:$4 sm:$0xff]  }
  0x37   : > { %2313 = vmatprep.mubr.bf16.mxu1 %v4662_v45  ;;  %4271 = vmatpush3.bf16.msra.mxu0 %v4683_v57  ;;  %v4729_v45 = vld [vmem:[%s5134_s6 + $0x3c8] ss:$48 sps:$4 sm:$0xff]  }
  0x38   : > { %4383 = vmatpush3.bf16.msra.mxu1 %v4689_v61  ;;  %4272 = vmatprep.subr.bf16.mxu0 %v4698_v1  ;;  %v4755_v57 = vld [vmem:[%s5134_s6 + $0x4e8] ss:$48 sps:$4 sm:$0xff]  }
  0x39   : > { %4384 = vmatprep.subr.bf16.mxu1 %v4700_v3  ;;  %v4761_v61 = vld [vmem:[%s5134_s6 + $0x548] ss:$48 sps:$4 sm:$0xff]   ;;  %v4777_v3 = vld [vmem:[%s5134_s6 + $0x1c] ss:$48 sps:$4 sm:$0xff]  }
  0x3a   : > { %v4771_v1 = vld [vmem:[%s5134_s6 + $0x5a8] ss:$48 sps:$4 sm:$0xff]  }
  0x3b   : > { %4273 = vmatpush3.bf16.msra.mxu0 %v4699_v2  ;;  %v4774_v2 = vld [vmem:[%s5134_s6 + $0x14] ss:$48 sps:$4 sm:$0xff]  }
  0x3c   : > { %4385 = vmatpush3.bf16.msra.mxu1 %v4705_v5  ;;  %4274 = vmatprep.subr.bf16.mxu0 %v4714_v10  ;;  %v4775_v5 = vld [vmem:[%s5134_s6 + $0x18] ss:$48 sps:$4 sm:$0xff]   ;;  %v4792_v10 = vld [vmem:[%s6019_s1 + $0x270] sm:$0xff]  }
  0x3d   : > { %2153 = vmatmul.mubr.bf16.gmra.mxu0 %v4664_v48  ;;  %4386 = vmatprep.subr.bf16.mxu1 %v4716_v12  ;;  %v4738_v48 = vld [vmem:[%s5134_s6 + $0x420] ss:$48 sps:$4 sm:$0xff]  }
  0x3e   : > { %2314 = vmatmul.mubr.bf16.gmra.mxu1 %v4665_v50  ;;  %2160 = vmatprep.mubr.bf16.mxu0 %v4669_v51  ;;  %v4740_v50 = vld [vmem:[%s5134_s6 + $0x484] ss:$48 sps:$4 sm:$0xff]   ;;  %v4742_v51 = vld [vmem:[%s5134_s6 + $0x48c] ss:$48 sps:$4 sm:$0xff]  }
  0x3f   : > { %2321 = vmatprep.mubr.bf16.mxu1 %v4671_v53  ;;  %4275 = vmatpush3.bf16.msra.mxu0 %v4715_v11  ;;  %v4745_v53 = vld [vmem:[%s5134_s6 + $0x488] ss:$48 sps:$4 sm:$0xff]   ;;  %v4794_v11 = vld [vmem:[%s6019_s1 + $0x230] sm:$0xff]  }
  0x40   : > { %4387 = vmatpush3.bf16.msra.mxu1 %v4721_v13  ;;  %4276 = vmatprep.subr.bf16.mxu0 %v4730_v18  ;;  %v4795_v12 = vld [vmem:[%s6019_s1 + $0x2b0] sm:$0xff]   ;;  %v4809_v18 = vld [vmem:[%s6019_s1 + $0x228] sm:$0xff]  }
  0x41   : > { %4388 = vmatprep.subr.bf16.mxu1 %v4732_v20  ;;  %v4783_v13 = vld [vmem:[%s5134_s6 + $0x70] ss:$48 sps:$4 sm:$0xff]  }
  0x42   : > { %v4823_v20 = vld [vmem:[%s6019_s1 + $0x260] sm:$0xff]  }
  0x43   : > { %4277 = vmatpush3.bf16.msra.mxu0 %v4731_v19  ;;  %v4810_v19 = vld [vmem:[%s6019_s1 + $0x2a8] sm:$0xff]  }
  0x44   : > { %4389 = vmatpush3.bf16.msra.mxu1 %v4737_v22  ;;  %4278 = vmatprep.subr.bf16.mxu0 %v4746_v26  ;;  %v4789_v22 = vld [vmem:[%s5134_s6 + $0xd0] ss:$48 sps:$4 sm:$0xff]   ;;  %v4796_v26 = vld [vmem:[%s5134_s6 + $0x134] ss:$48 sps:$4 sm:$0xff]  }
  0x45   : > { %2161 = vmatmul.mubr.bf16.gmra.mxu0 %v4674_v54  ;;  %4390 = vmatprep.subr.bf16.mxu1 %v4748_v28  ;;  %v4749_v54 = vld [vmem:[%s5134_s6 + $0x4e4] ss:$48 sps:$4 sm:$0xff]   ;;  %v4832_v28 = vld [vmem:[%s6019_s1 + $0x298] sm:$0xff]  }
  0x46   : > { %2322 = vmatmul.mubr.bf16.gmra.mxu1 %v4675_v56  ;;  %2168 = vmatprep.mubr.bf16.mxu0 %v4676_v59  ;;  %v4754_v56 = vld [vmem:[%s5134_s6 + $0x4e0] ss:$48 sps:$4 sm:$0xff]   ;;  %v4758_v59 = vld [vmem:[%s5134_s6 + $0x54c] ss:$48 sps:$4 sm:$0xff]  }
  0x47   : > { %2329 = vmatprep.mubr.bf16.mxu1 %v4678_v60  ;;  %4279 = vmatpush3.bf16.msra.mxu0 %v4747_v27  ;;  %v4760_v60 = vld [vmem:[%s5134_s6 + $0x540] ss:$48 sps:$4 sm:$0xff]   ;;  %v4799_v27 = vld [vmem:[%s5134_s6 + $0x13c] ss:$48 sps:$4 sm:$0xff]  }
  0x48   : > { %4391 = vmatpush3.bf16.msra.mxu1 %v4753_v31  ;;  %4280 = vmatprep.subr.bf16.mxu0 %v4762_v34  ;;  %v4843_v31 = vld [vmem:[%s6019_s1 + $0x290] sm:$0xff]   ;;  %v4801_v34 = vld [vmem:[%s5134_s6 + $0x138] ss:$48 sps:$4 sm:$0xff]  }
  0x49   : > { %4392 = vmatprep.subr.bf16.mxu1 %v4764_v37  ;;  %v4805_v37 = vld [vmem:[%s5134_s6 + $0x19c] ss:$48 sps:$4 sm:$0xff]  }
  0x4b   : > { %4281 = vmatpush3.bf16.msra.mxu0 %v4763_v35  ;;  %v4802_v35 = vld [vmem:[%s5134_s6 + $0x194] ss:$48 sps:$4 sm:$0xff]  }
  0x4c   : > { %4393 = vmatpush3.bf16.msra.mxu1 %v4769_v40  ;;  %4490 = vmatprep.subr.bf16.mxu0 %v4778_v43  ;;  %v4885_v40 = vld [vmem:[%s6019_s1 + $0x240] sm:$0xff]  }
  0x4d   : > { %2169 = vmatmul.mubr.bf16.gmra.mxu0 %v4680_v62  ;;  %2909 = vmatprep.subr.bf16.mxu1 %v5000_v42  ;;  %v4765_v62 = vld [vmem:[%s5134_s6 + $0x5a4] ss:$48 sps:$4 sm:$0xff]  }
  0x4e   : > { %2330 = vmatmul.mubr.bf16.gmra.mxu1 %v4681_v63  ;;  %2176 = vmatprep.mubr.bf16.mxu0 %v4685_v0  ;;  %v4767_v63 = vld [vmem:[%s5134_s6 + $0x5ac] ss:$48 sps:$4 sm:$0xff]   ;;  %v4770_v0 = vld [vmem:[%s5134_s6 + $0x5a0] ss:$48 sps:$4 sm:$0xff]  }
  0x4f   : > { %2337 = vmatprep.mubr.bf16.mxu1 %v4687_v4  ;;  %v4772_v4 = vld [vmem:[%s5134_s6 + $0x10] ss:$48 sps:$4 sm:$0xff]  }
  0x50   : > { %v4871_v43 = vld [vmem:[%s6019_s1 + $0x280] sm:$0xff]  }
  0x55   : > { %2177 = vmatmul.mubr.bf16.gmra.mxu0 %v4690_v6  ;;  %v4779_v6 = vld [vmem:[%s6019_s1 + $0x238] sm:$0xff]  }
  0x56   : > { %2338 = vmatmul.mubr.bf16.gmra.mxu1 %v4691_v7  ;;  %2184 = vmatprep.mubr.bf16.mxu0 %v4692_v8  ;;  %v4780_v7 = vld [vmem:[%s5134_s6 + $0x74] ss:$48 sps:$4 sm:$0xff]   ;;  %v4782_v8 = vld [vmem:[%s6019_s1 + $0x2b8] sm:$0xff]  }
  0x57   : > { %2345 = vmatprep.mubr.bf16.mxu1 %v4694_v9  ;;  %v4784_v9 = vld [vmem:[%s5134_s6 + $0x7c] ss:$48 sps:$4 sm:$0xff]  }
  0x5d   : > { %2185 = vmatmul.mubr.bf16.gmra.mxu0 %v4696_v14  ;;  %v4807_v14 = vld [vmem:[%s6019_s1 + $0x268] sm:$0xff]  }
  0x5e   : > { %2346 = vmatmul.mubr.bf16.gmra.mxu1 %v4697_v15  ;;  %2192 = vmatprep.mubr.bf16.mxu0 %v4701_v16  ;;  %v4786_v15 = vld [vmem:[%s5134_s6 + $0x78] ss:$48 sps:$4 sm:$0xff]   ;;  %v4787_v16 = vld [vmem:[%s5134_s6 + $0xd4] ss:$48 sps:$4 sm:$0xff]  }
  0x5f   : > { %2353 = vmatprep.mubr.bf16.mxu1 %v4703_v17  ;;  %v4790_v17 = vld [vmem:[%s5134_s6 + $0xdc] ss:$48 sps:$4 sm:$0xff]  }
  0x65   : > { %2193 = vmatmul.mubr.bf16.gmra.mxu0 %v4706_v21  ;;  %v4817_v21 = vld [vmem:[%s6019_s1 + $0x2a0] sm:$0xff]  }
  0x66   : > { %2354 = vmatmul.mubr.bf16.gmra.mxu1 %v4707_v23  ;;  %2200 = vmatprep.mubr.bf16.mxu0 %v4708_v24  ;;  %v4825_v23 = vld [vmem:[%s6019_s1 + $0x220] sm:$0xff]   ;;  %v4838_v24 = vld [vmem:[%s6019_s1 + $0x258] sm:$0xff]  }
  0x67   : > { %2361 = vmatprep.mubr.bf16.mxu1 %v4710_v25  ;;  %v4793_v25 = vld [vmem:[%s5134_s6 + $0xd8] ss:$48 sps:$4 sm:$0xff]  }
  0x6d   : > { %2201 = vmatmul.mubr.bf16.gmra.mxu0 %v4712_v29  ;;  %v4840_v29 = vld [vmem:[%s6019_s1 + $0x218] sm:$0xff]  }
  0x6e   : > { %2362 = vmatmul.mubr.bf16.gmra.mxu1 %v4713_v30  ;;  %2208 = vmatprep.mubr.bf16.mxu0 %v4717_v32  ;;  %v4853_v30 = vld [vmem:[%s6019_s1 + $0x250] sm:$0xff]  }
  0x6f   : > { %2369 = vmatprep.mubr.bf16.mxu1 %v4719_v33  ;;  %v4798_v32 = vld [vmem:[%s5134_s6 + $0x130] ss:$48 sps:$4 sm:$0xff]  }
  0x70   : > { %v4855_v33 = vld [vmem:[%s6019_s1 + $0x210] sm:$0xff]  }
  0x75   : > { %2209 = vmatmul.mubr.bf16.gmra.mxu0 %v4722_v36  ;;  %v4869_v36 = vld [vmem:[%s6019_s1 + $0x248] sm:$0xff]  }
  0x76   : > { %2370 = vmatmul.mubr.bf16.gmra.mxu1 %v4723_v38  ;;  %2216 = vmatprep.mubr.bf16.mxu0 %v4724_v39  ;;  %v4870_v38 = vld [vmem:[%s6019_s1 + $0x208] sm:$0xff]  }
  0x77   : > { %2377 = vmatprep.mubr.bf16.mxu1 %v4726_v41  ;;  %v4856_v39 = vld [vmem:[%s6019_s1 + $0x288] sm:$0xff]   ;;  %v4886_v41 = vld [vmem:[%s6019_s1 + $0x200] sm:$0xff]  }
  0x7d   : > { %2217 = vmatmul.mubr.bf16.gmra.mxu0 %v4728_v44  ;;  %v4804_v44 = vld [vmem:[%s5134_s6 + $0x190] ss:$48 sps:$4 sm:$0xff]  }
  0x7e   : > { %2378 = vmatmul.mubr.bf16.gmra.mxu1 %v4729_v45  ;;  %2224 = vmatprep.mubr.bf16.mxu0 %v4733_v46  ;;  %v4808_v45 = vld [vmem:[%s5134_s6 + $0x198] ss:$48 sps:$4 sm:$0xff]   ;;  %v4811_v46 = vld [vmem:[%s5134_s6 + $0x1f4] ss:$48 sps:$4 sm:$0xff]  }
  0x7f   : > { %2385 = vmatprep.mubr.bf16.mxu1 %v4735_v47  ;;  %v4814_v47 = vld [vmem:[%s5134_s6 + $0x1fc] ss:$48 sps:$4 sm:$0xff]  }
  0x85   : > { %2225 = vmatmul.mubr.bf16.gmra.mxu0 %v4738_v48  ;;  %v4878_v48 = vld [vmem:[%s6019_s1 + $0x2c8] sm:$0xff]  }
  0x86   : > { %2386 = vmatmul.mubr.bf16.gmra.mxu1 %v4739_v49  ;;  %2232 = vmatprep.mubr.bf16.mxu0 %v4740_v50  ;;  %v4893_v49 = vld [vmem:[%s6019_s1 + $0x2c0] sm:$0xff]  }
  0x87   : > { %2393 = vmatprep.mubr.bf16.mxu1 %v4742_v51  ;;  %v4813_v50 = vld [vmem:[%s5134_s6 + $0x1f0] ss:$48 sps:$4 sm:$0xff]   ;;  %v4816_v51 = vld [vmem:[%s5134_s6 + $0x1f8] ss:$48 sps:$4 sm:$0xff]  }
  0x8d   : > { %2233 = vmatmul.mubr.bf16.gmra.mxu0 %v4744_v52  ;;  %v4818_v52 = vld [vmem:[%s5134_s6 + $0x254] ss:$48 sps:$4 sm:$0xff]  }
  0x8e   : > { %2394 = vmatmul.mubr.bf16.gmra.mxu1 %v4745_v53  ;;  %2240 = vmatprep.mubr.bf16.mxu0 %v4749_v54  ;;  %v4821_v53 = vld [vmem:[%s5134_s6 + $0x25c] ss:$48 sps:$4 sm:$0xff]   ;;  %v4820_v54 = vld [vmem:[%s5134_s6 + $0x250] ss:$48 sps:$4 sm:$0xff]  }
  0x8f   : > { %2401 = vmatprep.mubr.bf16.mxu1 %v4751_v55  ;;  %v4824_v55 = vld [vmem:[%s5134_s6 + $0x258] ss:$48 sps:$4 sm:$0xff]  }
  0x95   : > { %2241 = vmatmul.mubr.bf16.gmra.mxu0 %v4754_v56  ;;  %v4826_v56 = vld [vmem:[%s5134_s6 + $0x2b4] ss:$48 sps:$4 sm:$0xff]  }
  0x96   : > { %2402 = vmatmul.mubr.bf16.gmra.mxu1 %v4755_v57  ;;  %2248 = vmatprep.mubr.bf16.mxu0 %v4756_v58  ;;  %v4829_v57 = vld [vmem:[%s5134_s6 + $0x2bc] ss:$48 sps:$4 sm:$0xff]   ;;  %v4831_v58 = vld [vmem:[%s5134_s6 + $0x2b8] ss:$48 sps:$4 sm:$0xff]  }
  0x97   : > { %2409 = vmatprep.mubr.bf16.mxu1 %v4758_v59  ;;  %v4833_v59 = vld [vmem:[%s5134_s6 + $0x314] ss:$48 sps:$4 sm:$0xff]  }
  0x9d   : > { %2249 = vmatmul.mubr.bf16.gmra.mxu0 %v4760_v60  ;;  %v4836_v60 = vld [vmem:[%s5134_s6 + $0x31c] ss:$48 sps:$4 sm:$0xff]  }
  0x9e   : > { %2410 = vmatmul.mubr.bf16.gmra.mxu1 %v4761_v61  ;;  %2256 = vmatprep.mubr.bf16.mxu0 %v4765_v62  ;;  %v4835_v61 = vld [vmem:[%s5134_s6 + $0x310] ss:$48 sps:$4 sm:$0xff]   ;;  %v4839_v62 = vld [vmem:[%s5134_s6 + $0x318] ss:$48 sps:$4 sm:$0xff]  }
  0x9f   : > { %2417 = vmatprep.mubr.bf16.mxu1 %v4767_v63  ;;  %v4841_v63 = vld [vmem:[%s5134_s6 + $0x374] ss:$48 sps:$4 sm:$0xff]  }
  0xa5   : > { %2257 = vmatmul.mubr.bf16.gmra.mxu0 %v4770_v0  ;;  %v4845_v0 = vld [vmem:[%s5134_s6 + $0x37c] ss:$48 sps:$4 sm:$0xff]  }
  0xa6   : > { %2418 = vmatmul.mubr.bf16.gmra.mxu1 %v4771_v1  ;;  %2458 = vmatprep.mubr.bf16.mxu0 %v4774_v2 }
  0xa7   : > { %2619 = vmatprep.mubr.bf16.mxu1 %v4777_v3 }
  0xad   : > { %2459 = vmatmul.mubr.bf16.vlgmr.msra.gmra.mxu0 %v4772_v4 }
  0xae   : > { %2620 = vmatmul.mubr.bf16.vlgmr.msra.gmra.mxu1 %v4775_v5  ;;  %4491 = vmatpush3.bf16.msra.mxu0 %v4779_v6 }
  0xaf   : > { %2466 = vmatprep.mubr.bf16.mxu0 %v4780_v7  ;;  %2910 = vmatpush1.bf16.msra.mxu1 %v4782_v8  ;;  %v4844_v8 = vld [vmem:[%s5134_s6 + $0x370] ss:$48 sps:$4 sm:$0xff]  }
  0xb0   : > { %2627 = vmatprep.mubr.bf16.mxu1 %v4784_v9  ;;  %4492 = vmatprep.subr.bf16.mxu0 %v4792_v10  ;;  %v4847_v10 = vld [vmem:[%s5134_s6 + $0x378] ss:$48 sps:$4 sm:$0xff]  }
  0xb1   : > { %2911 = vmatprep.subr.bf16.mxu1 %v5000_v42 }
  0xb2   : > { %4493 = vmatpush3.bf16.msra.mxu0 %v4794_v11  ;;  %v4848_v11 = vld [vmem:[%s5134_s6 + $0x3d4] ss:$48 sps:$4 sm:$0xff]  }
  0xb3   : > { %2912 = vmatpush1.bf16.msra.mxu1 %v4795_v12  ;;  %4494 = vmatprep.subr.bf16.mxu0 %v4807_v14  ;;  %v4851_v14 = vld [vmem:[%s5134_s6 + $0x3dc] ss:$48 sps:$4 sm:$0xff]  }
  0xb4   : > { %2913 = vmatprep.subr.bf16.mxu1 %v5000_v42 }
  0xb5   : > { %2467 = vmatmul.mubr.bf16.gmra.mxu0 %v4783_v13 }
  0xb6   : > { %2628 = vmatmul.mubr.bf16.gmra.mxu1 %v4786_v15  ;;  %2474 = vmatprep.mubr.bf16.mxu0 %v4787_v16 }
  0xb7   : > { %2635 = vmatprep.mubr.bf16.mxu1 %v4790_v17  ;;  %4495 = vmatpush3.bf16.msra.mxu0 %v4809_v18 }
  0xb8   : > { %2914 = vmatpush1.bf16.msra.mxu1 %v4810_v19  ;;  %4496 = vmatprep.subr.bf16.mxu0 %v4823_v20 }
  0xb9   : > { %2915 = vmatprep.subr.bf16.mxu1 %v5000_v42 }
  0xbb   : > { %4497 = vmatpush3.bf16.msra.mxu0 %v4825_v23 }
  0xbc   : > { %2916 = vmatpush1.bf16.msra.mxu1 %v4817_v21  ;;  %4498 = vmatprep.subr.bf16.mxu0 %v4838_v24 }
  0xbd   : > { %2475 = vmatmul.mubr.bf16.gmra.mxu0 %v4789_v22  ;;  %2917 = vmatprep.subr.bf16.mxu1 %v5000_v42 }
  0xbe   : > { %2636 = vmatmul.mubr.bf16.gmra.mxu1 %v4793_v25  ;;  %2482 = vmatprep.mubr.bf16.mxu0 %v4796_v26  ;;  %v4850_v26 = vld [vmem:[%s5134_s6 + $0x3d0] ss:$48 sps:$4 sm:$0xff]  }
  0xbf   : > { %2643 = vmatprep.mubr.bf16.mxu1 %v4799_v27  ;;  %4499 = vmatpush3.bf16.msra.mxu0 %v4840_v29  ;;  %v4857_v29 = vld [vmem:[%s5134_s6 + $0x434] ss:$48 sps:$4 sm:$0xff]  }
  0xc0   : > { %2918 = vmatpush1.bf16.msra.mxu1 %v4832_v28  ;;  %4500 = vmatprep.subr.bf16.mxu0 %v4853_v30  ;;  %v4854_v28 = vld [vmem:[%s5134_s6 + $0x3d8] ss:$48 sps:$4 sm:$0xff]  }
  0xc1   : > { %2919 = vmatprep.subr.bf16.mxu1 %v5000_v42 }
  0xc3   : > { %4501 = vmatpush3.bf16.msra.mxu0 %v4855_v33 }
  0xc4   : > { %2920 = vmatpush1.bf16.msra.mxu1 %v4843_v31  ;;  %4502 = vmatprep.subr.bf16.mxu0 %v4869_v36 }
  0xc5   : > { %2483 = vmatmul.mubr.bf16.gmra.mxu0 %v4798_v32  ;;  %2921 = vmatprep.subr.bf16.mxu1 %v5000_v42  ;;  %v4860_v32 = vld [vmem:[%s5134_s6 + $0x43c] ss:$48 sps:$4 sm:$0xff]  }
  0xc6   : > { %2644 = vmatmul.mubr.bf16.gmra.mxu1 %v4801_v34  ;;  %2490 = vmatprep.mubr.bf16.mxu0 %v4802_v35 }
  0xc7   : > { %2651 = vmatprep.mubr.bf16.mxu1 %v4805_v37  ;;  %4503 = vmatpush3.bf16.msra.mxu0 %v4870_v38 }
  0xc8   : > { %2922 = vmatpush1.bf16.msra.mxu1 %v4856_v39  ;;  %4504 = vmatprep.subr.bf16.mxu0 %v4885_v40 }
  0xc9   : > { %2923 = vmatprep.subr.bf16.mxu1 %v5000_v42 }
  0xcb   : > { %4505 = vmatpush3.bf16.msra.mxu0 %v4886_v41 }
  0xcc   : > { %2924 = vmatpush1.bf16.msra.mxu1 %v4871_v43 }
  0xcd   : > { %2491 = vmatmul.mubr.bf16.gmra.mxu0 %v4804_v44  ;;  %2937 = vmatprep.subr.bf16.mxu1 %v5000_v42 }
  0xce   : > { %2652 = vmatmul.mubr.bf16.gmra.mxu1 %v4808_v45  ;;  %2498 = vmatprep.mubr.bf16.mxu0 %v4811_v46  ;;  %v4859_v45 = vld [vmem:[%s5134_s6 + $0x430] ss:$48 sps:$4 sm:$0xff]  }
  0xcf   : > { %2659 = vmatprep.mubr.bf16.mxu1 %v4814_v47  ;;  %v4862_v47 = vld [vmem:[%s5134_s6 + $0x438] ss:$48 sps:$4 sm:$0xff]  }
  0xd0   : > { %2938 = vmatpush2.bf16.msra.mxu1 %v4878_v48  ;;  %v4865_v48 = vld [vmem:[%s5134_s6 + $0x494] ss:$48 sps:$4 sm:$0xff]  }
  0xd1   : > { %2939 = vmatprep.subr.bf16.mxu1 %v5000_v42  ;;  %v4828_v42 = vld [vmem:[%s5134_s6 + $0x2b0] ss:$48 sps:$4 sm:$0xff]  }
  0xd4   : > { %2940 = vmatpush2.bf16.msra.mxu1 %v4893_v49 }
  0xd5   : > { %2499 = vmatmul.mubr.bf16.gmra.mxu0 %v4813_v50 }
  0xd6   : > { %2660 = vmatmul.mubr.bf16.gmra.mxu1 %v4816_v51  ;;  %2506 = vmatprep.mubr.bf16.mxu0 %v4818_v52  ;;  %v4868_v51 = vld [vmem:[%s5134_s6 + $0x49c] ss:$48 sps:$4 sm:$0xff]  }
  0xd7   : > { %2667 = vmatprep.mubr.bf16.mxu1 %v4821_v53 }
  0xdd   : > { %2507 = vmatmul.mubr.bf16.gmra.mxu0 %v4820_v54 }
  0xde   : > { %2668 = vmatmul.mubr.bf16.gmra.mxu1 %v4824_v55  ;;  %2514 = vmatprep.mubr.bf16.mxu0 %v4826_v56 }
  0xdf   : > { %2675 = vmatprep.mubr.bf16.mxu1 %v4829_v57 }
  0xe5   : > { %2515 = vmatmul.mubr.bf16.gmra.mxu0 %v4828_v42 }
  0xe6   : > { %2676 = vmatmul.mubr.bf16.gmra.mxu1 %v4831_v58  ;;  %2522 = vmatprep.mubr.bf16.mxu0 %v4833_v59 }
  0xe7   : > { %2683 = vmatprep.mubr.bf16.mxu1 %v4836_v60 }
  0xed   : > { %v4058_v1 = vpop.f32.mrf.mxu0  ;;  %2523 = vmatmul.mubr.bf16.gmra.mxu0 %v4835_v61 }
  0xee   : > { %v4170_v2 = vpop.f32.mrf.mxu1  ;;  %2684 = vmatmul.mubr.bf16.gmra.mxu1 %v4839_v62  ;;  %2530 = vmatprep.mubr.bf16.mxu0 %v4841_v63  ;;  %v4863_v62 = vld [vmem:[%s5134_s6 + $0x490] ss:$48 sps:$4 sm:$0xff]  }
  0xef   : > { %v4059_v3 = vpop.f32.mrf.mxu0  ;;  %2691 = vmatprep.mubr.bf16.mxu1 %v4845_v0  ;;  %v4866_v0 = vld [vmem:[%s5134_s6 + $0x498] ss:$48 sps:$4 sm:$0xff]  }
  0xf0   : > { %v4060_v4 = vadd.f32 %v4059_v3, %v4058_v1  ;;  %v4171_v5 = vpop.f32.mrf.mxu1  ;;  %v4874_v1 = vld [vmem:[%s5134_s6 + $0x4f4] ss:$48 sps:$4 sm:$0xff]  }
  0xf1   : > { %v4172_v6 = vadd.f32 %v4171_v5, %v4170_v2  ;;  %v4061_v7 = vpop.f32.mrf.mxu0 }
  0xf2   : > { %v4173_v9 = vpop.f32.mrf.mxu1 }
  0xf3   : > { %v5431_v12 = vadd.f32 %v4172_v6, %v4060_v4  ;;  %v4062_v13 = vpop.f32.mrf.mxu0  ;;  %v4877_v4 = vld [vmem:[%s5134_s6 + $0x4fc] ss:$48 sps:$4 sm:$0xff]  }
  0xf4   : > { %v4063_v15 = vadd.f32 %v4062_v13, %v4061_v7  ;;  %v4174_v16 = vpop.f32.mrf.mxu1 }
  0xf5   : > { %v4175_v17 = vadd.f32 %v4174_v16, %v4173_v9  ;;  %v4064_v18 = vpop.f32.mrf.mxu0  ;;  %2531 = vmatmul.mubr.bf16.gmra.mxu0 %v4844_v8 }
  0xf6   : > { %v4176_v19 = vpop.f32.mrf.mxu1  ;;  %2692 = vmatmul.mubr.bf16.gmra.mxu1 %v4847_v10  ;;  %2538 = vmatprep.mubr.bf16.mxu0 %v4848_v11 }
  0xf7   : > { %v5434_v20 = vadd.f32 %v4175_v17, %v4063_v15  ;;  %v4065_v21 = vpop.f32.mrf.mxu0  ;;  %2699 = vmatprep.mubr.bf16.mxu1 %v4851_v14  ;;  %v4872_v17 = vld [vmem:[%s5134_s6 + $0x4f0] ss:$48 sps:$4 sm:$0xff]  }
  0xf8   : > { %v4066_v22 = vadd.f32 %v4065_v21, %v4064_v18  ;;  %v4177_v23 = vpop.f32.mrf.mxu1  ;;  %v4881_v21 = vld [vmem:[%s5134_s6 + $0x554] ss:$48 sps:$4 sm:$0xff]  }
  0xf9   : > { %v4178_v24 = vadd.f32 %v4177_v23, %v4176_v19  ;;  %v4067_v25 = vpop.f32.mrf.mxu0  ;;  %v4875_v19 = vld [vmem:[%s5134_s6 + $0x4f8] ss:$48 sps:$4 sm:$0xff]  }
  0xfa   : > { %v4179_v27 = vpop.f32.mrf.mxu1 }
  0xfb   : > { %v5439_v30 = vadd.f32 %v4178_v24, %v4066_v22  ;;  %v4068_v31 = vpop.f32.mrf.mxu0  ;;  %v4884_v24 = vld [vmem:[%s5134_s6 + $0x55c] ss:$48 sps:$4 sm:$0xff]  }
  0xfc   : > { %v4069_v33 = vadd.f32 %v4068_v31, %v4067_v25  ;;  %v4180_v34 = vpop.f32.mrf.mxu1 }
  0xfd   : > { %v4181_v35 = vadd.f32 %v4180_v34, %v4179_v27  ;;  %v4070_v36 = vpop.f32.mrf.mxu0  ;;  %2539 = vmatmul.mubr.bf16.gmra.mxu0 %v4850_v26 }
  0xfe   : > { %v4182_v37 = vpop.f32.mrf.mxu1  ;;  %2700 = vmatmul.mubr.bf16.gmra.mxu1 %v4854_v28  ;;  %2546 = vmatprep.mubr.bf16.mxu0 %v4857_v29 }
  0xff   : > { %v5442_v38 = vadd.f32 %v4181_v35, %v4069_v33  ;;  %v4071_v39 = vpop.f32.mrf.mxu0  ;;  %2707 = vmatprep.mubr.bf16.mxu1 %v4860_v32 }
 0x100   : > { %v4072_v40 = vadd.f32 %v4071_v39, %v4070_v36  ;;  %v4183_v41 = vpop.f32.mrf.mxu1 }
 0x101   : > { %v4184_v43 = vadd.f32 %v4183_v41, %v4182_v37  ;;  %v4073_v44 = vpop.f32.mrf.mxu0  ;;  %v4879_v37 = vld [vmem:[%s5134_s6 + $0x550] ss:$48 sps:$4 sm:$0xff]   ;;  %v4889_v41 = vld [vmem:[%s5134_s6 + $0x5b4] ss:$48 sps:$4 sm:$0xff]  }
 0x102   : > { %v4185_v46 = vpop.f32.mrf.mxu1 }
 0x103   : > { %v5447_v49 = vadd.f32 %v4184_v43, %v4072_v40  ;;  %v4074_v50 = vpop.f32.mrf.mxu0  ;;  %v4882_v40 = vld [vmem:[%s5134_s6 + $0x558] ss:$48 sps:$4 sm:$0xff]  }
 0x104   : > { %v4075_v52 = vadd.f32 %v4074_v50, %v4073_v44  ;;  %v4186_v53 = vpop.f32.mrf.mxu1 }
 0x105   : > { %v4187_v54 = vadd.f32 %v4186_v53, %v4185_v46  ;;  %v4076_v55 = vpop.f32.mrf.mxu0  ;;  %2547 = vmatmul.mubr.bf16.gmra.mxu0 %v4859_v45  ;;  %v4892_v45 = vld [vmem:[%s5134_s6 + $0x5bc] ss:$48 sps:$4 sm:$0xff]  }
 0x106   : > { %v4188_v56 = vpop.f32.mrf.mxu1  ;;  %2708 = vmatmul.mubr.bf16.gmra.mxu1 %v4862_v47  ;;  %2554 = vmatprep.mubr.bf16.mxu0 %v4865_v48 }
 0x107   : > { %v5450_v57 = vadd.f32 %v4187_v54, %v4075_v52  ;;  %v4077_v42 = vpop.f32.mrf.mxu0  ;;  %2715 = vmatprep.mubr.bf16.mxu1 %v4868_v51 }
 0x108   : > { %v4078_v58 = vadd.f32 %v4077_v42, %v4076_v55  ;;  %v4189_v59 = vpop.f32.mrf.mxu1 }
 0x109   : > { %v4190_v60 = vadd.f32 %v4189_v59, %v4188_v56  ;;  %v4079_v61 = vpop.f32.mrf.mxu0 }
 0x10a   : > { %v4191_v63 = vpop.f32.mrf.mxu1 }
 0x10b   : > { %v5455_v2 = vadd.f32 %v4190_v60, %v4078_v58  ;;  %v4080_v3 = vpop.f32.mrf.mxu0  ;;  %v4887_v58 = vld [vmem:[%s5134_s6 + $0x5b0] ss:$48 sps:$4 sm:$0xff]   ;;  %v4890_v60 = vld [vmem:[%s5134_s6 + $0x5b8] ss:$48 sps:$4 sm:$0xff]  }
 0x10c   : > { %v4081_v5 = vadd.f32 %v4080_v3, %v4079_v61  ;;  %v4192_v6 = vpop.f32.mrf.mxu1  ;;  %v4896_v61 = vld [vmem:[%s5134_s6 + $0x24] ss:$48 sps:$4 sm:$0xff]  }
 0x10d   : > { %v4193_v7 = vadd.f32 %v4192_v6, %v4191_v63  ;;  %v4082_v8 = vpop.f32.mrf.mxu0  ;;  %2555 = vmatmul.mubr.bf16.gmra.mxu0 %v4863_v62 }
 0x10e   : > { %v4194_v9 = vpop.f32.mrf.mxu1  ;;  %2716 = vmatmul.mubr.bf16.gmra.mxu1 %v4866_v0  ;;  %2562 = vmatprep.mubr.bf16.mxu0 %v4874_v1  ;;  %v4899_v0 = vld [vmem:[%s5134_s6 + $0x2c] ss:$48 sps:$4 sm:$0xff]  }
 0x10f   : > { %v5458_v10 = vadd.f32 %v4193_v7, %v4081_v5  ;;  %v4083_v11 = vpop.f32.mrf.mxu0  ;;  %2723 = vmatprep.mubr.bf16.mxu1 %v4877_v4 }
 0x110   : > { %v4084_v13 = vadd.f32 %v4083_v11, %v4082_v8  ;;  %v4195_v14 = vpop.f32.mrf.mxu1 }
 0x111   : > { %v4196_v15 = vadd.f32 %v4195_v14, %v4194_v9  ;;  %v4085_v16 = vpop.f32.mrf.mxu0 }
 0x112   : > { %v4197_v18 = vpop.f32.mrf.mxu1 }
 0x113   : > { %v5463_v22 = vadd.f32 %v4196_v15, %v4084_v13  ;;  %v4086_v23 = vpop.f32.mrf.mxu0  ;;  %v4894_v15 = vld [vmem:[%s5134_s6 + $0x20] ss:$48 sps:$4 sm:$0xff]  }
 0x114   : > { %v4087_v25 = vadd.f32 %v4086_v23, %v4085_v16  ;;  %v4198_v26 = vpop.f32.mrf.mxu1  ;;  %v4903_v23 = vld [vmem:[%s5134_s6 + $0x8c] ss:$48 sps:$4 sm:$0xff]  }
 0x115   : > { %v4199_v27 = vadd.f32 %v4198_v26, %v4197_v18  ;;  %v4088_v28 = vpop.f32.mrf.mxu0  ;;  %2563 = vmatmul.mubr.bf16.gmra.mxu0 %v4872_v17  ;;  %v4897_v17 = vld [vmem:[%s5134_s6 + $0x28] ss:$48 sps:$4 sm:$0xff]   ;;  %v4902_v18 = vld [vmem:[%s5134_s6 + $0x84] ss:$48 sps:$4 sm:$0xff]  }
 0x116   : > { %v4200_v29 = vpop.f32.mrf.mxu1  ;;  %2724 = vmatmul.mubr.bf16.gmra.mxu1 %v4875_v19  ;;  %2570 = vmatprep.mubr.bf16.mxu0 %v4881_v21 }
 0x117   : > { %v5466_v31 = vadd.f32 %v4199_v27, %v4087_v25  ;;  %v4089_v32 = vpop.f32.mrf.mxu0  ;;  %2731 = vmatprep.mubr.bf16.mxu1 %v4884_v24 }
 0x118   : > { %v4090_v33 = vadd.f32 %v4089_v32, %v4088_v28  ;;  %v4201_v34 = vpop.f32.mrf.mxu1 }
 0x119   : > { %v4202_v35 = vadd.f32 %v4201_v34, %v4200_v29  ;;  %v4091_v36 = vpop.f32.mrf.mxu0 }
 0x11a   : > { %v4203_v39 = vpop.f32.mrf.mxu1 }
 0x11b   : > { %v5471_v43 = vadd.f32 %v4202_v35, %v4090_v33  ;;  %v4092_v44 = vpop.f32.mrf.mxu0 }
 0x11c   : > { %v4093_v46 = vadd.f32 %v4092_v44, %v4091_v36  ;;  %v4204_v47 = vpop.f32.mrf.mxu1 }
 0x11d   : > { %v4205_v48 = vadd.f32 %v4204_v47, %v4203_v39  ;;  %v4094_v50 = vpop.f32.mrf.mxu0  ;;  %2571 = vmatmul.mubr.bf16.gmra.mxu0 %v4879_v37  ;;  %v4900_v37 = vld [vmem:[%s5134_s6 + $0x80] ss:$48 sps:$4 sm:$0xff]  }
 0x11e   : > { %v4206_v51 = vpop.f32.mrf.mxu1  ;;  %2732 = vmatmul.mubr.bf16.gmra.mxu1 %v4882_v40  ;;  %2578 = vmatprep.mubr.bf16.mxu0 %v4889_v41  ;;  %v4905_v40 = vld [vmem:[%s5134_s6 + $0x88] ss:$48 sps:$4 sm:$0xff]   ;;  %v4908_v41 = vld [vmem:[%s5134_s6 + $0xe4] ss:$48 sps:$4 sm:$0xff]  }
 0x11f   : > { %v5474_v52 = vadd.f32 %v4205_v48, %v4093_v46  ;;  %v4095_v53 = vpop.f32.mrf.mxu0  ;;  %2739 = vmatprep.mubr.bf16.mxu1 %v4892_v45  ;;  %v4909_v46 = vld [vmem:[%s5134_s6 + $0xec] ss:$48 sps:$4 sm:$0xff]  }
 0x120   : > { %v4096_v54 = vadd.f32 %v4095_v53, %v4094_v50  ;;  %v4207_v55 = vpop.f32.mrf.mxu1 }
 0x121   : > { %v4208_v56 = vadd.f32 %v4207_v55, %v4206_v51  ;;  %v4097_v42 = vpop.f32.mrf.mxu0 }
 0x122   : > { %v4209_v59 = vpop.f32.mrf.mxu1 }
 0x123   : > { %v5479_v62 = vadd.f32 %v4208_v56, %v4096_v54  ;;  %v4098_v63 = vpop.f32.mrf.mxu0 }
 0x124   : > { %v4099_v1 = vadd.f32 %v4098_v63, %v4097_v42  ;;  %v4210_v3 = vpop.f32.mrf.mxu1  ;;  %v4911_v63 = vld [vmem:[%s5134_s6 + $0xe8] ss:$48 sps:$4 sm:$0xff]  }
 0x125   : > { %v4211_v4 = vadd.f32 %v4210_v3, %v4209_v59  ;;  %v4100_v5 = vpop.f32.mrf.mxu0  ;;  %2579 = vmatmul.mubr.bf16.gmra.mxu0 %v4887_v58 }
 0x126   : > { %v4212_v6 = vpop.f32.mrf.mxu1  ;;  %2740 = vmatmul.mubr.bf16.gmra.mxu1 %v4890_v60  ;;  %2780 = vmatprep.mubr.bf16.mxu0 %v4896_v61  ;;  %v4906_v60 = vld [vmem:[%s5134_s6 + $0xe0] ss:$48 sps:$4 sm:$0xff]  }
 0x127   : > { %v5482_v7 = vadd.f32 %v4211_v4, %v4099_v1  ;;  %v4101_v8 = vpop.f32.mrf.mxu0  ;;  %3862 = vmatprep.mubr.msk.bf16.mxu1 %vm2055_vm0, %v4899_v0  ;;  %v4914_v0 = vld [vmem:[%s5134_s6 + $0x144] ss:$48 sps:$4 sm:$0xff]   ;;  %v4915_v4 = vld [vmem:[%s5134_s6 + $0x14c] ss:$48 sps:$4 sm:$0xff]  }
 0x128   : > { %v4102_v9 = vadd.f32 %v4101_v8, %v4100_v5  ;;  %v4213_v11 = vpop.f32.mrf.mxu1 }
 0x129   : > { %v4214_v13 = vadd.f32 %v4213_v11, %v4212_v6  ;;  %v4103_v14 = vpop.f32.mrf.mxu0 }
 0x12a   : > { %v4215_v16 = vpop.f32.mrf.mxu1 }
 0x12b   : > { %v5488_v19 = vadd.f32 %v4214_v13, %v4102_v9  ;;  %v4104_v21 = vpop.f32.mrf.mxu0 }
 0x12c   : > { %v4105_v24 = vadd.f32 %v4104_v21, %v4103_v14  ;;  %v4216_v25 = vpop.f32.mrf.mxu1  ;;  %v4912_v21 = vld [vmem:[%s5134_s6 + $0x140] ss:$48 sps:$4 sm:$0xff]  }
 0x12d   : > { %v4217_v26 = vadd.f32 %v4216_v25, %v4215_v16  ;;  %v4106_v27 = vpop.f32.mrf.mxu0  ;;  %2781 = vmatmul.mubr.bf16.vlgmr.msra.gmra.mxu0 %v4894_v15  ;;  %v4920_v25 = vld [vmem:[%s5134_s6 + $0x1a4] ss:$48 sps:$4 sm:$0xff]  }
 0x12e   : > { %v4218_v28 = vpop.f32.mrf.mxu1  ;;  %2942 = vmatmul.mubr.bf16.vlgmr.msra.gmra.mxu1 %v4897_v17  ;;  %2788 = vmatprep.mubr.bf16.mxu0 %v4902_v18 }
 0x12f   : > { %v5491_v29 = vadd.f32 %v4217_v26, %v4105_v24  ;;  %v4107_v32 = vpop.f32.mrf.mxu0  ;;  %3863 = vmatprep.mubr.msk.bf16.mxu1 %vm2055_vm0, %v4903_v23  ;;  %v4917_v24 = vld [vmem:[%s5134_s6 + $0x148] ss:$48 sps:$4 sm:$0xff]  }
 0x130   : > { %v4108_v33 = vadd.f32 %v4107_v32, %v4106_v27  ;;  %v4219_v34 = vpop.f32.mrf.mxu1 }
 0x131   : > { %v4220_v35 = vadd.f32 %v4219_v34, %v4218_v28  ;;  %v4109_v36 = vpop.f32.mrf.mxu0  ;;  %v4921_v28 = vld [vmem:[%s5134_s6 + $0x1ac] ss:$48 sps:$4 sm:$0xff]  }
 0x132   : > { %v4221_v39 = vpop.f32.mrf.mxu1 }
 0x133   : > { %v5497_v44 = vadd.f32 %v4220_v35, %v4108_v33  ;;  %v4110_v45 = vpop.f32.mrf.mxu0 }
 0x134   : > { %v4111_v47 = vadd.f32 %v4110_v45, %v4109_v36  ;;  %v4222_v48 = vpop.f32.mrf.mxu1 }
 0x135   : > { %v4223_v50 = vadd.f32 %v4222_v48, %v4221_v39  ;;  %v4112_v51 = vpop.f32.mrf.mxu0  ;;  %2789 = vmatmul.mubr.bf16.gmra.mxu0 %v4900_v37 }
 0x136   : > { %v4224_v53 = vpop.f32.mrf.mxu1  ;;  %2950 = vmatmul.mubr.bf16.gmra.mxu1 %v4905_v40  ;;  %2796 = vmatprep.mubr.bf16.mxu0 %v4908_v41 }
 0x137   : > { %v5500_v54 = vadd.f32 %v4223_v50, %v4111_v47  ;;  %v4113_v55 = vpop.f32.mrf.mxu0  ;;  %3864 = vmatprep.mubr.msk.bf16.mxu1 %vm2055_vm0, %v4909_v46  ;;  %v4918_v47 = vld [vmem:[%s5134_s6 + $0x1a0] ss:$48 sps:$4 sm:$0xff]   ;;  %v4923_v50 = vld [vmem:[%s5134_s6 + $0x1a8] ss:$48 sps:$4 sm:$0xff]  }
 0x138   : > { %v4114_v56 = vadd.f32 %v4113_v55, %v4112_v51  ;;  %v4225_v42 = vpop.f32.mrf.mxu1  ;;  %v4926_v51 = vld [vmem:[%s5134_s6 + $0x204] ss:$48 sps:$4 sm:$0xff]  }
 0x139   : > { %v4226_v58 = vadd.f32 %v4225_v42, %v4224_v53  ;;  %v4115_v59 = vpop.f32.mrf.mxu0 }
 0x13a   : > { %v4227_v61 = vpop.f32.mrf.mxu1 }
 0x13b   : > { %v5506_v1 = vadd.f32 %v4226_v58, %v4114_v56  ;;  %v4116_v3 = vpop.f32.mrf.mxu0  ;;  %v4927_v56 = vld [vmem:[%s5134_s6 + $0x20c] ss:$48 sps:$4 sm:$0xff]  }
 0x13c   : > { %v4117_v5 = vadd.f32 %v4116_v3, %v4115_v59  ;;  %v4228_v6 = vpop.f32.mrf.mxu1 }
 0x13d   : > { %v4229_v8 = vadd.f32 %v4228_v6, %v4227_v61  ;;  %v4118_v9 = vpop.f32.mrf.mxu0  ;;  %2797 = vmatmul.mubr.bf16.gmra.mxu0 %v4906_v60 }
 0x13e   : > { %v4230_v11 = vpop.f32.mrf.mxu1  ;;  %2958 = vmatmul.mubr.bf16.gmra.mxu1 %v4911_v63  ;;  %2804 = vmatprep.mubr.bf16.mxu0 %v4914_v0 }
 0x13f   : > { %v5509_v13 = vadd.f32 %v4229_v8, %v4117_v5  ;;  %v4119_v14 = vpop.f32.mrf.mxu0  ;;  %3865 = vmatprep.mubr.msk.bf16.mxu1 %vm2055_vm0, %v4915_v4  ;;  %v4924_v8 = vld [vmem:[%s5134_s6 + $0x200] ss:$48 sps:$4 sm:$0xff]  }
 0x140   : > { %v4120_v15 = vadd.f32 %v4119_v14, %v4118_v9  ;;  %v4231_v16 = vpop.f32.mrf.mxu1  ;;  %v4932_v14 = vld [vmem:[%s5134_s6 + $0x264] ss:$48 sps:$4 sm:$0xff]  }
 0x141   : > { %v4232_v17 = vadd.f32 %v4231_v16, %v4230_v11  ;;  %v4121_v18 = vpop.f32.mrf.mxu0  ;;  %v4929_v11 = vld [vmem:[%s5134_s6 + $0x208] ss:$48 sps:$4 sm:$0xff]  }
 0x142   : > { %v4233_v23 = vpop.f32.mrf.mxu1 }
 0x143   : > { %v5515_v26 = vadd.f32 %v4232_v17, %v4120_v15  ;;  %v4122_v27 = vpop.f32.mrf.mxu0  ;;  %v4933_v17 = vld [vmem:[%s5134_s6 + $0x26c] ss:$48 sps:$4 sm:$0xff]  }
 0x144   : > { %v4123_v32 = vadd.f32 %v4122_v27, %v4121_v18  ;;  %v4234_v33 = vpop.f32.mrf.mxu1 }
 0x145   : > { %v4235_v34 = vadd.f32 %v4234_v33, %v4233_v23  ;;  %v4124_v35 = vpop.f32.mrf.mxu0  ;;  %2805 = vmatmul.mubr.bf16.gmra.mxu0 %v4912_v21 }
 0x146   : > { %v4236_v36 = vpop.f32.mrf.mxu1  ;;  %2966 = vmatmul.mubr.bf16.gmra.mxu1 %v4917_v24  ;;  %2812 = vmatprep.mubr.bf16.mxu0 %v4920_v25 }
 0x147   : > { %v5518_v37 = vadd.f32 %v4235_v34, %v4123_v32  ;;  %v4125_v39 = vpop.f32.mrf.mxu0  ;;  %3866 = vmatprep.mubr.msk.bf16.mxu1 %vm2055_vm0, %v4921_v28 }
 0x148   : > { %v4126_v40 = vadd.f32 %v4125_v39, %v4124_v35  ;;  %v4237_v41 = vpop.f32.mrf.mxu1 }
 0x149   : > { %v4238_v45 = vadd.f32 %v4237_v41, %v4236_v36  ;;  %v4127_v46 = vpop.f32.mrf.mxu0  ;;  %v4930_v36 = vld [vmem:[%s5134_s6 + $0x260] ss:$48 sps:$4 sm:$0xff]   ;;  %v4938_v41 = vld [vmem:[%s5134_s6 + $0x2c4] ss:$48 sps:$4 sm:$0xff]  }
 0x14a   : > { %v4239_v48 = vpop.f32.mrf.mxu1 }
 0x14b   : > { %v5524_v53 = vadd.f32 %v4238_v45, %v4126_v40  ;;  %v4128_v55 = vpop.f32.mrf.mxu0  ;;  %v4935_v40 = vld [vmem:[%s5134_s6 + $0x268] ss:$48 sps:$4 sm:$0xff]  }
 0x14c   : > { %v4129_v42 = vadd.f32 %v4128_v55, %v4127_v46  ;;  %v4240_v58 = vpop.f32.mrf.mxu1 }
 0x14d   : > { %v4241_v59 = vadd.f32 %v4240_v58, %v4239_v48  ;;  %v4130_v60 = vpop.f32.mrf.mxu0  ;;  %2813 = vmatmul.mubr.bf16.gmra.mxu0 %v4918_v47  ;;  %v4939_v47 = vld [vmem:[%s5134_s6 + $0x2cc] ss:$48 sps:$4 sm:$0xff]  }
 0x14e   : > { %v4242_v61 = vpop.f32.mrf.mxu1  ;;  %2974 = vmatmul.mubr.bf16.gmra.mxu1 %v4923_v50  ;;  %2820 = vmatprep.mubr.bf16.mxu0 %v4926_v51 }
 0x14f   : > { %v5527_v63 = vadd.f32 %v4241_v59, %v4129_v42  ;;  %v4131_v0 = vpop.f32.mrf.mxu0  ;;  %3867 = vmatprep.mubr.msk.bf16.mxu1 %vm2055_vm0, %v4927_v56 }
 0x150   : > { %v4132_v3 = vadd.f32 %v4131_v0, %v4130_v60  ;;  %v4243_v4 = vpop.f32.mrf.mxu1 }
 0x151   : > { %v4244_v5 = vadd.f32 %v4243_v4, %v4242_v61  ;;  %v4133_v6 = vpop.f32.mrf.mxu0 }
 0x152   : > { %v4245_v9 = vpop.f32.mrf.mxu1 }
 0x153   : > { %v5533_v15 = vadd.f32 %v4244_v5, %v4132_v3  ;;  %v4134_v16 = vpop.f32.mrf.mxu0  ;;  %v4936_v3 = vld [vmem:[%s5134_s6 + $0x2c0] ss:$48 sps:$4 sm:$0xff]   ;;  %v4941_v5 = vld [vmem:[%s5134_s6 + $0x2c8] ss:$48 sps:$4 sm:$0xff]  }
 0x154   : > { %v4135_v18 = vadd.f32 %v4134_v16, %v4133_v6  ;;  %v4246_v21 = vpop.f32.mrf.mxu1  ;;  %v4944_v6 = vld [vmem:[%s5134_s6 + $0x324] ss:$48 sps:$4 sm:$0xff]  }
 0x155   : > { %v4247_v23 = vadd.f32 %v4246_v21, %v4245_v9  ;;  %v4136_v24 = vpop.f32.mrf.mxu0  ;;  %2821 = vmatmul.mubr.bf16.gmra.mxu0 %v4924_v8 }
 0x156   : > { %v4248_v25 = vpop.f32.mrf.mxu1  ;;  %2982 = vmatmul.mubr.bf16.gmra.mxu1 %v4929_v11  ;;  %2828 = vmatprep.mubr.bf16.mxu0 %v4932_v14  ;;  %v4945_v11 = vld [vmem:[%s5134_s6 + $0x32c] ss:$48 sps:$4 sm:$0xff]  }
 0x157   : > { %v5536_v27 = vadd.f32 %v4247_v23, %v4135_v18  ;;  %v4137_v28 = vpop.f32.mrf.mxu0  ;;  %3868 = vmatprep.mubr.msk.bf16.mxu1 %vm2055_vm0, %v4933_v17 }
 0x158   : > { %v4138_v32 = vadd.f32 %v4137_v28, %v4136_v24  ;;  %v4249_v33 = vpop.f32.mrf.mxu1 }
 0x159   : > { %v4250_v34 = vadd.f32 %v4249_v33, %v4248_v25  ;;  %v4139_v35 = vpop.f32.mrf.mxu0 }
 0x15a   : > { %v4251_v39 = vpop.f32.mrf.mxu1 }
 0x15b   : > { %v5542_v45 = vadd.f32 %v4250_v34, %v4138_v32  ;;  %v4140_v46 = vpop.f32.mrf.mxu0  ;;  %v4942_v34 = vld [vmem:[%s5134_s6 + $0x320] ss:$48 sps:$4 sm:$0xff]  }
 0x15c   : > { %v4141_v48 = vadd.f32 %v4140_v46, %v4139_v35  ;;  %v4252_v50 = vpop.f32.mrf.mxu1  ;;  %v4951_v46 = vld [vmem:[%s5134_s6 + $0x38c] ss:$48 sps:$4 sm:$0xff]  }
 0x15d   : > { %v4253_v51 = vadd.f32 %v4252_v50, %v4251_v39  ;;  %v4142_v55 = vpop.f32.mrf.mxu0  ;;  %2829 = vmatmul.mubr.bf16.gmra.mxu0 %v4930_v36  ;;  %v4947_v36 = vld [vmem:[%s5134_s6 + $0x328] ss:$48 sps:$4 sm:$0xff]   ;;  %v4950_v39 = vld [vmem:[%s5134_s6 + $0x384] ss:$48 sps:$4 sm:$0xff]  }
 0x15e   : > { %v4254_v56 = vpop.f32.mrf.mxu1  ;;  %2990 = vmatmul.mubr.bf16.gmra.mxu1 %v4935_v40  ;;  %2836 = vmatprep.mubr.bf16.mxu0 %v4938_v41 }
 0x15f   : > { %v5545_v42 = vadd.f32 %v4253_v51, %v4141_v48  ;;  %v4143_v58 = vpop.f32.mrf.mxu0  ;;  %3869 = vmatprep.mubr.msk.bf16.mxu1 %vm2055_vm0, %v4939_v47 }
 0x160   : > { %v4144_v59 = vadd.f32 %v4143_v58, %v4142_v55  ;;  %v4255_v60 = vpop.f32.mrf.mxu1 }
 0x161   : > { %v4256_v61 = vadd.f32 %v4255_v60, %v4254_v56  ;;  %v4145_v0 = vpop.f32.mrf.mxu0 }
 0x162   : > { %v4257_v4 = vpop.f32.mrf.mxu1 }
 0x163   : > { %v5551_v8 = vadd.f32 %v4256_v61, %v4144_v59  ;;  %v4146_v9 = vpop.f32.mrf.mxu0 }
 0x164   : > { %v4147_v14 = vadd.f32 %v4146_v9, %v4145_v0  ;;  %v4258_v16 = vpop.f32.mrf.mxu1  ;;  %v4956_v9 = vld [vmem:[%s5134_s6 + $0x3e4] ss:$48 sps:$4 sm:$0xff]  }
 0x165   : > { %v4259_v17 = vadd.f32 %v4258_v16, %v4257_v4  ;;  %v4148_v18 = vpop.f32.mrf.mxu0  ;;  %2837 = vmatmul.mubr.bf16.gmra.mxu0 %v4936_v3  ;;  %v4948_v3 = vld [vmem:[%s5134_s6 + $0x380] ss:$48 sps:$4 sm:$0xff]  }
 0x166   : > { %v4260_v21 = vpop.f32.mrf.mxu1  ;;  %2998 = vmatmul.mubr.bf16.gmra.mxu1 %v4941_v5  ;;  %2844 = vmatprep.mubr.bf16.mxu0 %v4944_v6  ;;  %v4953_v6 = vld [vmem:[%s5134_s6 + $0x388] ss:$48 sps:$4 sm:$0xff]  }
 0x167   : > { %v5554_v23 = vadd.f32 %v4259_v17, %v4147_v14  ;;  %v4149_v24 = vpop.f32.mrf.mxu0  ;;  %3870 = vmatprep.mubr.msk.bf16.mxu1 %vm2055_vm0, %v4945_v11  ;;  %v4957_v14 = vld [vmem:[%s5134_s6 + $0x3ec] ss:$48 sps:$4 sm:$0xff]  }
 0x168   : > { %v4150_v25 = vadd.f32 %v4149_v24, %v4148_v18  ;;  %v4261_v28 = vpop.f32.mrf.mxu1 }
 0x169   : > { %v4262_v32 = vadd.f32 %v4261_v28, %v4260_v21  ;;  %v4151_v33 = vpop.f32.mrf.mxu0 }
 0x16a   : > { %v4263_v35 = vpop.f32.mrf.mxu1 }
 0x16b   : > { %v5560_v40 = vadd.f32 %v4262_v32, %v4150_v25  ;;  %v4152_v41 = vpop.f32.mrf.mxu0 }
 0x16c   : > { %v4153_v47 = vadd.f32 %v4152_v41, %v4151_v33  ;;  %v4264_v48 = vpop.f32.mrf.mxu1 }
 0x16d   : > { %v4265_v50 = vadd.f32 %v4264_v48, %v4263_v35  ;;  %v4282_v51 = vpop.f32.mrf.mxu0  ;;  %2845 = vmatmul.mubr.bf16.gmra.mxu0 %v4942_v34  ;;  %v4962_v48 = vld [vmem:[%s5134_s6 + $0x444] ss:$48 sps:$4 sm:$0xff]  }
 0x16e   : > { %v4394_v55 = vpop.f32.mrf.mxu1  ;;  %3006 = vmatmul.mubr.bf16.gmra.mxu1 %v4947_v36  ;;  %2852 = vmatprep.mubr.bf16.mxu0 %v4950_v39  ;;  %v4954_v39 = vld [vmem:[%s5134_s6 + $0x3e0] ss:$48 sps:$4 sm:$0xff]  }
 0x16f   : > { %v5563_v56 = vadd.f32 %v4265_v50, %v4153_v47  ;;  %v4283_v58 = vpop.f32.mrf.mxu0  ;;  %3871 = vmatprep.mubr.msk.bf16.mxu1 %vm2055_vm0, %v4951_v46  ;;  %v4959_v47 = vld [vmem:[%s5134_s6 + $0x3e8] ss:$48 sps:$4 sm:$0xff]   ;;  %v4963_v50 = vld [vmem:[%s5134_s6 + $0x44c] ss:$48 sps:$4 sm:$0xff]  }
 0x170   : > { %v4284_v59 = vadd.f32 %v4283_v58, %v4282_v51  ;;  %v4395_v60 = vpop.f32.mrf.mxu1 }
 0x171   : > { %v4396_v61 = vadd.f32 %v4395_v60, %v4394_v55  ;;  %v4285_v0 = vpop.f32.mrf.mxu0 }
 0x172   : > { %v2461_v4 = vadd.f32 %v4284_v59, %v5431_v12  ;;  %v4397_v5 = vpop.f32.mrf.mxu1 }
 0x173   : > { %v4286_v11 = vpop.f32.mrf.mxu0 }
 0x174   : > { %v5571_v16 = vadd.f32 %v4396_v61, %v2461_v4  ;;  %v4287_v17 = vadd.f32 %v4286_v11, %v4285_v0  ;;  %v4398_v18 = vpop.f32.mrf.mxu1  ;;  %v4960_v11 = vld [vmem:[%s5134_s6 + $0x440] ss:$48 sps:$4 sm:$0xff]  }
 0x175   : > { %v4399_v21 = vadd.f32 %v4398_v18, %v4397_v5  ;;  %v4288_v24 = vpop.f32.mrf.mxu0  ;;  %2853 = vmatmul.mubr.bf16.gmra.mxu0 %v4948_v3  ;;  %v4965_v18 = vld [vmem:[%s5134_s6 + $0x448] ss:$48 sps:$4 sm:$0xff]  }
 0x176   : > { %v2464_v25 = vadd.f32 %v4287_v17, %v5434_v20  ;;  %v4400_v28 = vpop.f32.mrf.mxu1  ;;  %3014 = vmatmul.mubr.bf16.gmra.mxu1 %v4953_v6  ;;  %2860 = vmatprep.mubr.bf16.mxu0 %v4956_v9 }
 0x177   : > { %v4289_v12 = vpop.f32.mrf.mxu0  ;;  %3872 = vmatprep.mubr.msk.bf16.mxu1 %vm2055_vm0, %v4957_v14 }
 0x178   : > { %v5575_v32 = vadd.f32 %v4399_v21, %v2464_v25  ;;  %v4290_v33 = vadd.f32 %v4289_v12, %v4288_v24  ;;  %v4401_v34 = vpop.f32.mrf.mxu1  ;;  %v4968_v21 = vld [vmem:[%s5134_s6 + $0x4a4] ss:$48 sps:$4 sm:$0xff]   ;;  %v4969_v24 = vld [vmem:[%s5134_s6 + $0x4ac] ss:$48 sps:$4 sm:$0xff]  }
 0x179   : > { %v4402_v35 = vadd.f32 %v4401_v34, %v4400_v28  ;;  %v4291_v36 = vpop.f32.mrf.mxu0 }
 0x17a   : > { %v2469_v41 = vadd.f32 %v4290_v33, %v5439_v30  ;;  %v4403_v46 = vpop.f32.mrf.mxu1 }
 0x17b   : > { %v4292_v20 = vpop.f32.mrf.mxu0 }
 0x17c   : > { %v5582_v51 = vadd.f32 %v4402_v35, %v2469_v41  ;;  %v4293_v55 = vadd.f32 %v4292_v20, %v4291_v36  ;;  %v4404_v58 = vpop.f32.mrf.mxu1  ;;  %v4966_v20 = vld [vmem:[%s5134_s6 + $0x4a0] ss:$48 sps:$4 sm:$0xff]  }
 0x17d   : > { %v4405_v59 = vadd.f32 %v4404_v58, %v4403_v46  ;;  %v4294_v60 = vpop.f32.mrf.mxu0  ;;  %2861 = vmatmul.mubr.bf16.gmra.mxu0 %v4954_v39  ;;  %v4971_v58 = vld [vmem:[%s5134_s6 + $0x4a8] ss:$48 sps:$4 sm:$0xff]  }
 0x17e   : > { %v2472_v61 = vadd.f32 %v4293_v55, %v5442_v38  ;;  %v4406_v0 = vpop.f32.mrf.mxu1  ;;  %3022 = vmatmul.mubr.bf16.gmra.mxu1 %v4959_v47  ;;  %2868 = vmatprep.mubr.bf16.mxu0 %v4962_v48 }
 0x17f   : > { %v4295_v30 = vpop.f32.mrf.mxu0  ;;  %3873 = vmatprep.mubr.msk.bf16.mxu1 %vm2055_vm0, %v4963_v50 }
 0x180   : > { %v5586_v3 = vadd.f32 %v4405_v59, %v2472_v61  ;;  %v4296_v4 = vadd.f32 %v4295_v30, %v4294_v60  ;;  %v4407_v5 = vpop.f32.mrf.mxu1  ;;  %v4974_v59 = vld [vmem:[%s5134_s6 + $0x504] ss:$48 sps:$4 sm:$0xff]   ;;  %v4975_v60 = vld [vmem:[%s5134_s6 + $0x50c] ss:$48 sps:$4 sm:$0xff]  }
 0x181   : > { %v4408_v6 = vadd.f32 %v4407_v5, %v4406_v0  ;;  %v4297_v9 = vpop.f32.mrf.mxu0 }
 0x182   : > { %v2477_v14 = vadd.f32 %v4296_v4, %v5447_v49  ;;  %v4409_v17 = vpop.f32.mrf.mxu1 }
 0x183   : > { %v4298_v38 = vpop.f32.mrf.mxu0 }
 0x184   : > { %v5593_v25 = vadd.f32 %v4408_v6, %v2477_v14  ;;  %v4299_v28 = vadd.f32 %v4298_v38, %v4297_v9  ;;  %v4410_v12 = vpop.f32.mrf.mxu1  ;;  %v4972_v38 = vld [vmem:[%s5134_s6 + $0x500] ss:$48 sps:$4 sm:$0xff]  }
 0x185   : > { %v4411_v33 = vadd.f32 %v4410_v12, %v4409_v17  ;;  %v4300_v34 = vpop.f32.mrf.mxu0  ;;  %2869 = vmatmul.mubr.bf16.gmra.mxu0 %v4960_v11  ;;  %v4977_v12 = vld [vmem:[%s5134_s6 + $0x508] ss:$48 sps:$4 sm:$0xff]  }
 0x186   : > { %v2480_v35 = vadd.f32 %v4299_v28, %v5450_v57  ;;  %v4412_v36 = vpop.f32.mrf.mxu1  ;;  %3030 = vmatmul.mubr.bf16.gmra.mxu1 %v4965_v18  ;;  %2876 = vmatprep.mubr.bf16.mxu0 %v4968_v21 }
 0x187   : > { %v4301_v49 = vpop.f32.mrf.mxu0  ;;  %3874 = vmatprep.mubr.msk.bf16.mxu1 %vm2055_vm0, %v4969_v24 }
 0x188   : > { %v5597_v39 = vadd.f32 %v4411_v33, %v2480_v35  ;;  %v4302_v41 = vadd.f32 %v4301_v49, %v4300_v34  ;;  %v4413_v46 = vpop.f32.mrf.mxu1  ;;  %v4980_v33 = vld [vmem:[%s5134_s6 + $0x564] ss:$48 sps:$4 sm:$0xff]   ;;  %v4981_v34 = vld [vmem:[%s5134_s6 + $0x56c] ss:$48 sps:$4 sm:$0xff]  }
 0x189   : > { %v4414_v47 = vadd.f32 %v4413_v46, %v4412_v36  ;;  %v4303_v48 = vpop.f32.mrf.mxu0 }
 0x18a   : > { %v2485_v50 = vadd.f32 %v4302_v41, %v5455_v2  ;;  %v4415_v55 = vpop.f32.mrf.mxu1 }
 0x18b   : > { %v4304_v57 = vpop.f32.mrf.mxu0 }
 0x18c   : > { %v5604_v61 = vadd.f32 %v4414_v47, %v2485_v50  ;;  %v4305_v0 = vadd.f32 %v4304_v57, %v4303_v48  ;;  %v4416_v30 = vpop.f32.mrf.mxu1  ;;  %v4978_v57 = vld [vmem:[%s5134_s6 + $0x560] ss:$48 sps:$4 sm:$0xff]  }
 0x18d   : > { %v4417_v4 = vadd.f32 %v4416_v30, %v4415_v55  ;;  %v4306_v5 = vpop.f32.mrf.mxu0  ;;  %2877 = vmatmul.mubr.bf16.gmra.mxu0 %v4966_v20  ;;  %v4983_v30 = vld [vmem:[%s5134_s6 + $0x568] ss:$48 sps:$4 sm:$0xff]  }
 0x18e   : > { %v2488_v6 = vadd.f32 %v4305_v0, %v5458_v10  ;;  %v4418_v9 = vpop.f32.mrf.mxu1  ;;  %3038 = vmatmul.mubr.bf16.gmra.mxu1 %v4971_v58  ;;  %2884 = vmatprep.mubr.bf16.mxu0 %v4974_v59 }
 0x18f   : > { %v4307_v2 = vpop.f32.mrf.mxu0  ;;  %3875 = vmatprep.mubr.msk.bf16.mxu1 %vm2055_vm0, %v4975_v60 }
 0x190   : > { %v5608_v11 = vadd.f32 %v4417_v4, %v2488_v6  ;;  %v4308_v14 = vadd.f32 %v4307_v2, %v4306_v5  ;;  %v4419_v17 = vpop.f32.mrf.mxu1  ;;  %v4986_v4 = vld [vmem:[%s5134_s6 + $0x5c4] ss:$48 sps:$4 sm:$0xff]   ;;  %v4987_v5 = vld [vmem:[%s5134_s6 + $0x5cc] ss:$48 sps:$4 sm:$0xff]  }
 0x191   : > { %v4420_v18 = vadd.f32 %v4419_v17, %v4418_v9  ;;  %v4309_v21 = vpop.f32.mrf.mxu0 }
 0x192   : > { %v2493_v24 = vadd.f32 %v4308_v14, %v5463_v22  ;;  %v4421_v28 = vpop.f32.mrf.mxu1 }
 0x193   : > { %v4310_v10 = vpop.f32.mrf.mxu0 }
 0x194   : > { %v5615_v35 = vadd.f32 %v4420_v18, %v2493_v24  ;;  %v4311_v36 = vadd.f32 %v4310_v10, %v4309_v21  ;;  %v4422_v49 = vpop.f32.mrf.mxu1  ;;  %v4984_v10 = vld [vmem:[%s5134_s6 + $0x5c0] ss:$48 sps:$4 sm:$0xff]  }
 0x195   : > { %v4423_v41 = vadd.f32 %v4422_v49, %v4421_v28  ;;  %v4312_v46 = vpop.f32.mrf.mxu0  ;;  %2885 = vmatmul.mubr.bf16.gmra.mxu0 %v4972_v38  ;;  %v4989_v49 = vld [vmem:[%s5134_s6 + $0x5c8] ss:$48 sps:$4 sm:$0xff]  }
 0x196   : > { %v2496_v47 = vadd.f32 %v4311_v36, %v5466_v31  ;;  %v4424_v48 = vpop.f32.mrf.mxu1  ;;  %3046 = vmatmul.mubr.bf16.gmra.mxu1 %v4977_v12  ;;  %2892 = vmatprep.mubr.bf16.mxu0 %v4980_v33 }
 0x197   : > { %v4313_v22 = vpop.f32.mrf.mxu0  ;;  %3876 = vmatprep.mubr.msk.bf16.mxu1 %vm2055_vm0, %v4981_v34 }
 0x198   : > { %v5619_v20 = vadd.f32 %v4423_v41, %v2496_v47  ;;  %v4314_v50 = vadd.f32 %v4313_v22, %v4312_v46  ;;  %v4425_v55 = vpop.f32.mrf.mxu1 }
 0x199   : > { %v4426_v58 = vadd.f32 %v4425_v55, %v4424_v48  ;;  %v4315_v59 = vpop.f32.mrf.mxu0 }
 0x19a   : > { %v2501_v60 = vadd.f32 %v4314_v50, %v5471_v43  ;;  %v4427_v0 = vpop.f32.mrf.mxu1 }
 0x19b   : > { %v4316_v31 = vpop.f32.mrf.mxu0 }
 0x19c   : > { %v5626_v6 = vadd.f32 %v4426_v58, %v2501_v60  ;;  %v4317_v9 = vadd.f32 %v4316_v31, %v4315_v59  ;;  %v4428_v2 = vpop.f32.mrf.mxu1 }
 0x19d   : > { %v4429_v14 = vadd.f32 %v4428_v2, %v4427_v0  ;;  %v4318_v17 = vpop.f32.mrf.mxu0  ;;  %2893 = vmatmul.mubr.bf16.gmra.mxu0 %v4978_v57 }
 0x19e   : > { %v2504_v18 = vadd.f32 %v4317_v9, %v5474_v52  ;;  %v4430_v21 = vpop.f32.mrf.mxu1  ;;  %3054 = vmatmul.mubr.bf16.gmra.mxu1 %v4983_v30  ;;  %2900 = vmatprep.mubr.bf16.mxu0 %v4986_v4 }
 0x19f   : > { %v4319_v43 = vpop.f32.mrf.mxu0  ;;  %3877 = vmatprep.mubr.msk.bf16.mxu1 %vm2055_vm0, %v4987_v5 }
 0x1a0   : > { %v5630_v38 = vadd.f32 %v4429_v14, %v2504_v18  ;;  %v4320_v24 = vadd.f32 %v4319_v43, %v4318_v17  ;;  %v4431_v28 = vpop.f32.mrf.mxu1 }
 0x1a1   : > { %v4432_v12 = vadd.f32 %v4431_v28, %v4430_v21  ;;  %v4321_v33 = vpop.f32.mrf.mxu0 }
 0x1a2   : > { %v2509_v34 = vadd.f32 %v4320_v24, %v5479_v62  ;;  %v4433_v36 = vpop.f32.mrf.mxu1 }
 0x1a3   : > { %v4322_v41 = vpop.f32.mrf.mxu0 }
 0x1a4   : > { %v5635_v46 = vadd.f32 %v4432_v12, %v2509_v34  ;;  %v4323_v52 = vadd.f32 %v4322_v41, %v4321_v33  ;;  %v4434_v47 = vpop.f32.mrf.mxu1 }
 0x1a5   : > { %v4435_v48 = vadd.f32 %v4434_v47, %v4433_v36  ;;  %v4324_v22 = vpop.f32.mrf.mxu0  ;;  %2901 = vmatmul.mubr.bf16.gmra.mxu0 %v4984_v10 }
 0x1a6   : > { %v2512_v50 = vadd.f32 %v4323_v52, %v5482_v7  ;;  %v4436_v55 = vpop.f32.mrf.mxu1  ;;  %3062 = vmatmul.mubr.bf16.gmra.mxu1 %v4989_v49 }
 0x1a7   : > { %v4325_v58 = vpop.f32.mrf.mxu0 }
 0x1a8   : > { %v5638_v59 = vadd.f32 %v4435_v48, %v2512_v50  ;;  %v4326_v57 = vadd.f32 %v4325_v58, %v4324_v22  ;;  %v4437_v60 = vpop.f32.mrf.mxu1 }
 0x1a9   : > { %v4438_v62 = vadd.f32 %v4437_v60, %v4436_v55  ;;  %v4327_v0 = vpop.f32.mrf.mxu0 }
 0x1aa   : > { %v2517_v30 = vadd.f32 %v4326_v57, %v5488_v19  ;;  %v4439_v4 = vpop.f32.mrf.mxu1 }
 0x1ab   : > { %v4328_v31 = vpop.f32.mrf.mxu0 }
 0x1ac   : > { %v5641_v5 = vadd.f32 %v4438_v62, %v2517_v30  ;;  %v4329_v9 = vadd.f32 %v4328_v31, %v4327_v0  ;;  %v4440_v2 = vpop.f32.mrf.mxu1 }
 0x1ad   : > { %v4441_v14 = vadd.f32 %v4440_v2, %v4439_v4  ;;  %v4330_v17 = vpop.f32.mrf.mxu0 }
 0x1ae   : > { %v2520_v7 = vadd.f32 %v4329_v9, %v5491_v29  ;;  %v4442_v18 = vpop.f32.mrf.mxu1 }
 0x1af   : > { %v4331_v21 = vpop.f32.mrf.mxu0 }
 0x1b0   : > { %v5644_v43 = vadd.f32 %v4441_v14, %v2520_v7  ;;  %v4332_v24 = vadd.f32 %v4331_v21, %v4330_v17  ;;  %v4443_v28 = vpop.f32.mrf.mxu1 }
 0x1b1   : > { %v4444_v12 = vadd.f32 %v4443_v28, %v4442_v18  ;;  %v4333_v33 = vpop.f32.mrf.mxu0 }
 0x1b2   : > { %v2525_v19 = vadd.f32 %v4332_v24, %v5497_v44  ;;  %v4445_v10 = vpop.f32.mrf.mxu1 }
 0x1b3   : > { %v4334_v34 = vpop.f32.mrf.mxu0 }
 0x1b4   : > { %v5647_v36 = vadd.f32 %v4444_v12, %v2525_v19  ;;  %v4335_v49 = vadd.f32 %v4334_v34, %v4333_v33  ;;  %v4446_v41 = vpop.f32.mrf.mxu1 }
 0x1b5   : > { %v4447_v52 = vadd.f32 %v4446_v41, %v4445_v10  ;;  %v4336_v47 = vpop.f32.mrf.mxu0 }
 0x1b6   : > { %v2528_v29 = vadd.f32 %v4335_v49, %v5500_v54  ;;  %v4448_v48 = vpop.f32.mrf.mxu1 }
 0x1b7   : > { %v4337_v22 = vpop.f32.mrf.mxu0 }
 0x1b8   : > { %v5650_v50 = vadd.f32 %v4447_v52, %v2528_v29  ;;  %v4338_v55 = vadd.f32 %v4337_v22, %v4336_v47  ;;  %v4449_v58 = vpop.f32.mrf.mxu1 }
 0x1b9   : > { %v4450_v57 = vadd.f32 %v4449_v58, %v4448_v48  ;;  %v4339_v60 = vpop.f32.mrf.mxu0 }
 0x1ba   : > { %v2533_v44 = vadd.f32 %v4338_v55, %v5506_v1  ;;  %v4451_v62 = vpop.f32.mrf.mxu1 }
 0x1bb   : > { %v4340_v0 = vpop.f32.mrf.mxu0 }
 0x1bc   : > { %v5653_v30 = vadd.f32 %v4450_v57, %v2533_v44  ;;  %v4341_v4 = vadd.f32 %v4340_v0, %v4339_v60  ;;  %v4452_v31 = vpop.f32.mrf.mxu1 }
 0x1bd   : > { %v4453_v9 = vadd.f32 %v4452_v31, %v4451_v62  ;;  %v4342_v2 = vpop.f32.mrf.mxu0 }
 0x1be   : > { %v2536_v54 = vadd.f32 %v4341_v4, %v5509_v13  ;;  %v4454_v14 = vpop.f32.mrf.mxu1 }
 0x1bf   : > { %v4343_v17 = vpop.f32.mrf.mxu0 }
 0x1c0   : > { %v5656_v7 = vadd.f32 %v4453_v9, %v2536_v54  ;;  %v4344_v18 = vadd.f32 %v4343_v17, %v4342_v2  ;;  %v4455_v21 = vpop.f32.mrf.mxu1 }
 0x1c1   : > { %v4456_v24 = vadd.f32 %v4455_v21, %v4454_v14  ;;  %v4345_v28 = vpop.f32.mrf.mxu0 }
 0x1c2   : > { %v2541_v1 = vadd.f32 %v4344_v18, %v5515_v26  ;;  %v4457_v12 = vpop.f32.mrf.mxu1 }
 0x1c3   : > { %v4346_v33 = vpop.f32.mrf.mxu0 }
 0x1c4   : > { %v5659_v19 = vadd.f32 %v4456_v24, %v2541_v1  ;;  %v4347_v10 = vadd.f32 %v4346_v33, %v4345_v28  ;;  %v4458_v34 = vpop.f32.mrf.mxu1 }
 0x1c5   : > { %v4459_v49 = vadd.f32 %v4458_v34, %v4457_v12  ;;  %v4348_v41 = vpop.f32.mrf.mxu0 }
 0x1c6   : > { %v2544_v13 = vadd.f32 %v4347_v10, %v5518_v37  ;;  %v4460_v52 = vpop.f32.mrf.mxu1 }
 0x1c7   : > { %v4349_v47 = vpop.f32.mrf.mxu0 }
 0x1c8   : > { %v5662_v29 = vadd.f32 %v4459_v49, %v2544_v13  ;;  %v4350_v48 = vadd.f32 %v4349_v47, %v4348_v41  ;;  %v4461_v22 = vpop.f32.mrf.mxu1 }
 0x1c9   : > { %v4462_v55 = vadd.f32 %v4461_v22, %v4460_v52  ;;  %v4351_v58 = vpop.f32.mrf.mxu0 }
 0x1ca   : > { %v2549_v26 = vadd.f32 %v4350_v48, %v5524_v53  ;;  %v4463_v57 = vpop.f32.mrf.mxu1 }
 0x1cb   : > { %v4352_v60 = vpop.f32.mrf.mxu0 }
 0x1cc   : > { %v5665_v44 = vadd.f32 %v4462_v55, %v2549_v26  ;;  %v4353_v62 = vadd.f32 %v4352_v60, %v4351_v58  ;;  %v4464_v0 = vpop.f32.mrf.mxu1 }
 0x1cd   : > { %v4465_v4 = vadd.f32 %v4464_v0, %v4463_v57  ;;  %v4354_v31 = vpop.f32.mrf.mxu0 }
 0x1ce   : > { %v2552_v37 = vadd.f32 %v4353_v62, %v5527_v63  ;;  %v4466_v9 = vpop.f32.mrf.mxu1 }
 0x1cf   : > { %v4355_v2 = vpop.f32.mrf.mxu0 }
 0x1d0   : > { %v5668_v54 = vadd.f32 %v4465_v4, %v2552_v37  ;;  %v4356_v14 = vadd.f32 %v4355_v2, %v4354_v31  ;;  %v4467_v17 = vpop.f32.mrf.mxu1 }
 0x1d1   : > { %v4468_v18 = vadd.f32 %v4467_v17, %v4466_v9  ;;  %v4357_v21 = vpop.f32.mrf.mxu0 }
 0x1d2   : > { %v2557_v53 = vadd.f32 %v4356_v14, %v5533_v15  ;;  %v4469_v24 = vpop.f32.mrf.mxu1 }
 0x1d3   : > { %v4358_v28 = vpop.f32.mrf.mxu0 }
 0x1d4   : > { %v5671_v1 = vadd.f32 %v4468_v18, %v2557_v53  ;;  %v4359_v12 = vadd.f32 %v4358_v28, %v4357_v21  ;;  %v4470_v33 = vpop.f32.mrf.mxu1 }
 0x1d5   : > { %v4471_v10 = vadd.f32 %v4470_v33, %v4469_v24  ;;  %v4360_v34 = vpop.f32.mrf.mxu0 }
 0x1d6   : > { %v2560_v63 = vadd.f32 %v4359_v12, %v5536_v27  ;;  %v4472_v49 = vpop.f32.mrf.mxu1 }
 0x1d7   : > { %v4361_v41 = vpop.f32.mrf.mxu0 }
 0x1d8   : > { %v5674_v13 = vadd.f32 %v4471_v10, %v2560_v63  ;;  %v4362_v52 = vadd.f32 %v4361_v41, %v4360_v34  ;;  %v4473_v47 = vpop.f32.mrf.mxu1 }
 0x1d9   : > { %v4474_v48 = vadd.f32 %v4473_v47, %v4472_v49  ;;  %v4363_v22 = vpop.f32.mrf.mxu0 }
 0x1da   : > { %v2565_v15 = vadd.f32 %v4362_v52, %v5542_v45  ;;  %v4475_v55 = vpop.f32.mrf.mxu1 }
 0x1db   : > { %v4364_v58 = vpop.f32.mrf.mxu0 }
 0x1dc   : > { %v5677_v26 = vadd.f32 %v4474_v48, %v2565_v15  ;;  %v4365_v57 = vadd.f32 %v4364_v58, %v4363_v22  ;;  %v4476_v60 = vpop.f32.mrf.mxu1 }
 0x1dd   : > { %v4477_v62 = vadd.f32 %v4476_v60, %v4475_v55  ;;  %v4366_v0 = vpop.f32.mrf.mxu0 }
 0x1de   : > { %v2568_v27 = vadd.f32 %v4365_v57, %v5545_v42  ;;  %v4478_v4 = vpop.f32.mrf.mxu1 }
 0x1df   : > { %v4367_v31 = vpop.f32.mrf.mxu0 }
 0x1e0   : > { %v5680_v37 = vadd.f32 %v4477_v62, %v2568_v27  ;;  %v4368_v9 = vadd.f32 %v4367_v31, %v4366_v0  ;;  %v4479_v2 = vpop.f32.mrf.mxu1 }
 0x1e1   : > { %v4480_v14 = vadd.f32 %v4479_v2, %v4478_v4  ;;  %v4369_v17 = vpop.f32.mrf.mxu0 }
 0x1e2   : > { %v2573_v45 = vadd.f32 %v4368_v9, %v5551_v8  ;;  %v4481_v18 = vpop.f32.mrf.mxu1 }
 0x1e3   : > { %v4370_v21 = vpop.f32.mrf.mxu0 }
 0x1e4   : > { %v5683_v53 = vadd.f32 %v4480_v14, %v2573_v45  ;;  %v4371_v24 = vadd.f32 %v4370_v21, %v4369_v17  ;;  %v4482_v28 = vpop.f32.mrf.mxu1 }
 0x1e5   : > { %v4483_v12 = vadd.f32 %v4482_v28, %v4481_v18  ;;  %v4372_v33 = vpop.f32.mrf.mxu0 }
 0x1e6   : > { %v2576_v42 = vadd.f32 %v4371_v24, %v5554_v23  ;;  %v4484_v10 = vpop.f32.mrf.mxu1 }
 0x1e7   : > { %v4373_v34 = vpop.f32.mrf.mxu0 }
 0x1e8   : > { %v5686_v63 = vadd.f32 %v4483_v12, %v2576_v42  ;;  %v4374_v49 = vadd.f32 %v4373_v34, %v4372_v33  ;;  %v4485_v41 = vpop.f32.mrf.mxu1 }
 0x1e9   : > { %v4486_v52 = vadd.f32 %v4485_v41, %v4484_v10  ;;  %v4375_v47 = vpop.f32.mrf.mxu0 }
 0x1ea   : > { %v2581_v8 = vadd.f32 %v4374_v49, %v5560_v40  ;;  %v4487_v48 = vpop.f32.mrf.mxu1 }
 0x1eb   : > { %v4376_v22 = vpop.f32.mrf.mxu0 }
 0x1ec   : > { %v5689_v15 = vadd.f32 %v4486_v52, %v2581_v8  ;;  %v4377_v55 = vadd.f32 %v4376_v22, %v4375_v47  ;;  %v4488_v58 = vpop.f32.mrf.mxu1 }
 0x1ed   : > { %v4489_v57 = vadd.f32 %v4488_v58, %v4487_v48  ;;  %v4506_v60 = vpop.f32.mrf.mxu0 }
 0x1ee   : > { %v2584_v23 = vadd.f32 %v4377_v55, %v5563_v56  ;;  %v2943_v62 = vpop.f32.mrf.mxu1 }
 0x1ef   : > { %v4507_v0 = vpop.f32.mrf.mxu0 }
 0x1f0   : > { %v5692_v27 = vadd.f32 %v4489_v57, %v2584_v23  ;;  %v4508_v4 = vadd.f32 %v4507_v0, %v4506_v60  ;;  %v2945_v31 = vpop.f32.mrf.mxu1 }
 0x1f1   : > { %v4509_v9 = vpop.f32.mrf.mxu0 }
 0x1f2   : > { %v2783_v2 = vadd.f32 %v4508_v4, %v5571_v16  ;;  %v2946_v40 = vpop.f32.mrf.mxu1 }
 0x1f3   : > { %v4510_v14 = vpop.f32.mrf.mxu0 }
 0x1f4   : > { %v5695_v17 = vadd.f32 %v2943_v62, %v2783_v2  ;;  %v4511_v45 = vadd.f32 %v4510_v14, %v4509_v9  ;;  %v2948_v18 = vpop.f32.mrf.mxu1 }
 0x1f5   : > { %v4512_v21 = vpop.f32.mrf.mxu0 }
 0x1f6   : > { %v2786_v24 = vadd.f32 %v4511_v45, %v5575_v32  ;;  %v2951_v28 = vpop.f32.mrf.mxu1 }
 0x1f7   : > { %v4513_v56 = vpop.f32.mrf.mxu0 }
 0x1f8   : > { %v5698_v12 = vadd.f32 %v2946_v40, %v2786_v24  ;;  %v4514_v33 = vadd.f32 %v4513_v56, %v4512_v21  ;;  %v2953_v42 = vpop.f32.mrf.mxu1 }
 0x1f9   : > { %v4515_v10 = vpop.f32.mrf.mxu0 }
 0x1fa   : > { %v2791_v34 = vadd.f32 %v4514_v33, %v5582_v51  ;;  %v2954_v49 = vpop.f32.mrf.mxu1 }
 0x1fb   : > { %v4516_v16 = vpop.f32.mrf.mxu0 }
 0x1fc   : > { %v5701_v41 = vadd.f32 %v2951_v28, %v2791_v34  ;;  %v4517_v52 = vadd.f32 %v4516_v16, %v4515_v10  ;;  %v2956_v47 = vpop.f32.mrf.mxu1 }
 0x1fd   : > { %v4518_v8 = vpop.f32.mrf.mxu0 }
 0x1fe   : > { %v2794_v48 = vadd.f32 %v4517_v52, %v5586_v3  ;;  %v2959_v22 = vpop.f32.mrf.mxu1 }
 0x1ff   : > { %v4519_v32 = vpop.f32.mrf.mxu0 }
 0x200   : > { %v5704_v55 = vadd.f32 %v2954_v49, %v2794_v48  ;;  %v4520_v58 = vadd.f32 %v4519_v32, %v4518_v8  ;;  %v2961_v57 = vpop.f32.mrf.mxu1 }
 0x201   : > { %v4521_v60 = vpop.f32.mrf.mxu0 }
 0x202   : > { %v2799_v23 = vadd.f32 %v4520_v58, %v5593_v25  ;;  %v2962_v62 = vpop.f32.mrf.mxu1 }
 0x203   : > { %v4522_v51 = vpop.f32.mrf.mxu0 }
 0x204   : > { %v5707_v0 = vadd.f32 %v2959_v22, %v2799_v23  ;;  %v4523_v4 = vadd.f32 %v4522_v51, %v4521_v60  ;;  %v2964_v31 = vpop.f32.mrf.mxu1 }
 0x205   : > { %v4524_v9 = vpop.f32.mrf.mxu0 }
 0x206   : > { %v2802_v2 = vadd.f32 %v4523_v4, %v5597_v39  ;;  %v2967_v40 = vpop.f32.mrf.mxu1 }
 0x207   : > { %v4525_v3 = vpop.f32.mrf.mxu0 }
 0x208   : > { %v5710_v14 = vadd.f32 %v2962_v62, %v2802_v2  ;;  %v4526_v45 = vadd.f32 %v4525_v3, %v4524_v9  ;;  %v2969_v18 = vpop.f32.mrf.mxu1 }
 0x209   : > { %v4527_v21 = vpop.f32.mrf.mxu0 }
 0x20a   : > { %v2807_v24 = vadd.f32 %v4526_v45, %v5604_v61  ;;  %v2970_v28 = vpop.f32.mrf.mxu1 }
 0x20b   : > { %v4528_v25 = vpop.f32.mrf.mxu0 }
 0x20c   : > { %v5713_v56 = vadd.f32 %v2967_v40, %v2807_v24  ;;  %v4529_v33 = vadd.f32 %v4528_v25, %v4527_v21  ;;  %v2972_v42 = vpop.f32.mrf.mxu1  ;;  %v3109_v24 = vmul.f32 %v5701_v41, %v5701_v41  ;;  %v3070_v25 = vadd.f32 %v5698_v12, %v5695_v17 }
 0x20d   : > { %v4530_v10 = vpop.f32.mrf.mxu0 }
 0x20e   : > { %v2810_v34 = vadd.f32 %v4529_v33, %v5608_v11  ;;  %v2975_v49 = vpop.f32.mrf.mxu1 }
 0x20f   : > { %v4531_v39 = vpop.f32.mrf.mxu0 }
 0x210   : > { %v5716_v16 = vadd.f32 %v2970_v28, %v2810_v34  ;;  %v4532_v52 = vadd.f32 %v4531_v39, %v4530_v10  ;;  %v2977_v47 = vpop.f32.mrf.mxu1  ;;  %v3110_v10 = vmul.f32 %v5704_v55, %v5704_v55 }
 0x211   : > { %v4533_v8 = vpop.f32.mrf.mxu0 }
 0x212   : > { %v2815_v48 = vadd.f32 %v4532_v52, %v5615_v35  ;;  %v2978_v22 = vpop.f32.mrf.mxu1  ;;  %v3108_v35 = vmul.f32 %v5698_v12, %v5698_v12 }
 0x213   : > { %v4534_v61 = vpop.f32.mrf.mxu0 }
 0x214   : > { %v5719_v32 = vadd.f32 %v2975_v49, %v2815_v48  ;;  %v4535_v58 = vadd.f32 %v4534_v61, %v4533_v8  ;;  %v2980_v57 = vpop.f32.mrf.mxu1  ;;  %v3071_v49 = vadd.f32 %v3070_v25, %v5701_v41  ;;  %v3111_v48 = vmul.f32 %v5707_v0, %v5707_v0 }
 0x215   : > { %v4536_v60 = vpop.f32.mrf.mxu0 }
 0x216   : > { %v2818_v23 = vadd.f32 %v4535_v58, %v5619_v20  ;;  %v2983_v62 = vpop.f32.mrf.mxu1  ;;  %v3107_v20 = vmul.f32 %v5695_v17, %v5695_v17  ;;  %v3072_v61 = vadd.f32 %v3071_v49, %v5704_v55 }
 0x217   : > { %v4537_v11 = vpop.f32.mrf.mxu0 }
 0x218   : > { %v5722_v51 = vadd.f32 %v2978_v22, %v2818_v23  ;;  %v4538_v4 = vadd.f32 %v4537_v11, %v4536_v60  ;;  %v2985_v31 = vpop.f32.mrf.mxu1  ;;  %v3139_v42 = vadd.f32 %v3108_v35, %v3107_v20  ;;  %v3112_v60 = vmul.f32 %v5710_v14, %v5710_v14 }
 0x219   : > { %v4539_v9 = vpop.f32.mrf.mxu0 }
 0x21a   : > { %v2823_v2 = vadd.f32 %v4538_v4, %v5626_v6  ;;  %v2986_v40 = vpop.f32.mrf.mxu1  ;;  %v3140_v8 = vadd.f32 %v3139_v42, %v3109_v24  ;;  %v3115_v42 = vmul.f32 %v5719_v32, %v5719_v32 }
 0x21b   : > { %v4540_v3 = vpop.f32.mrf.mxu0 }
 0x21c   : > { %v5727_v45 = vadd.f32 %v2983_v62, %v2823_v2  ;;  %v4541_v18 = vadd.f32 %v4540_v3, %v4539_v9  ;;  %v2988_v21 = vpop.f32.mrf.mxu1  ;;  %v3141_v57 = vadd.f32 %v3140_v8, %v3110_v10  ;;  %v3073_v62 = vadd.f32 %v3072_v61, %v5707_v0 }
 0x21d   : > { %v4542_v28 = vpop.f32.mrf.mxu0  ;;  %v3113_v2 = vmul.f32 %v5713_v56, %v5713_v56  ;;  %v3114_v21 = vmul.f32 %v5716_v16, %v5716_v16 }
 0x21e   : > { %v2826_v6 = vadd.f32 %v4541_v18, %v5630_v38  ;;  %v2991_v33 = vpop.f32.mrf.mxu1  ;;  %v3142_v9 = vadd.f32 %v3141_v57, %v3111_v48  ;;  %v3074_v35 = vadd.f32 %v3073_v62, %v5710_v14  ;;  %v3117_v57 = vmul.f32 %v5727_v45, %v5727_v45 }
 0x21f   : > { %v4543_v34 = vpop.f32.mrf.mxu0 }
 0x220   : > { %v5739_v39 = vadd.f32 %v2986_v40, %v2826_v6  ;;  %v4544_v52 = vadd.f32 %v4543_v34, %v4542_v28  ;;  %v2993_v47 = vpop.f32.mrf.mxu1  ;;  %v3143_v18 = vadd.f32 %v3142_v9, %v3112_v60  ;;  %v3075_v24 = vadd.f32 %v3074_v35, %v5713_v56 }
 0x221   : > { %v4545_v22 = vpop.f32.mrf.mxu0  ;;  %v3116_v47 = vmul.f32 %v5722_v51, %v5722_v51 }
 0x222   : > { %v2831_v38 = vadd.f32 %v4544_v52, %v5635_v46  ;;  %v2994_v58 = vpop.f32.mrf.mxu1  ;;  %v3076_v34 = vadd.f32 %v3075_v24, %v5716_v16 }
 0x223   : > { %v4546_v23 = vpop.f32.mrf.mxu0 }
 0x224   : > { %v5748_v11 = vadd.f32 %v2991_v33, %v2831_v38  ;;  %v4547_v4 = vadd.f32 %v4546_v23, %v4545_v22  ;;  %v2996_v31 = vpop.f32.mrf.mxu1  ;;  %v3144_v33 = vadd.f32 %v3143_v18, %v3113_v2  ;;  %v3077_v48 = vadd.f32 %v3076_v34, %v5719_v32 }
 0x225   : > { %v4548_v40 = vpop.f32.mrf.mxu0  ;;  %v3118_v31 = vmul.f32 %v5739_v39, %v5739_v39 }
 0x226   : > { %v2834_v46 = vadd.f32 %v4547_v4, %v5638_v59  ;;  %v2999_v3 = vpop.f32.mrf.mxu1  ;;  %v3145_v52 = vadd.f32 %v3144_v33, %v3114_v21  ;;  %v3078_v23 = vadd.f32 %v3077_v48, %v5722_v51  ;;  %v3119_v18 = vmul.f32 %v5748_v11, %v5748_v11 }
 0x227   : > { %v4549_v20 = vpop.f32.mrf.mxu0 }
 0x228   : > { %v5757_v28 = vadd.f32 %v2994_v58, %v2834_v46  ;;  %v4550_v25 = vadd.f32 %v4549_v20, %v4548_v40  ;;  %v3001_v6 = vpop.f32.mrf.mxu1  ;;  %v3146_v58 = vadd.f32 %v3145_v52, %v3115_v42  ;;  %v3079_v2 = vadd.f32 %v3078_v23, %v5727_v45 }
 0x229   : > { %v4551_v10 = vpop.f32.mrf.mxu0 }
 0x22a   : > { %v2839_v59 = vadd.f32 %v4550_v25, %v5641_v5  ;;  %v3002_v49 = vpop.f32.mrf.mxu1  ;;  %v3147_v4 = vadd.f32 %v3146_v58, %v3116_v47  ;;  %v3080_v20 = vadd.f32 %v3079_v2, %v5739_v39  ;;  %v3120_v6 = vmul.f32 %v5757_v28, %v5757_v28 }
 0x22b   : > { %v4552_v8 = vpop.f32.mrf.mxu0 }
 0x22c   : > { %v5766_v22 = vadd.f32 %v2999_v3, %v2839_v59  ;;  %v4553_v61 = vadd.f32 %v4552_v8, %v4551_v10  ;;  %v3004_v38 = vpop.f32.mrf.mxu1  ;;  %v3148_v3 = vadd.f32 %v3147_v4, %v3117_v57  ;;  %v3081_v42 = vadd.f32 %v3080_v20, %v5748_v11 }
 0x22d   : > { %v4554_v60 = vpop.f32.mrf.mxu0 }
 0x22e   : > { %v2842_v5 = vadd.f32 %v4553_v61, %v5644_v43  ;;  %v3007_v62 = vpop.f32.mrf.mxu1  ;;  %v3149_v25 = vadd.f32 %v3148_v3, %v3118_v31  ;;  %v3082_v47 = vadd.f32 %v3081_v42, %v5757_v28 }
 0x22f   : > { %v4555_v9 = vpop.f32.mrf.mxu0 }
 0x230   : > { %v5775_v40 = vadd.f32 %v3002_v49, %v2842_v5  ;;  %v4556_v35 = vadd.f32 %v4555_v9, %v4554_v60  ;;  %v3009_v46 = vpop.f32.mrf.mxu1  ;;  %v3150_v59 = vadd.f32 %v3149_v25, %v3119_v18  ;;  %v3121_v49 = vmul.f32 %v5766_v22, %v5766_v22 }
 0x231   : > { %v4557_v21 = vpop.f32.mrf.mxu0  ;;  %v3083_v57 = vadd.f32 %v3082_v47, %v5766_v22 }
 0x232   : > { %v2847_v43 = vadd.f32 %v4556_v35, %v5647_v36  ;;  %v3010_v24 = vpop.f32.mrf.mxu1  ;;  %v3151_v61 = vadd.f32 %v3150_v59, %v3120_v6  ;;  %v3122_v38 = vmul.f32 %v5775_v40, %v5775_v40 }
 0x233   : > { %v4558_v33 = vpop.f32.mrf.mxu0  ;;  %v3084_v9 = vadd.f32 %v3083_v57, %v5775_v40 }
 0x234   : > { %v4559_v10 = vadd.f32 %v4558_v33, %v4557_v21  ;;  %v3012_v34 = vpop.f32.mrf.mxu1  ;;  %v5787_v8 = vadd.f32 %v3007_v62, %v2847_v43  ;;  %v3152_v4 = vadd.f32 %v3151_v61, %v3121_v49 }
 0x235   : > { %v4560_v52 = vpop.f32.mrf.mxu0 }
 0x236   : > { %v2850_v36 = vadd.f32 %v4559_v10, %v5650_v50  ;;  %v3015_v48 = vpop.f32.mrf.mxu1  ;;  %v3123_v62 = vmul.f32 %v5787_v8, %v5787_v8  ;;  %v3153_v35 = vadd.f32 %v3152_v4, %v3122_v38  ;;  %v3085_v3 = vadd.f32 %v3084_v9, %v5787_v8 }
 0x237   : > { %v4561_v58 = vpop.f32.mrf.mxu0 }
 0x238   : > { %v5793_v60 = vadd.f32 %v3010_v24, %v2850_v36  ;;  %v4562_v23 = vadd.f32 %v4561_v58, %v4560_v52  ;;  %v3017_v5 = vpop.f32.mrf.mxu1  ;;  %v3154_v25 = vadd.f32 %v3153_v35, %v3123_v62 }
 0x239   : > { %v4563_v31 = vpop.f32.mrf.mxu0 }
 0x23a   : > { %v2855_v50 = vadd.f32 %v4562_v23, %v5653_v30  ;;  %v3018_v2 = vpop.f32.mrf.mxu1  ;;  %v3124_v18 = vmul.f32 %v5793_v60, %v5793_v60  ;;  %v3086_v6 = vadd.f32 %v3085_v3, %v5793_v60 }
 0x23b   : > { %v4564_v46 = vpop.f32.mrf.mxu0 }
 0x23c   : > { %v5802_v21 = vadd.f32 %v3015_v48, %v2855_v50  ;;  %v4565_v20 = vadd.f32 %v4564_v46, %v4563_v31  ;;  %v3020_v43 = vpop.f32.mrf.mxu1  ;;  %v3155_v34 = vadd.f32 %v3154_v25, %v3124_v18 }
 0x23d   : > { %v4566_v24 = vpop.f32.mrf.mxu0 }
 0x23e   : > { %v3125_v33 = vmul.f32 %v5802_v21, %v5802_v21  ;;  %v2858_v30 = vadd.f32 %v4565_v20, %v5656_v7  ;;  %v3023_v42 = vpop.f32.mrf.mxu1  ;;  %v3087_v59 = vadd.f32 %v3086_v6, %v5802_v21 }
 0x23f   : > { %v4567_v10 = vpop.f32.mrf.mxu0 }
 0x240   : > { %v5809_v49 = vadd.f32 %v3018_v2, %v2858_v30  ;;  %v4568_v52 = vadd.f32 %v4567_v10, %v4566_v24  ;;  %v3025_v47 = vpop.f32.mrf.mxu1  ;;  %v3156_v48 = vadd.f32 %v3155_v34, %v3125_v33 }
 0x241   : > { %v4569_v36 = vpop.f32.mrf.mxu0 }
 0x242   : > { %v3088_v61 = vadd.f32 %v3087_v59, %v5809_v49  ;;  %v3126_v38 = vmul.f32 %v5809_v49, %v5809_v49  ;;  %v2863_v58 = vadd.f32 %v4568_v52, %v5659_v19  ;;  %v3026_v57 = vpop.f32.mrf.mxu1 }
 0x243   : > { %v4570_v7 = vpop.f32.mrf.mxu0 }
 0x244   : > { %v3157_v23 = vadd.f32 %v3156_v48, %v3126_v38  ;;  %v5815_v5 = vadd.f32 %v3023_v42, %v2863_v58  ;;  %v4571_v4 = vadd.f32 %v4570_v7, %v4569_v36  ;;  %v3028_v31 = vpop.f32.mrf.mxu1 }
 0x245   : > { %v4572_v9 = vpop.f32.mrf.mxu0 }
 0x246   : > { %v3089_v62 = vadd.f32 %v3088_v61, %v5815_v5  ;;  %v3127_v50 = vmul.f32 %v5815_v5, %v5815_v5  ;;  %v2866_v2 = vadd.f32 %v4571_v4, %v5662_v29  ;;  %v3031_v35 = vpop.f32.mrf.mxu1 }
 0x247   : > { %v4573_v46 = vpop.f32.mrf.mxu0 }
 0x248   : > { %v3158_v3 = vadd.f32 %v3157_v23, %v3127_v50  ;;  %v5821_v18 = vadd.f32 %v3026_v57, %v2866_v2  ;;  %v4574_v19 = vadd.f32 %v4573_v46, %v4572_v9  ;;  %v3033_v20 = vpop.f32.mrf.mxu1 }
 0x249   : > { %v4575_v43 = vpop.f32.mrf.mxu0 }
 0x24a   : > { %v3090_v24 = vadd.f32 %v3089_v62, %v5821_v18  ;;  %v3128_v25 = vmul.f32 %v5821_v18, %v5821_v18  ;;  %v2871_v6 = vadd.f32 %v4574_v19, %v5665_v44  ;;  %v3034_v33 = vpop.f32.mrf.mxu1 }
 0x24b   : > { %v4576_v30 = vpop.f32.mrf.mxu0 }
 0x24c   : > { %v3159_v42 = vadd.f32 %v3158_v3, %v3128_v25  ;;  %v5827_v10 = vadd.f32 %v3031_v35, %v2871_v6  ;;  %v4577_v29 = vadd.f32 %v4576_v30, %v4575_v43  ;;  %v3036_v34 = vpop.f32.mrf.mxu1 }
 0x24d   : > { %v4578_v59 = vpop.f32.mrf.mxu0 }
 0x24e   : > { %v3091_v52 = vadd.f32 %v3090_v24, %v5827_v10  ;;  %v3129_v47 = vmul.f32 %v5827_v10, %v5827_v10  ;;  %v2874_v36 = vadd.f32 %v4577_v29, %v5668_v54  ;;  %v3039_v48 = vpop.f32.mrf.mxu1 }
 0x24f   : > { %v4579_v61 = vpop.f32.mrf.mxu0 }
 0x250   : > { %v3160_v38 = vadd.f32 %v3159_v42, %v3129_v47  ;;  %v5833_v58 = vadd.f32 %v3034_v33, %v2874_v36  ;;  %v4580_v44 = vadd.f32 %v4579_v61, %v4578_v59  ;;  %v3041_v57 = vpop.f32.mrf.mxu1 }
 0x251   : > { %v4581_v7 = vpop.f32.mrf.mxu0 }
 0x252   : > { %v3092_v23 = vadd.f32 %v3091_v52, %v5833_v58  ;;  %v3130_v4 = vmul.f32 %v5833_v58, %v5833_v58  ;;  %v2879_v31 = vadd.f32 %v4580_v44, %v5671_v1  ;;  %v3042_v9 = vpop.f32.mrf.mxu1 }
 0x253   : > { %v4582_v62 = vpop.f32.mrf.mxu0 }
 0x254   : > { %v3161_v50 = vadd.f32 %v3160_v38, %v3130_v4  ;;  %v5839_v2 = vadd.f32 %v3039_v48, %v2879_v31  ;;  %v4583_v54 = vadd.f32 %v4582_v62, %v4581_v7  ;;  %v3044_v35 = vpop.f32.mrf.mxu1 }
 0x255   : > { %v4584_v46 = vpop.f32.mrf.mxu0 }
 0x256   : > { %v3093_v3 = vadd.f32 %v3092_v23, %v5839_v2  ;;  %v3131_v19 = vmul.f32 %v5839_v2, %v5839_v2  ;;  %v2882_v20 = vadd.f32 %v4583_v54, %v5674_v13  ;;  %v3047_v43 = vpop.f32.mrf.mxu1 }
 0x257   : > { %v4585_v24 = vpop.f32.mrf.mxu0 }
 0x258   : > { %v3162_v25 = vadd.f32 %v3161_v50, %v3131_v19  ;;  %v5845_v6 = vadd.f32 %v3042_v9, %v2882_v20  ;;  %v4586_v1 = vadd.f32 %v4585_v24, %v4584_v46  ;;  %v3049_v33 = vpop.f32.mrf.mxu1 }
 0x259   : > { %v4587_v30 = vpop.f32.mrf.mxu0 }
 0x25a   : > { %v3094_v42 = vadd.f32 %v3093_v3, %v5845_v6  ;;  %v3132_v29 = vmul.f32 %v5845_v6, %v5845_v6  ;;  %v2887_v34 = vadd.f32 %v4586_v1, %v5677_v26  ;;  %v3050_v59 = vpop.f32.mrf.mxu1 }
 0x25b   : > { %v4588_v52 = vpop.f32.mrf.mxu0 }
 0x25c   : > { %v3163_v47 = vadd.f32 %v3162_v25, %v3132_v29  ;;  %v5851_v36 = vadd.f32 %v3047_v43, %v2887_v34  ;;  %v4589_v13 = vadd.f32 %v4588_v52, %v4587_v30  ;;  %v3052_v48 = vpop.f32.mrf.mxu1 }
 0x25d   : > { %v4590_v61 = vpop.f32.mrf.mxu0 }
 0x25e   : > { %v3095_v38 = vadd.f32 %v3094_v42, %v5851_v36  ;;  %v3133_v44 = vmul.f32 %v5851_v36, %v5851_v36  ;;  %v2890_v57 = vadd.f32 %v4589_v13, %v5680_v37  ;;  %v3055_v7 = vpop.f32.mrf.mxu1 }
 0x25f   : > { %v4591_v23 = vpop.f32.mrf.mxu0 }
 0x260   : > { %v3164_v4 = vadd.f32 %v3163_v47, %v3133_v44  ;;  %v5857_v31 = vadd.f32 %v3050_v59, %v2890_v57  ;;  %v4592_v26 = vadd.f32 %v4591_v23, %v4590_v61  ;;  %v3057_v9 = vpop.f32.mrf.mxu1 }
 0x261   : > { %v4593_v62 = vpop.f32.mrf.mxu0 }
 0x262   : > { %v3096_v50 = vadd.f32 %v3095_v38, %v5857_v31  ;;  %v3134_v54 = vmul.f32 %v5857_v31, %v5857_v31  ;;  %v2895_v35 = vadd.f32 %v4592_v26, %v5683_v53  ;;  %v3058_v46 = vpop.f32.mrf.mxu1 }
 0x263   : > { %v4594_v3 = vpop.f32.mrf.mxu0 }
 0x264   : > { %v3165_v19 = vadd.f32 %v3164_v4, %v3134_v54  ;;  %v5863_v20 = vadd.f32 %v3055_v7, %v2895_v35  ;;  %v4595_v37 = vadd.f32 %v4594_v3, %v4593_v62  ;;  %v3060_v43 = vpop.f32.mrf.mxu1 }
 0x265   : > { %v4596_v24 = vpop.f32.mrf.mxu0 }
 0x266   : > { %v3097_v25 = vadd.f32 %v3096_v50, %v5863_v20  ;;  %v3135_v1 = vmul.f32 %v5863_v20, %v5863_v20  ;;  %v2898_v33 = vadd.f32 %v4595_v37, %v5686_v63  ;;  %v3063_v30 = vpop.f32.mrf.mxu1 }
 0x267   : > { %v4597_v42 = vpop.f32.mrf.mxu0 }
 0x268   : > { %v3166_v29 = vadd.f32 %v3165_v19, %v3135_v1  ;;  %v5869_v34 = vadd.f32 %v3058_v46, %v2898_v33  ;;  %v4598_v53 = vadd.f32 %v4597_v42, %v4596_v24  ;;  %v3065_v59 = vpop.f32.mrf.mxu1 }
 0x269   : > { %v4599_v52 = vpop.f32.mrf.mxu0 }
 0x26a   : > { %v3098_v47 = vadd.f32 %v3097_v25, %v5869_v34  ;;  %v3136_v13 = vmul.f32 %v5869_v34, %v5869_v34  ;;  %v2903_v48 = vadd.f32 %v4598_v53, %v5689_v15  ;;  %v3066_v61 = vpop.f32.mrf.mxu1 }
 0x26b   : > { %v4600_v38 = vpop.f32.mrf.mxu0 }
 0x26c   : > { %v3167_v44 = vadd.f32 %v3166_v29, %v3136_v13  ;;  %v5875_v57 = vadd.f32 %v3063_v30, %v2903_v48  ;;  %v4601_v63 = vadd.f32 %v4600_v38, %v4599_v52  ;;  %v3068_v7 = vpop.f32.mrf.mxu1 }
 0x26e   : > { %v3099_v23 = vadd.f32 %v3098_v47, %v5875_v57  ;;  %v3137_v4 = vmul.f32 %v5875_v57, %v5875_v57  ;;  %v2906_v26 = vadd.f32 %v4601_v63, %v5692_v27 }
 0x270   : > { %v3168_v9 = vadd.f32 %v3167_v44, %v3137_v4  ;;  %v5881_v62 = vadd.f32 %v3066_v61, %v2906_v26 }
 0x272   : > { %v3100_v50 = vadd.f32 %v3099_v23, %v5881_v62  ;;  %v3138_v15 = vmul.f32 %v5881_v62, %v5881_v62 }
 0x274   : > { %v3101_v54 = vrot.slane %v3100_v50, 4  ;;  %v3169_v35 = vadd.f32 %v3168_v9, %v3138_v15 }
 0x276   : > { %v3102_v46 = vadd.f32 %v3101_v54, %v3100_v50  ;;  %v3170_v3 = vrot.slane %v3169_v35, 4 }
 0x278   : > { %v3103_v19 = vrot.slane %v3102_v46, 2  ;;  %v3171_v37 = vadd.f32 %v3170_v3, %v3169_v35 }
 0x27a   : > { %v3104_v43 = vadd.f32 %v3103_v19, %v3102_v46  ;;  %v3172_v24 = vrot.slane %v3171_v37, 2 }
 0x27c   : > { %v3105_v25 = vrot.slane %v3104_v43, 1  ;;  %v3173_v1 = vadd.f32 %v3172_v24, %v3171_v37 }
 0x27e   : > { %v3106_v33 = vadd.f32 %v3105_v25, %v3104_v43  ;;  %v3174_v27 = vrot.slane %v3173_v1, 1 }
 0x280   : > { %v3175_v30 = vadd.f32 %v3174_v27, %v3173_v1  ;;  %v5886_v42 = vmul.f32 0.00390625, %v3106_v33 }
 0x282   : > { %v3177_v29 = vmul.f32 0.00390625, %v3175_v30  ;;  %v3178_v53 = vmul.f32 %v5886_v42, %v5886_v42  ;;  %v3199_v47 = vsub.f32 %v5802_v21, %v5886_v42  ;;  %v3200_v13 = vsub.f32 %v5809_v49, %v5886_v42  ;;  %v3878_v30 = vld [vmem:[%s6020_s2] ss:$0 sm:$0xff] }
 0x283   : > { %v3201_v48 = vsub.f32 %v5815_v5, %v5886_v42  ;;  %v3202_v61 = vsub.f32 %v5821_v18, %v5886_v42  ;;  %v3203_v38 = vsub.f32 %v5827_v10, %v5886_v42  ;;  %v3204_v44 = vsub.f32 %v5833_v58, %v5886_v42 }
 0x284   : > { %v3179_v59 = vsub.f32 %v3177_v29, %v3178_v53  ;;  %v3205_v63 = vsub.f32 %v5839_v2, %v5886_v42  ;;  %v3206_v21 = vsub.f32 %v5845_v6, %v5886_v42  ;;  %v3207_v49 = vsub.f32 %v5851_v36, %v5886_v42 }
 0x285   : > { %v3208_v5 = vsub.f32 %v5857_v31, %v5886_v42  ;;  %v3209_v18 = vsub.f32 %v5863_v20, %v5886_v42  ;;  %v3210_v10 = vsub.f32 %v5869_v34, %v5886_v42  ;;  %v3211_v58 = vsub.f32 %v5875_v57, %v5886_v42 }
 0x286   : > { %v3180_v52 = vmax.f32 %v3179_v59, 0.0  ;;  %v3212_v2 = vsub.f32 %v5881_v62, %v5886_v42  ;;  %v3181_v6 = vsub.f32 %v5695_v17, %v5886_v42  ;;  %v3182_v36 = vsub.f32 %v5698_v12, %v5886_v42 }
 0x287   : > { %v3183_v31 = vsub.f32 %v5701_v41, %v5886_v42  ;;  %v3184_v20 = vsub.f32 %v5704_v55, %v5886_v42  ;;  %v3185_v34 = vsub.f32 %v5707_v0, %v5886_v42  ;;  %v3186_v57 = vsub.f32 %v5710_v14, %v5886_v42 }
 0x288   : > { %v3213_v7 = vadd.f32 1e-05, %v3180_v52  ;;  %v3187_v23 = vsub.f32 %v5713_v56, %v5886_v42  ;;  %v3188_v17 = vsub.f32 %v5716_v16, %v5886_v42  ;;  %v3189_v12 = vsub.f32 %v5719_v32, %v5886_v42 }
 0x289   : > { %v3190_v41 = vsub.f32 %v5722_v51, %v5886_v42  ;;  %v3191_v55 = vsub.f32 %v5727_v45, %v5886_v42  ;;  %v3192_v0 = vsub.f32 %v5739_v39, %v5886_v42  ;;  %v3193_v14 = vsub.f32 %v5748_v11, %v5886_v42 }
 0x28a   : > { %4990 = vrsqrt.f32 %v3213_v7  ;;  %v3194_v56 = vsub.f32 %v5757_v28, %v5886_v42  ;;  %v3195_v16 = vsub.f32 %v5766_v22, %v5886_v42  ;;  %v3196_v32 = vsub.f32 %v5775_v40, %v5886_v42 }
 0x28b   : > { %v3197_v51 = vsub.f32 %v5787_v8, %v5886_v42  ;;  %v3198_v45 = vsub.f32 %v5793_v60, %v5886_v42 }
 0x297   : > { %v4991_v4 = vpop.eup %4990 }
 0x298   : > { %v3215_v39 = vmul.f32 %v4991_v4, %v3181_v6  ;;  %v3216_v26 = vmul.f32 %v4991_v4, %v3182_v36  ;;  %v3217_v9 = vmul.f32 %v4991_v4, %v3183_v31  ;;  %v3218_v11 = vmul.f32 %v4991_v4, %v3184_v20 }
 0x299   : > { %v3219_v62 = vmul.f32 %v4991_v4, %v3185_v34  ;;  %v3220_v50 = vmul.f32 %v4991_v4, %v3186_v57  ;;  %v3221_v28 = vmul.f32 %v4991_v4, %v3187_v23  ;;  %v3222_v15 = vmul.f32 %v4991_v4, %v3188_v17 }
 0x29a   : > { %v3223_v54 = vmul.f32 %v4991_v4, %v3189_v12  ;;  %v3224_v35 = vmul.f32 %v4991_v4, %v3190_v41  ;;  %v3225_v22 = vmul.f32 %v4991_v4, %v3191_v55  ;;  %v3226_v46 = vmul.f32 %v4991_v4, %v3192_v0 }
 0x29b   : > { %v3227_v3 = vmul.f32 %v4991_v4, %v3193_v14  ;;  %v3228_v40 = vmul.f32 %v4991_v4, %v3194_v56  ;;  %v3229_v19 = vmul.f32 %v4991_v4, %v3195_v16  ;;  %v3230_v37 = vmul.f32 %v4991_v4, %v3196_v32  ;;  %v3879_v14 = vld [vmem:[%s6021_s3] ss:$0 sm:$0xff] }
 0x29c   : > { %v3231_v8 = vmul.f32 %v4991_v4, %v3197_v51  ;;  %v3232_v43 = vmul.f32 %v4991_v4, %v3198_v45  ;;  %v3233_v24 = vmul.f32 %v4991_v4, %v3199_v47  ;;  %v3234_v60 = vmul.f32 %v4991_v4, %v3200_v13 }
 0x29d   : > { %v3235_v25 = vmul.f32 %v4991_v4, %v3201_v48  ;;  %v3236_v1 = vmul.f32 %v4991_v4, %v3202_v61  ;;  %v3237_v33 = vmul.f32 %v4991_v4, %v3203_v38  ;;  %v3238_v27 = vmul.f32 %v4991_v4, %v3204_v44 }
 0x29e   : > { %v3239_v42 = vmul.f32 %v4991_v4, %v3205_v63  ;;  %v3240_v29 = vmul.f32 %v4991_v4, %v3206_v21  ;;  %v3241_v53 = vmul.f32 %v4991_v4, %v3207_v49  ;;  %v3242_v59 = vmul.f32 %v4991_v4, %v3208_v5 }
 0x29f   : > { %v3243_v52 = vmul.f32 %v4991_v4, %v3209_v18  ;;  %v3244_v7 = vmul.f32 %v4991_v4, %v3210_v10  ;;  %v3245_v6 = vmul.f32 %v4991_v4, %v3211_v58  ;;  %v3246_v36 = vmul.f32 %v4991_v4, %v3212_v2 }
 0x2a0   : > { %v3254_v31 = vmul.f32 %v3878_v30, %v3215_v39  ;;  %v3255_v20 = vmul.f32 %v3878_v30, %v3216_v26  ;;  %v3256_v47 = vmul.f32 %v3878_v30, %v3217_v9  ;;  %v3257_v13 = vmul.f32 %v3878_v30, %v3218_v11 }
 0x2a1   : > { %v3258_v48 = vmul.f32 %v3878_v30, %v3219_v62  ;;  %v3259_v61 = vmul.f32 %v3878_v30, %v3220_v50  ;;  %v3260_v38 = vmul.f32 %v3878_v30, %v3221_v28  ;;  %v3261_v44 = vmul.f32 %v3878_v30, %v3222_v15 }
 0x2a2   : > { %v3262_v34 = vmul.f32 %v3878_v30, %v3223_v54  ;;  %v3263_v57 = vmul.f32 %v3878_v30, %v3224_v35  ;;  %v3264_v23 = vmul.f32 %v3878_v30, %v3225_v22  ;;  %v3265_v17 = vmul.f32 %v3878_v30, %v3226_v46 }
 0x2a3   : > { %v3266_v63 = vmul.f32 %v3878_v30, %v3227_v3  ;;  %v3267_v21 = vmul.f32 %v3878_v30, %v3228_v40  ;;  %v3268_v49 = vmul.f32 %v3878_v30, %v3229_v19  ;;  %v3269_v5 = vmul.f32 %v3878_v30, %v3230_v37 }
 0x2a4   : > { %v3270_v18 = vmul.f32 %v3878_v30, %v3231_v8  ;;  %v3271_v10 = vmul.f32 %v3878_v30, %v3232_v43  ;;  %v3272_v58 = vmul.f32 %v3878_v30, %v3233_v24  ;;  %v3273_v2 = vmul.f32 %v3878_v30, %v3234_v60 }
 0x2a5   : > { %v3274_v12 = vmul.f32 %v3878_v30, %v3235_v25  ;;  %v3275_v41 = vmul.f32 %v3878_v30, %v3236_v1  ;;  %v3276_v55 = vmul.f32 %v3878_v30, %v3237_v33  ;;  %v3277_v0 = vmul.f32 %v3878_v30, %v3238_v27 }
 0x2a6   : > { %v3278_v56 = vmul.f32 %v3878_v30, %v3239_v42  ;;  %v3279_v4 = vmul.f32 %v3878_v30, %v3240_v29  ;;  %v3280_v16 = vmul.f32 %v3878_v30, %v3241_v53  ;;  %v3281_v32 = vmul.f32 %v3878_v30, %v3242_v59 }
 0x2a7   : > { %v3282_v51 = vmul.f32 %v3878_v30, %v3243_v52  ;;  %v3283_v45 = vmul.f32 %v3878_v30, %v3244_v7  ;;  %v3284_v39 = vmul.f32 %v3878_v30, %v3245_v6  ;;  %v3285_v26 = vmul.f32 %v3878_v30, %v3246_v36 }
 0x2a8   : > { %v5960_v9 = vadd.f32 %v3879_v14, %v3254_v31  ;;  %v5962_v11 = vadd.f32 %v3879_v14, %v3255_v20  ;;  %v5964_v62 = vadd.f32 %v3879_v14, %v3256_v47  ;;  %v5966_v50 = vadd.f32 %v3879_v14, %v3257_v13 }
 0x2a9   : > { %v5968_v28 = vadd.f32 %v3879_v14, %v3258_v48  ;;  %v5970_v15 = vadd.f32 %v3879_v14, %v3259_v61  ;;  %v5972_v54 = vadd.f32 %v3879_v14, %v3260_v38  ;;  %v5974_v35 = vadd.f32 %v3879_v14, %v3261_v44 }
 0x2aa   : > { %v5976_v22 = vadd.f32 %v3879_v14, %v3262_v34  ;;  %v3302_v46 = vadd.f32 %v3879_v14, %v3263_v57  ;;  %v3303_v3 = vadd.f32 %v3879_v14, %v3264_v23  ;;  %v3304_v40 = vadd.f32 %v3879_v14, %v3265_v17 }
 0x2ab   : > { %v3305_v19 = vadd.f32 %v3879_v14, %v3266_v63  ;;  %v3306_v37 = vadd.f32 %v3879_v14, %v3267_v21  ;;  %v3307_v8 = vadd.f32 %v3879_v14, %v3268_v49  ;;  %v3308_v43 = vadd.f32 %v3879_v14, %v3269_v5 }
 0x2ac   : > { %v5978_v24 = vadd.f32 %v3879_v14, %v3270_v18  ;;  %v3310_v60 = vadd.f32 %v3879_v14, %v3271_v10  ;;  %v3311_v25 = vadd.f32 %v3879_v14, %v3272_v58  ;;  %v3312_v1 = vadd.f32 %v3879_v14, %v3273_v2 }
 0x2ad   : > { %v3313_v33 = vadd.f32 %v3879_v14, %v3274_v12  ;;  %v3314_v27 = vadd.f32 %v3879_v14, %v3275_v41  ;;  %v3315_v30 = vadd.f32 %v3879_v14, %v3276_v55  ;;  %v3316_v42 = vadd.f32 %v3879_v14, %v3277_v0 }
 0x2ae   : > { %v5980_v29 = vadd.f32 %v3879_v14, %v3278_v56  ;;  %v3318_v53 = vadd.f32 %v3879_v14, %v3279_v4  ;;  %v3319_v59 = vadd.f32 %v3879_v14, %v3280_v16  ;;  %v3320_v52 = vadd.f32 %v3879_v14, %v3281_v32 }
 0x2af   : > { %v3321_v7 = vadd.f32 %v3879_v14, %v3282_v51  ;;  %v3322_v6 = vadd.f32 %v3879_v14, %v3283_v45  ;;  %v3323_v36 = vadd.f32 %v3879_v14, %v3284_v39  ;;  %v3324_v31 = vadd.f32 %v3879_v14, %v3285_v26 }
 0x2b0   : > { %v3325_v20 = vmax.f32 %v5960_v9, 0.0  ;;  %v3326_v47 = vmax.f32 %v5962_v11, 0.0  ;;  %v3327_v13 = vmax.f32 %v5964_v62, 0.0  ;;  %v3328_v48 = vmax.f32 %v5966_v50, 0.0 }
 0x2b1   : > { %v3329_v61 = vmax.f32 %v5968_v28, 0.0  ;;  %v3330_v38 = vmax.f32 %v5970_v15, 0.0  ;;  %v3331_v44 = vmax.f32 %v5972_v54, 0.0  ;;  %v3332_v34 = vmax.f32 %v5974_v35, 0.0 }
 0x2b2   : > { %v3333_v57 = vmax.f32 %v5976_v22, 0.0  ;;  %v3334_v23 = vmax.f32 %v3302_v46, 0.0  ;;  %v3335_v17 = vmax.f32 %v3303_v3, 0.0  ;;  %v3336_v63 = vmax.f32 %v3304_v40, 0.0 }
 0x2b3   : > { %v3337_v21 = vmax.f32 %v3305_v19, 0.0  ;;  %v3338_v49 = vmax.f32 %v3306_v37, 0.0  ;;  %v3339_v5 = vmax.f32 %v3307_v8, 0.0  ;;  %v3340_v18 = vmax.f32 %v3308_v43, 0.0 }
 0x2b4   : > { %v3341_v10 = vmax.f32 %v5978_v24, 0.0  ;;  %v3342_v58 = vmax.f32 %v3310_v60, 0.0  ;;  %v3343_v2 = vmax.f32 %v3311_v25, 0.0  ;;  %v3344_v12 = vmax.f32 %v3312_v1, 0.0 }
 0x2b5   : > { %v3345_v41 = vmax.f32 %v3313_v33, 0.0  ;;  %v3346_v55 = vmax.f32 %v3314_v27, 0.0  ;;  %v3347_v0 = vmax.f32 %v3315_v30, 0.0  ;;  %v3348_v14 = vmax.f32 %v3316_v42, 0.0 }
 0x2b6   : > { %v3349_v56 = vmax.f32 %v5980_v29, 0.0  ;;  %v3350_v4 = vmax.f32 %v3318_v53, 0.0  ;;  %v3351_v16 = vmax.f32 %v3319_v59, 0.0  ;;  %v3352_v32 = vmax.f32 %v3320_v52, 0.0 }
 0x2b7   : > { %v3353_v51 = vmax.f32 %v3321_v7, 0.0  ;;  %v3354_v45 = vmax.f32 %v3322_v6, 0.0  ;;  %v3355_v39 = vmax.f32 %v3323_v36, 0.0  ;;  %v3356_v26 = vmax.f32 %v3324_v31, 0.0 }
 0x2b8   : > { %v3950_v9 = vpack.c.bf16 %v3326_v47, %v3325_v20  ;;  %v3955_v11 = vpack.c.bf16 %v3328_v48, %v3327_v13  ;;  %v3960_v62 = vpack.c.bf16 %v3330_v38, %v3329_v61  ;;  %v3965_v50 = vpack.c.bf16 %v3332_v34, %v3331_v44 }
 0x2b9   : > { %v3970_v28 = vpack.c.bf16 %v3334_v23, %v3333_v57  ;;  %v3975_v15 = vpack.c.bf16 %v3336_v63, %v3335_v17  ;;  %v3980_v54 = vpack.c.bf16 %v3338_v49, %v3337_v21  ;;  %v3985_v35 = vpack.c.bf16 %v3340_v18, %v3339_v5 }
 0x2ba   : > { %3951 = vst [vmem:[%s5997_s20] sm:$0xff] %v3950_v9   ;;  %4027 = vst [vmem:[%s5997_s20 + $0x8] sm:$0xff] %v3955_v11   ;;  %v3990_v22 = vpack.c.bf16 %v3342_v58, %v3341_v10  ;;  %v3995_v46 = vpack.c.bf16 %v3344_v12, %v3343_v2  ;;  %v4000_v3 = vpack.c.bf16 %v3346_v55, %v3345_v41 }
 0x2bb   : > { %4028 = vst [vmem:[%s5997_s20 + $0x10] sm:$0xff] %v3960_v62   ;;  %4029 = vst [vmem:[%s5997_s20 + $0x18] sm:$0xff] %v3965_v50   ;;  %v4005_v40 = vpack.c.bf16 %v3348_v14, %v3347_v0  ;;  %v4010_v19 = vpack.c.bf16 %v3350_v4, %v3349_v56  ;;  %v4015_v37 = vpack.c.bf16 %v3352_v32, %v3351_v16 }
 0x2bc   : > { %4030 = vst [vmem:[%s5997_s20 + $0x20] sm:$0xff] %v3970_v28   ;;  %4031 = vst [vmem:[%s5997_s20 + $0x28] sm:$0xff] %v3975_v15   ;;  %v4020_v8 = vpack.c.bf16 %v3354_v45, %v3353_v51  ;;  %v4025_v43 = vpack.c.bf16 %v3356_v26, %v3355_v39 }
 0x2bd   : > { %4032 = vst [vmem:[%s5997_s20 + $0x30] sm:$0xff] %v3980_v54   ;;  %4033 = vst [vmem:[%s5997_s20 + $0x38] sm:$0xff] %v3985_v35  }
 0x2be   : > { %4034 = vst [vmem:[%s5997_s20 + $0x40] sm:$0xff] %v3990_v22   ;;  %4035 = vst [vmem:[%s5997_s20 + $0x48] sm:$0xff] %v3995_v46  }
 0x2bf   : > { %4036 = vst [vmem:[%s5997_s20 + $0x50] sm:$0xff] %v4000_v3   ;;  %4037 = vst [vmem:[%s5997_s20 + $0x58] sm:$0xff] %v4005_v40  }
 0x2c0   : > { %4038 = vst [vmem:[%s5997_s20 + $0x60] sm:$0xff] %v4010_v19   ;;  %4039 = vst [vmem:[%s5997_s20 + $0x68] sm:$0xff] %v4015_v37  }
 0x2c1   : > { %4040 = vst [vmem:[%s5997_s20 + $0x70] sm:$0xff] %v4020_v8   ;;  %4041 = vst [vmem:[%s5997_s20 + $0x78] sm:$0xff] %v4025_v43  }
 0x2c2 PF: > { %s14_s15 = sadd.s32 1, %s4998_s15  }
 0x2c3   : > { %p11_p4 = scmp.ge.s32.totalorder %s14_s15, 4  }
 0x2c5   :  { %13 = sbr.rel (!%p11_p4) target bundleno = 1 (0x1), region = 66 }

// kernel: mapping_network_forward.12
= control target key start
LH: loop header
LB: loop body
LE: loop exit
PB: predicated region body
PF: predicated region fallthrough
CT: control target
= control target key end

     0   :  { %s4226_s15 = smov 0   ;;  %s5314_s0 = inlined_call_operand.vmem [shape: bf16[2,256,1152], index: 0, kind: input, shape index: {}]   ;;  %s5315_s1 = inlined_call_operand.vmem [shape: bf16[1152,128], index: 1, kind: input, shape index: {}]   ;;  %s5316_s2 = inlined_call_operand.vmem [shape: f32[1,128], index: 2, kind: input, shape index: {}]   ;;  %s5317_s3 = inlined_call_operand.vmem [shape: f32[1,128], index: 3, kind: input, shape index: {}]   ;;  %s5318_s4 = inlined_call_operand.vmem [shape: bf16[2,256,128], index: 4, kind: output, shape index: {}]  }
   0x1 LB: > { %s2978_s16 = sadd.s32 4294967295, %s4199_s15   ;;  %p2982_p0 = scmp.ge.s32.totalorder %s4199_s15, 1  ;;  %s4199_s15 = sphi %s4226_s15, %s14_s15  }
   0x2   : > { %p162_p1 = scmp.lt.s32.totalorder %s4199_s15, 3 }
   0x4   : > { %p163_p2 = pnand %p2982_p0, %p162_p1 }
   0x6   : > { %166 = sbr.rel (%p163_p2) target bundleno = 610 (0x262), region = 36 }
   0xb   : > { %v3911_v0 = vld [vmem:[%s5315_s1 + $0x78] sm:$0xff]   ;;  %v3913_v2 = vld [vmem:[%s5315_s1 + $0x70] sm:$0xff]   ;;  %p188_p3 = scmp.lt.s32.totalorder %s2978_s16, 1  ;;  %v3915_v4 = vld [vmem:[%s5315_s1 + $0x68] sm:$0xff]  }
   0xc   : > { %v3912_v1 = vld [vmem:[%s5315_s1 + $0x38] sm:$0xff]   ;;  %3366 = vmatprep.subr.bf16.mxu0 %v3911_v0  ;;  %3886 = vmatprep.subr.bf16.mxu1 %v3911_v0  ;;  %v3914_v3 = vld [vmem:[%s5315_s1 + $0x30] sm:$0xff]   ;;  %v3916_v5 = vld [vmem:[%s5315_s1 + $0x28] sm:$0xff]  }
   0xd   : > { %3367 = vmatpush3.bf16.msra.mxu0 %v3912_v1  ;;  %3894 = vmatpush3.bf16.msra.mxu1 %v3912_v1  ;;  %s5342_s16 = smov (!%p188_p3, %s2978_s16), 1  ;;  %v3917_v6 = vld [vmem:[%s5315_s1 + $0x60] sm:$0xff]   ;;  %v3919_v8 = vld [vmem:[%s5315_s1 + $0x58] sm:$0xff]   ;;  %v3921_v10 = vld [vmem:[%s5315_s1 + $0x50] sm:$0xff]  }
   0xe   : > { %3368 = vmatprep.subr.bf16.mxu0 %v3913_v2  ;;  %3887 = vmatprep.subr.bf16.mxu1 %v3913_v2  ;;  %s3902_s5 = smul.u32 1152, %s5342_s16  ;;  %v3918_v7 = vld [vmem:[%s5315_s1 + $0x20] sm:$0xff]   ;;  %v3920_v9 = vld [vmem:[%s5315_s1 + $0x18] sm:$0xff]   ;;  %v3922_v13 = vld [vmem:[%s5315_s1 + $0x10] sm:$0xff]   ;;  %s3238_s29 = sshll.u32 %s5342_s16, 7 }
   0xf   : > { %v3923_v14 = vld [vmem:[%s5315_s1 + $0x48] sm:$0xff]   ;;  %v3925_v16 = vld [vmem:[%s5315_s1 + $0x40] sm:$0xff]   ;;  %v3933_v18 = vld [vmem:[%s5315_s1 + $0xf8] sm:$0xff]   ;;  %s5293_s6 = scalar_lea.vmem %s5318_s4, %s3238_s29 }
  0x10   : > { %s4267_s12 = scalar_lea.vmem %s5314_s0, %s3902_s5  ;;  %v3924_v15 = vld [vmem:[%s5315_s1 + $0x8] sm:$0xff]   ;;  %v3926_v17 = vld [vmem:[%s5315_s1] sm:$0xff]   ;;  %v3934_v21 = vld [vmem:[%s5315_s1 + $0x178] sm:$0xff]  }
  0x11   : > { %3369 = vmatpush3.bf16.msra.mxu0 %v3914_v3  ;;  %3895 = vmatpush3.bf16.msra.mxu1 %v3914_v3  ;;  %v3929_v11 = vld [vmem:[%s4267_s12 + $0x4] ss:$36 sps:$4 sm:$0xff]   ;;  %v3935_v22 = vld [vmem:[%s5315_s1 + $0xb8] sm:$0xff]   ;;  %v3937_v24 = vld [vmem:[%s5315_s1 + $0xf0] sm:$0xff]  }
  0x12   : > { %3370 = vmatprep.subr.bf16.mxu0 %v3915_v4  ;;  %3888 = vmatprep.subr.bf16.mxu1 %v3915_v4  ;;  %v3932_v12 = vld [vmem:[%s4267_s12 + $0x364] ss:$36 sps:$4 sm:$0xff]   ;;  %v3936_v23 = vld [vmem:[%s5315_s1 + $0x138] sm:$0xff]   ;;  %v3939_v25 = vld [vmem:[%s4267_s12 + $0x4c] ss:$36 sps:$4 sm:$0xff]  }
  0x13   : > { %1703 = vmatprep.mubr.bf16.mxu0 %v3929_v11  ;;  %1799 = vmatprep.mubr.bf16.mxu1 %v3932_v12  ;;  %v3927_v19 = vld [vmem:[%s4267_s12] ss:$36 sps:$4 sm:$0xff]   ;;  %v3941_v26 = vld [vmem:[%s4267_s12 + $0x3ac] ss:$36 sps:$4 sm:$0xff]   ;;  %v3951_v35 = vld [vmem:[%s4267_s12 + $0x94] ss:$36 sps:$4 sm:$0xff]  }
  0x14   : > { %v3930_v20 = vld [vmem:[%s4267_s12 + $0x360] ss:$36 sps:$4 sm:$0xff]   ;;  %v3948_v27 = vld [vmem:[%s5315_s1 + $0x170] sm:$0xff]   ;;  %v3943_v30 = vld [vmem:[%s4267_s12 + $0x48] ss:$36 sps:$4 sm:$0xff]  }
  0x15   : > { %3371 = vmatpush3.bf16.msra.mxu0 %v3916_v5  ;;  %3896 = vmatpush3.bf16.msra.mxu1 %v3916_v5  ;;  %v3938_v28 = vld [vmem:[%s5315_s1 + $0xb0] sm:$0xff]   ;;  %v3944_v31 = vld [vmem:[%s4267_s12 + $0x3a8] ss:$36 sps:$4 sm:$0xff]   ;;  %v3947_v34 = vld [vmem:[%s5315_s1 + $0xe0] sm:$0xff]  }
  0x16   : > { %3372 = vmatprep.subr.bf16.mxu0 %v3917_v6  ;;  %3889 = vmatprep.subr.bf16.mxu1 %v3917_v6  ;;  %v3950_v29 = vld [vmem:[%s5315_s1 + $0x130] sm:$0xff]   ;;  %v3945_v32 = vld [vmem:[%s5315_s1 + $0xe8] sm:$0xff]   ;;  %v3949_v37 = vld [vmem:[%s5315_s1 + $0xa0] sm:$0xff]  }
  0x17   : > { %v3946_v33 = vld [vmem:[%s5315_s1 + $0xa8] sm:$0xff]   ;;  %v3953_v36 = vld [vmem:[%s4267_s12 + $0x3f4] ss:$36 sps:$4 sm:$0xff]   ;;  %v3961_v45 = vld [vmem:[%s4267_s12 + $0xdc] ss:$36 sps:$4 sm:$0xff]  }
  0x18   : > { %v3957_v38 = vld [vmem:[%s5315_s1 + $0xd8] sm:$0xff]   ;;  %v3955_v39 = vld [vmem:[%s4267_s12 + $0x90] ss:$36 sps:$4 sm:$0xff]   ;;  %v3968_v41 = vld [vmem:[%s5315_s1 + $0x168] sm:$0xff]  }
  0x19   : > { %3373 = vmatpush3.bf16.msra.mxu0 %v3918_v7  ;;  %3897 = vmatpush3.bf16.msra.mxu1 %v3918_v7  ;;  %v3956_v40 = vld [vmem:[%s4267_s12 + $0x3f0] ss:$36 sps:$4 sm:$0xff]   ;;  %v3958_v42 = vld [vmem:[%s5315_s1 + $0x98] sm:$0xff]   ;;  %v3970_v44 = vld [vmem:[%s5315_s1 + $0x128] sm:$0xff]  }
  0x1a   : > { %3374 = vmatprep.subr.bf16.mxu0 %v3919_v8  ;;  %3890 = vmatprep.subr.bf16.mxu1 %v3919_v8  ;;  %v3959_v43 = vld [vmem:[%s5315_s1 + $0xd0] sm:$0xff]   ;;  %v3963_v46 = vld [vmem:[%s4267_s12 + $0x43c] ss:$36 sps:$4 sm:$0xff]   ;;  %v3967_v50 = vld [vmem:[%s5315_s1 + $0xc8] sm:$0xff]  }
  0x1b   : > { %v3960_v47 = vld [vmem:[%s5315_s1 + $0x90] sm:$0xff]   ;;  %v3965_v48 = vld [vmem:[%s4267_s12 + $0xd8] ss:$36 sps:$4 sm:$0xff]   ;;  %v3969_v51 = vld [vmem:[%s5315_s1 + $0x88] sm:$0xff]  }
  0x1c   : > { %v3966_v49 = vld [vmem:[%s4267_s12 + $0x438] ss:$36 sps:$4 sm:$0xff]   ;;  %v3973_v52 = vld [vmem:[%s4267_s12 + $0x124] ss:$36 sps:$4 sm:$0xff]   ;;  %v3977_v56 = vld [vmem:[%s4267_s12 + $0xc] ss:$36 sps:$4 sm:$0xff]  }
  0x1d   : > { %3375 = vmatpush3.bf16.msra.mxu0 %v3920_v9  ;;  %3898 = vmatpush3.bf16.msra.mxu1 %v3920_v9  ;;  %v3971_v53 = vld [vmem:[%s5315_s1 + $0xc0] sm:$0xff]   ;;  %v3975_v58 = vld [vmem:[%s4267_s12 + $0x8] ss:$36 sps:$4 sm:$0xff]   ;;  %v3979_v60 = vld [vmem:[%s5315_s1 + $0x1f8] sm:$0xff]  }
  0x1e   : > { %3376 = vmatprep.subr.bf16.mxu0 %v3921_v10  ;;  %3891 = vmatprep.subr.bf16.mxu1 %v3921_v10  ;;  %v3981_v54 = vld [vmem:[%s5315_s1 + $0x160] sm:$0xff]   ;;  %v3980_v61 = vld [vmem:[%s5315_s1 + $0x1b8] sm:$0xff]   ;;  %v3983_v62 = vld [vmem:[%s4267_s12 + $0x16c] ss:$36 sps:$4 sm:$0xff]  }
  0x1f   : > { %v3982_v55 = vld [vmem:[%s5315_s1 + $0x120] sm:$0xff]   ;;  %v3995_v63 = vld [vmem:[%s5315_s1 + $0x158] sm:$0xff]   ;;  %v3996_v2 = vld [vmem:[%s5315_s1 + $0x1f0] sm:$0xff]  }
  0x20   : > { %v3972_v57 = vld [vmem:[%s5315_s1 + $0x80] sm:$0xff]   ;;  %v3985_v0 = vld [vmem:[%s4267_s12 + $0x54] ss:$36 sps:$4 sm:$0xff]   ;;  %v3987_v4 = vld [vmem:[%s4267_s12 + $0x168] ss:$36 sps:$4 sm:$0xff]  }
  0x21   : > { %3377 = vmatpush3.bf16.msra.mxu0 %v3922_v13  ;;  %3899 = vmatpush3.bf16.msra.mxu1 %v3922_v13  ;;  %v3978_v59 = vld [vmem:[%s4267_s12 + $0x120] ss:$36 sps:$4 sm:$0xff]   ;;  %v3997_v1 = vld [vmem:[%s5315_s1 + $0x118] sm:$0xff]   ;;  %v3998_v3 = vld [vmem:[%s5315_s1 + $0x1b0] sm:$0xff]  }
  0x22   : > { %3378 = vmatprep.subr.bf16.mxu0 %v3923_v14  ;;  %3892 = vmatprep.subr.bf16.mxu1 %v3923_v14  ;;  %v4005_v5 = vld [vmem:[%s5315_s1 + $0x150] sm:$0xff]   ;;  %v3991_v9 = vld [vmem:[%s4267_s12 + $0x9c] ss:$36 sps:$4 sm:$0xff]   ;;  %v4013_v10 = vld [vmem:[%s5315_s1 + $0x1e8] sm:$0xff]  }
  0x23   : > { %v4006_v6 = vld [vmem:[%s5315_s1 + $0x110] sm:$0xff]   ;;  %v4014_v11 = vld [vmem:[%s5315_s1 + $0x1a8] sm:$0xff]   ;;  %v3994_v13 = vld [vmem:[%s4267_s12 + $0x98] ss:$36 sps:$4 sm:$0xff]  }
  0x24   : > { %v3988_v7 = vld [vmem:[%s4267_s12 + $0x50] ss:$36 sps:$4 sm:$0xff]   ;;  %v3999_v14 = vld [vmem:[%s4267_s12 + $0x1fc] ss:$36 sps:$4 sm:$0xff]  }
  0x25   : > { %3379 = vmatpush3.bf16.msra.mxu0 %v3924_v15  ;;  %3900 = vmatpush3.bf16.msra.mxu1 %v3924_v15  ;;  %v3989_v8 = vld [vmem:[%s4267_s12 + $0x1b4] ss:$36 sps:$4 sm:$0xff]   ;;  %v4021_v15 = vld [vmem:[%s5315_s1 + $0x148] sm:$0xff]  }
  0x26   : > { %3380 = vmatprep.subr.bf16.mxu0 %v3925_v16  ;;  %3893 = vmatprep.subr.bf16.mxu1 %v3925_v16  ;;  %v3993_v12 = vld [vmem:[%s4267_s12 + $0x1b0] ss:$36 sps:$4 sm:$0xff]   ;;  %v4022_v16 = vld [vmem:[%s5315_s1 + $0x108] sm:$0xff]  }
  0x29   : > { %3381 = vmatpush3.bf16.msra.mxu0 %v3926_v17  ;;  %3901 = vmatpush3.bf16.msra.mxu1 %v3926_v17  ;;  %v4001_v17 = vld [vmem:[%s4267_s12 + $0xe4] ss:$36 sps:$4 sm:$0xff]  }
  0x2a   : > { %3478 = vmatprep.subr.bf16.mxu1 %v3933_v18  ;;  %3590 = vmatprep.subr.bf16.mxu0 %v3934_v21  ;;  %v4029_v18 = vld [vmem:[%s5315_s1 + $0x1e0] sm:$0xff]  }
  0x2b   : > { %v4031_v21 = vld [vmem:[%s5315_s1 + $0x140] sm:$0xff]  }
  0x2c   : > { %1704 = vmatmul.mubr.bf16.vlgmr.msra.gmra.mxu0 %v3927_v19  ;;  %1800 = vmatmul.mubr.bf16.vlgmr.msra.gmra.mxu1 %v3930_v20  ;;  %v4030_v19 = vld [vmem:[%s5315_s1 + $0x1a0] sm:$0xff]   ;;  %v4003_v20 = vld [vmem:[%s4267_s12 + $0x1f8] ss:$36 sps:$4 sm:$0xff]  }
  0x2d   : > { %3479 = vmatpush3.bf16.msra.mxu1 %v3935_v22  ;;  %3591 = vmatpush3.bf16.msra.mxu0 %v3936_v23  ;;  %v4032_v22 = vld [vmem:[%s5315_s1 + $0x100] sm:$0xff]  }
  0x2e   : > { %3480 = vmatprep.subr.bf16.mxu1 %v3937_v24  ;;  %1711 = vmatprep.mubr.bf16.mxu0 %v3939_v25  ;;  %v4004_v23 = vld [vmem:[%s4267_s12 + $0xe0] ss:$36 sps:$4 sm:$0xff]   ;;  %v4009_v25 = vld [vmem:[%s4267_s12 + $0x12c] ss:$36 sps:$4 sm:$0xff]  }
  0x2f   : > { %1807 = vmatprep.mubr.bf16.mxu1 %v3941_v26  ;;  %3592 = vmatprep.subr.bf16.mxu0 %v3948_v27  ;;  %v4007_v24 = vld [vmem:[%s4267_s12 + $0x244] ss:$36 sps:$4 sm:$0xff]   ;;  %v4045_v26 = vld [vmem:[%s5315_s1 + $0x1d8] sm:$0xff]  }
  0x30   : > { %v4011_v27 = vld [vmem:[%s4267_s12 + $0x240] ss:$36 sps:$4 sm:$0xff]  }
  0x31   : > { %3481 = vmatpush3.bf16.msra.mxu1 %v3938_v28  ;;  %3593 = vmatpush3.bf16.msra.mxu0 %v3950_v29  ;;  %v4046_v28 = vld [vmem:[%s5315_s1 + $0x238] sm:$0xff]  }
  0x32   : > { %3482 = vmatprep.subr.bf16.mxu1 %v3945_v32  ;;  %3594 = vmatprep.subr.bf16.mxu0 %v3968_v41  ;;  %v4047_v29 = vld [vmem:[%s5315_s1 + $0x198] sm:$0xff]   ;;  %v4075_v41 = vld [vmem:[%s5315_s1 + $0x1c8] sm:$0xff]  }
  0x33   : > { %v4017_v32 = vld [vmem:[%s4267_s12 + $0x174] ss:$36 sps:$4 sm:$0xff]  }
  0x34   : > { %1712 = vmatmul.mubr.bf16.gmra.mxu0 %v3943_v30  ;;  %1808 = vmatmul.mubr.bf16.gmra.mxu1 %v3944_v31  ;;  %v4012_v30 = vld [vmem:[%s4267_s12 + $0x128] ss:$36 sps:$4 sm:$0xff]  }
  0x35   : > { %3483 = vmatpush3.bf16.msra.mxu1 %v3946_v33  ;;  %1719 = vmatprep.mubr.bf16.mxu0 %v3951_v35  ;;  %v4015_v31 = vld [vmem:[%s4267_s12 + $0x28c] ss:$36 sps:$4 sm:$0xff]  }
  0x36   : > { %3484 = vmatprep.subr.bf16.mxu1 %v3947_v34  ;;  %1815 = vmatprep.mubr.bf16.mxu1 %v3953_v36  ;;  %v4060_v33 = vld [vmem:[%s5315_s1 + $0x1d0] sm:$0xff]   ;;  %v4019_v34 = vld [vmem:[%s4267_s12 + $0x288] ss:$36 sps:$4 sm:$0xff]  }
  0x37   : > { %3595 = vmatpush3.bf16.msra.mxu0 %v3970_v44  ;;  %v4020_v35 = vld [vmem:[%s4267_s12 + $0x170] ss:$36 sps:$4 sm:$0xff]   ;;  %v4035_v44 = vld [vmem:[%s4267_s12 + $0x204] ss:$36 sps:$4 sm:$0xff]  }
  0x38   : > { %3596 = vmatprep.subr.bf16.mxu0 %v3981_v54  ;;  %v4062_v36 = vld [vmem:[%s5315_s1 + $0x190] sm:$0xff]   ;;  %v4050_v54 = vld [vmem:[%s4267_s12 + $0x5c] ss:$36 sps:$4 sm:$0xff]  }
  0x39   : > { %3485 = vmatpush3.bf16.msra.mxu1 %v3949_v37  ;;  %v4023_v37 = vld [vmem:[%s4267_s12 + $0x2d4] ss:$36 sps:$4 sm:$0xff]  }
  0x3a   : > { %3486 = vmatprep.subr.bf16.mxu1 %v3957_v38  ;;  %v4025_v38 = vld [vmem:[%s4267_s12 + $0x1bc] ss:$36 sps:$4 sm:$0xff]  }
  0x3b   : > { %3597 = vmatpush3.bf16.msra.mxu0 %v3982_v55  ;;  %v4061_v55 = vld [vmem:[%s5315_s1 + $0x230] sm:$0xff]  }
  0x3c   : > { %1720 = vmatmul.mubr.bf16.gmra.mxu0 %v3955_v39  ;;  %1816 = vmatmul.mubr.bf16.gmra.mxu1 %v3956_v40  ;;  %v4027_v39 = vld [vmem:[%s4267_s12 + $0x2d0] ss:$36 sps:$4 sm:$0xff]   ;;  %v4028_v40 = vld [vmem:[%s4267_s12 + $0x1b8] ss:$36 sps:$4 sm:$0xff]  }
  0x3d   : > { %3487 = vmatpush3.bf16.msra.mxu1 %v3958_v42  ;;  %1727 = vmatprep.mubr.bf16.mxu0 %v3961_v45  ;;  %v4033_v42 = vld [vmem:[%s4267_s12 + $0x31c] ss:$36 sps:$4 sm:$0xff]  }
  0x3e   : > { %3488 = vmatprep.subr.bf16.mxu1 %v3959_v43  ;;  %1823 = vmatprep.mubr.bf16.mxu1 %v3963_v46  ;;  %v4077_v43 = vld [vmem:[%s5315_s1 + $0x188] sm:$0xff]   ;;  %v4037_v45 = vld [vmem:[%s4267_s12 + $0x318] ss:$36 sps:$4 sm:$0xff]   ;;  %v4038_v46 = vld [vmem:[%s4267_s12 + $0x200] ss:$36 sps:$4 sm:$0xff]  }
  0x3f   : > { %3598 = vmatprep.subr.bf16.mxu0 %v3995_v63  ;;  %v4058_v63 = vld [vmem:[%s4267_s12 + $0x2d8] ss:$36 sps:$4 sm:$0xff]  }
  0x40   : > { %3599 = vmatpush3.bf16.msra.mxu0 %v3997_v1  ;;  %v4063_v1 = vld [vmem:[%s4267_s12 + $0x324] ss:$36 sps:$4 sm:$0xff]  }
  0x41   : > { %3489 = vmatpush3.bf16.msra.mxu1 %v3960_v47  ;;  %3600 = vmatprep.subr.bf16.mxu0 %v4005_v5  ;;  %v4090_v47 = vld [vmem:[%s5315_s1 + $0x1c0] sm:$0xff]   ;;  %v4068_v5 = vld [vmem:[%s4267_s12 + $0xe8] ss:$36 sps:$4 sm:$0xff]  }
  0x42   : > { %3490 = vmatprep.subr.bf16.mxu1 %v3967_v50  ;;  %v4043_v50 = vld [vmem:[%s4267_s12 + $0x14] ss:$36 sps:$4 sm:$0xff]  }
  0x44   : > { %1728 = vmatmul.mubr.bf16.gmra.mxu0 %v3965_v48  ;;  %1824 = vmatmul.mubr.bf16.gmra.mxu1 %v3966_v49  ;;  %v4039_v48 = vld [vmem:[%s4267_s12 + $0x24c] ss:$36 sps:$4 sm:$0xff]   ;;  %v4092_v49 = vld [vmem:[%s5315_s1 + $0x180] sm:$0xff]  }
  0x45   : > { %3491 = vmatpush3.bf16.msra.mxu1 %v3969_v51  ;;  %1735 = vmatprep.mubr.bf16.mxu0 %v3973_v52  ;;  %v4041_v51 = vld [vmem:[%s4267_s12 + $0x10] ss:$36 sps:$4 sm:$0xff]   ;;  %v4044_v52 = vld [vmem:[%s4267_s12 + $0x248] ss:$36 sps:$4 sm:$0xff]  }
  0x46   : > { %3492 = vmatprep.subr.bf16.mxu1 %v3971_v53  ;;  %1864 = vmatprep.mubr.bf16.mxu1 %v3977_v56  ;;  %v4048_v53 = vld [vmem:[%s4267_s12 + $0x294] ss:$36 sps:$4 sm:$0xff]   ;;  %v4076_v56 = vld [vmem:[%s5315_s1 + $0x228] sm:$0xff]  }
  0x47   : > { %3601 = vmatpush3.bf16.msra.mxu0 %v4006_v6  ;;  %v4131_v6 = vld [vmem:[%s5315_s1 + $0x208] sm:$0xff]  }
  0x48   : > { %3602 = vmatprep.subr.bf16.mxu0 %v4021_v15  ;;  %v4083_v15 = vld [vmem:[%s4267_s12 + $0x178] ss:$36 sps:$4 sm:$0xff]  }
  0x49   : > { %3493 = vmatpush3.bf16.msra.mxu1 %v3972_v57  ;;  %v4052_v57 = vld [vmem:[%s4267_s12 + $0x290] ss:$36 sps:$4 sm:$0xff]  }
  0x4a   : > { %3702 = vmatprep.subr.bf16.mxu1 %v3979_v60  ;;  %v4056_v60 = vld [vmem:[%s4267_s12 + $0xa4] ss:$36 sps:$4 sm:$0xff]  }
  0x4b   : > { %3603 = vmatpush3.bf16.msra.mxu0 %v4022_v16  ;;  %v4084_v16 = vld [vmem:[%s4267_s12 + $0x3fc] ss:$36 sps:$4 sm:$0xff]  }
  0x4c   : > { %1736 = vmatmul.mubr.bf16.gmra.mxu0 %v3978_v59  ;;  %1865 = vmatmul.mubr.bf16.vlgmr.msra.gmra.mxu1 %v3975_v58  ;;  %v4053_v58 = vld [vmem:[%s4267_s12 + $0x58] ss:$36 sps:$4 sm:$0xff]  }
  0x4d   : > { %3703 = vmatpush3.bf16.msra.mxu1 %v3980_v61  ;;  %1743 = vmatprep.mubr.bf16.mxu0 %v3983_v62  ;;  %v4054_v59 = vld [vmem:[%s4267_s12 + $0x2dc] ss:$36 sps:$4 sm:$0xff]  }
  0x4e   : > { %1872 = vmatprep.mubr.bf16.mxu1 %v3985_v0  ;;  %3704 = vmatprep.subr.bf16.mxu1 %v3996_v2  ;;  %v4091_v61 = vld [vmem:[%s5315_s1 + $0x220] sm:$0xff]   ;;  %v4105_v62 = vld [vmem:[%s5315_s1 + $0x218] sm:$0xff]   ;;  %v4065_v2 = vld [vmem:[%s4267_s12 + $0xec] ss:$36 sps:$4 sm:$0xff]  }
  0x4f   : > { %3604 = vmatprep.subr.bf16.mxu0 %v4031_v21  ;;  %v4059_v0 = vld [vmem:[%s4267_s12 + $0xa0] ss:$36 sps:$4 sm:$0xff]   ;;  %v4095_v21 = vld [vmem:[%s4267_s12 + $0x20c] ss:$36 sps:$4 sm:$0xff]  }
  0x50   : > { %3605 = vmatpush3.bf16.msra.mxu0 %v4032_v22  ;;  %v4097_v22 = vld [vmem:[%s4267_s12 + $0x440] ss:$36 sps:$4 sm:$0xff]  }
  0x51   : > { %3705 = vmatpush3.bf16.msra.mxu1 %v3998_v3  ;;  %3838 = vmatprep.subr.bf16.mxu0 %v4046_v28  ;;  %v4118_v3 = vld [vmem:[%s5315_s1 + $0x210] sm:$0xff]  }
  0x52   : > { %3706 = vmatprep.subr.bf16.mxu1 %v4013_v10  ;;  %v4073_v10 = vld [vmem:[%s4267_s12 + $0x368] ss:$36 sps:$4 sm:$0xff]  }
  0x54   : > { %1744 = vmatmul.mubr.bf16.gmra.mxu0 %v3987_v4  ;;  %1873 = vmatmul.mubr.bf16.gmra.mxu1 %v3988_v7  ;;  %v4067_v4 = vld [vmem:[%s4267_s12 + $0x320] ss:$36 sps:$4 sm:$0xff]   ;;  %v4069_v7 = vld [vmem:[%s4267_s12 + $0x36c] ss:$36 sps:$4 sm:$0xff]  }
  0x55   : > { %1751 = vmatprep.mubr.bf16.mxu0 %v3989_v8  ;;  %1880 = vmatprep.mubr.bf16.mxu1 %v3991_v9  ;;  %v4071_v8 = vld [vmem:[%s4267_s12 + $0x134] ss:$36 sps:$4 sm:$0xff]   ;;  %v4144_v9 = vld [vmem:[%s5315_s1 + $0x200] sm:$0xff]  }
  0x56   : > { %3707 = vmatpush3.bf16.msra.mxu1 %v4014_v11  ;;  %v4074_v11 = vld [vmem:[%s4267_s12 + $0x130] ss:$36 sps:$4 sm:$0xff]  }
  0x57   : > { %3708 = vmatprep.subr.bf16.mxu1 %v4029_v18  ;;  %v4088_v18 = vld [vmem:[%s4267_s12 + $0x3f8] ss:$36 sps:$4 sm:$0xff]  }
  0x5a   : > { %3709 = vmatpush3.bf16.msra.mxu1 %v4030_v19  ;;  %v4089_v19 = vld [vmem:[%s4267_s12 + $0x1c0] ss:$36 sps:$4 sm:$0xff]  }
  0x5b   : > { %3710 = vmatprep.subr.bf16.mxu1 %v4045_v26  ;;  %v4101_v26 = vld [vmem:[%s4267_s12 + $0x18] ss:$36 sps:$4 sm:$0xff]  }
  0x5c   : > { %1752 = vmatmul.mubr.bf16.gmra.mxu0 %v3993_v12  ;;  %1881 = vmatmul.mubr.bf16.gmra.mxu1 %v3994_v13  ;;  %v4078_v12 = vld [vmem:[%s4267_s12 + $0x3b4] ss:$36 sps:$4 sm:$0xff]   ;;  %v4080_v13 = vld [vmem:[%s4267_s12 + $0x17c] ss:$36 sps:$4 sm:$0xff]  }
  0x5d   : > { %1759 = vmatprep.mubr.bf16.mxu0 %v3999_v14  ;;  %1888 = vmatprep.mubr.bf16.mxu1 %v4001_v17  ;;  %v4082_v14 = vld [vmem:[%s4267_s12 + $0x3b0] ss:$36 sps:$4 sm:$0xff]   ;;  %v4086_v17 = vld [vmem:[%s4267_s12 + $0x1c4] ss:$36 sps:$4 sm:$0xff]  }
  0x5e   : > { %3711 = vmatpush3.bf16.msra.mxu1 %v4047_v29  ;;  %v4108_v29 = vld [vmem:[%s4267_s12 + $0x64] ss:$36 sps:$4 sm:$0xff]  }
  0x5f   : > { %3712 = vmatprep.subr.bf16.mxu1 %v4060_v33  ;;  %v4114_v33 = vld [vmem:[%s4267_s12 + $0xac] ss:$36 sps:$4 sm:$0xff]  }
  0x62   : > { %3713 = vmatpush3.bf16.msra.mxu1 %v4062_v36  ;;  %v4119_v36 = vld [vmem:[%s4267_s12 + $0x32c] ss:$36 sps:$4 sm:$0xff]  }
  0x63   : > { %3714 = vmatprep.subr.bf16.mxu1 %v4075_v41  ;;  %v4127_v41 = vld [vmem:[%s4267_s12 + $0x13c] ss:$36 sps:$4 sm:$0xff]  }
  0x64   : > { %1760 = vmatmul.mubr.bf16.gmra.mxu0 %v4003_v20  ;;  %1889 = vmatmul.mubr.bf16.gmra.mxu1 %v4004_v23  ;;  %v4093_v20 = vld [vmem:[%s4267_s12 + $0x444] ss:$36 sps:$4 sm:$0xff]  }
  0x65   : > { %1767 = vmatprep.mubr.bf16.mxu0 %v4007_v24  ;;  %1896 = vmatprep.mubr.bf16.mxu1 %v4009_v25  ;;  %v4098_v23 = vld [vmem:[%s4267_s12 + $0x208] ss:$36 sps:$4 sm:$0xff]   ;;  %v4099_v24 = vld [vmem:[%s4267_s12 + $0x254] ss:$36 sps:$4 sm:$0xff]   ;;  %v4103_v25 = vld [vmem:[%s4267_s12 + $0x1c] ss:$36 sps:$4 sm:$0xff]  }
  0x66   : > { %3715 = vmatpush3.bf16.msra.mxu1 %v4077_v43  ;;  %v4130_v43 = vld [vmem:[%s4267_s12 + $0x138] ss:$36 sps:$4 sm:$0xff]  }
  0x67   : > { %3716 = vmatprep.subr.bf16.mxu1 %v4090_v47 }
  0x6a   : > { %3717 = vmatpush3.bf16.msra.mxu1 %v4092_v49 }
  0x6c   : > { %1768 = vmatmul.mubr.bf16.gmra.mxu0 %v4011_v27  ;;  %1897 = vmatmul.mubr.bf16.gmra.mxu1 %v4012_v30  ;;  %v4104_v27 = vld [vmem:[%s4267_s12 + $0x250] ss:$36 sps:$4 sm:$0xff]   ;;  %v4110_v30 = vld [vmem:[%s4267_s12 + $0x298] ss:$36 sps:$4 sm:$0xff]  }
  0x6d   : > { %1775 = vmatprep.mubr.bf16.mxu0 %v4015_v31  ;;  %1904 = vmatprep.mubr.bf16.mxu1 %v4017_v32  ;;  %v4111_v31 = vld [vmem:[%s4267_s12 + $0x60] ss:$36 sps:$4 sm:$0xff]  }
  0x6e   : > { %v4112_v32 = vld [vmem:[%s4267_s12 + $0x2e4] ss:$36 sps:$4 sm:$0xff]  }
  0x74   : > { %1776 = vmatmul.mubr.bf16.gmra.mxu0 %v4019_v34  ;;  %1905 = vmatmul.mubr.bf16.gmra.mxu1 %v4020_v35  ;;  %v4116_v34 = vld [vmem:[%s4267_s12 + $0x2e0] ss:$36 sps:$4 sm:$0xff]   ;;  %v4117_v35 = vld [vmem:[%s4267_s12 + $0xa8] ss:$36 sps:$4 sm:$0xff]  }
  0x75   : > { %1783 = vmatprep.mubr.bf16.mxu0 %v4023_v37  ;;  %1912 = vmatprep.mubr.bf16.mxu1 %v4025_v38  ;;  %v4121_v37 = vld [vmem:[%s4267_s12 + $0xf4] ss:$36 sps:$4 sm:$0xff]   ;;  %v4123_v38 = vld [vmem:[%s4267_s12 + $0x328] ss:$36 sps:$4 sm:$0xff]  }
  0x7c   : > { %1784 = vmatmul.mubr.bf16.gmra.mxu0 %v4027_v39  ;;  %1913 = vmatmul.mubr.bf16.gmra.mxu1 %v4028_v40  ;;  %v4124_v39 = vld [vmem:[%s4267_s12 + $0xf0] ss:$36 sps:$4 sm:$0xff]  }
  0x7d   : > { %1791 = vmatprep.mubr.bf16.mxu0 %v4033_v42  ;;  %1920 = vmatprep.mubr.bf16.mxu1 %v4035_v44  ;;  %v4125_v40 = vld [vmem:[%s4267_s12 + $0x374] ss:$36 sps:$4 sm:$0xff]   ;;  %v4132_v44 = vld [vmem:[%s4267_s12 + $0x3bc] ss:$36 sps:$4 sm:$0xff]  }
  0x7e   : > { %v4129_v42 = vld [vmem:[%s4267_s12 + $0x370] ss:$36 sps:$4 sm:$0xff]  }
  0x84   : > { %1792 = vmatmul.mubr.bf16.gmra.mxu0 %v4037_v45  ;;  %1921 = vmatmul.mubr.bf16.gmra.mxu1 %v4038_v46  ;;  %v4134_v45 = vld [vmem:[%s4267_s12 + $0x184] ss:$36 sps:$4 sm:$0xff]  }
  0x85   : > { %1928 = vmatprep.mubr.bf16.mxu1 %v4039_v48  ;;  %2025 = vmatprep.mubr.bf16.mxu0 %v4043_v50 }
  0x8c   : > { %1929 = vmatmul.mubr.bf16.gmra.mxu1 %v4044_v52  ;;  %2026 = vmatmul.mubr.bf16.vlgmr.msra.gmra.mxu0 %v4041_v51 }
  0x8d   : > { %3839 = vmatpush3.bf16.msra.mxu0 %v4046_v28  ;;  %1936 = vmatprep.mubr.bf16.mxu1 %v4048_v53  ;;  %v4106_v28 = vld [vmem:[%s4267_s12 + $0x29c] ss:$36 sps:$4 sm:$0xff]  }
  0x8e   : > { %2033 = vmatprep.mubr.bf16.mxu0 %v4050_v54  ;;  %3840 = vmatprep.subr.bf16.mxu0 %v4061_v55  ;;  %v4136_v54 = vld [vmem:[%s4267_s12 + $0x3b8] ss:$36 sps:$4 sm:$0xff]  }
  0x91   : > { %3841 = vmatpush3.bf16.msra.mxu0 %v4061_v55  ;;  %v4137_v55 = vld [vmem:[%s4267_s12 + $0x180] ss:$36 sps:$4 sm:$0xff]  }
  0x92   : > { %3842 = vmatprep.subr.bf16.mxu0 %v4076_v56 }
  0x94   : > { %1937 = vmatmul.mubr.bf16.gmra.mxu1 %v4052_v57  ;;  %2034 = vmatmul.mubr.bf16.gmra.mxu0 %v4053_v58  ;;  %v4140_v57 = vld [vmem:[%s4267_s12 + $0x1cc] ss:$36 sps:$4 sm:$0xff]  }
  0x95   : > { %1944 = vmatprep.mubr.bf16.mxu1 %v4054_v59  ;;  %2041 = vmatprep.mubr.bf16.mxu0 %v4056_v60 }
  0x96   : > { %3843 = vmatpush3.bf16.msra.mxu0 %v4076_v56  ;;  %v4138_v56 = vld [vmem:[%s4267_s12 + $0x404] ss:$36 sps:$4 sm:$0xff]  }
  0x97   : > { %3844 = vmatprep.subr.bf16.mxu0 %v4091_v61 }
  0x9a   : > { %3845 = vmatpush3.bf16.msra.mxu0 %v4091_v61 }
  0x9b   : > { %3846 = vmatprep.subr.bf16.mxu0 %v4105_v62 }
  0x9c   : > { %1945 = vmatmul.mubr.bf16.gmra.mxu1 %v4058_v63  ;;  %2042 = vmatmul.mubr.bf16.gmra.mxu0 %v4059_v0 }
  0x9d   : > { %1952 = vmatprep.mubr.bf16.mxu1 %v4063_v1  ;;  %2049 = vmatprep.mubr.bf16.mxu0 %v4065_v2 }
  0x9e   : > { %3847 = vmatpush3.bf16.msra.mxu0 %v4105_v62 }
  0x9f   : > { %3848 = vmatprep.subr.bf16.mxu0 %v4118_v3 }
  0xa2   : > { %3849 = vmatpush3.bf16.msra.mxu0 %v4118_v3 }
  0xa3   : > { %3850 = vmatprep.subr.bf16.mxu0 %v4131_v6 }
  0xa4   : > { %1953 = vmatmul.mubr.bf16.gmra.mxu1 %v4067_v4  ;;  %2050 = vmatmul.mubr.bf16.gmra.mxu0 %v4068_v5 }
  0xa5   : > { %1960 = vmatprep.mubr.bf16.mxu1 %v4069_v7  ;;  %2057 = vmatprep.mubr.bf16.mxu0 %v4071_v8  ;;  %v4143_v7 = vld [vmem:[%s4267_s12 + $0x1c8] ss:$36 sps:$4 sm:$0xff]  }
  0xa6   : > { %3851 = vmatpush3.bf16.msra.mxu0 %v4131_v6  ;;  %v4142_v6 = vld [vmem:[%s4267_s12 + $0x400] ss:$36 sps:$4 sm:$0xff]   ;;  %v4145_v8 = vld [vmem:[%s4267_s12 + $0x44c] ss:$36 sps:$4 sm:$0xff]  }
  0xa7   : > { %3852 = vmatprep.subr.bf16.mxu0 %v4144_v9 }
  0xaa   : > { %3853 = vmatpush3.bf16.msra.mxu0 %v4144_v9  ;;  %v4147_v9 = vld [vmem:[%s4267_s12 + $0x214] ss:$36 sps:$4 sm:$0xff]  }
  0xac   : > { %1961 = vmatmul.mubr.bf16.gmra.mxu1 %v4073_v10  ;;  %2058 = vmatmul.mubr.bf16.gmra.mxu0 %v4074_v11 }
  0xad   : > { %1968 = vmatprep.mubr.bf16.mxu1 %v4078_v12  ;;  %2065 = vmatprep.mubr.bf16.mxu0 %v4080_v13 }
  0xb4   : > { %1969 = vmatmul.mubr.bf16.gmra.mxu1 %v4082_v14  ;;  %2066 = vmatmul.mubr.bf16.gmra.mxu0 %v4083_v15 }
  0xb5   : > { %1976 = vmatprep.mubr.bf16.mxu1 %v4084_v16  ;;  %2073 = vmatprep.mubr.bf16.mxu0 %v4086_v17 }
  0xbc   : > { %1977 = vmatmul.mubr.bf16.gmra.mxu1 %v4088_v18  ;;  %2074 = vmatmul.mubr.bf16.gmra.mxu0 %v4089_v19 }
  0xbd   : > { %1984 = vmatprep.mubr.bf16.mxu1 %v4093_v20  ;;  %2081 = vmatprep.mubr.bf16.mxu0 %v4095_v21 }
  0xc4   : > { %1985 = vmatmul.mubr.bf16.gmra.mxu1 %v4097_v22  ;;  %2082 = vmatmul.mubr.bf16.gmra.mxu0 %v4098_v23  ;;  %v4149_v22 = vld [vmem:[%s4267_s12 + $0x448] ss:$36 sps:$4 sm:$0xff]   ;;  %v4150_v23 = vld [vmem:[%s4267_s12 + $0x210] ss:$36 sps:$4 sm:$0xff]  }
  0xc5   : > { %2089 = vmatprep.mubr.bf16.mxu0 %v4099_v24  ;;  %2186 = vmatprep.mubr.bf16.mxu1 %v4103_v25  ;;  %v4153_v24 = vld [vmem:[%s4267_s12 + $0x25c] ss:$36 sps:$4 sm:$0xff]  }
  0xc6   : > { %v4154_v25 = vld [vmem:[%s4267_s12 + $0x20] ss:$36 sps:$4 sm:$0xff]  }
  0xcc   : > { %2090 = vmatmul.mubr.bf16.gmra.mxu0 %v4104_v27  ;;  %2187 = vmatmul.mubr.bf16.vlgmr.msra.gmra.mxu1 %v4101_v26 }
  0xcd   : > { %2097 = vmatprep.mubr.bf16.mxu0 %v4106_v28  ;;  %2194 = vmatprep.mubr.bf16.mxu1 %v4108_v29 }
  0xd4   : > { %2098 = vmatmul.mubr.bf16.gmra.mxu0 %v4110_v30  ;;  %2195 = vmatmul.mubr.bf16.gmra.mxu1 %v4111_v31 }
  0xd5   : > { %2105 = vmatprep.mubr.bf16.mxu0 %v4112_v32  ;;  %2202 = vmatprep.mubr.bf16.mxu1 %v4114_v33 }
  0xdc   : > { %2106 = vmatmul.mubr.bf16.gmra.mxu0 %v4116_v34  ;;  %2203 = vmatmul.mubr.bf16.gmra.mxu1 %v4117_v35 }
  0xdd   : > { %2113 = vmatprep.mubr.bf16.mxu0 %v4119_v36  ;;  %2210 = vmatprep.mubr.bf16.mxu1 %v4121_v37 }
  0xe4   : > { %2114 = vmatmul.mubr.bf16.gmra.mxu0 %v4123_v38  ;;  %2211 = vmatmul.mubr.bf16.gmra.mxu1 %v4124_v39  ;;  %v4151_v38 = vld [vmem:[%s4267_s12 + $0x258] ss:$36 sps:$4 sm:$0xff]   ;;  %v4155_v39 = vld [vmem:[%s4267_s12 + $0x68] ss:$36 sps:$4 sm:$0xff]  }
  0xe5   : > { %2121 = vmatprep.mubr.bf16.mxu0 %v4125_v40  ;;  %2218 = vmatprep.mubr.bf16.mxu1 %v4127_v41  ;;  %v4158_v40 = vld [vmem:[%s4267_s12 + $0x2a4] ss:$36 sps:$4 sm:$0xff]   ;;  %v4159_v41 = vld [vmem:[%s4267_s12 + $0xb0] ss:$36 sps:$4 sm:$0xff]  }
  0xec   : > { %v3382_v46 = vpop.f32.mrf.mxu0  ;;  %v3454_v47 = vpop.f32.mrf.mxu1  ;;  %2122 = vmatmul.mubr.bf16.gmra.mxu0 %v4129_v42  ;;  %2219 = vmatmul.mubr.bf16.gmra.mxu1 %v4130_v43 }
  0xed   : > { %2129 = vmatprep.mubr.bf16.mxu0 %v4132_v44  ;;  %2226 = vmatprep.mubr.bf16.mxu1 %v4134_v45 }
  0xee   : > { %v3383_v48 = vpop.f32.mrf.mxu0  ;;  %v3455_v49 = vpop.f32.mrf.mxu1 }
  0xef   : > { %v4560_v50 = vadd.f32 %v3383_v48, %v3382_v46  ;;  %v4562_v51 = vadd.f32 %v3455_v49, %v3454_v47 }
  0xf0   : > { %v3385_v52 = vpop.f32.mrf.mxu0  ;;  %v3457_v53 = vpop.f32.mrf.mxu1 }
  0xf2   : > { %v3386_v58 = vpop.f32.mrf.mxu0  ;;  %v3458_v59 = vpop.f32.mrf.mxu1 }
  0xf3   : > { %v4568_v60 = vadd.f32 %v3386_v58, %v3385_v52  ;;  %v4570_v61 = vadd.f32 %v3458_v59, %v3457_v53  ;;  %v4163_v59 = vld [vmem:[%s4267_s12 + $0x2ec] ss:$36 sps:$4 sm:$0xff]  }
  0xf4   : > { %v3388_v62 = vpop.f32.mrf.mxu0  ;;  %v3460_v63 = vpop.f32.mrf.mxu1  ;;  %2130 = vmatmul.mubr.bf16.gmra.mxu0 %v4136_v54  ;;  %2227 = vmatmul.mubr.bf16.gmra.mxu1 %v4137_v55 }
  0xf5   : > { %2137 = vmatprep.mubr.bf16.mxu0 %v4138_v56  ;;  %2234 = vmatprep.mubr.bf16.mxu1 %v4140_v57  ;;  %v4156_v56 = vld [vmem:[%s4267_s12 + $0x2a0] ss:$36 sps:$4 sm:$0xff]   ;;  %v4160_v57 = vld [vmem:[%s4267_s12 + $0xf8] ss:$36 sps:$4 sm:$0xff]  }
  0xf6   : > { %v3389_v0 = vpop.f32.mrf.mxu0  ;;  %v3461_v1 = vpop.f32.mrf.mxu1 }
  0xf7   : > { %v4572_v2 = vadd.f32 %v3389_v0, %v3388_v62  ;;  %v4574_v3 = vadd.f32 %v3461_v1, %v3460_v63  ;;  %v4164_v62 = vld [vmem:[%s4267_s12 + $0x140] ss:$36 sps:$4 sm:$0xff]  }
  0xf8   : > { %v3391_v4 = vpop.f32.mrf.mxu0  ;;  %v3463_v5 = vpop.f32.mrf.mxu1 }
  0xfa   : > { %v3392_v10 = vpop.f32.mrf.mxu0  ;;  %v3464_v11 = vpop.f32.mrf.mxu1 }
  0xfb   : > { %v4580_v12 = vadd.f32 %v3392_v10, %v3391_v4  ;;  %v4582_v13 = vadd.f32 %v3464_v11, %v3463_v5 }
  0xfc   : > { %v3394_v14 = vpop.f32.mrf.mxu0  ;;  %v3466_v15 = vpop.f32.mrf.mxu1  ;;  %2138 = vmatmul.mubr.bf16.gmra.mxu0 %v4142_v6  ;;  %2235 = vmatmul.mubr.bf16.gmra.mxu1 %v4143_v7 }
  0xfd   : > { %2145 = vmatprep.mubr.bf16.mxu0 %v4145_v8  ;;  %2242 = vmatprep.mubr.bf16.mxu1 %v4147_v9 }
  0xfe   : > { %v3395_v16 = vpop.f32.mrf.mxu0  ;;  %v3467_v17 = vpop.f32.mrf.mxu1 }
  0xff   : > { %v4584_v18 = vadd.f32 %v3395_v16, %v3394_v14  ;;  %v4586_v19 = vadd.f32 %v3467_v17, %v3466_v15  ;;  %v4161_v15 = vld [vmem:[%s4267_s12 + $0x2e8] ss:$36 sps:$4 sm:$0xff]  }
 0x100   : > { %v3397_v20 = vpop.f32.mrf.mxu0  ;;  %v3469_v21 = vpop.f32.mrf.mxu1  ;;  %v4165_v16 = vld [vmem:[%s4267_s12 + $0x188] ss:$36 sps:$4 sm:$0xff]  }
 0x102   : > { %v3398_v26 = vpop.f32.mrf.mxu0  ;;  %v3470_v27 = vpop.f32.mrf.mxu1 }
 0x103   : > { %v4592_v28 = vadd.f32 %v3398_v26, %v3397_v20  ;;  %v4594_v29 = vadd.f32 %v3470_v27, %v3469_v21  ;;  %v4168_v20 = vld [vmem:[%s4267_s12 + $0x334] ss:$36 sps:$4 sm:$0xff]  }
 0x104   : > { %v3400_v30 = vpop.f32.mrf.mxu0  ;;  %v3472_v31 = vpop.f32.mrf.mxu1  ;;  %2146 = vmatmul.mubr.bf16.gmra.mxu0 %v4149_v22  ;;  %2243 = vmatmul.mubr.bf16.gmra.mxu1 %v4150_v23  ;;  %v4169_v21 = vld [vmem:[%s4267_s12 + $0x1d0] ss:$36 sps:$4 sm:$0xff]  }
 0x105   : > { %2250 = vmatprep.mubr.bf16.mxu1 %v4153_v24  ;;  %3854 = vmatprep.mubr.bf16.mxu0 %v4154_v25 }
 0x106   : > { %v3401_v32 = vpop.f32.mrf.mxu0  ;;  %v3473_v33 = vpop.f32.mrf.mxu1 }
 0x107   : > { %v4596_v34 = vadd.f32 %v3401_v32, %v3400_v30  ;;  %v4598_v35 = vadd.f32 %v3473_v33, %v3472_v31 }
 0x108   : > { %v3403_v36 = vpop.f32.mrf.mxu0  ;;  %v3475_v37 = vpop.f32.mrf.mxu1 }
 0x10a   : > { %v3404_v42 = vpop.f32.mrf.mxu0  ;;  %v3476_v43 = vpop.f32.mrf.mxu1 }
 0x10b   : > { %v4604_v44 = vadd.f32 %v3404_v42, %v3403_v36  ;;  %v4606_v45 = vadd.f32 %v3476_v43, %v3475_v37  ;;  %v4166_v37 = vld [vmem:[%s4267_s12 + $0x330] ss:$36 sps:$4 sm:$0xff]  }
 0x10c   : > { %v3406_v46 = vpop.f32.mrf.mxu0  ;;  %v3494_v47 = vpop.f32.mrf.mxu1  ;;  %2251 = vmatmul.mubr.bf16.gmra.mxu1 %v4151_v38  ;;  %3855 = vmatmul.mubr.bf16.vlgmr.msra.gmra.mxu0 %v4155_v39  ;;  %v4170_v38 = vld [vmem:[%s4267_s12 + $0x218] ss:$36 sps:$4 sm:$0xff]  }
 0x10d   : > { %2258 = vmatprep.mubr.bf16.mxu1 %v4158_v40  ;;  %3858 = vmatprep.mubr.bf16.mxu0 %v4159_v41  ;;  %v4173_v40 = vld [vmem:[%s4267_s12 + $0x37c] ss:$36 sps:$4 sm:$0xff]  }
 0x10e   : > { %v3407_v48 = vpop.f32.mrf.mxu0  ;;  %v3495_v49 = vpop.f32.mrf.mxu1  ;;  %v4174_v41 = vld [vmem:[%s4267_s12 + $0x260] ss:$36 sps:$4 sm:$0xff]  }
 0x10f   : > { %v4608_v52 = vadd.f32 %v3407_v48, %v3406_v46  ;;  %v3496_v53 = vadd.f32 %v3495_v49, %v3494_v47 }
 0x110   : > { %v3409_v54 = vpop.f32.mrf.mxu0  ;;  %v3497_v55 = vpop.f32.mrf.mxu1 }
 0x111   : > { %v4613_v58 = vadd.f32 %v3496_v53, %v4560_v50 }
 0x112   : > { %v3410_v63 = vpop.f32.mrf.mxu0  ;;  %v3498_v0 = vpop.f32.mrf.mxu1 }
 0x113   : > { %v4617_v1 = vadd.f32 %v3410_v63, %v3409_v54  ;;  %v3499_v4 = vadd.f32 %v3498_v0, %v3497_v55  ;;  %v4178_v0 = vld [vmem:[%s4267_s12 + $0x3c4] ss:$36 sps:$4 sm:$0xff]  }
 0x114   : > { %v3412_v5 = vpop.f32.mrf.mxu0  ;;  %v3500_v6 = vpop.f32.mrf.mxu1  ;;  %2259 = vmatmul.mubr.bf16.gmra.mxu1 %v4156_v56  ;;  %3859 = vmatmul.mubr.bf16.gmra.mxu0 %v4160_v57 }
 0x115   : > { %v4620_v7 = vadd.f32 %v3499_v4, %v4568_v60  ;;  %2266 = vmatprep.mubr.bf16.mxu1 %v4163_v59  ;;  %3862 = vmatprep.mubr.bf16.mxu0 %v4164_v62  ;;  %v4171_v59 = vld [vmem:[%s4267_s12 + $0x378] ss:$36 sps:$4 sm:$0xff]   ;;  %v4175_v62 = vld [vmem:[%s4267_s12 + $0x2a8] ss:$36 sps:$4 sm:$0xff]   ;;  %v4179_v4 = vld [vmem:[%s4267_s12 + $0x2f0] ss:$36 sps:$4 sm:$0xff]  }
 0x116   : > { %v3413_v50 = vpop.f32.mrf.mxu0  ;;  %v3501_v8 = vpop.f32.mrf.mxu1 }
 0x117   : > { %v4622_v9 = vadd.f32 %v3413_v50, %v3412_v5  ;;  %v3502_v10 = vadd.f32 %v3501_v8, %v3500_v6 }
 0x118   : > { %v3415_v11 = vpop.f32.mrf.mxu0  ;;  %v3503_v14 = vpop.f32.mrf.mxu1 }
 0x119   : > { %v4627_v17 = vadd.f32 %v3502_v10, %v4572_v2 }
 0x11a   : > { %v3416_v22 = vpop.f32.mrf.mxu0  ;;  %v3504_v23 = vpop.f32.mrf.mxu1 }
 0x11b   : > { %v4631_v60 = vadd.f32 %v3416_v22, %v3415_v11  ;;  %v3505_v24 = vadd.f32 %v3504_v23, %v3503_v14  ;;  %v4176_v22 = vld [vmem:[%s4267_s12 + $0x3c0] ss:$36 sps:$4 sm:$0xff]   ;;  %v4180_v23 = vld [vmem:[%s4267_s12 + $0x338] ss:$36 sps:$4 sm:$0xff]  }
 0x11c   : > { %v3418_v25 = vpop.f32.mrf.mxu0  ;;  %v3506_v26 = vpop.f32.mrf.mxu1  ;;  %2267 = vmatmul.mubr.bf16.gmra.mxu1 %v4161_v15  ;;  %3863 = vmatmul.mubr.bf16.gmra.mxu0 %v4165_v16 }
 0x11d   : > { %v4634_v27 = vadd.f32 %v3505_v24, %v4580_v12  ;;  %2274 = vmatprep.mubr.bf16.mxu1 %v4168_v20  ;;  %3866 = vmatprep.mubr.bf16.mxu0 %v4169_v21 }
 0x11e   : > { %v3419_v2 = vpop.f32.mrf.mxu0  ;;  %v3507_v30 = vpop.f32.mrf.mxu1 }
 0x11f   : > { %v4636_v31 = vadd.f32 %v3419_v2, %v3418_v25  ;;  %v3508_v32 = vadd.f32 %v3507_v30, %v3506_v26  ;;  %v4183_v25 = vld [vmem:[%s4267_s12 + $0x40c] ss:$36 sps:$4 sm:$0xff]   ;;  %v4184_v26 = vld [vmem:[%s4267_s12 + $0x380] ss:$36 sps:$4 sm:$0xff]  }
 0x120   : > { %v3421_v33 = vpop.f32.mrf.mxu0  ;;  %v3509_v36 = vpop.f32.mrf.mxu1 }
 0x121   : > { %v4641_v39 = vadd.f32 %v3508_v32, %v4584_v18 }
 0x122   : > { %v3422_v42 = vpop.f32.mrf.mxu0  ;;  %v3510_v43 = vpop.f32.mrf.mxu1 }
 0x123   : > { %v4645_v12 = vadd.f32 %v3422_v42, %v3421_v33  ;;  %v3511_v46 = vadd.f32 %v3510_v43, %v3509_v36 }
 0x124   : > { %v3424_v47 = vpop.f32.mrf.mxu0  ;;  %v3512_v48 = vpop.f32.mrf.mxu1  ;;  %2275 = vmatmul.mubr.bf16.gmra.mxu1 %v4166_v37  ;;  %3867 = vmatmul.mubr.bf16.gmra.mxu0 %v4170_v38 }
 0x125   : > { %v4648_v49 = vadd.f32 %v3511_v46, %v4592_v28  ;;  %2282 = vmatprep.mubr.bf16.mxu1 %v4173_v40  ;;  %3870 = vmatprep.mubr.bf16.mxu0 %v4174_v41  ;;  %v4181_v46 = vld [vmem:[%s4267_s12 + $0x408] ss:$36 sps:$4 sm:$0xff]  }
 0x126   : > { %v3425_v18 = vpop.f32.mrf.mxu0  ;;  %v3513_v53 = vpop.f32.mrf.mxu1 }
 0x127   : > { %v4650_v54 = vadd.f32 %v3425_v18, %v3424_v47  ;;  %v3514_v55 = vadd.f32 %v3513_v53, %v3512_v48  ;;  %v4185_v47 = vld [vmem:[%s4267_s12 + $0x3c8] ss:$36 sps:$4 sm:$0xff]   ;;  %v4188_v18 = vld [vmem:[%s4267_s12 + $0x454] ss:$36 sps:$4 sm:$0xff]  }
 0x128   : > { %v3427_v56 = vpop.f32.mrf.mxu0  ;;  %v3515_v57 = vpop.f32.mrf.mxu1  ;;  %v4189_v53 = vld [vmem:[%s4267_s12 + $0x410] ss:$36 sps:$4 sm:$0xff]  }
 0x129   : > { %v4655_v63 = vadd.f32 %v3514_v55, %v4596_v34 }
 0x12a   : > { %v3428_v5 = vpop.f32.mrf.mxu0  ;;  %v3516_v6 = vpop.f32.mrf.mxu1 }
 0x12b   : > { %v4659_v28 = vadd.f32 %v3428_v5, %v3427_v56  ;;  %v3517_v50 = vadd.f32 %v3516_v6, %v3515_v57 }
 0x12c   : > { %v3430_v8 = vpop.f32.mrf.mxu0  ;;  %v3518_v10 = vpop.f32.mrf.mxu1  ;;  %2283 = vmatmul.mubr.bf16.gmra.mxu1 %v4171_v59  ;;  %3871 = vmatmul.mubr.bf16.gmra.mxu0 %v4175_v62 }
 0x12d   : > { %v4662_v11 = vadd.f32 %v3517_v50, %v4604_v44  ;;  %2290 = vmatprep.mubr.bf16.mxu1 %v4178_v0  ;;  %3874 = vmatprep.mubr.bf16.mxu0 %v4179_v4 }
 0x12e   : > { %v3431_v34 = vpop.f32.mrf.mxu0  ;;  %v3519_v14 = vpop.f32.mrf.mxu1 }
 0x12f   : > { %v4664_v15 = vadd.f32 %v3431_v34, %v3430_v8  ;;  %v3520_v16 = vadd.f32 %v3519_v14, %v3518_v10  ;;  %v4186_v10 = vld [vmem:[%s4267_s12 + $0x450] ss:$36 sps:$4 sm:$0xff]   ;;  %v4190_v34 = vld [vmem:[%s4267_s12 + $0x458] ss:$36 sps:$4 sm:$0xff]  }
 0x130   : > { %v3433_v20 = vpop.f32.mrf.mxu0  ;;  %v3521_v21 = vpop.f32.mrf.mxu1 }
 0x131   : > { %v4669_v24 = vadd.f32 %v3520_v16, %v4608_v52 }
 0x132   : > { %v3434_v2 = vpop.f32.mrf.mxu0  ;;  %v3522_v30 = vpop.f32.mrf.mxu1 }
 0x133   : > { %v4673_v44 = vadd.f32 %v3434_v2, %v3433_v20  ;;  %v3523_v32 = vadd.f32 %v3522_v30, %v3521_v21 }
 0x134   : > { %v3436_v33 = vpop.f32.mrf.mxu0  ;;  %v3524_v36 = vpop.f32.mrf.mxu1  ;;  %2291 = vmatmul.mubr.bf16.gmra.mxu1 %v4176_v22  ;;  %3875 = vmatmul.mubr.bf16.gmra.mxu0 %v4180_v23 }
 0x135   : > { %v4676_v37 = vadd.f32 %v3523_v32, %v4617_v1  ;;  %2298 = vmatprep.mubr.bf16.mxu1 %v4183_v25  ;;  %3878 = vmatprep.mubr.bf16.mxu0 %v4184_v26 }
 0x136   : > { %v3437_v52 = vpop.f32.mrf.mxu0  ;;  %v3525_v38 = vpop.f32.mrf.mxu1 }
 0x137   : > { %v4678_v40 = vadd.f32 %v3437_v52, %v3436_v33  ;;  %v3526_v41 = vadd.f32 %v3525_v38, %v3524_v36 }
 0x138   : > { %v3439_v42 = vpop.f32.mrf.mxu0  ;;  %v3527_v43 = vpop.f32.mrf.mxu1 }
 0x139   : > { %v4683_v48 = vadd.f32 %v3526_v41, %v4622_v9 }
 0x13a   : > { %v3440_v55 = vpop.f32.mrf.mxu0  ;;  %v3528_v56 = vpop.f32.mrf.mxu1 }
 0x13b   : > { %v4687_v1 = vadd.f32 %v3440_v55, %v3439_v42  ;;  %v3529_v57 = vadd.f32 %v3528_v56, %v3527_v43 }
 0x13c   : > { %v3442_v59 = vpop.f32.mrf.mxu0  ;;  %v3530_v62 = vpop.f32.mrf.mxu1  ;;  %2299 = vmatmul.mubr.bf16.gmra.mxu1 %v4181_v46  ;;  %3879 = vmatmul.mubr.bf16.gmra.mxu0 %v4185_v47 }
 0x13d   : > { %v4690_v0 = vadd.f32 %v3529_v57, %v4631_v60  ;;  %2306 = vmatprep.mubr.bf16.mxu1 %v4188_v18  ;;  %3882 = vmatprep.mubr.bf16.mxu0 %v4189_v53 }
 0x13e   : > { %v3443_v9 = vpop.f32.mrf.mxu0  ;;  %v3531_v4 = vpop.f32.mrf.mxu1 }
 0x13f   : > { %v4692_v5 = vadd.f32 %v3443_v9, %v3442_v59  ;;  %v3532_v6 = vadd.f32 %v3531_v4, %v3530_v62 }
 0x140   : > { %v3445_v50 = vpop.f32.mrf.mxu0  ;;  %v3533_v8 = vpop.f32.mrf.mxu1 }
 0x141   : > { %v4697_v14 = vadd.f32 %v3532_v6, %v4636_v31 }
 0x142   : > { %v3446_v16 = vpop.f32.mrf.mxu0  ;;  %v3534_v20 = vpop.f32.mrf.mxu1 }
 0x143   : > { %v4699_v21 = vadd.f32 %v3446_v16, %v3445_v50  ;;  %v3535_v60 = vadd.f32 %v3534_v20, %v3533_v8 }
 0x144   : > { %v3448_v22 = vpop.f32.mrf.mxu0  ;;  %v3536_v23 = vpop.f32.mrf.mxu1  ;;  %2307 = vmatmul.mubr.bf16.gmra.mxu1 %v4186_v10  ;;  %3883 = vmatmul.mubr.bf16.gmra.mxu0 %v4190_v34 }
 0x145   : > { %v4702_v25 = vadd.f32 %v3535_v60, %v4645_v12 }
 0x146   : > { %v3449_v26 = vpop.f32.mrf.mxu0  ;;  %v3537_v2 = vpop.f32.mrf.mxu1 }
 0x147   : > { %v4704_v30 = vadd.f32 %v3449_v26, %v3448_v22  ;;  %v3538_v32 = vadd.f32 %v3537_v2, %v3536_v23 }
 0x148   : > { %v3451_v33 = vpop.f32.mrf.mxu0  ;;  %v3539_v31 = vpop.f32.mrf.mxu1 }
 0x149   : > { %v4707_v36 = vadd.f32 %v3538_v32, %v4650_v54 }
 0x14a   : > { %v3452_v52 = vpop.f32.mrf.mxu0  ;;  %v3540_v38 = vpop.f32.mrf.mxu1 }
 0x14b   : > { %v4709_v41 = vadd.f32 %v3452_v52, %v3451_v33  ;;  %v3541_v42 = vadd.f32 %v3540_v38, %v3539_v31 }
 0x14c   : > { %v3542_v43 = vpop.f32.mrf.mxu1  ;;  %v3606_v46 = vpop.f32.mrf.mxu0 }
 0x14d   : > { %v4712_v12 = vadd.f32 %v3541_v42, %v4659_v28 }
 0x14e   : > { %v3543_v47 = vpop.f32.mrf.mxu1  ;;  %v3607_v18 = vpop.f32.mrf.mxu0 }
 0x14f   : > { %v3544_v53 = vadd.f32 %v3543_v47, %v3542_v43  ;;  %v3608_v55 = vadd.f32 %v3607_v18, %v3606_v46 }
 0x150   : > { %v3545_v56 = vpop.f32.mrf.mxu1  ;;  %v3609_v57 = vpop.f32.mrf.mxu0 }
 0x151   : > { %v4715_v59 = vadd.f32 %v3544_v53, %v4664_v15  ;;  %v4718_v54 = vadd.f32 %v3608_v55, %v4613_v58 }
 0x152   : > { %v3546_v62 = vpop.f32.mrf.mxu1  ;;  %v3610_v9 = vpop.f32.mrf.mxu0 }
 0x153   : > { %v3547_v4 = vadd.f32 %v3546_v62, %v3545_v56  ;;  %v3611_v6 = vadd.f32 %v3610_v9, %v3609_v57 }
 0x154   : > { %v3548_v50 = vpop.f32.mrf.mxu1  ;;  %v3612_v8 = vpop.f32.mrf.mxu0 }
 0x155   : > { %v4721_v28 = vadd.f32 %v3547_v4, %v4673_v44  ;;  %v4724_v10 = vadd.f32 %v3611_v6, %v4620_v7 }
 0x156   : > { %v3549_v34 = vpop.f32.mrf.mxu1  ;;  %v3613_v16 = vpop.f32.mrf.mxu0 }
 0x157   : > { %v3550_v20 = vadd.f32 %v3549_v34, %v3548_v50  ;;  %v3614_v15 = vadd.f32 %v3613_v16, %v3612_v8 }
 0x158   : > { %v3551_v60 = vpop.f32.mrf.mxu1  ;;  %v3615_v22 = vpop.f32.mrf.mxu0 }
 0x159   : > { %v4727_v58 = vadd.f32 %v3550_v20, %v4678_v40  ;;  %v4730_v23 = vadd.f32 %v3614_v15, %v4627_v17 }
 0x15a   : > { %v3552_v26 = vpop.f32.mrf.mxu1  ;;  %v3616_v2 = vpop.f32.mrf.mxu0 }
 0x15b   : > { %v3553_v32 = vadd.f32 %v3552_v26, %v3551_v60  ;;  %v3617_v44 = vadd.f32 %v3616_v2, %v3615_v22 }
 0x15c   : > { %v3554_v33 = vpop.f32.mrf.mxu1  ;;  %v3618_v31 = vpop.f32.mrf.mxu0 }
 0x15d   : > { %v4733_v7 = vadd.f32 %v3553_v32, %v4687_v1  ;;  %v4736_v52 = vadd.f32 %v3617_v44, %v4634_v27 }
 0x15e   : > { %v3555_v38 = vpop.f32.mrf.mxu1  ;;  %v3619_v42 = vpop.f32.mrf.mxu0 }
 0x15f   : > { %v3556_v43 = vadd.f32 %v3555_v38, %v3554_v33  ;;  %v3620_v40 = vadd.f32 %v3619_v42, %v3618_v31 }
 0x160   : > { %v3557_v46 = vpop.f32.mrf.mxu1  ;;  %v3621_v47 = vpop.f32.mrf.mxu0 }
 0x161   : > { %v4739_v17 = vadd.f32 %v3556_v43, %v4692_v5  ;;  %v4742_v18 = vadd.f32 %v3620_v40, %v4641_v39 }
 0x162   : > { %v3558_v53 = vpop.f32.mrf.mxu1  ;;  %v3622_v55 = vpop.f32.mrf.mxu0 }
 0x163   : > { %v3559_v56 = vadd.f32 %v3558_v53, %v3557_v46  ;;  %v3623_v1 = vadd.f32 %v3622_v55, %v3621_v47 }
 0x164   : > { %v3560_v57 = vpop.f32.mrf.mxu1  ;;  %v3624_v62 = vpop.f32.mrf.mxu0 }
 0x165   : > { %v4745_v27 = vadd.f32 %v3559_v56, %v4699_v21  ;;  %v4748_v9 = vadd.f32 %v3623_v1, %v4648_v49 }
 0x166   : > { %v3561_v4 = vpop.f32.mrf.mxu1  ;;  %v3625_v6 = vpop.f32.mrf.mxu0 }
 0x167   : > { %v3562_v50 = vadd.f32 %v3561_v4, %v3560_v57  ;;  %v3626_v5 = vadd.f32 %v3625_v6, %v3624_v62 }
 0x168   : > { %v3563_v8 = vpop.f32.mrf.mxu1  ;;  %v3627_v34 = vpop.f32.mrf.mxu0 }
 0x169   : > { %v4751_v39 = vadd.f32 %v3562_v50, %v4704_v30  ;;  %v4754_v16 = vadd.f32 %v3626_v5, %v4655_v63 }
 0x16a   : > { %v3564_v20 = vpop.f32.mrf.mxu1  ;;  %v3628_v15 = vpop.f32.mrf.mxu0 }
 0x16b   : > { %v3565_v60 = vadd.f32 %v3564_v20, %v3563_v8  ;;  %v3629_v21 = vadd.f32 %v3628_v15, %v3627_v34 }
 0x16c   : > { %v3566_v22 = vpop.f32.mrf.mxu1  ;;  %v3630_v26 = vpop.f32.mrf.mxu0 }
 0x16d   : > { %v4757_v49 = vadd.f32 %v3565_v60, %v4709_v41  ;;  %v4760_v2 = vadd.f32 %v3629_v21, %v4662_v11 }
 0x16e   : > { %v3567_v32 = vpop.f32.mrf.mxu1  ;;  %v3631_v44 = vpop.f32.mrf.mxu0 }
 0x16f   : > { %v3568_v33 = vadd.f32 %v3567_v32, %v3566_v22  ;;  %v3632_v30 = vadd.f32 %v3631_v44, %v3630_v26 }
 0x170   : > { %v3569_v31 = vpop.f32.mrf.mxu1  ;;  %v3633_v38 = vpop.f32.mrf.mxu0 }
 0x171   : > { %v4763_v63 = vadd.f32 %v3568_v33, %v4562_v51  ;;  %v4766_v42 = vadd.f32 %v3632_v30, %v4669_v24 }
 0x172   : > { %v3570_v43 = vpop.f32.mrf.mxu1  ;;  %v3634_v40 = vpop.f32.mrf.mxu0 }
 0x173   : > { %v3571_v46 = vadd.f32 %v3570_v43, %v3569_v31  ;;  %v3635_v41 = vadd.f32 %v3634_v40, %v3633_v38 }
 0x174   : > { %v3572_v47 = vpop.f32.mrf.mxu1  ;;  %v3636_v53 = vpop.f32.mrf.mxu0 }
 0x175   : > { %v4769_v11 = vadd.f32 %v3571_v46, %v4570_v61  ;;  %v4772_v55 = vadd.f32 %v3635_v41, %v4676_v37 }
 0x176   : > { %v3573_v56 = vpop.f32.mrf.mxu1  ;;  %v3637_v1 = vpop.f32.mrf.mxu0 }
 0x177   : > { %v3574_v57 = vadd.f32 %v3573_v56, %v3572_v47  ;;  %v3638_v51 = vadd.f32 %v3637_v1, %v3636_v53 }
 0x178   : > { %v3575_v62 = vpop.f32.mrf.mxu1  ;;  %v3639_v4 = vpop.f32.mrf.mxu0 }
 0x179   : > { %v4775_v24 = vadd.f32 %v3574_v57, %v4574_v3  ;;  %v4778_v6 = vadd.f32 %v3638_v51, %v4683_v48 }
 0x17a   : > { %v3576_v50 = vpop.f32.mrf.mxu1  ;;  %v3640_v5 = vpop.f32.mrf.mxu0 }
 0x17b   : > { %v3577_v8 = vadd.f32 %v3576_v50, %v3575_v62  ;;  %v3641_v61 = vadd.f32 %v3640_v5, %v3639_v4 }
 0x17c   : > { %v3578_v34 = vpop.f32.mrf.mxu1  ;;  %v3642_v20 = vpop.f32.mrf.mxu0 }
 0x17d   : > { %v4781_v37 = vadd.f32 %v3577_v8, %v4582_v13  ;;  %v4784_v15 = vadd.f32 %v3641_v61, %v4690_v0 }
 0x17e   : > { %v3579_v60 = vpop.f32.mrf.mxu1  ;;  %v3643_v21 = vpop.f32.mrf.mxu0 }
 0x17f   : > { %v3580_v22 = vadd.f32 %v3579_v60, %v3578_v34  ;;  %v3644_v3 = vadd.f32 %v3643_v21, %v3642_v20 }
 0x180   : > { %v3581_v26 = vpop.f32.mrf.mxu1  ;;  %v3645_v32 = vpop.f32.mrf.mxu0 }
 0x181   : > { %v4787_v48 = vadd.f32 %v3580_v22, %v4586_v19  ;;  %v4790_v44 = vadd.f32 %v3644_v3, %v4697_v14 }
 0x182   : > { %v3582_v33 = vpop.f32.mrf.mxu1  ;;  %v3646_v30 = vpop.f32.mrf.mxu0 }
 0x183   : > { %v3583_v31 = vadd.f32 %v3582_v33, %v3581_v26  ;;  %v3647_v13 = vadd.f32 %v3646_v30, %v3645_v32 }
 0x184   : > { %v3584_v38 = vpop.f32.mrf.mxu1  ;;  %v3648_v43 = vpop.f32.mrf.mxu0 }
 0x185   : > { %v4793_v0 = vadd.f32 %v3583_v31, %v4594_v29  ;;  %v4796_v40 = vadd.f32 %v3647_v13, %v4702_v25 }
 0x186   : > { %v3585_v46 = vpop.f32.mrf.mxu1  ;;  %v3649_v41 = vpop.f32.mrf.mxu0 }
 0x187   : > { %v3586_v47 = vadd.f32 %v3585_v46, %v3584_v38  ;;  %v3650_v19 = vadd.f32 %v3649_v41, %v3648_v43 }
 0x188   : > { %v3587_v53 = vpop.f32.mrf.mxu1  ;;  %v3651_v56 = vpop.f32.mrf.mxu0 }
 0x189   : > { %v4799_v14 = vadd.f32 %v3586_v47, %v4598_v35  ;;  %v4802_v1 = vadd.f32 %v3650_v19, %v4707_v36 }
 0x18a   : > { %v3588_v57 = vpop.f32.mrf.mxu1  ;;  %v3652_v51 = vpop.f32.mrf.mxu0 }
 0x18b   : > { %v3589_v62 = vadd.f32 %v3588_v57, %v3587_v53  ;;  %v3653_v29 = vadd.f32 %v3652_v51, %v3651_v56 }
 0x18c   : > { %v3654_v4 = vpop.f32.mrf.mxu0  ;;  %v3718_v50 = vpop.f32.mrf.mxu1 }
 0x18d   : > { %v4805_v25 = vadd.f32 %v3589_v62, %v4606_v45  ;;  %v4808_v5 = vadd.f32 %v3653_v29, %v4712_v12 }
 0x18e   : > { %v3655_v8 = vpop.f32.mrf.mxu0  ;;  %v3719_v61 = vpop.f32.mrf.mxu1 }
 0x18f   : > { %v3656_v34 = vadd.f32 %v3655_v8, %v3654_v4  ;;  %v3720_v35 = vadd.f32 %v3719_v61, %v3718_v50 }
 0x190   : > { %v3657_v20 = vpop.f32.mrf.mxu0  ;;  %v4810_v60 = vpop.f32.mrf.mxu1 }
 0x191   : > { %v4813_v36 = vadd.f32 %v3656_v34, %v4715_v59  ;;  %v4816_v21 = vadd.f32 %v3720_v35, %v4718_v54 }
 0x192   : > { %v3658_v22 = vpop.f32.mrf.mxu0  ;;  %v4818_v3 = vpop.f32.mrf.mxu1 }
 0x193   : > { %v3659_v45 = vadd.f32 %v3658_v22, %v3657_v20 }
 0x194   : > { %v3660_v26 = vpop.f32.mrf.mxu0  ;;  %v4820_v12 = vpop.f32.mrf.mxu1 }
 0x195   : > { %v4823_v32 = vadd.f32 %v3659_v45, %v4721_v28 }
 0x196   : > { %v3661_v33 = vpop.f32.mrf.mxu0  ;;  %v4825_v30 = vpop.f32.mrf.mxu1 }
 0x197   : > { %v3662_v31 = vadd.f32 %v3661_v33, %v3660_v26 }
 0x198   : > { %v3663_v13 = vpop.f32.mrf.mxu0  ;;  %v4827_v59 = vpop.f32.mrf.mxu1 }
 0x199   : > { %v4830_v54 = vadd.f32 %v3662_v31, %v4727_v58 }
 0x19a   : > { %v3664_v38 = vpop.f32.mrf.mxu0  ;;  %v4832_v43 = vpop.f32.mrf.mxu1 }
 0x19b   : > { %v3665_v46 = vadd.f32 %v3664_v38, %v3663_v13 }
 0x19c   : > { %v3666_v41 = vpop.f32.mrf.mxu0  ;;  %v4834_v47 = vpop.f32.mrf.mxu1 }
 0x19d   : > { %v4837_v28 = vadd.f32 %v3665_v46, %v4733_v7 }
 0x19e   : > { %v3667_v19 = vpop.f32.mrf.mxu0  ;;  %v4839_v53 = vpop.f32.mrf.mxu1 }
 0x19f   : > { %v3668_v56 = vadd.f32 %v3667_v19, %v3666_v41 }
 0x1a0   : > { %v3669_v57 = vpop.f32.mrf.mxu0  ;;  %v4841_v51 = vpop.f32.mrf.mxu1 }
 0x1a1   : > { %v4844_v58 = vadd.f32 %v3668_v56, %v4739_v17 }
 0x1a2   : > { %v3670_v62 = vpop.f32.mrf.mxu0  ;;  %v4846_v29 = vpop.f32.mrf.mxu1 }
 0x1a3   : > { %5319 = vst [vmem:[#allocation2_spill] sm:$0xff] %v4844_v58  ;;  %v3671_v4 = vadd.f32 %v3670_v62, %v3669_v57 }
 0x1a4   : > { %v3672_v50 = vpop.f32.mrf.mxu0  ;;  %v4848_v8 = vpop.f32.mrf.mxu1 }
 0x1a5   : > { %v4851_v7 = vadd.f32 %v3671_v4, %v4745_v27 }
 0x1a6   : > { %v3673_v61 = vpop.f32.mrf.mxu0  ;;  %v4853_v34 = vpop.f32.mrf.mxu1 }
 0x1a7   : > { %5320 = vst [vmem:[#allocation3_spill] sm:$0xff] %v4851_v7  ;;  %v3674_v35 = vadd.f32 %v3673_v61, %v3672_v50 }
 0x1a8   : > { %v3675_v20 = vpop.f32.mrf.mxu0  ;;  %v4855_v22 = vpop.f32.mrf.mxu1 }
 0x1a9   : > { %v4858_v17 = vadd.f32 %v3674_v35, %v4751_v39 }
 0x1aa   : > { %v3676_v45 = vpop.f32.mrf.mxu0  ;;  %v4860_v26 = vpop.f32.mrf.mxu1 }
 0x1ab   : > { %5321 = vst [vmem:[#allocation4_spill] sm:$0xff] %v4858_v17  ;;  %v3677_v33 = vadd.f32 %v3676_v45, %v3675_v20 }
 0x1ac   : > { %v3678_v31 = vpop.f32.mrf.mxu0  ;;  %v4862_v13 = vpop.f32.mrf.mxu1 }
 0x1ad   : > { %v4865_v27 = vadd.f32 %v3677_v33, %v4757_v49 }
 0x1ae   : > { %v3679_v38 = vpop.f32.mrf.mxu0  ;;  %v4867_v46 = vpop.f32.mrf.mxu1 }
 0x1af   : > { %5322 = vst [vmem:[#allocation5_spill] sm:$0xff] %v4865_v27  ;;  %v3680_v41 = vadd.f32 %v3679_v38, %v3678_v31 }
 0x1b0   : > { %v3681_v19 = vpop.f32.mrf.mxu0  ;;  %v4869_v56 = vpop.f32.mrf.mxu1 }
 0x1b1   : > { %v4872_v39 = vadd.f32 %v3680_v41, %v4763_v63 }
 0x1b2   : > { %v3682_v57 = vpop.f32.mrf.mxu0  ;;  %v4874_v62 = vpop.f32.mrf.mxu1 }
 0x1b3   : > { %5323 = vst [vmem:[#allocation6_spill] sm:$0xff] %v4872_v39  ;;  %v3683_v4 = vadd.f32 %v3682_v57, %v3681_v19 }
 0x1b4   : > { %v3684_v50 = vpop.f32.mrf.mxu0  ;;  %v4876_v61 = vpop.f32.mrf.mxu1 }
 0x1b5   : > { %v4879_v49 = vadd.f32 %v3683_v4, %v4769_v11 }
 0x1b6   : > { %v3685_v35 = vpop.f32.mrf.mxu0  ;;  %v4881_v20 = vpop.f32.mrf.mxu1 }
 0x1b7   : > { %5324 = vst [vmem:[#allocation7_spill] sm:$0xff] %v4879_v49  ;;  %v3686_v45 = vadd.f32 %v3685_v35, %v3684_v50 }
 0x1b8   : > { %v3687_v33 = vpop.f32.mrf.mxu0  ;;  %v4883_v31 = vpop.f32.mrf.mxu1 }
 0x1b9   : > { %v4886_v63 = vadd.f32 %v3686_v45, %v4775_v24 }
 0x1ba   : > { %v3688_v38 = vpop.f32.mrf.mxu0  ;;  %v4888_v41 = vpop.f32.mrf.mxu1 }
 0x1bb   : > { %5325 = vst [vmem:[#allocation8_spill] sm:$0xff] %v4886_v63  ;;  %v3689_v19 = vadd.f32 %v3688_v38, %v3687_v33 }
 0x1bc   : > { %v3690_v57 = vpop.f32.mrf.mxu0  ;;  %v4890_v39 = vpop.f32.mrf.mxu1 }
 0x1bd   : > { %v4893_v11 = vadd.f32 %v3689_v19, %v4781_v37 }
 0x1be   : > { %v3691_v4 = vpop.f32.mrf.mxu0  ;;  %v4895_v49 = vpop.f32.mrf.mxu1 }
 0x1bf   : > { %5326 = vst [vmem:[#allocation9_spill] sm:$0xff] %v4893_v11  ;;  %v3692_v50 = vadd.f32 %v3691_v4, %v3690_v57 }
 0x1c0   : > { %v3693_v35 = vpop.f32.mrf.mxu0  ;;  %v4897_v27 = vpop.f32.mrf.mxu1 }
 0x1c1   : > { %v4900_v24 = vadd.f32 %v3692_v50, %v4787_v48 }
 0x1c2   : > { %v3694_v45 = vpop.f32.mrf.mxu0  ;;  %v4902_v63 = vpop.f32.mrf.mxu1 }
 0x1c3   : > { %5327 = vst [vmem:[#allocation10_spill] sm:$0xff] %v4900_v24  ;;  %v3695_v33 = vadd.f32 %v3694_v45, %v3693_v35 }
 0x1c4   : > { %v3696_v38 = vpop.f32.mrf.mxu0  ;;  %v4904_v7 = vpop.f32.mrf.mxu1 }
 0x1c5   : > { %v4907_v37 = vadd.f32 %v3695_v33, %v4793_v0  ;;  %v3723_v0 = vadd.f32 %v4818_v3, %v4810_v60  ;;  %v3726_v33 = vadd.f32 %v4825_v30, %v4820_v12 }
 0x1c6   : > { %v3697_v19 = vpop.f32.mrf.mxu0  ;;  %v4909_v11 = vpop.f32.mrf.mxu1 }
 0x1c7   : > { %5328 = vst [vmem:[#allocation11_spill] sm:$0xff] %v4907_v37  ;;  %v3698_v57 = vadd.f32 %v3697_v19, %v3696_v38  ;;  %v2192_v60 = vadd.f32 %v3723_v0, %v4724_v10 }
 0x1c8   : > { %v3699_v4 = vpop.f32.mrf.mxu0  ;;  %v4911_v17 = vpop.f32.mrf.mxu1 }
 0x1c9   : > { %v4914_v48 = vadd.f32 %v3698_v57, %v4799_v14  ;;  %v3729_v57 = vadd.f32 %v4832_v43, %v4827_v59 }
 0x1ca   : > { %v3700_v50 = vpop.f32.mrf.mxu0  ;;  %v4916_v24 = vpop.f32.mrf.mxu1 }
 0x1cb   : > { %5329 = vst [vmem:[#allocation12_spill] sm:$0xff] %v4914_v48  ;;  %v3701_v35 = vadd.f32 %v3700_v50, %v3699_v4  ;;  %v2197_v50 = vadd.f32 %v3726_v33, %v4730_v23  ;;  %v2200_v59 = vadd.f32 %v3729_v57, %v4736_v52  ;;  %v3738_v52 = vadd.f32 %v4853_v34, %v4848_v8 }
 0x1cc   : > { %v4918_v45 = vpop.f32.mrf.mxu1  ;;  %v3856_v58 = vpop.f32.mrf.mxu0 }
 0x1cd   : > { %v4925_v38 = vadd.f32 %v3701_v35, %v4805_v25  ;;  %v3732_v25 = vadd.f32 %v4839_v53, %v4834_v47  ;;  %v4942_v30 = vadd.f32 %v3856_v58, %v2197_v50  ;;  %v3735_v53 = vadd.f32 %v4846_v29, %v4841_v51 }
 0x1ce   : > { %v4927_v19 = vpop.f32.mrf.mxu1  ;;  %v2349_v14 = vpop.f32.mrf.mxu0 }
 0x1cf   : > { %v4935_v48 = vadd.f32 %v2349_v14, %v4816_v21  ;;  %v2205_v0 = vadd.f32 %v3732_v25, %v4742_v18  ;;  %v2515_v57 = vmul.f32 %v4942_v30, %v4942_v30  ;;  %v3744_v25 = vadd.f32 %v4867_v46, %v4862_v13 }
 0x1d0   : > { %v4931_v37 = vpop.f32.mrf.mxu1  ;;  %v3857_v4 = vpop.f32.mrf.mxu0  ;;  %v3747_v46 = vadd.f32 %v4874_v62, %v4869_v56 }
 0x1d1   : > { %v2513_v21 = vmul.f32 %v4935_v48, %v4935_v48  ;;  %v4951_v33 = vadd.f32 %v3857_v4, %v2200_v59  ;;  %v2213_v59 = vadd.f32 %v3738_v52, %v4754_v16 }
 0x1d2   : > { %v4940_v3 = vpop.f32.mrf.mxu1  ;;  %v2352_v12 = vpop.f32.mrf.mxu0 }
 0x1d3   : > { %v4945_v43 = vadd.f32 %v2352_v12, %v2192_v60  ;;  %v3741_v60 = vadd.f32 %v4860_v26, %v4855_v22  ;;  %v2516_v8 = vmul.f32 %v4951_v33, %v4951_v33  ;;  %v2208_v22 = vadd.f32 %v3735_v53, %v4748_v9 }
 0x1d4   : > { %v4947_v35 = vpop.f32.mrf.mxu1  ;;  %v3860_v23 = vpop.f32.mrf.mxu0  ;;  %v3750_v9 = vadd.f32 %v4881_v20, %v4876_v61 }
 0x1d5   : > { %v2476_v10 = vadd.f32 %v4945_v43, %v4935_v48  ;;  %v2514_v47 = vmul.f32 %v4945_v43, %v4945_v43 }
 0x1d6   : > { %v4961_v58 = vpop.f32.mrf.mxu1  ;;  %v2365_v14 = vpop.f32.mrf.mxu0 }
 0x1d7   : > { %v2477_v4 = vadd.f32 %v2476_v10, %v4942_v30  ;;  %v2545_v50 = vadd.f32 %v2514_v47, %v2513_v21  ;;  %v4969_v12 = vadd.f32 %v2365_v14, %v2205_v0  ;;  %v4985_v14 = vadd.f32 %v3860_v23, %v2213_v59 }
 0x1d8   : > { %v4971_v51 = vpop.f32.mrf.mxu1  ;;  %v3861_v29 = vpop.f32.mrf.mxu0  ;;  %v2229_v59 = vadd.f32 %v3750_v9, %v4778_v6  ;;  %v3759_v9 = vadd.f32 %v4902_v63, %v4897_v27 }
 0x1d9   : > { %v2546_v34 = vadd.f32 %v2545_v50, %v2515_v57  ;;  %v2478_v18 = vadd.f32 %v2477_v4, %v4951_v33  ;;  %v2517_v47 = vmul.f32 %v4969_v12, %v4969_v12  ;;  %v2216_v57 = vadd.f32 %v3741_v60, %v4760_v2 }
 0x1da   : > { %v4979_v21 = vpop.f32.mrf.mxu1  ;;  %v2368_v26 = vpop.f32.mrf.mxu0  ;;  %v2221_v60 = vadd.f32 %v3744_v25, %v4766_v42  ;;  %v2519_v56 = vmul.f32 %v4985_v14, %v4985_v14  ;;  %v3756_v42 = vadd.f32 %v4895_v49, %v4890_v39 }
 0x1db   : > { %v2479_v10 = vadd.f32 %v2478_v18, %v4969_v12  ;;  %v2547_v0 = vadd.f32 %v2546_v34, %v2516_v8  ;;  %v4988_v4 = vadd.f32 %v2368_v26, %v2208_v22  ;;  %v4996_v52 = vadd.f32 %v3861_v29, %v2216_v57 }
 0x1dc   : > { %v4990_v13 = vpop.f32.mrf.mxu1  ;;  %v3864_v16 = vpop.f32.mrf.mxu0  ;;  %v3753_v34 = vadd.f32 %v4888_v41, %v4883_v31  ;;  %v2224_v22 = vadd.f32 %v3747_v46, %v4772_v55 }
 0x1dd   : > { %v2548_v53 = vadd.f32 %v2547_v0, %v2517_v47  ;;  %v2480_v50 = vadd.f32 %v2479_v10, %v4988_v4  ;;  %v2518_v23 = vmul.f32 %v4988_v4, %v4988_v4  ;;  %v2520_v31 = vmul.f32 %v4996_v52, %v4996_v52 }
 0x1de   : > { %v5001_v2 = vpop.f32.mrf.mxu1  ;;  %v2381_v8 = vpop.f32.mrf.mxu0  ;;  %v2232_v47 = vadd.f32 %v3753_v34, %v4784_v15  ;;  %v5025_v57 = vadd.f32 %v3864_v16, %v2229_v59  ;;  %v2240_v59 = vadd.f32 %v3759_v9, %v4796_v40 }
 0x1df   : > { %v2481_v62 = vadd.f32 %v2480_v50, %v4985_v14  ;;  %v2549_v61 = vadd.f32 %v2548_v53, %v2518_v23  ;;  %v5009_v20 = vadd.f32 %v2381_v8, %v2221_v60  ;;  %v3762_v53 = vadd.f32 %v4909_v11, %v4904_v7 }
 0x1e0   : > { %v5011_v29 = vpop.f32.mrf.mxu1  ;;  %v3865_v18 = vpop.f32.mrf.mxu0  ;;  %v2237_v8 = vadd.f32 %v3756_v42, %v4790_v44  ;;  %v2523_v27 = vmul.f32 %v5025_v57, %v5025_v57  ;;  %v3768_v44 = vadd.f32 %v4927_v19, %v4918_v45 }
 0x1e1   : > { %v2550_v41 = vadd.f32 %v2549_v61, %v2519_v56  ;;  %v2482_v25 = vadd.f32 %v2481_v62, %v4996_v52  ;;  %v2521_v6 = vmul.f32 %v5009_v20, %v5009_v20  ;;  %v5038_v50 = vadd.f32 %v3865_v18, %v2232_v47 }
 0x1e2   : > { %v5020_v26 = vpop.f32.mrf.mxu1  ;;  %v2384_v10 = vpop.f32.mrf.mxu0  ;;  %v3765_v56 = vadd.f32 %v4916_v24, %v4911_v17  ;;  %v2245_v18 = vadd.f32 %v3762_v53, %v4802_v1 }
 0x1e3   : > { %v5023_v0 = vadd.f32 %v2384_v10, %v2224_v22  ;;  %v2483_v55 = vadd.f32 %v2482_v25, %v5009_v20  ;;  %v2551_v39 = vadd.f32 %v2550_v41, %v2520_v31  ;;  %v2524_v17 = vmul.f32 %v5038_v50, %v5038_v50 }
 0x1e4   : > { %v5030_v49 = vpop.f32.mrf.mxu1  ;;  %v3868_v46 = vpop.f32.mrf.mxu0  ;;  %v2248_v41 = vadd.f32 %v3765_v56, %v4808_v5 }
 0x1e5   : > { %v2522_v15 = vmul.f32 %v5023_v0, %v5023_v0  ;;  %v2552_v16 = vadd.f32 %v2551_v39, %v2521_v6  ;;  %v2484_v23 = vadd.f32 %v2483_v55, %v5023_v0  ;;  %v5059_v10 = vadd.f32 %v3868_v46, %v2245_v18 }
 0x1e6   : > { %v3785_v60 = vpop.f32.mrf.mxu1  ;;  %v2397_v34 = vpop.f32.mrf.mxu0  ;;  %v3771_v55 = vadd.f32 %v4940_v3, %v4931_v37  ;;  %v3774_v6 = vadd.f32 %v4961_v58, %v4947_v35 }
 0x1e7   : > { %v2485_v7 = vadd.f32 %v2484_v23, %v5025_v57  ;;  %v2553_v63 = vadd.f32 %v2552_v16, %v2522_v15  ;;  %v5047_v11 = vadd.f32 %v2397_v34, %v2237_v8  ;;  %v2253_v15 = vadd.f32 %v3768_v44, %v4813_v36 }
 0x1e8   : > { %v3787_v62 = vpop.f32.mrf.mxu1  ;;  %v3869_v61 = vpop.f32.mrf.mxu0  ;;  %v3777_v23 = vadd.f32 %v4979_v21, %v4971_v51  ;;  %v2527_v37 = vmul.f32 %v5059_v10, %v5059_v10  ;;  %v2261_v56 = vadd.f32 %v3774_v6, %v4830_v54  ;;  %v3780_v36 = vadd.f32 %v5001_v2, %v4990_v13 }
 0x1e9   : > { %v2554_v24 = vadd.f32 %v2553_v63, %v2523_v27  ;;  %v2486_v22 = vadd.f32 %v2485_v7, %v5038_v50  ;;  %v2525_v40 = vmul.f32 %v5047_v11, %v5047_v11  ;;  %v5070_v46 = vadd.f32 %v3869_v61, %v2248_v41 }
 0x1ea   : > { %v3788_v42 = vpop.f32.mrf.mxu1  ;;  %v2400_v31 = vpop.f32.mrf.mxu0  ;;  %v2256_v27 = vadd.f32 %v3771_v55, %v4823_v32  ;;  %v2264_v18 = vadd.f32 %v3777_v23, %v4837_v28 }
 0x1eb   : > { %v5057_v25 = vadd.f32 %v2400_v31, %v2240_v59  ;;  %v2487_v1 = vadd.f32 %v2486_v22, %v5047_v11  ;;  %v2555_v45 = vadd.f32 %v2554_v24, %v2524_v17  ;;  %v2528_v51 = vmul.f32 %v5070_v46, %v5070_v46 }
 0x1ec   : > { %v3790_v19 = vpop.f32.mrf.mxu1  ;;  %v3872_v47 = vpop.f32.mrf.mxu0  ;;  %v3783_v24 = vadd.f32 %v5020_v26, %v5011_v29  ;;  %v3786_v22 = vadd.f32 %v3785_v60, %v5030_v49  ;;  %v3789_v6 = vadd.f32 %v3788_v42, %v3787_v62 }
 0x1ed   : > { %v2526_v5 = vmul.f32 %v5057_v25, %v5057_v25  ;;  %v2556_v39 = vadd.f32 %v2555_v45, %v2525_v40  ;;  %v2488_v9 = vadd.f32 %v2487_v1, %v5057_v25  ;;  %v5091_v44 = vadd.f32 %v3872_v47, %v2261_v56  ;;  %v5330_v45 = vld [vmem:[#allocation2_spill] sm:$0xff] }
 0x1ee   : > { %v3791_v53 = vpop.f32.mrf.mxu1  ;;  %v2413_v16 = vpop.f32.mrf.mxu0  ;;  %v2269_v47 = vadd.f32 %v3780_v36, %v5330_v45 }
 0x1ef   : > { %v2489_v3 = vadd.f32 %v2488_v9, %v5059_v10  ;;  %v2557_v35 = vadd.f32 %v2556_v39, %v2526_v5  ;;  %v5079_v58 = vadd.f32 %v2413_v16, %v2253_v15  ;;  %v2531_v5 = vmul.f32 %v5091_v44, %v5091_v44  ;;  %v5331_v9 = vld [vmem:[#allocation4_spill] sm:$0xff]  ;;  %v5332_v16 = vld [vmem:[#allocation3_spill] sm:$0xff] }
 0x1f0   : > { %v3793_v8 = vpop.f32.mrf.mxu1  ;;  %v3873_v34 = vpop.f32.mrf.mxu0  ;;  %v2277_v15 = vadd.f32 %v3786_v22, %v5331_v9  ;;  %v2272_v23 = vadd.f32 %v3783_v24, %v5332_v16 }
 0x1f1   : > { %v2558_v21 = vadd.f32 %v2557_v35, %v2527_v37  ;;  %v2490_v7 = vadd.f32 %v2489_v3, %v5070_v46  ;;  %v2529_v32 = vmul.f32 %v5079_v58, %v5079_v58  ;;  %v5101_v41 = vadd.f32 %v3873_v34, %v2264_v18 }
 0x1f2   : > { %v3794_v63 = vpop.f32.mrf.mxu1  ;;  %v2416_v61 = vpop.f32.mrf.mxu0  ;;  %v3792_v37 = vadd.f32 %v3791_v53, %v3790_v19 }
 0x1f3   : > { %v5089_v59 = vadd.f32 %v2416_v61, %v2256_v27  ;;  %v2491_v54 = vadd.f32 %v2490_v7, %v5079_v58  ;;  %v2559_v13 = vadd.f32 %v2558_v21, %v2528_v51  ;;  %v2532_v3 = vmul.f32 %v5101_v41, %v5101_v41  ;;  %v5333_v7 = vld [vmem:[#allocation5_spill] sm:$0xff] }
 0x1f4   : > { %v3796_v2 = vpop.f32.mrf.mxu1  ;;  %v3876_v17 = vpop.f32.mrf.mxu0  ;;  %v2280_v19 = vadd.f32 %v3789_v6, %v5333_v7  ;;  %v3795_v18 = vadd.f32 %v3794_v63, %v3793_v8  ;;  %v5335_v6 = vld [vmem:[#allocation8_spill] sm:$0xff] }
 0x1f5   : > { %v2530_v28 = vmul.f32 %v5089_v59, %v5089_v59  ;;  %v2560_v31 = vadd.f32 %v2559_v13, %v2529_v32  ;;  %v2492_v1 = vadd.f32 %v2491_v54, %v5089_v59  ;;  %v5115_v56 = vadd.f32 %v3876_v17, %v2277_v15 }
 0x1f6   : > { %v3797_v40 = vpop.f32.mrf.mxu1  ;;  %v2429_v55 = vpop.f32.mrf.mxu0 }
 0x1f7   : > { %v2493_v29 = vadd.f32 %v2492_v1, %v5091_v44  ;;  %v2561_v26 = vadd.f32 %v2560_v31, %v2530_v28  ;;  %v5108_v49 = vadd.f32 %v2429_v55, %v2269_v47  ;;  %v3798_v54 = vadd.f32 %v3797_v40, %v3796_v2  ;;  %v5334_v28 = vld [vmem:[#allocation6_spill] sm:$0xff] }
 0x1f8   : > { %v3799_v60 = vpop.f32.mrf.mxu1  ;;  %v3877_v39 = vpop.f32.mrf.mxu0  ;;  %v2285_v31 = vadd.f32 %v3792_v37, %v5334_v28  ;;  %v2535_v45 = vmul.f32 %v5115_v56, %v5115_v56 }
 0x1f9   : > { %v2562_v35 = vadd.f32 %v2561_v26, %v2531_v5  ;;  %v2494_v62 = vadd.f32 %v2493_v29, %v5101_v41  ;;  %v2533_v51 = vmul.f32 %v5108_v49, %v5108_v49  ;;  %v5125_v17 = vadd.f32 %v3877_v39, %v2280_v19  ;;  %v5336_v29 = vld [vmem:[#allocation7_spill] sm:$0xff] }
 0x1fa   : > { %v3800_v42 = vpop.f32.mrf.mxu1  ;;  %v2432_v34 = vpop.f32.mrf.mxu0  ;;  %v2293_v5 = vadd.f32 %v3798_v54, %v5335_v6  ;;  %v2288_v26 = vadd.f32 %v3795_v18, %v5336_v29 }
 0x1fb   : > { %v5117_v27 = vadd.f32 %v2432_v34, %v2272_v23  ;;  %v2495_v36 = vadd.f32 %v2494_v62, %v5108_v49  ;;  %v2563_v21 = vadd.f32 %v2562_v35, %v2532_v3  ;;  %v3801_v47 = vadd.f32 %v3800_v42, %v3799_v60  ;;  %v5337_v34 = vld [vmem:[#allocation9_spill] sm:$0xff] }
 0x1fc   : > { %v3802_v53 = vpop.f32.mrf.mxu1  ;;  %v3880_v61 = vpop.f32.mrf.mxu0  ;;  %v2536_v39 = vmul.f32 %v5125_v17, %v5125_v17 }
 0x1fd   : > { %v2534_v32 = vmul.f32 %v5117_v27, %v5117_v27  ;;  %v2564_v13 = vadd.f32 %v2563_v21, %v2533_v51  ;;  %v2496_v24 = vadd.f32 %v2495_v36, %v5117_v27  ;;  %v5139_v37 = vadd.f32 %v3880_v61, %v2293_v5 }
 0x1fe   : > { %v3803_v22 = vpop.f32.mrf.mxu1  ;;  %v2445_v1 = vpop.f32.mrf.mxu0  ;;  %v2296_v36 = vadd.f32 %v3801_v47, %v5337_v34 }
 0x1ff   : > { %v2497_v55 = vadd.f32 %v2496_v24, %v5115_v56  ;;  %v2565_v8 = vadd.f32 %v2564_v13, %v2534_v32  ;;  %v5132_v63 = vadd.f32 %v2445_v1, %v2285_v31  ;;  %v3804_v15 = vadd.f32 %v3803_v22, %v3802_v53  ;;  %v5338_v32 = vld [vmem:[#allocation10_spill] sm:$0xff] }
 0x200   : > { %v3805_v2 = vpop.f32.mrf.mxu1  ;;  %v3881_v40 = vpop.f32.mrf.mxu0  ;;  %v2539_v28 = vmul.f32 %v5139_v37, %v5139_v37 }
 0x201   : > { %v2566_v9 = vadd.f32 %v2565_v8, %v2535_v45  ;;  %v2498_v16 = vadd.f32 %v2497_v55, %v5125_v17  ;;  %v2537_v62 = vmul.f32 %v5132_v63, %v5132_v63  ;;  %v5149_v18 = vadd.f32 %v3881_v40, %v2296_v36  ;;  %v5339_v8 = vld [vmem:[#allocation12_spill] sm:$0xff]  ;;  %v5340_v40 = vld [vmem:[#allocation11_spill] sm:$0xff] }
 0x202   : > { %v3806_v23 = vpop.f32.mrf.mxu1  ;;  %v2448_v60 = vpop.f32.mrf.mxu0  ;;  %v2301_v13 = vadd.f32 %v3804_v15, %v5338_v32 }
 0x203   : > { %v5141_v3 = vadd.f32 %v2448_v60, %v2288_v26  ;;  %v2499_v35 = vadd.f32 %v2498_v16, %v5132_v63  ;;  %v2567_v42 = vadd.f32 %v2566_v9, %v2536_v39  ;;  %v3807_v7 = vadd.f32 %v3806_v23, %v3805_v2 }
 0x204   : > { %v3808_v51 = vpop.f32.mrf.mxu1  ;;  %v3884_v21 = vpop.f32.mrf.mxu0  ;;  %v2540_v5 = vmul.f32 %v5149_v18, %v5149_v18 }
 0x205   : > { %v2538_v19 = vmul.f32 %v5141_v3, %v5141_v3  ;;  %v2568_v53 = vadd.f32 %v2567_v42, %v2537_v62  ;;  %v2500_v61 = vadd.f32 %v2499_v35, %v5141_v3  ;;  %v2304_v6 = vadd.f32 %v3807_v7, %v5340_v40 }
 0x206   : > { %v3809_v54 = vpop.f32.mrf.mxu1  ;;  %v2461_v24 = vpop.f32.mrf.mxu0 }
 0x207   : > { %v3810_v22 = vadd.f32 %v3809_v54, %v3808_v51  ;;  %v2501_v31 = vadd.f32 %v2500_v61, %v5139_v37  ;;  %v2569_v1 = vadd.f32 %v2568_v53, %v2538_v19  ;;  %v5156_v45 = vadd.f32 %v2461_v24, %v2301_v13 }
 0x208   : > { %v3811_v47 = vpop.f32.mrf.mxu1  ;;  %v3885_v55 = vpop.f32.mrf.mxu0 }
 0x209   : > { %v2309_v2 = vadd.f32 %v3810_v22, %v5339_v8  ;;  %v2570_v29 = vadd.f32 %v2569_v1, %v2539_v28  ;;  %v2502_v26 = vadd.f32 %v2501_v31, %v5149_v18  ;;  %v2541_v35 = vmul.f32 %v5156_v45, %v5156_v45 }
 0x20a   : > { %v3812_v39 = vpop.f32.mrf.mxu1  ;;  %v2464_v9 = vpop.f32.mrf.mxu0 }
 0x20b   : > { %v3813_v15 = vadd.f32 %v3812_v39, %v3811_v47  ;;  %v5163_v16 = vadd.f32 %v2464_v9, %v2304_v6  ;;  %v5165_v23 = vadd.f32 %v3884_v21, %v2309_v2  ;;  %v2503_v60 = vadd.f32 %v2502_v26, %v5156_v45 }
 0x20c   : > { %v2571_v62 = vadd.f32 %v2570_v29, %v2540_v5 }
 0x20d   : > { %v2312_v42 = vadd.f32 %v3813_v15, %v4925_v38  ;;  %v2542_v34 = vmul.f32 %v5163_v16, %v5163_v16  ;;  %v2504_v51 = vadd.f32 %v2503_v60, %v5163_v16  ;;  %v2543_v21 = vmul.f32 %v5165_v23, %v5165_v23 }
 0x20e   : > { %v2572_v36 = vadd.f32 %v2571_v62, %v2541_v35 }
 0x20f   : > { %v5174_v7 = vadd.f32 %v3885_v55, %v2312_v42  ;;  %v2505_v19 = vadd.f32 %v2504_v51, %v5165_v23 }
 0x210   : > { %v2573_v53 = vadd.f32 %v2572_v36, %v2542_v34 }
 0x211   : > { %v2544_v61 = vmul.f32 %v5174_v7, %v5174_v7  ;;  %v2506_v54 = vadd.f32 %v2505_v19, %v5174_v7 }
 0x212   : > { %v2574_v38 = vadd.f32 %v2573_v53, %v2543_v21 }
 0x213   : > { %v2507_v32 = vrot.slane %v2506_v54, 4 }
 0x214   : > { %v2575_v13 = vadd.f32 %v2574_v38, %v2544_v61 }
 0x215   : > { %v2508_v24 = vadd.f32 %v2507_v32, %v2506_v54 }
 0x216   : > { %v2576_v22 = vrot.slane %v2575_v13, 4 }
 0x217   : > { %v2509_v28 = vrot.slane %v2508_v24, 2 }
 0x218   : > { %v2577_v31 = vadd.f32 %v2576_v22, %v2575_v13 }
 0x219   : > { %v2510_v1 = vadd.f32 %v2509_v28, %v2508_v24 }
 0x21a   : > { %v2578_v47 = vrot.slane %v2577_v31, 2 }
 0x21b   : > { %v2511_v55 = vrot.slane %v2510_v1, 1 }
 0x21c   : > { %v2579_v8 = vadd.f32 %v2578_v47, %v2577_v31 }
 0x21d   : > { %v2512_v2 = vadd.f32 %v2511_v55, %v2510_v1 }
 0x21e   : > { %v2580_v40 = vrot.slane %v2579_v8, 1 }
 0x21f   : > { %v5182_v5 = vmul.f32 0.00390625, %v2512_v2 }
 0x220   : > { %v2581_v6 = vadd.f32 %v2580_v40, %v2579_v8 }
 0x221   : > { %v2584_v26 = vmul.f32 %v5182_v5, %v5182_v5  ;;  %v2596_v9 = vsub.f32 %v5023_v0, %v5182_v5  ;;  %v2599_v15 = vsub.f32 %v5047_v11, %v5182_v5  ;;  %v2600_v35 = vsub.f32 %v5057_v25, %v5182_v5 }
 0x222   : > { %v2583_v29 = vmul.f32 0.00390625, %v2581_v6  ;;  %v2601_v62 = vsub.f32 %v5059_v10, %v5182_v5  ;;  %v2602_v42 = vsub.f32 %v5070_v46, %v5182_v5  ;;  %v2603_v34 = vsub.f32 %v5079_v58, %v5182_v5  ;;  %v3202_v6 = vld [vmem:[%s5316_s2] ss:$0 sm:$0xff] }
 0x223   : > { %v2604_v36 = vsub.f32 %v5089_v59, %v5182_v5  ;;  %v2605_v0 = vsub.f32 %v5091_v44, %v5182_v5  ;;  %v2606_v11 = vsub.f32 %v5101_v41, %v5182_v5  ;;  %v2607_v25 = vsub.f32 %v5108_v49, %v5182_v5 }
 0x224   : > { %v2585_v39 = vsub.f32 %v2583_v29, %v2584_v26  ;;  %v2608_v10 = vsub.f32 %v5117_v27, %v5182_v5  ;;  %v2609_v46 = vsub.f32 %v5115_v56, %v5182_v5  ;;  %v2610_v58 = vsub.f32 %v5125_v17, %v5182_v5 }
 0x225   : > { %v2611_v59 = vsub.f32 %v5132_v63, %v5182_v5  ;;  %v2612_v44 = vsub.f32 %v5141_v3, %v5182_v5  ;;  %v2613_v41 = vsub.f32 %v5139_v37, %v5182_v5  ;;  %v2614_v49 = vsub.f32 %v5149_v18, %v5182_v5 }
 0x226   : > { %v2586_v60 = vmax.f32 %v2585_v39, 0.0  ;;  %v2615_v27 = vsub.f32 %v5156_v45, %v5182_v5  ;;  %v2616_v56 = vsub.f32 %v5163_v16, %v5182_v5  ;;  %v2617_v17 = vsub.f32 %v5165_v23, %v5182_v5 }
 0x227   : > { %v2618_v63 = vsub.f32 %v5174_v7, %v5182_v5  ;;  %v2587_v37 = vsub.f32 %v4935_v48, %v5182_v5  ;;  %v2588_v3 = vsub.f32 %v4945_v43, %v5182_v5  ;;  %v2589_v18 = vsub.f32 %v4942_v30, %v5182_v5 }
 0x228   : > { %v2619_v51 = vadd.f32 1e-05, %v2586_v60  ;;  %v2590_v45 = vsub.f32 %v4951_v33, %v5182_v5  ;;  %v2591_v16 = vsub.f32 %v4969_v12, %v5182_v5  ;;  %v2592_v23 = vsub.f32 %v4988_v4, %v5182_v5 }
 0x229   : > { %v2593_v7 = vsub.f32 %v4985_v14, %v5182_v5  ;;  %v2594_v48 = vsub.f32 %v4996_v52, %v5182_v5  ;;  %v2595_v43 = vsub.f32 %v5009_v20, %v5182_v5  ;;  %v2597_v30 = vsub.f32 %v5025_v57, %v5182_v5 }
 0x22a   : > { %4191 = vrsqrt.f32 %v2619_v51  ;;  %v2598_v33 = vsub.f32 %v5038_v50, %v5182_v5 }
 0x237   : > { %v4192_v21 = vpop.eup %4191 }
 0x238   : > { %v2621_v12 = vmul.f32 %v4192_v21, %v2587_v37  ;;  %v2622_v19 = vmul.f32 %v4192_v21, %v2588_v3  ;;  %v2623_v53 = vmul.f32 %v4192_v21, %v2589_v18  ;;  %v2624_v4 = vmul.f32 %v4192_v21, %v2590_v45 }
 0x239   : > { %v2625_v61 = vmul.f32 %v4192_v21, %v2591_v16  ;;  %v2626_v54 = vmul.f32 %v4192_v21, %v2592_v23  ;;  %v2627_v14 = vmul.f32 %v4192_v21, %v2593_v7  ;;  %v2628_v38 = vmul.f32 %v4192_v21, %v2594_v48  ;;  %v3203_v23 = vld [vmem:[%s5317_s3] ss:$0 sm:$0xff] }
 0x23a   : > { %v2629_v32 = vmul.f32 %v4192_v21, %v2595_v43  ;;  %v2630_v13 = vmul.f32 %v4192_v21, %v2596_v9  ;;  %v2631_v52 = vmul.f32 %v4192_v21, %v2597_v30  ;;  %v2632_v24 = vmul.f32 %v4192_v21, %v2598_v33 }
 0x23b   : > { %v2633_v22 = vmul.f32 %v4192_v21, %v2599_v15  ;;  %v2634_v20 = vmul.f32 %v4192_v21, %v2600_v35  ;;  %v2635_v28 = vmul.f32 %v4192_v21, %v2601_v62  ;;  %v2636_v31 = vmul.f32 %v4192_v21, %v2602_v42 }
 0x23c   : > { %v2637_v57 = vmul.f32 %v4192_v21, %v2603_v34  ;;  %v2638_v1 = vmul.f32 %v4192_v21, %v2604_v36  ;;  %v2639_v47 = vmul.f32 %v4192_v21, %v2605_v0  ;;  %v2640_v50 = vmul.f32 %v4192_v21, %v2606_v11 }
 0x23d   : > { %v2641_v55 = vmul.f32 %v4192_v21, %v2607_v25  ;;  %v2642_v8 = vmul.f32 %v4192_v21, %v2608_v10  ;;  %v2643_v2 = vmul.f32 %v4192_v21, %v2609_v46  ;;  %v2644_v40 = vmul.f32 %v4192_v21, %v2610_v58 }
 0x23e   : > { %v2645_v5 = vmul.f32 %v4192_v21, %v2611_v59  ;;  %v2646_v29 = vmul.f32 %v4192_v21, %v2612_v44  ;;  %v2647_v26 = vmul.f32 %v4192_v21, %v2613_v41  ;;  %v2648_v39 = vmul.f32 %v4192_v21, %v2614_v49 }
 0x23f   : > { %v2649_v9 = vmul.f32 %v4192_v21, %v2615_v27  ;;  %v2650_v15 = vmul.f32 %v4192_v21, %v2616_v56  ;;  %v2651_v60 = vmul.f32 %v4192_v21, %v2617_v17  ;;  %v2652_v35 = vmul.f32 %v4192_v21, %v2618_v63 }
 0x240   : > { %v2660_v62 = vmul.f32 %v3202_v6, %v2621_v12  ;;  %v2661_v42 = vmul.f32 %v3202_v6, %v2622_v19  ;;  %v2662_v34 = vmul.f32 %v3202_v6, %v2623_v53  ;;  %v2663_v36 = vmul.f32 %v3202_v6, %v2624_v4 }
 0x241   : > { %v2664_v0 = vmul.f32 %v3202_v6, %v2625_v61  ;;  %v2665_v11 = vmul.f32 %v3202_v6, %v2626_v54  ;;  %v2666_v25 = vmul.f32 %v3202_v6, %v2627_v14  ;;  %v2667_v10 = vmul.f32 %v3202_v6, %v2628_v38 }
 0x242   : > { %v2668_v46 = vmul.f32 %v3202_v6, %v2629_v32  ;;  %v2669_v58 = vmul.f32 %v3202_v6, %v2630_v13  ;;  %v2670_v51 = vmul.f32 %v3202_v6, %v2631_v52  ;;  %v2671_v37 = vmul.f32 %v3202_v6, %v2632_v24 }
 0x243   : > { %v2672_v59 = vmul.f32 %v3202_v6, %v2633_v22  ;;  %v2673_v44 = vmul.f32 %v3202_v6, %v2634_v20  ;;  %v2674_v41 = vmul.f32 %v3202_v6, %v2635_v28  ;;  %v2675_v49 = vmul.f32 %v3202_v6, %v2636_v31 }
 0x244   : > { %v2676_v27 = vmul.f32 %v3202_v6, %v2637_v57  ;;  %v2677_v56 = vmul.f32 %v3202_v6, %v2638_v1  ;;  %v2678_v17 = vmul.f32 %v3202_v6, %v2639_v47  ;;  %v2679_v63 = vmul.f32 %v3202_v6, %v2640_v50 }
 0x245   : > { %v2680_v3 = vmul.f32 %v3202_v6, %v2641_v55  ;;  %v2681_v18 = vmul.f32 %v3202_v6, %v2642_v8  ;;  %v2682_v45 = vmul.f32 %v3202_v6, %v2643_v2  ;;  %v2683_v16 = vmul.f32 %v3202_v6, %v2644_v40 }
 0x246   : > { %v2684_v7 = vmul.f32 %v3202_v6, %v2645_v5  ;;  %v2685_v21 = vmul.f32 %v3202_v6, %v2646_v29  ;;  %v2686_v48 = vmul.f32 %v3202_v6, %v2647_v26  ;;  %v2687_v43 = vmul.f32 %v3202_v6, %v2648_v39 }
 0x247   : > { %v2688_v30 = vmul.f32 %v3202_v6, %v2649_v9  ;;  %v2689_v33 = vmul.f32 %v3202_v6, %v2650_v15  ;;  %v2690_v12 = vmul.f32 %v3202_v6, %v2651_v60  ;;  %v2691_v19 = vmul.f32 %v3202_v6, %v2652_v35 }
 0x248   : > { %v5256_v53 = vadd.f32 %v3203_v23, %v2660_v62  ;;  %v5258_v4 = vadd.f32 %v3203_v23, %v2661_v42  ;;  %v5260_v61 = vadd.f32 %v3203_v23, %v2662_v34  ;;  %v5262_v54 = vadd.f32 %v3203_v23, %v2663_v36 }
 0x249   : > { %v5264_v14 = vadd.f32 %v3203_v23, %v2664_v0  ;;  %v5266_v38 = vadd.f32 %v3203_v23, %v2665_v11  ;;  %v5268_v32 = vadd.f32 %v3203_v23, %v2666_v25  ;;  %v5270_v13 = vadd.f32 %v3203_v23, %v2667_v10 }
 0x24a   : > { %v5272_v52 = vadd.f32 %v3203_v23, %v2668_v46  ;;  %v2708_v24 = vadd.f32 %v3203_v23, %v2669_v58  ;;  %v2709_v22 = vadd.f32 %v3203_v23, %v2670_v51  ;;  %v2710_v20 = vadd.f32 %v3203_v23, %v2671_v37 }
 0x24b   : > { %v2711_v28 = vadd.f32 %v3203_v23, %v2672_v59  ;;  %v2712_v31 = vadd.f32 %v3203_v23, %v2673_v44  ;;  %v2713_v57 = vadd.f32 %v3203_v23, %v2674_v41  ;;  %v2714_v1 = vadd.f32 %v3203_v23, %v2675_v49 }
 0x24c   : > { %v5274_v47 = vadd.f32 %v3203_v23, %v2676_v27  ;;  %v2716_v50 = vadd.f32 %v3203_v23, %v2677_v56  ;;  %v2717_v55 = vadd.f32 %v3203_v23, %v2678_v17  ;;  %v2718_v8 = vadd.f32 %v3203_v23, %v2679_v63 }
 0x24d   : > { %v2719_v2 = vadd.f32 %v3203_v23, %v2680_v3  ;;  %v2720_v40 = vadd.f32 %v3203_v23, %v2681_v18  ;;  %v2721_v6 = vadd.f32 %v3203_v23, %v2682_v45  ;;  %v2722_v5 = vadd.f32 %v3203_v23, %v2683_v16 }
 0x24e   : > { %v5276_v29 = vadd.f32 %v3203_v23, %v2684_v7  ;;  %v2724_v26 = vadd.f32 %v3203_v23, %v2685_v21  ;;  %v2725_v39 = vadd.f32 %v3203_v23, %v2686_v48  ;;  %v2726_v9 = vadd.f32 %v3203_v23, %v2687_v43 }
 0x24f   : > { %v2727_v15 = vadd.f32 %v3203_v23, %v2688_v30  ;;  %v2728_v60 = vadd.f32 %v3203_v23, %v2689_v33  ;;  %v2729_v35 = vadd.f32 %v3203_v23, %v2690_v12  ;;  %v2730_v62 = vadd.f32 %v3203_v23, %v2691_v19 }
 0x250   : > { %v2731_v42 = vmax.f32 %v5256_v53, 0.0  ;;  %v2732_v34 = vmax.f32 %v5258_v4, 0.0  ;;  %v2733_v36 = vmax.f32 %v5260_v61, 0.0  ;;  %v2734_v0 = vmax.f32 %v5262_v54, 0.0 }
 0x251   : > { %v2735_v11 = vmax.f32 %v5264_v14, 0.0  ;;  %v2736_v25 = vmax.f32 %v5266_v38, 0.0  ;;  %v2737_v10 = vmax.f32 %v5268_v32, 0.0  ;;  %v2738_v46 = vmax.f32 %v5270_v13, 0.0 }
 0x252   : > { %v2739_v58 = vmax.f32 %v5272_v52, 0.0  ;;  %v2740_v51 = vmax.f32 %v2708_v24, 0.0  ;;  %v2741_v37 = vmax.f32 %v2709_v22, 0.0  ;;  %v2742_v59 = vmax.f32 %v2710_v20, 0.0 }
 0x253   : > { %v2743_v44 = vmax.f32 %v2711_v28, 0.0  ;;  %v2744_v41 = vmax.f32 %v2712_v31, 0.0  ;;  %v2745_v49 = vmax.f32 %v2713_v57, 0.0  ;;  %v2746_v27 = vmax.f32 %v2714_v1, 0.0 }
 0x254   : > { %v2747_v56 = vmax.f32 %v5274_v47, 0.0  ;;  %v2748_v17 = vmax.f32 %v2716_v50, 0.0  ;;  %v2749_v63 = vmax.f32 %v2717_v55, 0.0  ;;  %v2750_v3 = vmax.f32 %v2718_v8, 0.0 }
 0x255   : > { %v2751_v18 = vmax.f32 %v2719_v2, 0.0  ;;  %v2752_v45 = vmax.f32 %v2720_v40, 0.0  ;;  %v2753_v16 = vmax.f32 %v2721_v6, 0.0  ;;  %v2754_v23 = vmax.f32 %v2722_v5, 0.0 }
 0x256   : > { %v2755_v7 = vmax.f32 %v5276_v29, 0.0  ;;  %v2756_v21 = vmax.f32 %v2724_v26, 0.0  ;;  %v2757_v48 = vmax.f32 %v2725_v39, 0.0  ;;  %v2758_v43 = vmax.f32 %v2726_v9, 0.0 }
 0x257   : > { %v2759_v30 = vmax.f32 %v2727_v15, 0.0  ;;  %v2760_v33 = vmax.f32 %v2728_v60, 0.0  ;;  %v2761_v12 = vmax.f32 %v2729_v35, 0.0  ;;  %v2762_v19 = vmax.f32 %v2730_v62, 0.0 }
 0x258   : > { %v3274_v53 = vpack.c.bf16 %v2732_v34, %v2731_v42  ;;  %v3279_v4 = vpack.c.bf16 %v2734_v0, %v2733_v36  ;;  %v3284_v61 = vpack.c.bf16 %v2736_v25, %v2735_v11  ;;  %v3289_v54 = vpack.c.bf16 %v2738_v46, %v2737_v10 }
 0x259   : > { %v3294_v14 = vpack.c.bf16 %v2740_v51, %v2739_v58  ;;  %v3299_v38 = vpack.c.bf16 %v2742_v59, %v2741_v37  ;;  %v3304_v32 = vpack.c.bf16 %v2744_v41, %v2743_v44  ;;  %v3309_v13 = vpack.c.bf16 %v2746_v27, %v2745_v49 }
 0x25a   : > { %3275 = vst [vmem:[%s5293_s6] sm:$0xff] %v3274_v53   ;;  %3351 = vst [vmem:[%s5293_s6 + $0x8] sm:$0xff] %v3279_v4   ;;  %v3314_v52 = vpack.c.bf16 %v2748_v17, %v2747_v56  ;;  %v3319_v24 = vpack.c.bf16 %v2750_v3, %v2749_v63  ;;  %v3324_v22 = vpack.c.bf16 %v2752_v45, %v2751_v18 }
 0x25b   : > { %3352 = vst [vmem:[%s5293_s6 + $0x10] sm:$0xff] %v3284_v61   ;;  %3353 = vst [vmem:[%s5293_s6 + $0x18] sm:$0xff] %v3289_v54   ;;  %v3329_v20 = vpack.c.bf16 %v2754_v23, %v2753_v16  ;;  %v3334_v28 = vpack.c.bf16 %v2756_v21, %v2755_v7  ;;  %v3339_v31 = vpack.c.bf16 %v2758_v43, %v2757_v48 }
 0x25c   : > { %3354 = vst [vmem:[%s5293_s6 + $0x20] sm:$0xff] %v3294_v14   ;;  %3355 = vst [vmem:[%s5293_s6 + $0x28] sm:$0xff] %v3299_v38   ;;  %v3344_v57 = vpack.c.bf16 %v2760_v33, %v2759_v30  ;;  %v3349_v1 = vpack.c.bf16 %v2762_v19, %v2761_v12 }
 0x25d   : > { %3356 = vst [vmem:[%s5293_s6 + $0x30] sm:$0xff] %v3304_v32   ;;  %3357 = vst [vmem:[%s5293_s6 + $0x38] sm:$0xff] %v3309_v13  }
 0x25e   : > { %3358 = vst [vmem:[%s5293_s6 + $0x40] sm:$0xff] %v3314_v52   ;;  %3359 = vst [vmem:[%s5293_s6 + $0x48] sm:$0xff] %v3319_v24  }
 0x25f   : > { %3360 = vst [vmem:[%s5293_s6 + $0x50] sm:$0xff] %v3324_v22   ;;  %3361 = vst [vmem:[%s5293_s6 + $0x58] sm:$0xff] %v3329_v20  }
 0x260   : > { %3362 = vst [vmem:[%s5293_s6 + $0x60] sm:$0xff] %v3334_v28   ;;  %3363 = vst [vmem:[%s5293_s6 + $0x68] sm:$0xff] %v3339_v31  }
 0x261   : > { %3364 = vst [vmem:[%s5293_s6 + $0x70] sm:$0xff] %v3344_v57   ;;  %3365 = vst [vmem:[%s5293_s6 + $0x78] sm:$0xff] %v3349_v1  }
 0x262 PF: > { %s14_s15 = sadd.s32 1, %s4199_s15  }
 0x263   : > { %p11_p4 = scmp.ge.s32.totalorder %s14_s15, 4  }
 0x265   :  { %13 = sbr.rel (!%p11_p4) target bundleno = 1 (0x1), region = 66 }

// kernel: mapping_network_forward.13
= control target key start
LH: loop header
LB: loop body
LE: loop exit
PB: predicated region body
PF: predicated region fallthrough
CT: control target
= control target key end

     0   :  { %s3458_s12 = smov 0   ;;  %s4051_s0 = inlined_call_operand.vmem [shape: bf16[2,200,1152], index: 0, kind: input, shape index: {}]   ;;  %s4052_s1 = inlined_call_operand.vmem [shape: bf16[1152,128], index: 1, kind: input, shape index: {}]   ;;  %s4053_s2 = inlined_call_operand.vmem [shape: f32[1,128], index: 2, kind: input, shape index: {}]   ;;  %s4054_s3 = inlined_call_operand.vmem [shape: f32[2,200,128], index: 3, kind: output, shape index: {}]  }
   0x1 LB: > { %s2374_s13 = sadd.s32 4294967295, %s3434_s12   ;;  %p2378_p0 = scmp.ge.s32.totalorder %s3434_s12, 1  ;;  %s3434_s12 = sphi %s3458_s12, %s13_s12  }
   0x2   : > { %p137_p1 = scmp.lt.s32.totalorder %s3434_s12, 3 }
   0x4   : > { %p138_p2 = pnand %p2378_p0, %p137_p1 }
   0x5   : > { %p161_p3 = scmp.lt.s32.totalorder (!%p138_p2), %s2374_s13, 1 }
   0x6   : > { %141 = sbr.rel (%p138_p2) target bundleno = 529 (0x211), region = 32 }
   0xb   : > { %v3091_v0 = vld [vmem:[%s4052_s1 + $0x78] sm:$0xff]   ;;  %v3093_v2 = vld [vmem:[%s4052_s1 + $0x70] sm:$0xff]   ;;  %v3095_v4 = vld [vmem:[%s4052_s1 + $0x68] sm:$0xff]   ;;  %s4056_s13 = smov (!%p161_p3, %s2374_s13), 1  ;;  %vm3437_vm0 = vmmov 0  }
   0xc   : > { %v3092_v1 = vld [vmem:[%s4052_s1 + $0x38] sm:$0xff]   ;;  %2598 = vmatprep.subr.bf16.mxu0 %v3091_v0  ;;  %3063 = vmatprep.subr.bf16.mxu1 %v3091_v0  ;;  %v3094_v3 = vld [vmem:[%s4052_s1 + $0x30] sm:$0xff]   ;;  %v3096_v5 = vld [vmem:[%s4052_s1 + $0x28] sm:$0xff]   ;;  %s3079_s28 = smul.u32 900, %s4056_s13 }
   0xd   : > { %2599 = vmatpush3.bf16.msra.mxu0 %v3092_v1  ;;  %3071 = vmatpush3.bf16.msra.mxu1 %v3092_v1  ;;  %v3097_v6 = vld [vmem:[%s4052_s1 + $0x60] sm:$0xff]   ;;  %v3099_v8 = vld [vmem:[%s4052_s1 + $0x58] sm:$0xff]   ;;  %v3101_v10 = vld [vmem:[%s4052_s1 + $0x50] sm:$0xff]  }
   0xe   : > { %2600 = vmatprep.subr.bf16.mxu0 %v3093_v2  ;;  %3064 = vmatprep.subr.bf16.mxu1 %v3093_v2  ;;  %v3098_v7 = vld [vmem:[%s4052_s1 + $0x20] sm:$0xff]   ;;  %s3499_s8 = scalar_lea.vmem %s4051_s0, %s3079_s28  ;;  %v3100_v9 = vld [vmem:[%s4052_s1 + $0x18] sm:$0xff]   ;;  %v3102_v13 = vld [vmem:[%s4052_s1 + $0x10] sm:$0xff]  }
   0xf   : > { %v3109_v11 = vld [vmem:[%s3499_s8 + $0x4] ss:$36 sps:$4 sm:$0xff]   ;;  %v3112_v12 = vld [vmem:[%s3499_s8 + $0x1fc] ss:$36 sps:$4 sm:$0xff]   ;;  %v3117_v24 = vld [vmem:[%s3499_s8 + $0x4c] ss:$36 sps:$4 sm:$0xff]  }
  0x10   : > { %v3103_v14 = vld [vmem:[%s4052_s1 + $0x48] sm:$0xff]   ;;  %1496 = vmatprep.mubr.bf16.mxu0 %v3109_v11  ;;  %1552 = vmatprep.mubr.bf16.mxu1 %v3112_v12  ;;  %v3105_v16 = vld [vmem:[%s4052_s1 + $0x40] sm:$0xff]   ;;  %v3113_v18 = vld [vmem:[%s4052_s1 + $0x178] sm:$0xff]   ;;  %v3436_v11 = vmov 0.0  }
  0x11   : > { %2601 = vmatpush3.bf16.msra.mxu0 %v3094_v3  ;;  %3072 = vmatpush3.bf16.msra.mxu1 %v3094_v3  ;;  %v3104_v15 = vld [vmem:[%s4052_s1 + $0x8] sm:$0xff]   ;;  %v3106_v17 = vld [vmem:[%s4052_s1] sm:$0xff]   ;;  %v3110_v20 = vld [vmem:[%s3499_s8 + $0x1f8] ss:$36 sps:$4 sm:$0xff]  }
  0x12   : > { %2602 = vmatprep.subr.bf16.mxu0 %v3095_v4  ;;  %3065 = vmatprep.subr.bf16.mxu1 %v3095_v4  ;;  %v3107_v19 = vld [vmem:[%s3499_s8] ss:$36 sps:$4 sm:$0xff]   ;;  %v3115_v21 = vld [vmem:[%s4052_s1 + $0xf8] sm:$0xff]   ;;  %v3121_v26 = vld [vmem:[%s4052_s1 + $0x170] sm:$0xff]  }
  0x13   : > { %v3114_v22 = vld [vmem:[%s4052_s1 + $0x138] sm:$0xff]   ;;  %v3119_v25 = vld [vmem:[%s3499_s8 + $0x244] ss:$36 sps:$4 sm:$0xff]   ;;  %v3124_v27 = vld [vmem:[%s4052_s1 + $0xf0] sm:$0xff]  }
  0x14   : > { %v3116_v23 = vld [vmem:[%s4052_s1 + $0xb8] sm:$0xff]   ;;  %v3125_v28 = vld [vmem:[%s4052_s1 + $0x130] sm:$0xff]   ;;  %v3127_v30 = vld [vmem:[%s4052_s1 + $0xe8] sm:$0xff]  }
  0x15   : > { %2603 = vmatpush3.bf16.msra.mxu0 %v3096_v5  ;;  %3073 = vmatpush3.bf16.msra.mxu1 %v3096_v5  ;;  %v3126_v29 = vld [vmem:[%s4052_s1 + $0xb0] sm:$0xff]   ;;  %v3122_v31 = vld [vmem:[%s3499_s8 + $0x48] ss:$36 sps:$4 sm:$0xff]   ;;  %v3123_v32 = vld [vmem:[%s3499_s8 + $0x240] ss:$36 sps:$4 sm:$0xff]  }
  0x16   : > { %2604 = vmatprep.subr.bf16.mxu0 %v3097_v6  ;;  %3066 = vmatprep.subr.bf16.mxu1 %v3097_v6  ;;  %v3128_v33 = vld [vmem:[%s4052_s1 + $0x168] sm:$0xff]   ;;  %v3129_v34 = vld [vmem:[%s3499_s8 + $0x94] ss:$36 sps:$4 sm:$0xff]   ;;  %v3137_v38 = vld [vmem:[%s4052_s1 + $0xe0] sm:$0xff]  }
  0x17   : > { %v3131_v35 = vld [vmem:[%s3499_s8 + $0x28c] ss:$36 sps:$4 sm:$0xff]   ;;  %v3139_v39 = vld [vmem:[%s4052_s1 + $0x160] sm:$0xff]   ;;  %v3147_v44 = vld [vmem:[%s4052_s1 + $0xd8] sm:$0xff]  }
  0x18   : > { %v3133_v36 = vld [vmem:[%s4052_s1 + $0xa8] sm:$0xff]   ;;  %v3138_v40 = vld [vmem:[%s4052_s1 + $0xa0] sm:$0xff]   ;;  %v3135_v42 = vld [vmem:[%s3499_s8 + $0x90] ss:$36 sps:$4 sm:$0xff]  }
  0x19   : > { %2605 = vmatpush3.bf16.msra.mxu0 %v3098_v7  ;;  %3074 = vmatpush3.bf16.msra.mxu1 %v3098_v7  ;;  %v3134_v37 = vld [vmem:[%s4052_s1 + $0x128] sm:$0xff]   ;;  %v3140_v41 = vld [vmem:[%s4052_s1 + $0x120] sm:$0xff]   ;;  %v3149_v45 = vld [vmem:[%s4052_s1 + $0x158] sm:$0xff]  }
  0x1a   : > { %2606 = vmatprep.subr.bf16.mxu0 %v3099_v8  ;;  %3067 = vmatprep.subr.bf16.mxu1 %v3099_v8  ;;  %v3136_v43 = vld [vmem:[%s3499_s8 + $0x288] ss:$36 sps:$4 sm:$0xff]   ;;  %v3141_v46 = vld [vmem:[%s3499_s8 + $0xdc] ss:$36 sps:$4 sm:$0xff]   ;;  %v3143_v47 = vld [vmem:[%s3499_s8 + $0x2d4] ss:$36 sps:$4 sm:$0xff]  }
  0x1b   : > { %v3148_v48 = vld [vmem:[%s4052_s1 + $0x98] sm:$0xff]   ;;  %v3157_v50 = vld [vmem:[%s4052_s1 + $0xd0] sm:$0xff]   ;;  %v3161_v56 = vld [vmem:[%s4052_s1 + $0xc8] sm:$0xff]  }
  0x1c   : > { %v3150_v49 = vld [vmem:[%s4052_s1 + $0x118] sm:$0xff]   ;;  %v3158_v51 = vld [vmem:[%s4052_s1 + $0x90] sm:$0xff]   ;;  %v3151_v57 = vld [vmem:[%s3499_s8 + $0x124] ss:$36 sps:$4 sm:$0xff]  }
  0x1d   : > { %2607 = vmatpush3.bf16.msra.mxu0 %v3100_v9  ;;  %3075 = vmatpush3.bf16.msra.mxu1 %v3100_v9  ;;  %v3145_v52 = vld [vmem:[%s3499_s8 + $0xd8] ss:$36 sps:$4 sm:$0xff]   ;;  %v3146_v53 = vld [vmem:[%s3499_s8 + $0x2d0] ss:$36 sps:$4 sm:$0xff]   ;;  %v3165_v59 = vld [vmem:[%s4052_s1 + $0x88] sm:$0xff]  }
  0x1e   : > { %2608 = vmatprep.subr.bf16.mxu0 %v3101_v10  ;;  %3068 = vmatprep.subr.bf16.mxu1 %v3101_v10  ;;  %v3159_v54 = vld [vmem:[%s4052_s1 + $0x150] sm:$0xff]   ;;  %v3153_v58 = vld [vmem:[%s3499_s8 + $0x31c] ss:$36 sps:$4 sm:$0xff]   ;;  %v3168_v60 = vld [vmem:[%s4052_s1 + $0x148] sm:$0xff]  }
  0x1f   : > { %v3160_v55 = vld [vmem:[%s4052_s1 + $0x110] sm:$0xff]   ;;  %v292_v61 = vld [vmem:[%s3499_s8 + $0x360] sm:$0xff]  ;;  %v3169_v62 = vld [vmem:[%s4052_s1 + $0x108] sm:$0xff]  }
  0x20   : > { %v3170_v63 = vld [vmem:[%s4052_s1 + $0xc0] sm:$0xff]   ;;  %v3156_v2 = vld [vmem:[%s3499_s8 + $0x318] ss:$36 sps:$4 sm:$0xff]   ;;  %v3162_v3 = vld [vmem:[%s3499_s8 + $0x16c] ss:$36 sps:$4 sm:$0xff]   ;;  %v2491_v4 = vcombine.high %v292_v61, %v292_v61  ;;  %v2490_v9 = vcombine.low %v292_v61, %v292_v61 }
  0x21   : > { %2609 = vmatpush3.bf16.msra.mxu0 %v3102_v13  ;;  %3076 = vmatpush3.bf16.msra.mxu1 %v3102_v13  ;;  %v3171_v0 = vld [vmem:[%s4052_s1 + $0x80] sm:$0xff]   ;;  %v3180_v7 = vld [vmem:[%s4052_s1 + $0x1f8] sm:$0xff]   ;;  %v3166_v8 = vld [vmem:[%s3499_s8 + $0x168] ss:$36 sps:$4 sm:$0xff]  }
  0x22   : > { %2610 = vmatprep.subr.bf16.mxu0 %v3103_v14  ;;  %3069 = vmatprep.subr.bf16.mxu1 %v3103_v14  ;;  %v3155_v1 = vld [vmem:[%s3499_s8 + $0x120] ss:$36 sps:$4 sm:$0xff]   ;;  %v3172_v10 = vld [vmem:[%s3499_s8 + $0x1b4] ss:$36 sps:$4 sm:$0xff]   ;;  %v3176_v12 = vld [vmem:[%s3499_s8 + $0xc] ss:$36 sps:$4 sm:$0xff]  }
  0x23   : > { %v3178_v5 = vld [vmem:[%s4052_s1 + $0x140] sm:$0xff]   ;;  %v3174_v13 = vld [vmem:[%s3499_s8 + $0x8] ss:$36 sps:$4 sm:$0xff]   ;;  %v3177_v14 = vld [vmem:[%s3499_s8 + $0x1b0] ss:$36 sps:$4 sm:$0xff]  }
  0x24   : > { %v3179_v6 = vld [vmem:[%s4052_s1 + $0x100] sm:$0xff]   ;;  %v3226_v61 = vld [vmem:[%s3499_s8 + $0x178] ss:$36 sps:$4 sm:$0xff]  }
  0x25   : > { %2611 = vmatpush3.bf16.msra.mxu0 %v3104_v15  ;;  %3077 = vmatpush3.bf16.msra.mxu1 %v3104_v15  ;;  %v3181_v15 = vld [vmem:[%s4052_s1 + $0x1b8] sm:$0xff]  }
  0x26   : > { %2612 = vmatprep.subr.bf16.mxu0 %v3105_v16  ;;  %3070 = vmatprep.subr.bf16.mxu1 %v3105_v16  ;;  %v3182_v16 = vld [vmem:[%s3499_s8 + $0x54] ss:$36 sps:$4 sm:$0xff]  }
  0x29   : > { %2613 = vmatpush3.bf16.msra.mxu0 %v3106_v17  ;;  %3078 = vmatpush3.bf16.msra.mxu1 %v3106_v17  ;;  %v3186_v17 = vld [vmem:[%s3499_s8 + $0x14] ss:$36 sps:$4 sm:$0xff]  }
  0x2a   : > { %2786 = vmatprep.subr.bf16.mxu0 %v3113_v18  ;;  %2692 = vmatprep.subr.bf16.mxu1 %v3115_v21  ;;  %v3193_v18 = vld [vmem:[%s4052_s1 + $0x1f0] sm:$0xff]  }
  0x2b   : > { %v3184_v21 = vld [vmem:[%s3499_s8 + $0x10] ss:$36 sps:$4 sm:$0xff]  }
  0x2c   : > { %1497 = vmatmul.mubr.bf16.vlgmr.msra.gmra.mxu0 %v3107_v19  ;;  %1553 = vmatmul.mubr.bf16.vlgmr.msra.gmra.mxu1 %v3110_v20  ;;  %v3196_v19 = vld [vmem:[%s4052_s1 + $0x1b0] sm:$0xff]   ;;  %v3204_v20 = vld [vmem:[%s4052_s1 + $0x1e8] sm:$0xff]  }
  0x2d   : > { %2787 = vmatpush3.bf16.msra.mxu0 %v3114_v22  ;;  %2693 = vmatpush3.bf16.msra.mxu1 %v3116_v23  ;;  %v3187_v22 = vld [vmem:[%s3499_s8 + $0x50] ss:$36 sps:$4 sm:$0xff]   ;;  %v3188_v23 = vld [vmem:[%s4052_s1 + $0x238] sm:$0xff]  }
  0x2e   : > { %1504 = vmatprep.mubr.bf16.mxu0 %v3117_v24  ;;  %1560 = vmatprep.mubr.bf16.mxu1 %v3119_v25  ;;  %v3189_v24 = vld [vmem:[%s3499_s8 + $0x9c] ss:$36 sps:$4 sm:$0xff]  }
  0x2f   : > { %2788 = vmatprep.subr.bf16.mxu0 %v3121_v26  ;;  %2694 = vmatprep.subr.bf16.mxu1 %v3124_v27  ;;  %v3191_v25 = vld [vmem:[%s3499_s8 + $0x5c] ss:$36 sps:$4 sm:$0xff]   ;;  %v3205_v26 = vld [vmem:[%s4052_s1 + $0x1a8] sm:$0xff]  }
  0x30   : > { %v3219_v27 = vld [vmem:[%s4052_s1 + $0x1e0] sm:$0xff]  }
  0x31   : > { %2789 = vmatpush3.bf16.msra.mxu0 %v3125_v28  ;;  %2695 = vmatpush3.bf16.msra.mxu1 %v3126_v29  ;;  %v3197_v28 = vld [vmem:[%s4052_s1 + $0x230] sm:$0xff]   ;;  %v3194_v29 = vld [vmem:[%s3499_s8 + $0x98] ss:$36 sps:$4 sm:$0xff]  }
  0x32   : > { %2696 = vmatprep.subr.bf16.mxu1 %v3127_v30  ;;  %2790 = vmatprep.subr.bf16.mxu0 %v3128_v33  ;;  %v3195_v30 = vld [vmem:[%s3499_s8 + $0x58] ss:$36 sps:$4 sm:$0xff]   ;;  %v3200_v33 = vld [vmem:[%s3499_s8 + $0xa4] ss:$36 sps:$4 sm:$0xff]  }
  0x34   : > { %1505 = vmatmul.mubr.bf16.gmra.mxu0 %v3122_v31  ;;  %1561 = vmatmul.mubr.bf16.gmra.mxu1 %v3123_v32  ;;  %v3198_v31 = vld [vmem:[%s3499_s8 + $0xe4] ss:$36 sps:$4 sm:$0xff]  }
  0x35   : > { %1512 = vmatprep.mubr.bf16.mxu0 %v3129_v34  ;;  %1568 = vmatprep.mubr.bf16.mxu1 %v3131_v35  ;;  %v3220_v32 = vld [vmem:[%s4052_s1 + $0x1a0] sm:$0xff]   ;;  %v3212_v34 = vld [vmem:[%s4052_s1 + $0x228] sm:$0xff]   ;;  %v3228_v35 = vld [vmem:[%s4052_s1 + $0x1d8] sm:$0xff]  }
  0x36   : > { %2697 = vmatpush3.bf16.msra.mxu1 %v3133_v36  ;;  %2791 = vmatpush3.bf16.msra.mxu0 %v3134_v37  ;;  %v3233_v36 = vld [vmem:[%s4052_s1 + $0x198] sm:$0xff]   ;;  %v3202_v37 = vld [vmem:[%s3499_s8 + $0xe0] ss:$36 sps:$4 sm:$0xff]  }
  0x37   : > { %2698 = vmatprep.subr.bf16.mxu1 %v3137_v38  ;;  %2792 = vmatprep.subr.bf16.mxu0 %v3139_v39  ;;  %v3227_v38 = vld [vmem:[%s4052_s1 + $0x220] sm:$0xff]  }
  0x38   : > { %v3203_v39 = vld [vmem:[%s3499_s8 + $0xa0] ss:$36 sps:$4 sm:$0xff]  }
  0x3a   : > { %2699 = vmatpush3.bf16.msra.mxu1 %v3138_v40  ;;  %2793 = vmatpush3.bf16.msra.mxu0 %v3140_v41  ;;  %v3206_v40 = vld [vmem:[%s3499_s8 + $0x12c] ss:$36 sps:$4 sm:$0xff]  }
  0x3b   : > { %2700 = vmatprep.subr.bf16.mxu1 %v3147_v44  ;;  %2794 = vmatprep.subr.bf16.mxu0 %v3149_v45  ;;  %v3208_v41 = vld [vmem:[%s3499_s8 + $0xec] ss:$36 sps:$4 sm:$0xff]   ;;  %v3236_v44 = vld [vmem:[%s4052_s1 + $0x218] sm:$0xff]  }
  0x3c   : > { %1513 = vmatmul.mubr.bf16.gmra.mxu0 %v3135_v42  ;;  %1569 = vmatmul.mubr.bf16.gmra.mxu1 %v3136_v43  ;;  %v3243_v42 = vld [vmem:[%s4052_s1 + $0x1d0] sm:$0xff]   ;;  %v3210_v45 = vld [vmem:[%s3499_s8 + $0x128] ss:$36 sps:$4 sm:$0xff]  }
  0x3d   : > { %1520 = vmatprep.mubr.bf16.mxu0 %v3141_v46  ;;  %1576 = vmatprep.mubr.bf16.mxu1 %v3143_v47  ;;  %v3244_v43 = vld [vmem:[%s4052_s1 + $0x190] sm:$0xff]   ;;  %v3211_v47 = vld [vmem:[%s3499_s8 + $0xe8] ss:$36 sps:$4 sm:$0xff]  }
  0x3e   : > { %2701 = vmatpush3.bf16.msra.mxu1 %v3148_v48  ;;  %2795 = vmatpush3.bf16.msra.mxu0 %v3150_v49  ;;  %v3251_v46 = vld [vmem:[%s4052_s1 + $0x210] sm:$0xff]  }
  0x3f   : > { %2702 = vmatprep.subr.bf16.mxu1 %v3157_v50  ;;  %2796 = vmatprep.subr.bf16.mxu0 %v3159_v54  ;;  %v3213_v48 = vld [vmem:[%s3499_s8 + $0x174] ss:$36 sps:$4 sm:$0xff]   ;;  %v3258_v50 = vld [vmem:[%s4052_s1 + $0x1c8] sm:$0xff]   ;;  %v3267_v54 = vld [vmem:[%s4052_s1 + $0x1c0] sm:$0xff]  }
  0x40   : > { %v3215_v49 = vld [vmem:[%s3499_s8 + $0x134] ss:$36 sps:$4 sm:$0xff]  }
  0x42   : > { %2703 = vmatpush3.bf16.msra.mxu1 %v3158_v51  ;;  %2797 = vmatpush3.bf16.msra.mxu0 %v3160_v55  ;;  %v3259_v51 = vld [vmem:[%s4052_s1 + $0x188] sm:$0xff]   ;;  %v3268_v55 = vld [vmem:[%s4052_s1 + $0x180] sm:$0xff]  }
  0x43   : > { %2704 = vmatprep.subr.bf16.mxu1 %v3161_v56  ;;  %2798 = vmatprep.subr.bf16.mxu0 %v3168_v60  ;;  %v3218_v56 = vld [vmem:[%s3499_s8 + $0x130] ss:$36 sps:$4 sm:$0xff]   ;;  %v3225_v60 = vld [vmem:[%s3499_s8 + $0x1b8] ss:$36 sps:$4 sm:$0xff]  }
  0x44   : > { %1521 = vmatmul.mubr.bf16.gmra.mxu0 %v3145_v52  ;;  %1577 = vmatmul.mubr.bf16.gmra.mxu1 %v3146_v53  ;;  %v3264_v52 = vld [vmem:[%s4052_s1 + $0x208] sm:$0xff]   ;;  %v3217_v53 = vld [vmem:[%s3499_s8 + $0x170] ss:$36 sps:$4 sm:$0xff]  }
  0x45   : > { %1528 = vmatprep.mubr.bf16.mxu0 %v3151_v57  ;;  %1584 = vmatprep.mubr.bf16.mxu1 %v3153_v58  ;;  %v3221_v57 = vld [vmem:[%s3499_s8 + $0x1bc] ss:$36 sps:$4 sm:$0xff]  }
  0x46   : > { %2705 = vmatpush3.bf16.msra.mxu1 %v3165_v59  ;;  %2799 = vmatpush3.bf16.msra.mxu0 %v3169_v62  ;;  %v3223_v58 = vld [vmem:[%s3499_s8 + $0x17c] ss:$36 sps:$4 sm:$0xff]   ;;  %v3229_v62 = vld [vmem:[%s3499_s8 + $0x204] ss:$36 sps:$4 sm:$0xff]  }
  0x47   : > { %2706 = vmatprep.subr.bf16.mxu1 %v3170_v63  ;;  %2800 = vmatprep.subr.bf16.mxu0 %v3178_v5  ;;  %v3274_v59 = vld [vmem:[%s4052_s1 + $0x200] sm:$0xff]   ;;  %v3242_v5 = vld [vmem:[%s3499_s8 + $0x208] ss:$36 sps:$4 sm:$0xff]  }
  0x48   : > { %v3231_v63 = vld [vmem:[%s3499_s8 + $0x1c4] ss:$36 sps:$4 sm:$0xff]  }
  0x4a   : > { %2707 = vmatpush3.bf16.msra.mxu1 %v3171_v0  ;;  %2801 = vmatpush3.bf16.msra.mxu0 %v3179_v6  ;;  %v3234_v0 = vld [vmem:[%s3499_s8 + $0x200] ss:$36 sps:$4 sm:$0xff]   ;;  %v3245_v6 = vld [vmem:[%s3499_s8 + $0x294] ss:$36 sps:$4 sm:$0xff]  }
  0x4b   : > { %2880 = vmatprep.subr.bf16.mxu1 %v3180_v7  ;;  %2995 = vmatprep.subr.bf16.mxu0 %v3436_v11  ;;  %v3247_v7 = vld [vmem:[%s3499_s8 + $0x254] ss:$36 sps:$4 sm:$0xff]  }
  0x4c   : > { %1529 = vmatmul.mubr.bf16.gmra.mxu0 %v3155_v1  ;;  %1585 = vmatmul.mubr.bf16.gmra.mxu1 %v3156_v2  ;;  %v3235_v1 = vld [vmem:[%s3499_s8 + $0x1c0] ss:$36 sps:$4 sm:$0xff]   ;;  %v3237_v2 = vld [vmem:[%s3499_s8 + $0x24c] ss:$36 sps:$4 sm:$0xff]  }
  0x4d   : > { %1536 = vmatprep.mubr.bf16.mxu0 %v3162_v3  ;;  %1592 = vmatprep.mubr.bf16.mxu1 %v2491_v4  ;;  %v3239_v3 = vld [vmem:[%s3499_s8 + $0x20c] ss:$36 sps:$4 sm:$0xff]  }
  0x4e   : > { %v3241_v4 = vld [vmem:[%s3499_s8 + $0x248] ss:$36 sps:$4 sm:$0xff]  }
  0x54   : > { %1537 = vmatmul.mubr.bf16.gmra.mxu0 %v3166_v8  ;;  %1593 = vmatmul.mubr.bf16.gmra.mxu1 %v2490_v9  ;;  %v3249_v8 = vld [vmem:[%s3499_s8 + $0x290] ss:$36 sps:$4 sm:$0xff]  }
  0x55   : > { %1544 = vmatprep.mubr.bf16.mxu0 %v3172_v10  ;;  %1632 = vmatprep.mubr.bf16.mxu1 %v3176_v12  ;;  %v3250_v9 = vld [vmem:[%s3499_s8 + $0x250] ss:$36 sps:$4 sm:$0xff]   ;;  %v3252_v10 = vld [vmem:[%s3499_s8 + $0x2dc] ss:$36 sps:$4 sm:$0xff]  }
  0x56   : > { %v3254_v12 = vld [vmem:[%s3499_s8 + $0x29c] ss:$36 sps:$4 sm:$0xff]  }
  0x5c   : > { %1545 = vmatmul.mubr.bf16.gmra.mxu0 %v3177_v14  ;;  %1633 = vmatmul.mubr.bf16.vlgmr.msra.gmra.mxu1 %v3174_v13  ;;  %v3256_v13 = vld [vmem:[%s3499_s8 + $0x2d8] ss:$36 sps:$4 sm:$0xff]  }
  0x5d   : > { %2881 = vmatpush3.bf16.msra.mxu1 %v3181_v15  ;;  %1640 = vmatprep.mubr.bf16.mxu1 %v3182_v16  ;;  %v3257_v14 = vld [vmem:[%s3499_s8 + $0x298] ss:$36 sps:$4 sm:$0xff]   ;;  %v3260_v15 = vld [vmem:[%s3499_s8 + $0x324] ss:$36 sps:$4 sm:$0xff]  }
  0x5e   : > { %1768 = vmatprep.mubr.bf16.mxu0 %v3186_v17  ;;  %2882 = vmatprep.subr.bf16.mxu1 %v3193_v18  ;;  %v3262_v16 = vld [vmem:[%s3499_s8 + $0x2e4] ss:$36 sps:$4 sm:$0xff]  }
  0x5f   : > { %v293_v17 = vld [vmem:[%s3499_s8 + $0x368] sm:$0xff]  ;;  %v3265_v18 = vld [vmem:[%s3499_s8 + $0x320] ss:$36 sps:$4 sm:$0xff]  }
  0x61   : > { %2883 = vmatpush3.bf16.msra.mxu1 %v3196_v19  ;;  %v3266_v19 = vld [vmem:[%s3499_s8 + $0x2e0] ss:$36 sps:$4 sm:$0xff]  }
  0x62   : > { %2884 = vmatprep.subr.bf16.mxu1 %v3204_v20  ;;  %v2493_v20 = vcombine.high %v293_v17, %v293_v17 }
  0x64   : > { %1641 = vmatmul.mubr.bf16.gmra.mxu1 %v3187_v22  ;;  %1769 = vmatmul.mubr.bf16.vlgmr.msra.gmra.mxu0 %v3184_v21  ;;  %v3270_v21 = vld [vmem:[%s3499_s8 + $0x32c] ss:$36 sps:$4 sm:$0xff]  }
  0x65   : > { %2996 = vmatpush3.bf16.msra.mxu0 %v3188_v23  ;;  %1648 = vmatprep.mubr.bf16.mxu1 %v3189_v24  ;;  %v294_v22 = vld [vmem:[%s3499_s8 + $0x370] sm:$0xff]  ;;  %v2492_v23 = vcombine.low %v293_v17, %v293_v17  ;;  %v3273_v24 = vld [vmem:[%s3499_s8 + $0x328] ss:$36 sps:$4 sm:$0xff]  }
  0x66   : > { %1776 = vmatprep.mubr.bf16.mxu0 %v3191_v25  ;;  %2997 = vmatprep.subr.bf16.mxu0 %v3436_v11  ;;  %v2495_v25 = vcombine.high %v294_v22, %v294_v22 }
  0x67   : > { %2885 = vmatpush3.bf16.msra.mxu1 %v3205_v26  ;;  %v3278_v26 = vld [vmem:[%s3499_s8 + $0x1c] ss:$36 sps:$4 sm:$0xff]  }
  0x68   : > { %2886 = vmatprep.subr.bf16.mxu1 %v3219_v27  ;;  %v3276_v27 = vld [vmem:[%s3499_s8 + $0x18] ss:$36 sps:$4 sm:$0xff]  }
  0x69   : > { %2998 = vmatpush3.bf16.msra.mxu0 %v3197_v28  ;;  %v2494_v28 = vcombine.low %v294_v22, %v294_v22 }
  0x6a   : > { %2999 = vmatprep.subr.bf16.mxu0 %v3436_v11 }
  0x6b   : > { %2887 = vmatpush3.bf16.msra.mxu1 %v3220_v32  ;;  %v3284_v32 = vld [vmem:[%s3499_s8 + $0xac] ss:$36 sps:$4 sm:$0xff]  }
  0x6c   : > { %1649 = vmatmul.mubr.bf16.gmra.mxu1 %v3194_v29  ;;  %1777 = vmatmul.mubr.bf16.gmra.mxu0 %v3195_v30  ;;  %v3280_v29 = vld [vmem:[%s3499_s8 + $0x64] ss:$36 sps:$4 sm:$0xff]  }
  0x6d   : > { %1656 = vmatprep.mubr.bf16.mxu1 %v3198_v31  ;;  %1784 = vmatprep.mubr.bf16.mxu0 %v3200_v33  ;;  %v3282_v30 = vld [vmem:[%s3499_s8 + $0x60] ss:$36 sps:$4 sm:$0xff]   ;;  %v3286_v33 = vld [vmem:[%s3499_s8 + $0xa8] ss:$36 sps:$4 sm:$0xff]  }
  0x6e   : > { %3000 = vmatpush3.bf16.msra.mxu0 %v3212_v34  ;;  %2888 = vmatprep.subr.bf16.mxu1 %v3228_v35  ;;  %v3283_v31 = vld [vmem:[%s3499_s8 + $0x20] ss:$36 sps:$4 sm:$0xff]   ;;  %v3287_v34 = vld [vmem:[%s3499_s8 + $0x68] ss:$36 sps:$4 sm:$0xff]   ;;  %v3288_v35 = vld [vmem:[%s3499_s8 + $0xf4] ss:$36 sps:$4 sm:$0xff]  }
  0x6f   : > { %3001 = vmatprep.subr.bf16.mxu0 %v3436_v11  ;;  %2889 = vmatpush3.bf16.msra.mxu1 %v3233_v36  ;;  %v3290_v36 = vld [vmem:[%s3499_s8 + $0xf0] ss:$36 sps:$4 sm:$0xff]  }
  0x70   : > { %2890 = vmatprep.subr.bf16.mxu1 %v3243_v42  ;;  %v3298_v42 = vld [vmem:[%s3499_s8 + $0x180] ss:$36 sps:$4 sm:$0xff]  }
  0x72   : > { %3002 = vmatpush3.bf16.msra.mxu0 %v3227_v38  ;;  %v3292_v38 = vld [vmem:[%s3499_s8 + $0x13c] ss:$36 sps:$4 sm:$0xff]  }
  0x73   : > { %3003 = vmatprep.subr.bf16.mxu0 %v3436_v11  ;;  %2891 = vmatpush3.bf16.msra.mxu1 %v3244_v43  ;;  %v3299_v43 = vld [vmem:[%s3499_s8 + $0x140] ss:$36 sps:$4 sm:$0xff]  }
  0x74   : > { %1657 = vmatmul.mubr.bf16.gmra.mxu1 %v3202_v37  ;;  %1785 = vmatmul.mubr.bf16.gmra.mxu0 %v3203_v39  ;;  %v3291_v37 = vld [vmem:[%s3499_s8 + $0xb0] ss:$36 sps:$4 sm:$0xff]   ;;  %v3294_v39 = vld [vmem:[%s3499_s8 + $0x138] ss:$36 sps:$4 sm:$0xff]  }
  0x75   : > { %1664 = vmatprep.mubr.bf16.mxu1 %v3206_v40  ;;  %1792 = vmatprep.mubr.bf16.mxu0 %v3208_v41  ;;  %v3295_v40 = vld [vmem:[%s3499_s8 + $0xf8] ss:$36 sps:$4 sm:$0xff]   ;;  %v3296_v41 = vld [vmem:[%s3499_s8 + $0x184] ss:$36 sps:$4 sm:$0xff]  }
  0x76   : > { %3004 = vmatpush3.bf16.msra.mxu0 %v3236_v44  ;;  %2892 = vmatprep.subr.bf16.mxu1 %v3258_v50  ;;  %v3300_v44 = vld [vmem:[%s3499_s8 + $0x1cc] ss:$36 sps:$4 sm:$0xff]  }
  0x77   : > { %3005 = vmatprep.subr.bf16.mxu0 %v3436_v11  ;;  %2893 = vmatpush3.bf16.msra.mxu1 %v3259_v51 }
  0x78   : > { %2894 = vmatprep.subr.bf16.mxu1 %v3267_v54  ;;  %v3303_v54 = vld [vmem:[%s3499_s8 + $0x188] ss:$36 sps:$4 sm:$0xff]  }
  0x7a   : > { %3006 = vmatpush3.bf16.msra.mxu0 %v3251_v46 }
  0x7b   : > { %3007 = vmatprep.subr.bf16.mxu0 %v3436_v11  ;;  %2895 = vmatpush3.bf16.msra.mxu1 %v3268_v55  ;;  %v3304_v55 = vld [vmem:[%s3499_s8 + $0x214] ss:$36 sps:$4 sm:$0xff]  }
  0x7c   : > { %1665 = vmatmul.mubr.bf16.gmra.mxu1 %v3210_v45  ;;  %1793 = vmatmul.mubr.bf16.gmra.mxu0 %v3211_v47 }
  0x7d   : > { %1672 = vmatprep.mubr.bf16.mxu1 %v3213_v48  ;;  %1800 = vmatprep.mubr.bf16.mxu0 %v3215_v49 }
  0x7e   : > { %3008 = vmatpush3.bf16.msra.mxu0 %v3264_v52 }
  0x7f   : > { %3009 = vmatprep.subr.bf16.mxu0 %v3436_v11 }
  0x82   : > { %3010 = vmatpush3.bf16.msra.mxu0 %v3274_v59 }
  0x84   : > { %1673 = vmatmul.mubr.bf16.gmra.mxu1 %v3217_v53  ;;  %1801 = vmatmul.mubr.bf16.gmra.mxu0 %v3218_v56  ;;  %v3302_v53 = vld [vmem:[%s3499_s8 + $0x1c8] ss:$36 sps:$4 sm:$0xff]  }
  0x85   : > { %1680 = vmatprep.mubr.bf16.mxu1 %v3221_v57  ;;  %1808 = vmatprep.mubr.bf16.mxu0 %v3223_v58 }
  0x8c   : > { %1681 = vmatmul.mubr.bf16.gmra.mxu1 %v3225_v60  ;;  %1809 = vmatmul.mubr.bf16.gmra.mxu0 %v3226_v61 }
  0x8d   : > { %1688 = vmatprep.mubr.bf16.mxu1 %v3229_v62  ;;  %1816 = vmatprep.mubr.bf16.mxu0 %v3231_v63 }
  0x94   : > { %1689 = vmatmul.mubr.bf16.gmra.mxu1 %v3234_v0  ;;  %1817 = vmatmul.mubr.bf16.gmra.mxu0 %v3235_v1 }
  0x95   : > { %1696 = vmatprep.mubr.bf16.mxu1 %v3237_v2  ;;  %1824 = vmatprep.mubr.bf16.mxu0 %v3239_v3  ;;  %v3821_v2 = vld [vmem:[%s4053_s2] ss:$0 sm:$0xff] }
  0x9c   : > { %1697 = vmatmul.mubr.bf16.gmra.mxu1 %v3241_v4  ;;  %1825 = vmatmul.mubr.bf16.gmra.mxu0 %v3242_v5  ;;  %v3306_v5 = vld [vmem:[%s3499_s8 + $0x210] ss:$36 sps:$4 sm:$0xff]  }
  0x9d   : > { %1704 = vmatprep.mubr.bf16.mxu1 %v3245_v6  ;;  %1832 = vmatprep.mubr.bf16.mxu0 %v3247_v7  ;;  %v3307_v6 = vld [vmem:[%s3499_s8 + $0x1d0] ss:$36 sps:$4 sm:$0xff]  }
  0xa4   : > { %1705 = vmatmul.mubr.bf16.gmra.mxu1 %v3249_v8  ;;  %1833 = vmatmul.mubr.bf16.gmra.mxu0 %v3250_v9  ;;  %v3308_v8 = vld [vmem:[%s3499_s8 + $0x25c] ss:$36 sps:$4 sm:$0xff]  }
  0xa5   : > { %1712 = vmatprep.mubr.bf16.mxu1 %v3252_v10  ;;  %1840 = vmatprep.mubr.bf16.mxu0 %v3254_v12 }
  0xac   : > { %1713 = vmatmul.mubr.bf16.gmra.mxu1 %v3256_v13  ;;  %1841 = vmatmul.mubr.bf16.gmra.mxu0 %v3257_v14 }
  0xad   : > { %1720 = vmatprep.mubr.bf16.mxu1 %v3260_v15  ;;  %1848 = vmatprep.mubr.bf16.mxu0 %v3262_v16 }
  0xb4   : > { %1721 = vmatmul.mubr.bf16.gmra.mxu1 %v3265_v18  ;;  %1849 = vmatmul.mubr.bf16.gmra.mxu0 %v3266_v19 }
  0xb5   : > { %1728 = vmatprep.mubr.bf16.mxu1 %v2493_v20  ;;  %1856 = vmatprep.mubr.bf16.mxu0 %v3270_v21 }
  0xbc   : > { %1729 = vmatmul.mubr.bf16.gmra.mxu1 %v2492_v23  ;;  %1857 = vmatmul.mubr.bf16.gmra.mxu0 %v3273_v24  ;;  %v3310_v23 = vld [vmem:[%s3499_s8 + $0x258] ss:$36 sps:$4 sm:$0xff]  }
  0xbd   : > { %1864 = vmatprep.mubr.bf16.mxu0 %v2495_v25  ;;  %1904 = vmatprep.mubr.bf16.mxu1 %v3278_v26  ;;  %v3311_v24 = vld [vmem:[%s3499_s8 + $0x218] ss:$36 sps:$4 sm:$0xff]   ;;  %v3314_v26 = vld [vmem:[%s3499_s8 + $0x2a4] ss:$36 sps:$4 sm:$0xff]  }
  0xc4   : > { %1865 = vmatmul.mubr.bf16.gmra.mxu0 %v2494_v28  ;;  %1905 = vmatmul.mubr.bf16.vlgmr.msra.gmra.mxu1 %v3276_v27 }
  0xc5   : > { %1912 = vmatprep.mubr.bf16.mxu1 %v3280_v29  ;;  %3011 = vmatprep.mubr.msk.bf16.mxu0 %vm3437_vm0, %v3436_v11 }
  0xcc   : > { %1913 = vmatmul.mubr.bf16.gmra.mxu1 %v3282_v30  ;;  %3012 = vmatmul.mubr.bf16.vlgmr.msra.gmra.mxu0 %v3283_v31 }
  0xcd   : > { %1920 = vmatprep.mubr.bf16.mxu1 %v3284_v32  ;;  %3015 = vmatprep.mubr.msk.bf16.mxu0 %vm3437_vm0, %v3436_v11 }
  0xd4   : > { %1921 = vmatmul.mubr.bf16.gmra.mxu1 %v3286_v33  ;;  %3016 = vmatmul.mubr.bf16.gmra.mxu0 %v3287_v34 }
  0xd5   : > { %1928 = vmatprep.mubr.bf16.mxu1 %v3288_v35  ;;  %3019 = vmatprep.mubr.msk.bf16.mxu0 %vm3437_vm0, %v3436_v11 }
  0xdc   : > { %1929 = vmatmul.mubr.bf16.gmra.mxu1 %v3290_v36  ;;  %3020 = vmatmul.mubr.bf16.gmra.mxu0 %v3291_v37 }
  0xdd   : > { %1936 = vmatprep.mubr.bf16.mxu1 %v3292_v38  ;;  %3023 = vmatprep.mubr.msk.bf16.mxu0 %vm3437_vm0, %v3436_v11 }
  0xe4   : > { %1937 = vmatmul.mubr.bf16.gmra.mxu1 %v3294_v39  ;;  %3024 = vmatmul.mubr.bf16.gmra.mxu0 %v3295_v40  ;;  %v3312_v40 = vld [vmem:[%s3499_s8 + $0x2a0] ss:$36 sps:$4 sm:$0xff]  }
  0xe5   : > { %1944 = vmatprep.mubr.bf16.mxu1 %v3296_v41  ;;  %3027 = vmatprep.mubr.msk.bf16.mxu0 %vm3437_vm0, %v3436_v11  ;;  %v3315_v41 = vld [vmem:[%s3499_s8 + $0x260] ss:$36 sps:$4 sm:$0xff]  }
  0xec   : > { %v2614_v45 = vpop.f32.mrf.mxu0  ;;  %v2656_v46 = vpop.f32.mrf.mxu1  ;;  %1945 = vmatmul.mubr.bf16.gmra.mxu1 %v3298_v42  ;;  %3028 = vmatmul.mubr.bf16.gmra.mxu0 %v3299_v43  ;;  %v3318_v43 = vld [vmem:[%s3499_s8 + $0x2ec] ss:$36 sps:$4 sm:$0xff]  }
  0xed   : > { %1952 = vmatprep.mubr.bf16.mxu1 %v3300_v44  ;;  %3031 = vmatprep.mubr.msk.bf16.mxu0 %vm3437_vm0, %v3436_v11 }
  0xee   : > { %v2615_v47 = vpop.f32.mrf.mxu0  ;;  %v2657_v48 = vpop.f32.mrf.mxu1 }
  0xef   : > { %v3803_v49 = vadd.f32 %v2615_v47, %v2614_v45  ;;  %v3805_v50 = vadd.f32 %v2657_v48, %v2656_v46 }
  0xf0   : > { %v2617_v51 = vpop.f32.mrf.mxu0  ;;  %v2659_v52 = vpop.f32.mrf.mxu1 }
  0xf2   : > { %v2618_v56 = vpop.f32.mrf.mxu0  ;;  %v2660_v57 = vpop.f32.mrf.mxu1 }
  0xf3   : > { %v3810_v58 = vadd.f32 %v2618_v56, %v2617_v51  ;;  %v3812_v59 = vadd.f32 %v2660_v57, %v2659_v52 }
  0xf4   : > { %v2620_v60 = vpop.f32.mrf.mxu0  ;;  %v2662_v61 = vpop.f32.mrf.mxu1  ;;  %1953 = vmatmul.mubr.bf16.gmra.mxu1 %v3302_v53  ;;  %3032 = vmatmul.mubr.bf16.gmra.mxu0 %v3303_v54 }
  0xf5   : > { %1960 = vmatprep.mubr.bf16.mxu1 %v3304_v55  ;;  %3035 = vmatprep.mubr.msk.bf16.mxu0 %vm3437_vm0, %v3436_v11 }
  0xf6   : > { %v2621_v62 = vpop.f32.mrf.mxu0  ;;  %v2663_v63 = vpop.f32.mrf.mxu1 }
  0xf7   : > { %v3816_v0 = vadd.f32 %v2621_v62, %v2620_v60  ;;  %v2664_v1 = vadd.f32 %v2663_v63, %v2662_v61  ;;  %v3316_v61 = vld [vmem:[%s3499_s8 + $0x2e8] ss:$36 sps:$4 sm:$0xff]  }
  0xf8   : > { %v2623_v3 = vpop.f32.mrf.mxu0  ;;  %v2665_v4 = vpop.f32.mrf.mxu1  ;;  %v3319_v62 = vld [vmem:[%s3499_s8 + $0x2a8] ss:$36 sps:$4 sm:$0xff]  }
  0xf9   : > { %v3826_v7 = vadd.f32 %v2664_v1, %v3821_v2  ;;  %v3322_v1 = vld [vmem:[%s3499_s8 + $0x334] ss:$36 sps:$4 sm:$0xff]  }
  0xfa   : > { %v2624_v9 = vpop.f32.mrf.mxu0  ;;  %v2666_v10 = vpop.f32.mrf.mxu1 }
  0xfb   : > { %v3829_v12 = vadd.f32 %v2624_v9, %v2623_v3  ;;  %v2667_v13 = vadd.f32 %v2666_v10, %v2665_v4 }
  0xfc   : > { %v2626_v14 = vpop.f32.mrf.mxu0  ;;  %v2668_v15 = vpop.f32.mrf.mxu1  ;;  %1961 = vmatmul.mubr.bf16.gmra.mxu1 %v3306_v5  ;;  %3036 = vmatmul.mubr.bf16.gmra.mxu0 %v3307_v6 }
  0xfd   : > { %v3832_v16 = vadd.f32 %v2667_v13, %v3821_v2  ;;  %1968 = vmatprep.mubr.bf16.mxu1 %v3308_v8  ;;  %3039 = vmatprep.mubr.msk.bf16.mxu0 %vm3437_vm0, %v3436_v11 }
  0xfe   : > { %v2627_v17 = vpop.f32.mrf.mxu0  ;;  %v2669_v18 = vpop.f32.mrf.mxu1 }
  0xff   : > { %v3836_v19 = vadd.f32 %v2627_v17, %v2626_v14  ;;  %v2670_v20 = vadd.f32 %v2669_v18, %v2668_v15  ;;  %v295_v15 = vld [vmem:[%s3499_s8 + $0x378] sm:$0xff] }
 0x100   : > { %v2629_v21 = vpop.f32.mrf.mxu0  ;;  %v2671_v22 = vpop.f32.mrf.mxu1 }
 0x101   : > { %v3841_v25 = vadd.f32 %v2670_v20, %v3821_v2 }
 0x102   : > { %v2630_v27 = vpop.f32.mrf.mxu0  ;;  %v2672_v28 = vpop.f32.mrf.mxu1 }
 0x103   : > { %v3844_v29 = vadd.f32 %v2630_v27, %v2629_v21  ;;  %v2673_v30 = vadd.f32 %v2672_v28, %v2671_v22  ;;  %v3320_v22 = vld [vmem:[%s3499_s8 + $0x330] ss:$36 sps:$4 sm:$0xff]  }
 0x104   : > { %v2632_v31 = vpop.f32.mrf.mxu0  ;;  %v2674_v32 = vpop.f32.mrf.mxu1  ;;  %1969 = vmatmul.mubr.bf16.gmra.mxu1 %v3310_v23  ;;  %3040 = vmatmul.mubr.bf16.gmra.mxu0 %v3311_v24  ;;  %v3323_v23 = vld [vmem:[%s3499_s8 + $0x2f0] ss:$36 sps:$4 sm:$0xff]  }
 0x105   : > { %v3847_v33 = vadd.f32 %v2673_v30, %v3821_v2  ;;  %1976 = vmatprep.mubr.bf16.mxu1 %v3314_v26  ;;  %3043 = vmatprep.mubr.msk.bf16.mxu0 %vm3437_vm0, %v3436_v11  ;;  %v2497_v26 = vcombine.high %v295_v15, %v295_v15 }
 0x106   : > { %v2633_v34 = vpop.f32.mrf.mxu0  ;;  %v2675_v35 = vpop.f32.mrf.mxu1 }
 0x107   : > { %v3851_v36 = vadd.f32 %v2633_v34, %v2632_v31  ;;  %v2676_v37 = vadd.f32 %v2675_v35, %v2674_v32 }
 0x108   : > { %v2635_v38 = vpop.f32.mrf.mxu0  ;;  %v2677_v39 = vpop.f32.mrf.mxu1 }
 0x109   : > { %v3856_v42 = vadd.f32 %v2676_v37, %v3821_v2  ;;  %v1499_v37 = vadd.f32 %v3803_v49, %v3821_v2 }
 0x10a   : > { %v2636_v44 = vpop.f32.mrf.mxu0  ;;  %v2678_v45 = vpop.f32.mrf.mxu1 }
 0x10b   : > { %v3859_v46 = vadd.f32 %v2636_v44, %v2635_v38  ;;  %v2679_v47 = vadd.f32 %v2678_v45, %v2677_v39  ;;  %v3326_v44 = vld [vmem:[%s3499_s8 + $0x338] ss:$36 sps:$4 sm:$0xff]  }
 0x10c   : > { %v2638_v48 = vpop.f32.mrf.mxu0  ;;  %v2680_v51 = vpop.f32.mrf.mxu1  ;;  %1977 = vmatmul.mubr.bf16.gmra.mxu1 %v3312_v40  ;;  %3044 = vmatmul.mubr.bf16.gmra.mxu0 %v3315_v41 }
 0x10d   : > { %v3862_v52 = vadd.f32 %v2679_v47, %v3821_v2  ;;  %1984 = vmatprep.mubr.bf16.mxu1 %v3318_v43  ;;  %3047 = vmatprep.mubr.msk.bf16.mxu0 %vm3437_vm0, %v3436_v11  ;;  %v2496_v43 = vcombine.low %v295_v15, %v295_v15  ;;  %v1510_v15 = vadd.f32 %v3829_v12, %v3821_v2 }
 0x10e   : > { %v2639_v53 = vpop.f32.mrf.mxu0  ;;  %v2681_v54 = vpop.f32.mrf.mxu1 }
 0x10f   : > { %v3866_v55 = vadd.f32 %v2639_v53, %v2638_v48  ;;  %v2682_v56 = vadd.f32 %v2681_v54, %v2680_v51  ;;  %v1502_v51 = vadd.f32 %v3810_v58, %v3821_v2 }
 0x110   : > { %v2641_v57 = vpop.f32.mrf.mxu0  ;;  %v2683_v60 = vpop.f32.mrf.mxu1 }
 0x111   : > { %v3871_v63 = vadd.f32 %v2682_v56, %v3821_v2 }
 0x112   : > { %v2642_v3 = vpop.f32.mrf.mxu0  ;;  %v2684_v4 = vpop.f32.mrf.mxu1 }
 0x113   : > { %v3874_v5 = vadd.f32 %v2642_v3, %v2641_v57  ;;  %v2685_v6 = vadd.f32 %v2684_v4, %v2683_v60 }
 0x114   : > { %v2644_v8 = vpop.f32.mrf.mxu0  ;;  %v2686_v9 = vpop.f32.mrf.mxu1  ;;  %1985 = vmatmul.mubr.bf16.gmra.mxu1 %v3316_v61  ;;  %3048 = vmatmul.mubr.bf16.gmra.mxu0 %v3319_v62  ;;  %v1507_v62 = vadd.f32 %v3816_v0, %v3821_v2 }
 0x115   : > { %v3877_v10 = vadd.f32 %v2685_v6, %v3821_v2  ;;  %1992 = vmatprep.mubr.bf16.mxu1 %v3322_v1  ;;  %3051 = vmatprep.mubr.msk.bf16.mxu0 %vm3437_vm0, %v3436_v11  ;;  %v3327_v6 = vld [vmem:[%s3499_s8 + $0x380] ss:$0 sps:$4 sm:$0xff]   ;;  %s3080_s8 = smul.u32 200, %s4056_s13 }
 0x116   : > { %v2645_v13 = vpop.f32.mrf.mxu0  ;;  %v2687_v14 = vpop.f32.mrf.mxu1 }
 0x117   : > { %v3882_v17 = vadd.f32 %v2645_v13, %v2644_v8  ;;  %v2688_v18 = vadd.f32 %v2687_v14, %v2686_v9  ;;  %s4005_s21 = scalar_lea.vmem %s4054_s3, %s3080_s8 }
 0x118   : > { %v2647_v20 = vpop.f32.mrf.mxu0  ;;  %v2689_v21 = vpop.f32.mrf.mxu1 }
 0x119   : > { %v3887_v24 = vadd.f32 %v2688_v18, %v3821_v2 }
 0x11a   : > { %v2648_v27 = vpop.f32.mrf.mxu0  ;;  %v2690_v28 = vpop.f32.mrf.mxu1 }
 0x11b   : > { %v3889_v30 = vadd.f32 %v2648_v27, %v2647_v20  ;;  %v1515_v27 = vadd.f32 %v3836_v19, %v3821_v2 }
 0x11c   : > { %v2650_v31 = vpop.f32.mrf.mxu0  ;;  %v2708_v32 = vpop.f32.mrf.mxu1  ;;  %1993 = vmatmul.mubr.bf16.gmra.mxu1 %v3320_v22  ;;  %3052 = vmatmul.mubr.bf16.gmra.mxu0 %v3323_v23 }
 0x11d   : > { %2000 = vmatprep.mubr.bf16.mxu1 %v2497_v26  ;;  %3055 = vmatprep.mubr.msk.bf16.mxu0 %vm3437_vm0, %v3436_v11 }
 0x11e   : > { %v2651_v34 = vpop.f32.mrf.mxu0  ;;  %v2709_v35 = vpop.f32.mrf.mxu1 }
 0x11f   : > { %v3895_v38 = vadd.f32 %v2651_v34, %v2650_v31  ;;  %v2710_v39 = vadd.f32 %v2709_v35, %v2708_v32 }
 0x120   : > { %v2653_v40 = vpop.f32.mrf.mxu0  ;;  %v2711_v41 = vpop.f32.mrf.mxu1 }
 0x121   : > { %v1635_v45 = vadd.f32 %v2710_v39, %v1499_v37 }
 0x122   : > { %v2654_v47 = vpop.f32.mrf.mxu0  ;;  %v2712_v48 = vpop.f32.mrf.mxu1 }
 0x123   : > { %v3900_v53 = vadd.f32 %v2654_v47, %v2653_v40  ;;  %v2713_v54 = vadd.f32 %v2712_v48, %v2711_v41  ;;  %v1518_v40 = vadd.f32 %v3844_v29, %v3821_v2 }
 0x124   : > { %v2714_v56 = vpop.f32.mrf.mxu1  ;;  %v2802_v57 = vpop.f32.mrf.mxu0  ;;  %2001 = vmatmul.mubr.bf16.gmra.mxu1 %v2496_v43  ;;  %3056 = vmatmul.mubr.bf16.gmra.mxu0 %v3326_v44 }
 0x125   : > { %v1638_v49 = vadd.f32 %v2713_v54, %v1502_v51  ;;  %3059 = vmatprep.mubr.msk.bf16.mxu0 %vm3437_vm0, %v3436_v11  ;;  %v1523_v54 = vadd.f32 %v3851_v36, %v3821_v2 }
 0x126   : > { %v2715_v60 = vpop.f32.mrf.mxu1  ;;  %v2803_v61 = vpop.f32.mrf.mxu0 }
 0x127   : > { %v2716_v1 = vadd.f32 %v2715_v60, %v2714_v56  ;;  %v2804_v3 = vadd.f32 %v2803_v61, %v2802_v57 }
 0x128   : > { %v2717_v58 = vpop.f32.mrf.mxu1  ;;  %v2805_v4 = vpop.f32.mrf.mxu0 }
 0x129   : > { %v1643_v8 = vadd.f32 %v2716_v1, %v1507_v62  ;;  %v3907_v9 = vadd.f32 %v2804_v3, %v1635_v45  ;;  %v1526_v3 = vadd.f32 %v3859_v46, %v3821_v2 }
 0x12a   : > { %v2718_v13 = vpop.f32.mrf.mxu1  ;;  %v2806_v14 = vpop.f32.mrf.mxu0 }
 0x12b   : > { %v2719_v18 = vadd.f32 %v2718_v13, %v2717_v58  ;;  %v2807_v11 = vadd.f32 %v2806_v14, %v2805_v4 }
 0x12c   : > { %v2720_v20 = vpop.f32.mrf.mxu1  ;;  %v2808_v21 = vpop.f32.mrf.mxu0  ;;  %3060 = vmatmul.mubr.bf16.gmra.mxu0 %v3327_v6 }
 0x12d   : > { %v1646_v22 = vadd.f32 %v2719_v18, %v1510_v15  ;;  %v3911_v0 = vadd.f32 %v2807_v11, %v1638_v49  ;;  %v1531_v18 = vadd.f32 %v3866_v55, %v3821_v2 }
 0x12e   : > { %v2721_v23 = vpop.f32.mrf.mxu1  ;;  %v2809_v26 = vpop.f32.mrf.mxu0 }
 0x12f   : > { %v2722_v28 = vadd.f32 %v2721_v23, %v2720_v20  ;;  %v2810_v31 = vadd.f32 %v2809_v26, %v2808_v21 }
 0x130   : > { %v2723_v32 = vpop.f32.mrf.mxu1  ;;  %v2811_v34 = vpop.f32.mrf.mxu0 }
 0x131   : > { %v1651_v35 = vadd.f32 %v2722_v28, %v1515_v27  ;;  %v3915_v37 = vadd.f32 %v2810_v31, %v1643_v8  ;;  %v1534_v28 = vadd.f32 %v3874_v5, %v3821_v2 }
 0x132   : > { %v2724_v12 = vpop.f32.mrf.mxu1  ;;  %v2812_v39 = vpop.f32.mrf.mxu0 }
 0x133   : > { %v2725_v41 = vadd.f32 %v2724_v12, %v2723_v32  ;;  %v2813_v43 = vadd.f32 %v2812_v39, %v2811_v34 }
 0x134   : > { %v2726_v44 = vpop.f32.mrf.mxu1  ;;  %v2814_v45 = vpop.f32.mrf.mxu0 }
 0x135   : > { %v1654_v47 = vadd.f32 %v2725_v41, %v1518_v40  ;;  %v3919_v48 = vadd.f32 %v2813_v43, %v1646_v22  ;;  %v1539_v41 = vadd.f32 %v3882_v17, %v3821_v2 }
 0x136   : > { %v2727_v19 = vpop.f32.mrf.mxu1  ;;  %v2815_v51 = vpop.f32.mrf.mxu0 }
 0x137   : > { %v2728_v56 = vadd.f32 %v2727_v19, %v2726_v44  ;;  %v2816_v57 = vadd.f32 %v2815_v51, %v2814_v45 }
 0x138   : > { %v2729_v49 = vpop.f32.mrf.mxu1  ;;  %v2817_v60 = vpop.f32.mrf.mxu0 }
 0x139   : > { %v1659_v61 = vadd.f32 %v2728_v56, %v1523_v54  ;;  %v3923_v62 = vadd.f32 %v2816_v57, %v1651_v35  ;;  %v1542_v56 = vadd.f32 %v3889_v30, %v3821_v2 }
 0x13a   : > { %v2730_v29 = vpop.f32.mrf.mxu1  ;;  %v2818_v1 = vpop.f32.mrf.mxu0 }
 0x13b   : > { %v2731_v58 = vadd.f32 %v2730_v29, %v2729_v49  ;;  %v2819_v4 = vadd.f32 %v2818_v1, %v2817_v60 }
 0x13c   : > { %v2732_v6 = vpop.f32.mrf.mxu1  ;;  %v2820_v8 = vpop.f32.mrf.mxu0 }
 0x13d   : > { %v1662_v13 = vadd.f32 %v2731_v58, %v1526_v3  ;;  %v3927_v14 = vadd.f32 %v2819_v4, %v1654_v47  ;;  %v1547_v58 = vadd.f32 %v3895_v38, %v3821_v2 }
 0x13e   : > { %v2733_v36 = vpop.f32.mrf.mxu1  ;;  %v2821_v15 = vpop.f32.mrf.mxu0 }
 0x13f   : > { %v2734_v11 = vadd.f32 %v2733_v36, %v2732_v6  ;;  %v2822_v20 = vadd.f32 %v2821_v15, %v2820_v8 }
 0x140   : > { %v2735_v21 = vpop.f32.mrf.mxu1  ;;  %v2823_v22 = vpop.f32.mrf.mxu0 }
 0x141   : > { %v1667_v23 = vadd.f32 %v2734_v11, %v1531_v18  ;;  %v3931_v26 = vadd.f32 %v2822_v20, %v1659_v61  ;;  %v1550_v11 = vadd.f32 %v3900_v53, %v3821_v2 }
 0x142   : > { %v2736_v46 = vpop.f32.mrf.mxu1  ;;  %v2824_v27 = vpop.f32.mrf.mxu0 }
 0x143   : > { %v2737_v31 = vadd.f32 %v2736_v46, %v2735_v21  ;;  %v2825_v32 = vadd.f32 %v2824_v27, %v2823_v22 }
 0x144   : > { %v2738_v34 = vpop.f32.mrf.mxu1  ;;  %v2826_v35 = vpop.f32.mrf.mxu0 }
 0x145   : > { %v1670_v12 = vadd.f32 %v2737_v31, %v1534_v28  ;;  %v3935_v39 = vadd.f32 %v2825_v32, %v1662_v13  ;;  %v1555_v31 = vadd.f32 %v3805_v50, %v3821_v2 }
 0x146   : > { %v2739_v55 = vpop.f32.mrf.mxu1  ;;  %v2827_v40 = vpop.f32.mrf.mxu0 }
 0x147   : > { %v2740_v43 = vadd.f32 %v2739_v55, %v2738_v34  ;;  %v2828_v44 = vadd.f32 %v2827_v40, %v2826_v35 }
 0x148   : > { %v2741_v45 = vpop.f32.mrf.mxu1  ;;  %v2829_v47 = vpop.f32.mrf.mxu0 }
 0x149   : > { %v1675_v19 = vadd.f32 %v2740_v43, %v1539_v41  ;;  %v3939_v51 = vadd.f32 %v2828_v44, %v1667_v23  ;;  %v1558_v43 = vadd.f32 %v3812_v59, %v3821_v2 }
 0x14a   : > { %v2742_v5 = vpop.f32.mrf.mxu1  ;;  %v2830_v54 = vpop.f32.mrf.mxu0 }
 0x14b   : > { %v2743_v57 = vadd.f32 %v2742_v5, %v2741_v45  ;;  %v2831_v49 = vadd.f32 %v2830_v54, %v2829_v47 }
 0x14c   : > { %v2744_v60 = vpop.f32.mrf.mxu1  ;;  %v2832_v61 = vpop.f32.mrf.mxu0 }
 0x14d   : > { %v1678_v29 = vadd.f32 %v2743_v57, %v1542_v56  ;;  %v3943_v1 = vadd.f32 %v2831_v49, %v1670_v12 }
 0x14e   : > { %v2745_v17 = vpop.f32.mrf.mxu1  ;;  %v2833_v3 = vpop.f32.mrf.mxu0 }
 0x14f   : > { %v2746_v4 = vadd.f32 %v2745_v17, %v2744_v60  ;;  %v2834_v6 = vadd.f32 %v2833_v3, %v2832_v61 }
 0x150   : > { %v2747_v8 = vpop.f32.mrf.mxu1  ;;  %v2835_v13 = vpop.f32.mrf.mxu0 }
 0x151   : > { %v1683_v36 = vadd.f32 %v2746_v4, %v1547_v58  ;;  %v3947_v15 = vadd.f32 %v2834_v6, %v1675_v19 }
 0x152   : > { %v2748_v30 = vpop.f32.mrf.mxu1  ;;  %v2836_v18 = vpop.f32.mrf.mxu0 }
 0x153   : > { %v2749_v20 = vadd.f32 %v2748_v30, %v2747_v8  ;;  %v2837_v21 = vadd.f32 %v2836_v18, %v2835_v13 }
 0x154   : > { %v2750_v22 = vpop.f32.mrf.mxu1  ;;  %v2838_v23 = vpop.f32.mrf.mxu0 }
 0x155   : > { %v1686_v46 = vadd.f32 %v2749_v20, %v1550_v11  ;;  %v3951_v27 = vadd.f32 %v2837_v21, %v1678_v29 }
 0x156   : > { %v2751_v38 = vpop.f32.mrf.mxu1  ;;  %v2839_v28 = vpop.f32.mrf.mxu0 }
 0x157   : > { %v2752_v32 = vadd.f32 %v2751_v38, %v2750_v22  ;;  %v2840_v34 = vadd.f32 %v2839_v28, %v2838_v23 }
 0x158   : > { %v2753_v35 = vpop.f32.mrf.mxu1  ;;  %v2841_v12 = vpop.f32.mrf.mxu0 }
 0x159   : > { %v1691_v55 = vadd.f32 %v2752_v32, %v1555_v31  ;;  %v3955_v40 = vadd.f32 %v2840_v34, %v1683_v36 }
 0x15a   : > { %v2754_v53 = vpop.f32.mrf.mxu1  ;;  %v2842_v41 = vpop.f32.mrf.mxu0 }
 0x15b   : > { %v2755_v44 = vadd.f32 %v2754_v53, %v2753_v35  ;;  %v2843_v45 = vadd.f32 %v2842_v41, %v2841_v12 }
 0x15c   : > { %v2756_v47 = vpop.f32.mrf.mxu1  ;;  %v2844_v19 = vpop.f32.mrf.mxu0 }
 0x15d   : > { %v1694_v5 = vadd.f32 %v2755_v44, %v1558_v43  ;;  %v3959_v54 = vadd.f32 %v2843_v45, %v1686_v46 }
 0x15e   : > { %v2757_v50 = vpop.f32.mrf.mxu1  ;;  %v2845_v56 = vpop.f32.mrf.mxu0 }
 0x15f   : > { %v2758_v57 = vadd.f32 %v2757_v50, %v2756_v47  ;;  %v2846_v49 = vadd.f32 %v2845_v56, %v2844_v19 }
 0x160   : > { %v2759_v60 = vpop.f32.mrf.mxu1  ;;  %v2847_v61 = vpop.f32.mrf.mxu0 }
 0x161   : > { %v1699_v29 = vadd.f32 %v2758_v57, %v3826_v7  ;;  %v3962_v17 = vadd.f32 %v2846_v49, %v1691_v55 }
 0x162   : > { %v2760_v3 = vpop.f32.mrf.mxu1  ;;  %v2848_v58 = vpop.f32.mrf.mxu0 }
 0x163   : > { %v2761_v59 = vadd.f32 %v2760_v3, %v2759_v60  ;;  %v2849_v2 = vadd.f32 %v2848_v58, %v2847_v61 }
 0x164   : > { %v2762_v4 = vpop.f32.mrf.mxu1  ;;  %v2850_v6 = vpop.f32.mrf.mxu0 }
 0x165   : > { %v1702_v8 = vadd.f32 %v2761_v59, %v3832_v16  ;;  %v3965_v13 = vadd.f32 %v2849_v2, %v1694_v5 }
 0x166   : > { %v2763_v36 = vpop.f32.mrf.mxu1  ;;  %v2851_v30 = vpop.f32.mrf.mxu0 }
 0x167   : > { %v2764_v18 = vadd.f32 %v2763_v36, %v2762_v4  ;;  %v2852_v11 = vadd.f32 %v2851_v30, %v2850_v6 }
 0x168   : > { %v2765_v20 = vpop.f32.mrf.mxu1  ;;  %v2853_v21 = vpop.f32.mrf.mxu0 }
 0x169   : > { %v1707_v7 = vadd.f32 %v2764_v18, %v3841_v25  ;;  %v3968_v22 = vadd.f32 %v2852_v11, %v1699_v29 }
 0x16a   : > { %v2766_v23 = vpop.f32.mrf.mxu1  ;;  %v2854_v46 = vpop.f32.mrf.mxu0 }
 0x16b   : > { %v2767_v38 = vadd.f32 %v2766_v23, %v2765_v20  ;;  %v2855_v28 = vadd.f32 %v2854_v46, %v2853_v21 }
 0x16c   : > { %v2768_v31 = vpop.f32.mrf.mxu1  ;;  %v2856_v32 = vpop.f32.mrf.mxu0 }
 0x16d   : > { %v1710_v16 = vadd.f32 %v2767_v38, %v3847_v33  ;;  %v3971_v34 = vadd.f32 %v2855_v28, %v1702_v8 }
 0x16e   : > { %v2769_v35 = vpop.f32.mrf.mxu1  ;;  %v2857_v12 = vpop.f32.mrf.mxu0 }
 0x16f   : > { %v2770_v55 = vadd.f32 %v2769_v35, %v2768_v31  ;;  %v2858_v53 = vadd.f32 %v2857_v12, %v2856_v32 }
 0x170   : > { %v2771_v41 = vpop.f32.mrf.mxu1  ;;  %v2859_v43 = vpop.f32.mrf.mxu0 }
 0x171   : > { %v1715_v25 = vadd.f32 %v2770_v55, %v3856_v42  ;;  %v3974_v44 = vadd.f32 %v2858_v53, %v1707_v7 }
 0x172   : > { %v2772_v45 = vpop.f32.mrf.mxu1  ;;  %v2860_v47 = vpop.f32.mrf.mxu0 }
 0x173   : > { %v2773_v19 = vadd.f32 %v2772_v45, %v2771_v41  ;;  %v2861_v5 = vadd.f32 %v2860_v47, %v2859_v43 }
 0x174   : > { %v2774_v50 = vpop.f32.mrf.mxu1  ;;  %v2862_v56 = vpop.f32.mrf.mxu0 }
 0x175   : > { %v1718_v33 = vadd.f32 %v2773_v19, %v3862_v52  ;;  %v3977_v57 = vadd.f32 %v2861_v5, %v1710_v16 }
 0x176   : > { %v2775_v49 = vpop.f32.mrf.mxu1  ;;  %v2863_v60 = vpop.f32.mrf.mxu0 }
 0x177   : > { %v2776_v61 = vadd.f32 %v2775_v49, %v2774_v50  ;;  %v2864_v29 = vadd.f32 %v2863_v60, %v2862_v56 }
 0x178   : > { %v2777_v3 = vpop.f32.mrf.mxu1  ;;  %v2865_v58 = vpop.f32.mrf.mxu0 }
 0x179   : > { %v1723_v42 = vadd.f32 %v2776_v61, %v3871_v63  ;;  %v3980_v59 = vadd.f32 %v2864_v29, %v1715_v25 }
 0x17a   : > { %v2778_v2 = vpop.f32.mrf.mxu1  ;;  %v2866_v4 = vpop.f32.mrf.mxu0 }
 0x17b   : > { %v2779_v6 = vadd.f32 %v2778_v2, %v2777_v3  ;;  %v2867_v8 = vadd.f32 %v2866_v4, %v2865_v58 }
 0x17c   : > { %v2780_v36 = vpop.f32.mrf.mxu1  ;;  %v2868_v30 = vpop.f32.mrf.mxu0 }
 0x17d   : > { %v1726_v52 = vadd.f32 %v2779_v6, %v3877_v10  ;;  %v3983_v18 = vadd.f32 %v2867_v8, %v1718_v33 }
 0x17e   : > { %v2781_v11 = vpop.f32.mrf.mxu1  ;;  %v2869_v20 = vpop.f32.mrf.mxu0 }
 0x17f   : > { %v2782_v21 = vadd.f32 %v2781_v11, %v2780_v36  ;;  %v2870_v7 = vadd.f32 %v2869_v20, %v2868_v30 }
 0x180   : > { %v2783_v23 = vpop.f32.mrf.mxu1  ;;  %v2871_v46 = vpop.f32.mrf.mxu0 }
 0x181   : > { %v1731_v63 = vadd.f32 %v2782_v21, %v3887_v24  ;;  %v3986_v38 = vadd.f32 %v2870_v7, %v1723_v42 }
 0x182   : > { %v2784_v28 = vpop.f32.mrf.mxu1  ;;  %v2872_v31 = vpop.f32.mrf.mxu0 }
 0x183   : > { %v2873_v32 = vadd.f32 %v2872_v31, %v2871_v46 }
 0x184   : > { %v2874_v16 = vpop.f32.mrf.mxu0  ;;  %v2896_v35 = vpop.f32.mrf.mxu1 }
 0x185   : > { %v3988_v12 = vadd.f32 %v2873_v32, %v1726_v52 }
 0x186   : > { %v2875_v10 = vpop.f32.mrf.mxu0  ;;  %v2897_v55 = vpop.f32.mrf.mxu1 }
 0x187   : > { %v2876_v53 = vadd.f32 %v2875_v10, %v2874_v16  ;;  %v2898_v41 = vadd.f32 %v2897_v55, %v2896_v35 }
 0x188   : > { %v2877_v43 = vpop.f32.mrf.mxu0  ;;  %v2899_v25 = vpop.f32.mrf.mxu1 }
 0x189   : > { %v3990_v45 = vadd.f32 %v2876_v53, %v1731_v63  ;;  %v1907_v5 = vadd.f32 %v2898_v41, %v3907_v9 }
 0x18a   : > { %v2878_v47 = vpop.f32.mrf.mxu0  ;;  %v2900_v19 = vpop.f32.mrf.mxu1 }
 0x18b   : > { %v2901_v24 = vadd.f32 %v2900_v19, %v2899_v25 }
 0x18c   : > { %v2902_v50 = vpop.f32.mrf.mxu1  ;;  %v2042_v56 = vpop.f32.mrf.mxu0 }
 0x18d   : > { %v2043_v33 = vadd.f32 %v2042_v56, %v1907_v5  ;;  %v1910_v3 = vadd.f32 %v2901_v24, %v3911_v0 }
 0x18e   : > { %v2903_v49 = vpop.f32.mrf.mxu1  ;;  %v3013_v60 = vpop.f32.mrf.mxu0 }
 0x18f   : > { %v2571_v61 = vmul.f32 -1.442695, %v2043_v33  ;;  %v2904_v29 = vadd.f32 %v2903_v49, %v2902_v50 }
 0x190   : > { %v2905_v58 = vpop.f32.mrf.mxu1  ;;  %v2045_v42 = vpop.f32.mrf.mxu0 }
 0x191   : > { %3328 = vpow2.f32 %v2571_v61  ;;  %v2046_v2 = vadd.f32 %v2045_v42, %v1910_v3  ;;  %v1915_v30 = vadd.f32 %v2904_v29, %v3915_v37 }
 0x192   : > { %v2906_v4 = vpop.f32.mrf.mxu1  ;;  %v3014_v6 = vpop.f32.mrf.mxu0 }
 0x193   : > { %v2572_v8 = vmul.f32 -1.442695, %v2046_v2  ;;  %v2907_v36 = vadd.f32 %v2906_v4, %v2905_v58 }
 0x194   : > { %v2908_v9 = vpop.f32.mrf.mxu1  ;;  %v2050_v52 = vpop.f32.mrf.mxu0 }
 0x195   : > { %3330 = vpow2.f32 %v2572_v8  ;;  %v2051_v11 = vadd.f32 %v2050_v52, %v1915_v30  ;;  %v1918_v0 = vadd.f32 %v2907_v36, %v3919_v48 }
 0x196   : > { %v2909_v20 = vpop.f32.mrf.mxu1  ;;  %v3017_v21 = vpop.f32.mrf.mxu0 }
 0x197   : > { %v2573_v7 = vmul.f32 -1.442695, %v2051_v11  ;;  %v2910_v23 = vadd.f32 %v2909_v20, %v2908_v9 }
 0x198   : > { %v2911_v46 = vpop.f32.mrf.mxu1  ;;  %v2053_v63 = vpop.f32.mrf.mxu0 }
 0x199   : > { %3332 = vpow2.f32 %v2573_v7  ;;  %v2054_v28 = vadd.f32 %v2053_v63, %v1918_v0  ;;  %v1923_v37 = vadd.f32 %v2910_v23, %v3923_v62 }
 0x19a   : > { %v2912_v31 = vpop.f32.mrf.mxu1  ;;  %v3018_v32 = vpop.f32.mrf.mxu0 }
 0x19b   : > { %v2574_v16 = vmul.f32 -1.442695, %v2054_v28  ;;  %v2913_v35 = vadd.f32 %v2912_v31, %v2911_v46 }
 0x19c   : > { %v2914_v10 = vpop.f32.mrf.mxu1  ;;  %v2058_v55 = vpop.f32.mrf.mxu0 }
 0x19d   : > { %3334 = vpow2.f32 %v2574_v16  ;;  %v2059_v53 = vadd.f32 %v2058_v55, %v1923_v37  ;;  %v1926_v24 = vadd.f32 %v2913_v35, %v3927_v14 }
 0x19e   : > { %v3329_v41 = vpop.eup %3328  ;;  %v2915_v43 = vpop.f32.mrf.mxu1 }
 0x19f   : > { %v3021_v25 = vpop.f32.mrf.mxu0  ;;  %v2219_v47 = vadd.f32 1.0, %v3329_v41  ;;  %v2575_v19 = vmul.f32 -1.442695, %v2059_v53  ;;  %v2916_v48 = vadd.f32 %v2915_v43, %v2914_v10 }
 0x1a0   : > { %v2917_v5 = vpop.f32.mrf.mxu1 }
 0x1a1   : > { %v2061_v50 = vpop.f32.mrf.mxu0  ;;  %3336 = vrcp.f32 %v2219_v47  ;;  %v1931_v3 = vadd.f32 %v2916_v48, %v3931_v26 }
 0x1a2   : > { %v2062_v56 = vadd.f32 %v2061_v50, %v1926_v24  ;;  %v3331_v33 = vpop.eup %3330  ;;  %3338 = vpow2.f32 %v2575_v19  ;;  %v2918_v49 = vpop.f32.mrf.mxu1 }
 0x1a3   : > { %v3022_v62 = vpop.f32.mrf.mxu0  ;;  %v2220_v60 = vadd.f32 1.0, %v3331_v33  ;;  %v2919_v29 = vadd.f32 %v2918_v49, %v2917_v5 }
 0x1a4   : > { %v2576_v61 = vmul.f32 -1.442695, %v2062_v56  ;;  %v2920_v58 = vpop.f32.mrf.mxu1 }
 0x1a5   : > { %v2066_v42 = vpop.f32.mrf.mxu0  ;;  %3340 = vrcp.f32 %v2220_v60  ;;  %v1934_v9 = vadd.f32 %v2919_v29, %v3935_v39 }
 0x1a6   : > { %v2067_v2 = vadd.f32 %v2066_v42, %v1931_v3  ;;  %v3333_v4 = vpop.eup %3332  ;;  %3342 = vpow2.f32 %v2576_v61  ;;  %v2921_v14 = vpop.f32.mrf.mxu1 }
 0x1a7   : > { %v3025_v6 = vpop.f32.mrf.mxu0  ;;  %v2221_v8 = vadd.f32 1.0, %v3333_v4  ;;  %v2922_v30 = vadd.f32 %v2921_v14, %v2920_v58 }
 0x1a8   : > { %v2577_v36 = vmul.f32 -1.442695, %v2067_v2  ;;  %v2923_v52 = vpop.f32.mrf.mxu1 }
 0x1a9   : > { %v2069_v11 = vpop.f32.mrf.mxu0  ;;  %3344 = vrcp.f32 %v2221_v8  ;;  %v1939_v63 = vadd.f32 %v2922_v30, %v3939_v51 }
 0x1aa   : > { %v2070_v20 = vadd.f32 %v2069_v11, %v1934_v9  ;;  %v3335_v21 = vpop.eup %3334  ;;  %3346 = vpow2.f32 %v2577_v36  ;;  %v2924_v26 = vpop.f32.mrf.mxu1 }
 0x1ab   : > { %v3026_v7 = vpop.f32.mrf.mxu0  ;;  %v2222_v23 = vadd.f32 1.0, %v3335_v21  ;;  %v2925_v46 = vadd.f32 %v2924_v26, %v2923_v52 }
 0x1ac   : > { %v2578_v0 = vmul.f32 -1.442695, %v2070_v20  ;;  %v2926_v39 = vpop.f32.mrf.mxu1 }
 0x1ad   : > { %v2074_v28 = vpop.f32.mrf.mxu0  ;;  %3348 = vrcp.f32 %v2222_v23  ;;  %v1942_v51 = vadd.f32 %v2925_v46, %v3943_v1 }
 0x1ae   : > { %v2075_v31 = vadd.f32 %v2074_v28, %v1939_v63  ;;  %v3337_v32 = vpop.eup %3336  ;;  %3350 = vpow2.f32 %v2578_v0  ;;  %v2927_v16 = vpop.f32.mrf.mxu1 }
 0x1af   : > { %v3029_v35 = vpop.f32.mrf.mxu0  ;;  %v3339_v37 = vpop.eup %3338  ;;  %2294 = vst [vmem:[%s4005_s21] sm:$0xff] %v3337_v32  ;;  %v2928_v55 = vadd.f32 %v2927_v16, %v2926_v39 }
 0x1b0   : > { %v2579_v10 = vmul.f32 -1.442695, %v2075_v31  ;;  %v2223_v53 = vadd.f32 1.0, %v3339_v37  ;;  %v2929_v41 = vpop.f32.mrf.mxu1 }
 0x1b1   : > { %v2077_v43 = vpop.f32.mrf.mxu0  ;;  %v1947_v56 = vadd.f32 %v2928_v55, %v3947_v15 }
 0x1b2   : > { %3352 = vpow2.f32 %v2579_v10  ;;  %v2078_v25 = vadd.f32 %v2077_v43, %v1942_v51  ;;  %v3341_v47 = vpop.eup %3340  ;;  %v2930_v19 = vpop.f32.mrf.mxu1 }
 0x1b3   : > { %3354 = vrcp.f32 %v2223_v53  ;;  %v3030_v48 = vpop.f32.mrf.mxu0  ;;  %v3343_v24 = vpop.eup %3342  ;;  %2295 = vst [vmem:[%s4005_s21 + $0x8] sm:$0xff] %v3341_v47  ;;  %v2931_v50 = vadd.f32 %v2930_v19, %v2929_v41 }
 0x1b4   : > { %v2580_v5 = vmul.f32 -1.442695, %v2078_v25  ;;  %v2224_v33 = vadd.f32 1.0, %v3343_v24  ;;  %v2932_v49 = vpop.f32.mrf.mxu1 }
 0x1b5   : > { %v2082_v62 = vpop.f32.mrf.mxu0  ;;  %v1950_v2 = vadd.f32 %v2931_v50, %v3951_v27 }
 0x1b6   : > { %3356 = vpow2.f32 %v2580_v5  ;;  %v2083_v1 = vadd.f32 %v2082_v62, %v1947_v56  ;;  %v3345_v60 = vpop.eup %3344  ;;  %v2933_v61 = vpop.f32.mrf.mxu1 }
 0x1b7   : > { %3358 = vrcp.f32 %v2224_v33  ;;  %v3033_v29 = vpop.f32.mrf.mxu0  ;;  %v3347_v3 = vpop.eup %3346  ;;  %2296 = vst [vmem:[%s4005_s21 + $0x10] sm:$0xff] %v3345_v60  ;;  %v2934_v42 = vadd.f32 %v2933_v61, %v2932_v49 }
 0x1b8   : > { %v2581_v58 = vmul.f32 -1.442695, %v2083_v1  ;;  %v2225_v4 = vadd.f32 1.0, %v3347_v3  ;;  %v2935_v14 = vpop.f32.mrf.mxu1 }
 0x1b9   : > { %v2085_v6 = vpop.f32.mrf.mxu0  ;;  %v1955_v20 = vadd.f32 %v2934_v42, %v3955_v40 }
 0x1ba   : > { %3360 = vpow2.f32 %v2581_v58  ;;  %v2086_v15 = vadd.f32 %v2085_v6, %v1950_v2  ;;  %v3349_v8 = vpop.eup %3348  ;;  %v2936_v36 = vpop.f32.mrf.mxu1 }
 0x1bb   : > { %3362 = vrcp.f32 %v2225_v4  ;;  %v3034_v30 = vpop.f32.mrf.mxu0  ;;  %v3351_v9 = vpop.eup %3350  ;;  %2297 = vst [vmem:[%s4005_s21 + $0x18] sm:$0xff] %v3349_v8  ;;  %v2937_v11 = vadd.f32 %v2936_v36, %v2935_v14 }
 0x1bc   : > { %v2582_v52 = vmul.f32 -1.442695, %v2086_v15  ;;  %v2226_v21 = vadd.f32 1.0, %v3351_v9  ;;  %v2938_v26 = vpop.f32.mrf.mxu1 }
 0x1bd   : > { %v2090_v7 = vpop.f32.mrf.mxu0  ;;  %v1958_v32 = vadd.f32 %v2937_v11, %v3959_v54 }
 0x1be   : > { %3364 = vpow2.f32 %v2582_v52  ;;  %v2091_v27 = vadd.f32 %v2090_v7, %v1955_v20  ;;  %v2939_v0 = vpop.f32.mrf.mxu1 }
 0x1bf   : > { %v3353_v23 = vpop.eup %3352  ;;  %3366 = vrcp.f32 %v2226_v21  ;;  %v3037_v46 = vpop.f32.mrf.mxu0  ;;  %v2940_v31 = vadd.f32 %v2939_v0, %v2938_v26 }
 0x1c0   : > { %v3355_v63 = vpop.eup %3354  ;;  %v2227_v39 = vadd.f32 1.0, %v3353_v23  ;;  %v2583_v28 = vmul.f32 -1.442695, %v2091_v27  ;;  %v2941_v16 = vpop.f32.mrf.mxu1 }
 0x1c1   : > { %2298 = vst [vmem:[%s4005_s21 + $0x20] sm:$0xff] %v3355_v63  ;;  %v2093_v35 = vpop.f32.mrf.mxu0  ;;  %v1963_v25 = vadd.f32 %v2940_v31, %v3962_v17 }
 0x1c2   : > { %3368 = vrcp.f32 %v2227_v39  ;;  %v2094_v40 = vadd.f32 %v2093_v35, %v1958_v32  ;;  %v2942_v10 = vpop.f32.mrf.mxu1 }
 0x1c3   : > { %v3357_v37 = vpop.eup %3356  ;;  %3370 = vpow2.f32 %v2583_v28  ;;  %v3038_v55 = vpop.f32.mrf.mxu0  ;;  %v2943_v43 = vadd.f32 %v2942_v10, %v2941_v16 }
 0x1c4   : > { %v3359_v51 = vpop.eup %3358  ;;  %v2228_v53 = vadd.f32 1.0, %v3357_v37  ;;  %v2584_v41 = vmul.f32 -1.442695, %v2094_v40  ;;  %v2944_v47 = vpop.f32.mrf.mxu1 }
 0x1c5   : > { %2299 = vst [vmem:[%s4005_s21 + $0x28] sm:$0xff] %v3359_v51  ;;  %v2098_v19 = vpop.f32.mrf.mxu0  ;;  %v1966_v62 = vadd.f32 %v2943_v43, %v3965_v13 }
 0x1c6   : > { %3372 = vrcp.f32 %v2228_v53  ;;  %v2099_v54 = vadd.f32 %v2098_v19, %v1963_v25  ;;  %v2945_v24 = vpop.f32.mrf.mxu1 }
 0x1c7   : > { %v3361_v48 = vpop.eup %3360  ;;  %3374 = vpow2.f32 %v2584_v41  ;;  %v3041_v5 = vpop.f32.mrf.mxu0  ;;  %v2946_v49 = vadd.f32 %v2945_v24, %v2944_v47 }
 0x1c8   : > { %v3363_v50 = vpop.eup %3362  ;;  %v2229_v56 = vadd.f32 1.0, %v3361_v48  ;;  %v2585_v33 = vmul.f32 -1.442695, %v2099_v54  ;;  %v2947_v1 = vpop.f32.mrf.mxu1 }
 0x1c9   : > { %2300 = vst [vmem:[%s4005_s21 + $0x30] sm:$0xff] %v3363_v50  ;;  %v2101_v60 = vpop.f32.mrf.mxu0  ;;  %v1971_v14 = vadd.f32 %v2946_v49, %v3968_v22 }
 0x1ca   : > { %3376 = vrcp.f32 %v2229_v56  ;;  %v2102_v17 = vadd.f32 %v2101_v60, %v1966_v62  ;;  %v2948_v29 = vpop.f32.mrf.mxu1 }
 0x1cb   : > { %v3365_v61 = vpop.eup %3364  ;;  %3378 = vpow2.f32 %v2585_v33  ;;  %v3042_v3 = vpop.f32.mrf.mxu0  ;;  %v2949_v4 = vadd.f32 %v2948_v29, %v2947_v1 }
 0x1cc   : > { %v3367_v58 = vpop.eup %3366  ;;  %v2230_v42 = vadd.f32 1.0, %v3365_v61  ;;  %v2586_v2 = vmul.f32 -1.442695, %v2102_v17  ;;  %v2950_v6 = vpop.f32.mrf.mxu1 }
 0x1cd   : > { %2301 = vst [vmem:[%s4005_s21 + $0x38] sm:$0xff] %v3367_v58  ;;  %v2106_v15 = vpop.f32.mrf.mxu0  ;;  %v1974_v20 = vadd.f32 %v2949_v4, %v3971_v34 }
 0x1ce   : > { %3380 = vrcp.f32 %v2230_v42  ;;  %v2107_v13 = vadd.f32 %v2106_v15, %v1971_v14  ;;  %v2951_v36 = vpop.f32.mrf.mxu1 }
 0x1cf   : > { %v3369_v8 = vpop.eup %3368  ;;  %3382 = vpow2.f32 %v2586_v2  ;;  %v3045_v30 = vpop.f32.mrf.mxu0  ;;  %v2952_v11 = vadd.f32 %v2951_v36, %v2950_v6 }
 0x1d0   : > { %v3371_v9 = vpop.eup %3370  ;;  %2302 = vst [vmem:[%s4005_s21 + $0x40] sm:$0xff] %v3369_v8  ;;  %v2587_v52 = vmul.f32 -1.442695, %v2107_v13  ;;  %v2953_v26 = vpop.f32.mrf.mxu1 }
 0x1d1   : > { %v2231_v21 = vadd.f32 1.0, %v3371_v9  ;;  %v2109_v7 = vpop.f32.mrf.mxu0  ;;  %v1979_v28 = vadd.f32 %v2952_v11, %v3974_v44 }
 0x1d2   : > { %3384 = vpow2.f32 %v2587_v52  ;;  %v2110_v22 = vadd.f32 %v2109_v7, %v1974_v20  ;;  %v2954_v23 = vpop.f32.mrf.mxu1 }
 0x1d3   : > { %v3373_v27 = vpop.eup %3372  ;;  %3386 = vrcp.f32 %v2231_v21  ;;  %v3046_v0 = vpop.f32.mrf.mxu0  ;;  %v2955_v39 = vadd.f32 %v2954_v23, %v2953_v26 }
 0x1d4   : > { %v3375_v46 = vpop.eup %3374  ;;  %2303 = vst [vmem:[%s4005_s21 + $0x48] sm:$0xff] %v3373_v27  ;;  %v2588_v63 = vmul.f32 -1.442695, %v2110_v22  ;;  %v2956_v32 = vpop.f32.mrf.mxu1 }
 0x1d5   : > { %v2232_v31 = vadd.f32 1.0, %v3375_v46  ;;  %v2114_v16 = vpop.f32.mrf.mxu0  ;;  %v1982_v53 = vadd.f32 %v2955_v39, %v3977_v57 }
 0x1d6   : > { %3388 = vpow2.f32 %v2588_v63  ;;  %v2115_v34 = vadd.f32 %v2114_v16, %v1979_v28  ;;  %v2957_v40 = vpop.f32.mrf.mxu1 }
 0x1d7   : > { %v3377_v35 = vpop.eup %3376  ;;  %3390 = vrcp.f32 %v2232_v31  ;;  %v3049_v37 = vpop.f32.mrf.mxu0  ;;  %v2958_v51 = vadd.f32 %v2957_v40, %v2956_v32 }
 0x1d8   : > { %v3379_v10 = vpop.eup %3378  ;;  %2304 = vst [vmem:[%s4005_s21 + $0x50] sm:$0xff] %v3377_v35  ;;  %v2589_v55 = vmul.f32 -1.442695, %v2115_v34  ;;  %v2959_v43 = vpop.f32.mrf.mxu1 }
 0x1d9   : > { %v2233_v41 = vadd.f32 1.0, %v3379_v10  ;;  %v2117_v25 = vpop.f32.mrf.mxu0  ;;  %v1987_v50 = vadd.f32 %v2958_v51, %v3980_v59 }
 0x1da   : > { %3392 = vpow2.f32 %v2589_v55  ;;  %v2118_v44 = vadd.f32 %v2117_v25, %v1982_v53  ;;  %v2960_v19 = vpop.f32.mrf.mxu1 }
 0x1db   : > { %v3381_v47 = vpop.eup %3380  ;;  %3394 = vrcp.f32 %v2233_v41  ;;  %v3050_v54 = vpop.f32.mrf.mxu0  ;;  %v2961_v5 = vadd.f32 %v2960_v19, %v2959_v43 }
 0x1dc   : > { %v3383_v48 = vpop.eup %3382  ;;  %2305 = vst [vmem:[%s4005_s21 + $0x58] sm:$0xff] %v3381_v47  ;;  %v2590_v24 = vmul.f32 -1.442695, %v2118_v44  ;;  %v2962_v33 = vpop.f32.mrf.mxu1 }
 0x1dd   : > { %v2234_v56 = vadd.f32 1.0, %v3383_v48  ;;  %v2122_v49 = vpop.f32.mrf.mxu0  ;;  %v1990_v58 = vadd.f32 %v2961_v5, %v3983_v18 }
 0x1de   : > { %3396 = vpow2.f32 %v2590_v24  ;;  %v2123_v57 = vadd.f32 %v2122_v49, %v1987_v50  ;;  %v2963_v1 = vpop.f32.mrf.mxu1 }
 0x1df   : > { %v3385_v62 = vpop.eup %3384  ;;  %3398 = vrcp.f32 %v2234_v56  ;;  %v3053_v60 = vpop.f32.mrf.mxu0  ;;  %v2964_v3 = vadd.f32 %v2963_v1, %v2962_v33 }
 0x1e0   : > { %v3387_v17 = vpop.eup %3386  ;;  %v2235_v61 = vadd.f32 1.0, %v3385_v62  ;;  %v2591_v29 = vmul.f32 -1.442695, %v2123_v57  ;;  %v2965_v42 = vpop.f32.mrf.mxu1 }
 0x1e1   : > { %2306 = vst [vmem:[%s4005_s21 + $0x60] sm:$0xff] %v3387_v17  ;;  %v2125_v2 = vpop.f32.mrf.mxu0  ;;  %v1995_v30 = vadd.f32 %v2964_v3, %v3986_v38 }
 0x1e2   : > { %3400 = vrcp.f32 %v2235_v61  ;;  %v2126_v59 = vadd.f32 %v2125_v2, %v1990_v58  ;;  %v2966_v14 = vpop.f32.mrf.mxu1 }
 0x1e3   : > { %v3389_v4 = vpop.eup %3388  ;;  %3402 = vpow2.f32 %v2591_v29  ;;  %v3054_v6 = vpop.f32.mrf.mxu0  ;;  %v2967_v36 = vadd.f32 %v2966_v14, %v2965_v42 }
 0x1e4   : > { %v3391_v15 = vpop.eup %3390  ;;  %v2236_v13 = vadd.f32 1.0, %v3389_v4  ;;  %v2592_v8 = vmul.f32 -1.442695, %v2126_v59  ;;  %v2968_v9 = vpop.f32.mrf.mxu1 }
 0x1e5   : > { %2307 = vst [vmem:[%s4005_s21 + $0x68] sm:$0xff] %v3391_v15  ;;  %v2130_v52 = vpop.f32.mrf.mxu0  ;;  %v1998_v23 = vadd.f32 %v2967_v36, %v3988_v12 }
 0x1e6   : > { %3404 = vrcp.f32 %v2236_v13  ;;  %v2131_v18 = vadd.f32 %v2130_v52, %v1995_v30  ;;  %v2969_v20 = vpop.f32.mrf.mxu1 }
 0x1e7   : > { %v3393_v11 = vpop.eup %3392  ;;  %3406 = vpow2.f32 %v2592_v8  ;;  %v3057_v21 = vpop.f32.mrf.mxu0  ;;  %v2970_v27 = vadd.f32 %v2969_v20, %v2968_v9 }
 0x1e8   : > { %v3395_v26 = vpop.eup %3394  ;;  %v2237_v7 = vadd.f32 1.0, %v3393_v11  ;;  %v2593_v22 = vmul.f32 -1.442695, %v2131_v18  ;;  %v2971_v0 = vpop.f32.mrf.mxu1 }
 0x1e9   : > { %2308 = vst [vmem:[%s4005_s21 + $0x70] sm:$0xff] %v3395_v26  ;;  %v2133_v46 = vpop.f32.mrf.mxu0  ;;  %v2003_v34 = vadd.f32 %v2970_v27, %v3990_v45 }
 0x1ea   : > { %3408 = vrcp.f32 %v2237_v7  ;;  %v2134_v38 = vadd.f32 %v2133_v46, %v1998_v23  ;;  %v2972_v39 = vpop.f32.mrf.mxu1 }
 0x1eb   : > { %v3397_v63 = vpop.eup %3396  ;;  %3410 = vpow2.f32 %v2593_v22  ;;  %v3058_v28 = vpop.f32.mrf.mxu0 }
 0x1ec   : > { %v3399_v31 = vpop.eup %3398  ;;  %v2238_v32 = vadd.f32 1.0, %v3397_v63  ;;  %v2594_v16 = vmul.f32 -1.442695, %v2134_v38 }
 0x1ed   : > { %2309 = vst [vmem:[%s4005_s21 + $0x78] sm:$0xff] %v3399_v31  ;;  %v2138_v35 = vpop.f32.mrf.mxu0 }
 0x1ee   : > { %3412 = vrcp.f32 %v2238_v32  ;;  %v2139_v12 = vadd.f32 %v2138_v35, %v2003_v34 }
 0x1ef   : > { %v3401_v40 = vpop.eup %3400  ;;  %3414 = vpow2.f32 %v2594_v16  ;;  %v3061_v37 = vpop.f32.mrf.mxu0 }
 0x1f0   : > { %v3403_v10 = vpop.eup %3402  ;;  %2310 = vst [vmem:[%s4005_s21 + $0x80] sm:$0xff] %v3401_v40  ;;  %v2595_v55 = vmul.f32 -1.442695, %v2139_v12 }
 0x1f1   : > { %v2239_v51 = vadd.f32 1.0, %v3403_v10  ;;  %v2141_v53 = vpop.f32.mrf.mxu0 }
 0x1f2   : > { %3416 = vpow2.f32 %v2595_v55 }
 0x1f3   : > { %v3405_v41 = vpop.eup %3404  ;;  %3418 = vrcp.f32 %v2239_v51  ;;  %v3062_v43 = vpop.f32.mrf.mxu0 }
 0x1f4   : > { %v3407_v45 = vpop.eup %3406  ;;  %2311 = vst [vmem:[%s4005_s21 + $0x88] sm:$0xff] %v3405_v41 }
 0x1f5   : > { %v2240_v25 = vadd.f32 1.0, %v3407_v45 }
 0x1f7   : > { %v3409_v44 = vpop.eup %3408  ;;  %3420 = vrcp.f32 %v2240_v25 }
 0x1f8   : > { %v3411_v47 = vpop.eup %3410  ;;  %2312 = vst [vmem:[%s4005_s21 + $0x90] sm:$0xff] %v3409_v44 }
 0x1f9   : > { %v2241_v19 = vadd.f32 1.0, %v3411_v47 }
 0x1fb   : > { %v3413_v54 = vpop.eup %3412  ;;  %3422 = vrcp.f32 %v2241_v19 }
 0x1fc   : > { %v3415_v48 = vpop.eup %3414  ;;  %2313 = vst [vmem:[%s4005_s21 + $0x98] sm:$0xff] %v3413_v54 }
 0x1fd   : > { %v2242_v24 = vadd.f32 1.0, %v3415_v48 }
 0x1ff   : > { %v3417_v5 = vpop.eup %3416  ;;  %3424 = vrcp.f32 %v2242_v24 }
 0x200   : > { %v3419_v50 = vpop.eup %3418  ;;  %v2243_v56 = vadd.f32 1.0, %v3417_v5 }
 0x201   : > { %2314 = vst [vmem:[%s4005_s21 + $0xa0] sm:$0xff] %v3419_v50 }
 0x202   : > { %3426 = vrcp.f32 %v2243_v56 }
 0x204   : > { %v3421_v33 = vpop.eup %3420 }
 0x205   : > { %2315 = vst [vmem:[%s4005_s21 + $0xa8] sm:$0xff] %v3421_v33 }
 0x208   : > { %v3423_v49 = vpop.eup %3422 }
 0x209   : > { %2316 = vst [vmem:[%s4005_s21 + $0xb0] sm:$0xff] %v3423_v49 }
 0x20c   : > { %v3425_v57 = vpop.eup %3424 }
 0x20d   : > { %2317 = vst [vmem:[%s4005_s21 + $0xb8] sm:$0xff] %v3425_v57 }
 0x20f   : > { %v3427_v62 = vpop.eup %3426 }
 0x210   : > { %2318 = vst [vmem:[%s4005_s21 + $0xc0] sm:$0xff] %v3427_v62 }
 0x211 PF: > { %s13_s12 = sadd.s32 1, %s3434_s12  }
 0x212   : > { %p10_p4 = scmp.ge.s32.totalorder %s13_s12, 4  }
 0x214   :  { %12 = sbr.rel (!%p10_p4) target bundleno = 1 (0x1), region = 62 }

</bundles_post_ra>
